<compile_context>
chip_gen: v6e
topology: v6e:2x2x1
jax: 0.10.0
libtpu: 0.0.40
codegen_flags: <defaults>
</compile_context>

<pallas_src>
import math

import jax
import jax.numpy as jnp
from jax.experimental import pallas as pl
from jax.experimental.pallas import tpu as pltpu

_BN_EPS = 1e-5
_LN_EPS = 1e-5
_CHUNK_ROWS = 128  # row tile of the in-kernel GEMM loop (keeps vreg pressure low)


# ----------------------------------------------------------------------------
# Fused GEMM + folded-BatchNorm (scale/bias) + ReLU kernel  (used by every conv)
# ----------------------------------------------------------------------------
def _make_gemm_bn_act_kernel(M, relu):
    def kernel(p_ref, w_ref, sb_ref, o_ref):
        # p_ref : (M, Kd)   im2col patches of one image (batch squeezed)
        # w_ref : (Kd, Cout)
        # sb_ref: (2, Cout) row0 = scale, row1 = bias (BN folded, + conv bias)
        # o_ref : (M, Cout)
        scale = sb_ref[0:1, :]
        bias = sb_ref[1:2, :]
        for s0 in range(0, M, _CHUNK_ROWS):
            ch = min(_CHUNK_ROWS, M - s0)
            acc = jnp.dot(p_ref[s0:s0 + ch, :], w_ref[...],
                          preferred_element_type=jnp.float32)
            y = acc * scale + bias
            if relu:
                y = jnp.maximum(y, 0.0)
            o_ref[s0:s0 + ch, :] = y.astype(o_ref.dtype)

    return kernel


def _gemm_bn_act(patches, w2d, scale, bias, relu):
    """patches: (N, M, Kd), w2d: (Kd, Cout) -> (N, M, Cout)."""
    N, M, Kd = patches.shape
    Cout = w2d.shape[1]
    sb = jnp.stack([scale, bias], axis=0)  # (2, Cout)
    cost = pl.CostEstimate(
        flops=2 * N * M * Kd * Cout,
        transcendentals=0,
        bytes_accessed=4 * (N * M * Kd + Kd * Cout + N * M * Cout))
    return pl.pallas_call(
        _make_gemm_bn_act_kernel(M, relu),
        out_shape=jax.ShapeDtypeStruct((N, M, Cout), jnp.float32),
        grid=(N,),
        in_specs=[
            pl.BlockSpec((pl.Squeezed(), M, Kd), lambda n: (n, 0, 0)),
            pl.BlockSpec((Kd, Cout), lambda n: (0, 0)),
            pl.BlockSpec((2, Cout), lambda n: (0, 0)),
        ],
        out_specs=pl.BlockSpec((pl.Squeezed(), M, Cout), lambda n: (n, 0, 0)),
        compiler_params=pltpu.CompilerParams(
            dimension_semantics=("parallel",)),
        cost_estimate=cost,
    )(patches, w2d, sb)


def _im2col(x, K, stride):
    """x: (N,H,W,C) -> patches (N, Ho*Wo, K*K*C) (same padding), plus Ho, Wo."""
    N, H, W, C = x.shape
    pad = (K - 1) // 2
    xp = jnp.pad(x, ((0, 0), (pad, pad), (pad, pad), (0, 0))) if pad else x
    Ho = (H + 2 * pad - K) // stride + 1
    Wo = (W + 2 * pad - K) // stride + 1
    cols = []
    for dy in range(K):
        for dx in range(K):
            cols.append(xp[:, dy:dy + stride * Ho:stride,
                           dx:dx + stride * Wo:stride, :])
    patches = jnp.concatenate(cols, axis=-1)  # (N, Ho, Wo, K*K*C)
    return patches.reshape(N, Ho * Wo, K * K * C), Ho, Wo


def _fold_bn(p):
    scale = p["gamma"] * jax.lax.rsqrt(p["var"] + _BN_EPS)
    bias = p["beta"] - p["mean"] * scale
    if "b" in p:
        bias = bias + p["b"] * scale
    return scale, bias


def conv_bn_relu(x, p, stride):
    """x: (N,H,W,Cin) -> (N,Ho,Wo,Cout); fused Conv + BN(eval) + ReLU."""
    K, _, Cin, Cout = p["w"].shape
    patches, Ho, Wo = _im2col(x, K, stride)
    w2d = p["w"].reshape(K * K * Cin, Cout)
    scale, bias = _fold_bn(p)
    out = _gemm_bn_act(patches, w2d, scale, bias, relu=True)
    return out.reshape(x.shape[0], Ho, Wo, Cout)


# ----------------------------------------------------------------------------
# Shared math helpers (used both in-kernel and by the pure-JAX reference)
# ----------------------------------------------------------------------------
def _gelu_tanh(x):
    return 0.5 * x * (1.0 + jnp.tanh(0.7978845608028654 *
                                     (x + 0.044715 * x * x * x)))


def _ln(x, g, b):
    mu = jnp.mean(x, axis=-1, keepdims=True)
    xc = x - mu
    var = jnp.mean(xc * xc, axis=-1, keepdims=True)
    return xc * jax.lax.rsqrt(var + _LN_EPS) * g + b


# ----------------------------------------------------------------------------
# Fused ViT kernel: projection + cls/pos embedding + all transformer blocks
# ----------------------------------------------------------------------------
def _make_vit_kernel(num_blocks, num_heads, T0, T, D, dh, mlp, att_scale):
    def kernel(tok_ref, pw_ref, pb_ref, pre_ref, sel_ref,
               wq_ref, wk_ref, wv_ref, wo_ref,
               ln1g_ref, ln1b_ref, w1_ref, b1_ref, w2_ref, b2_ref,
               ln2g_ref, ln2b_ref, o_ref):
        f32 = jnp.float32
        # Linear patch projection + bias.
        proj = jnp.dot(tok_ref[...], pw_ref[...],
                       preferred_element_type=f32) + pb_ref[...]        # (T0,D)
        # x = [cls; proj] + positional embedding, built via a (T,T0) shift matmul
        # (avoids in-kernel concatenation / unaligned stores).
        x = pre_ref[...] + jnp.dot(sel_ref[...], proj,
                                   preferred_element_type=f32)          # (T,D)

        for blk in range(num_blocks):
            att = jnp.zeros((T, D), f32)
            for h in range(num_heads):
                q = jnp.dot(x, wq_ref[blk, h], preferred_element_type=f32)
                k = jnp.dot(x, wk_ref[blk, h], preferred_element_type=f32)
                v = jnp.dot(x, wv_ref[blk, h], preferred_element_type=f32)
                s = jax.lax.dot_general(q, k, (((1,), (1,)), ((), ())),
                                        preferred_element_type=f32) * att_scale
                s = s - jnp.max(s, axis=-1, keepdims=True)
                e = jnp.exp(s)
                p = e / jnp.sum(e, axis=-1, keepdims=True)
                o = jnp.dot(p, v, preferred_element_type=f32)           # (T,dh)
                att = att + jnp.dot(o, wo_ref[blk, h],
                                    preferred_element_type=f32)         # (T,D)
            x = _ln(x + att, ln1g_ref[blk], ln1b_ref[blk])
            m = jnp.dot(x, w1_ref[blk], preferred_element_type=f32) + b1_ref[blk]
            m = _gelu_tanh(m)
            m = jnp.dot(m, w2_ref[blk], preferred_element_type=f32) + b2_ref[blk]
            x = _ln(x + m, ln2g_ref[blk], ln2b_ref[blk])

        o_ref[...] = x[1:, :].astype(o_ref.dtype)   # drop the cls token

    return kernel


def vit_pallas(vp, tokens):
    """tokens: (N, T0, D) -> (N, T0, D) (classification=False)."""
    N, T0, D = tokens.shape
    T = T0 + 1
    blocks = vp["blocks"]
    B = len(blocks)
    heads = blocks[0]["wq"].shape[0]
    dh = blocks[0]["wq"].shape[2]
    mlp = blocks[0]["w1"].shape[1]

    pre = jnp.concatenate([vp["cls"], jnp.zeros((T0, D), jnp.float32)],
                          axis=0) + vp["pos"]                      # (T, D)
    sel = jnp.zeros((T, T0), jnp.float32)
    sel = sel.at[1 + jnp.arange(T0), jnp.arange(T0)].set(1.0)      # shift matrix

    stk = lambda name: jnp.stack([b[name] for b in blocks], axis=0)
    weights = [
        vp["proj_w"], vp["proj_b"][None, :], pre, sel,
        stk("wq"), stk("wk"), stk("wv"), stk("wo"),
        stk("ln1_g")[:, None, :], stk("ln1_b")[:, None, :],
        stk("w1"), stk("b1")[:, None, :],
        stk("w2"), stk("b2")[:, None, :],
        stk("ln2_g")[:, None, :], stk("ln2_b")[:, None, :],
    ]

    in_specs = [pl.BlockSpec((pl.Squeezed(), T0, D), lambda n: (n, 0, 0))]
    for wgt in weights:
        in_specs.append(
            pl.BlockSpec(wgt.shape, lambda n, _nd=wgt.ndim: (0,) * _nd))

    cost = pl.CostEstimate(
        flops=N * B * (8 * T * D * D + 4 * heads * T * T * dh + 4 * T * D * mlp),
        transcendentals=N * B * (heads * T * T + T * mlp),
        bytes_accessed=4 * (2 * N * T0 * D + sum(int(w.size) for w in weights)))

    return pl.pallas_call(
        _make_vit_kernel(B, heads, T0, T, D, dh, mlp, 1.0 / math.sqrt(dh)),
        out_shape=jax.ShapeDtypeStruct((N, T0, D), jnp.float32),
        grid=(N,),
        in_specs=in_specs,
        out_specs=pl.BlockSpec((pl.Squeezed(), T0, D), lambda n: (n, 0, 0)),
        compiler_params=pltpu.CompilerParams(
            dimension_semantics=("parallel",)),
        cost_estimate=cost,
    )(tokens, *weights)


# ----------------------------------------------------------------------------
# Encoder: parameters + forward
# ----------------------------------------------------------------------------
def init_encoder_params(key, img_dim, in_channels, out_channels, head_num,
                        mlp_dim, block_num, patch_dim):
    c = out_channels
    D = c * 8
    T0 = (img_dim // patch_dim) ** 2
    dh = D // head_num
    keys = iter(jax.random.split(key, 64))

    def conv_bn(cin, cout, k, with_bias):
        p = {
            "w": jax.random.normal(next(keys), (k, k, cin, cout), jnp.float32)
                 * (k * k * cin) ** -0.5,
            "gamma": 1.0 + 0.1 * jax.random.normal(next(keys), (cout,), jnp.float32),
            "beta": 0.1 * jax.random.normal(next(keys), (cout,), jnp.float32),
            "mean": 0.1 * jax.random.normal(next(keys), (cout,), jnp.float32),
            "var": 1.0 + 0.1 * jax.random.uniform(next(keys), (cout,), jnp.float32),
        }
        if with_bias:
            p["b"] = 0.1 * jax.random.normal(next(keys), (cout,), jnp.float32)
        return p

    params = {
        "conv_layer": conv_bn(in_channels, c, 7, False),        # 7x7 s2, bias=False
        "encoder1": conv_bn(c, c * 2, 3, False),
        "encoder2": conv_bn(c * 2, c * 4, 3, False),
        "encoder3": conv_bn(c * 4, c * 8, 3, False),
        "post_transformer": conv_bn(c * 8, 512, 3, True),       # 3x3 s1, bias=True
    }

    blocks = []
    for _ in range(block_num):
        blocks.append({
            "wq": jax.random.normal(next(keys), (head_num, D, dh), jnp.float32) * D ** -0.5,
            "wk": jax.random.normal(next(keys), (head_num, D, dh), jnp.float32) * D ** -0.5,
            "wv": jax.random.normal(next(keys), (head_num, D, dh), jnp.float32) * D ** -0.5,
            "wo": jax.random.normal(next(keys), (head_num, dh, D), jnp.float32) * D ** -0.5,
            "ln1_g": jnp.ones((D,), jnp.float32),
            "ln1_b": jnp.zeros((D,), jnp.float32),
            "w1": jax.random.normal(next(keys), (D, mlp_dim), jnp.float32) * D ** -0.5,
            "b1": 0.1 * jax.random.normal(next(keys), (mlp_dim,), jnp.float32),
            "w2": jax.random.normal(next(keys), (mlp_dim, D), jnp.float32) * mlp_dim ** -0.5,
            "b2": 0.1 * jax.random.normal(next(keys), (D,), jnp.float32),
            "ln2_g": jnp.ones((D,), jnp.float32),
            "ln2_b": jnp.zeros((D,), jnp.float32),
        })
    params["vit"] = {
        "proj_w": jax.random.normal(next(keys), (D, D), jnp.float32) * D ** -0.5,
        "proj_b": 0.1 * jax.random.normal(next(keys), (D,), jnp.float32),
        "cls": 0.1 * jax.random.normal(next(keys), (1, D), jnp.float32),
        "pos": 0.02 * jax.random.normal(next(keys), (T0 + 1, D), jnp.float32),
        "blocks": blocks,
    }
    return params


def _to_nhwc(t):
    return jnp.transpose(t, (0, 2, 3, 1))


def _to_nchw(t):
    return jnp.transpose(t, (0, 3, 1, 2))


@jax.jit
def encoder_forward(params, x):
    """Matches Encoder.forward; input/outputs are NCHW like PyTorch."""
    h = _to_nhwc(x)
    x1 = conv_bn_relu(h, params["conv_layer"], stride=2)
    x2 = conv_bn_relu(x1, params["encoder1"], stride=2)
    x3 = conv_bn_relu(x2, params["encoder2"], stride=2)
    x4 = conv_bn_relu(x3, params["encoder3"], stride=2)

    N, Hv, Wv, D = x4.shape
    tokens = x4.reshape(N, Hv * Wv, D)          # 'b c h w -> b (h w) c' (NHWC)
    tv = vit_pallas(params["vit"], tokens)      # classification=False -> tokens
    xv = tv.reshape(N, Hv, Wv, D)               # 'b (x y) c -> b c x y' (NHWC)

    xo = conv_bn_relu(xv, params["post_transformer"], stride=1)
    return _to_nchw(xo), _to_nchw(x1), _to_nchw(x2), _to_nchw(x3)


# ----------------------------------------------------------------------------
# Pure-JAX reference (for a correctness cross-check)
# ----------------------------------------------------------------------------
def _ref_conv_bn_relu(x, p, stride):
    K = p["w"].shape[0]
    pad = (K - 1) // 2
    y = jax.lax.conv_general_dilated(
        x, p["w"], (stride, stride), [(pad, pad), (pad, pad)],
        dimension_numbers=("NHWC", "HWIO", "NHWC"),
        precision=jax.lax.Precision.HIGHEST)
    if "b" in p:
        y = y + p["b"]
    y = (y - p["mean"]) * jax.lax.rsqrt(p["var"] + _BN_EPS) * p["gamma"] + p["beta"]
    return jnp.maximum(y, 0.0)


def _ref_vit(vp, tokens):
    N, T0, D = tokens.shape
    dh = vp["blocks"][0]["wq"].shape[2]
    proj = tokens @ vp["proj_w"] + vp["proj_b"]
    cls = jnp.broadcast_to(vp["cls"][None, :, :], (N, 1, D))
    x = jnp.concatenate([cls, proj], axis=1) + vp["pos"][None, :, :]
    for blk in vp["blocks"]:
        q = jnp.einsum("ntd,hde->nhte", x, blk["wq"])
        k = jnp.einsum("ntd,hde->nhte", x, blk["wk"])
        v = jnp.einsum("ntd,hde->nhte", x, blk["wv"])
        s = jnp.einsum("nhte,nhse->nhts", q, k) / math.sqrt(dh)
        a = jax.nn.softmax(s, axis=-1)
        o = jnp.einsum("nhts,nhse->nhte", a, v)
        att = jnp.einsum("nhte,hed->ntd", o, blk["wo"])
        x = _ln(x + att, blk["ln1_g"], blk["ln1_b"])
        m = _gelu_tanh(x @ blk["w1"] + blk["b1"])
        m = m @ blk["w2"] + blk["b2"]
        x = _ln(x + m, blk["ln2_g"], blk["ln2_b"])
    return x[:, 1:, :]


@jax.jit
def encoder_forward_ref(params, x):
    h = _to_nhwc(x)
    x1 = _ref_conv_bn_relu(h, params["conv_layer"], 2)
    x2 = _ref_conv_bn_relu(x1, params["encoder1"], 2)
    x3 = _ref_conv_bn_relu(x2, params["encoder2"], 2)
    x4 = _ref_conv_bn_relu(x3, params["encoder3"], 2)
    N, Hv, Wv, D = x4.shape
    tv = _ref_vit(params["vit"], x4.reshape(N, Hv * Wv, D))
    xv = tv.reshape(N, Hv, Wv, D)
    xo = _ref_conv_bn_relu(xv, params["post_transformer"], 1)
    return _to_nchw(xo), _to_nchw(x1), _to_nchw(x2), _to_nchw(x3)


# ----------------------------------------------------------------------------
if __name__ == "__main__":
    img_dim, in_channels, out_channels = 64, 3, 8
    head_num, mlp_dim, block_num, patch_dim = 4, 32, 2, 16
    N = 2

    key = jax.random.PRNGKey(0)
    k_in, k_par = jax.random.split(key)
    x = jax.random.normal(k_in, (N, in_channels, img_dim, img_dim), jnp.float32)
    params = init_encoder_params(k_par, img_dim, in_channels, out_channels,
                                 head_num, mlp_dim, block_num, patch_dim)

    outs = encoder_forward(params, x)
    outs = jax.block_until_ready(outs)
    xo, x1, x2, x3 = outs

    vit_dim = img_dim // patch_dim
    assert xo.shape == (N, 512, vit_dim, vit_dim), xo.shape
    assert x1.shape == (N, out_channels, img_dim // 2, img_dim // 2), x1.shape
    assert x2.shape == (N, out_channels * 2, img_dim // 4, img_dim // 4), x2.shape
    assert x3.shape == (N, out_channels * 4, img_dim // 8, img_dim // 8), x3.shape

    refs = jax.block_until_ready(encoder_forward_ref(params, x))
    for name, got, ref in zip(("x", "x1", "x2", "x3"), outs, refs):
        err = float(jnp.max(jnp.abs(got - ref)))
        mag = max(1.0, float(jnp.max(jnp.abs(ref))))
        assert err <= 1e-2 * mag, f"{name}: max abs err {err} (ref magnitude {mag})"

    print("KERNEL_OK")
</pallas_src>

<mosaic_0001>
module attributes {stable_mosaic.version = 11 : i64} {
  func.func @kernel(%arg0: i32, %arg1: memref<1x1024x147xf32, #tpu.memory_space<vmem>>, %arg2: memref<147x8xf32, #tpu.memory_space<vmem>>, %arg3: memref<2x8xf32, #tpu.memory_space<vmem>>, %arg4: memref<1x1024x8xf32, #tpu.memory_space<vmem>>) attributes {dimension_semantics = [#tpu.dimension_semantics<parallel>], iteration_bounds = array<i64: 2>, scalar_prefetch = 0 : i64, scratch_operands = 0 : i64, tpu.core_type = #tpu.core_type<tc>, window_params = [{transform_indices = @transform_0, window_bounds = array<i64: 1, 1024, 147>}, {pipeline_mode = #tpu.pipeline_mode<synchronous>, transform_indices = @transform_1, window_bounds = array<i64: 147, 8>}, {pipeline_mode = #tpu.pipeline_mode<synchronous>, transform_indices = @transform_2, window_bounds = array<i64: 2, 8>}, {transform_indices = @transform_3, window_bounds = array<i64: 1, 1024, 8>}]} {
    %c0 = arith.constant 0 : index
    %c0_0 = arith.constant 0 : index
    %0 = vector.load %arg3[%c0, %c0_0] : memref<2x8xf32, #tpu.memory_space<vmem>>, vector<1x8xf32>
    %c1 = arith.constant 1 : index
    %c0_1 = arith.constant 0 : index
    %1 = vector.load %arg3[%c1, %c0_1] : memref<2x8xf32, #tpu.memory_space<vmem>>, vector<1x8xf32>
    %c0_2 = arith.constant 0 : index
    %c0_3 = arith.constant 0 : index
    %c0_4 = arith.constant 0 : index
    %2 = vector.load %arg1[%c0_2, %c0_3, %c0_4] : memref<1x1024x147xf32, #tpu.memory_space<vmem>>, vector<1x128x147xf32>
    %3 = vector.shape_cast %2 : vector<1x128x147xf32> to vector<128x147xf32>
    %c0_5 = arith.constant 0 : index
    %c0_6 = arith.constant 0 : index
    %4 = vector.load %arg2[%c0_5, %c0_6] : memref<147x8xf32, #tpu.memory_space<vmem>>, vector<147x8xf32>
    %cst = arith.constant dense<0.000000e+00> : vector<128x8xf32>
    %5 = tpu.matmul %3, %4, %cst {dimension_numbers = #tpu.dot_dimension_numbers<[1], [0], [0], [1], [0, 0, 1, 1], [], []>} : vector<128x147xf32>, vector<147x8xf32>, vector<128x8xf32> -> vector<128x8xf32>
    %6 = vector.broadcast %0 : vector<1x8xf32> to vector<128x8xf32>
    %7 = arith.mulf %5, %6 : vector<128x8xf32>
    %8 = vector.broadcast %1 : vector<1x8xf32> to vector<128x8xf32>
    %9 = arith.addf %7, %8 : vector<128x8xf32>
    %cst_7 = arith.constant 0.000000e+00 : f32
    %10 = vector.broadcast %cst_7 : f32 to vector<128x8xf32>
    %11 = arith.maximumf %9, %10 : vector<128x8xf32>
    %c0_8 = arith.constant 0 : index
    %c0_9 = arith.constant 0 : index
    %c0_10 = arith.constant 0 : index
    %12 = vector.load %arg4[%c0_8, %c0_9, %c0_10] : memref<1x1024x8xf32, #tpu.memory_space<vmem>>, vector<1x128x8xf32>
    %13 = vector.shape_cast %12 : vector<1x128x8xf32> to vector<128x8xf32>
    %14 = vector.shape_cast %11 : vector<128x8xf32> to vector<1x128x8xf32>
    tpu.vector_store %arg4[%c0_8, %c0_9, %c0_10], %14 {strides = array<i32>} : memref<1x1024x8xf32, #tpu.memory_space<vmem>>, vector<1x128x8xf32>,
    %c0_11 = arith.constant 0 : index
    %c128 = arith.constant 128 : index
    %c0_12 = arith.constant 0 : index
    %15 = vector.load %arg1[%c0_11, %c128, %c0_12] : memref<1x1024x147xf32, #tpu.memory_space<vmem>>, vector<1x128x147xf32>
    %16 = vector.shape_cast %15 : vector<1x128x147xf32> to vector<128x147xf32>
    %c0_13 = arith.constant 0 : index
    %c0_14 = arith.constant 0 : index
    %17 = vector.load %arg2[%c0_13, %c0_14] : memref<147x8xf32, #tpu.memory_space<vmem>>, vector<147x8xf32>
    %cst_15 = arith.constant dense<0.000000e+00> : vector<128x8xf32>
    %18 = tpu.matmul %16, %17, %cst_15 {dimension_numbers = #tpu.dot_dimension_numbers<[1], [0], [0], [1], [0, 0, 1, 1], [], []>} : vector<128x147xf32>, vector<147x8xf32>, vector<128x8xf32> -> vector<128x8xf32>
    %19 = vector.broadcast %0 : vector<1x8xf32> to vector<128x8xf32>
    %20 = arith.mulf %18, %19 : vector<128x8xf32>
    %21 = vector.broadcast %1 : vector<1x8xf32> to vector<128x8xf32>
    %22 = arith.addf %20, %21 : vector<128x8xf32>
    %cst_16 = arith.constant 0.000000e+00 : f32
    %23 = vector.broadcast %cst_16 : f32 to vector<128x8xf32>
    %24 = arith.maximumf %22, %23 : vector<128x8xf32>
    %c0_17 = arith.constant 0 : index
    %c128_18 = arith.constant 128 : index
    %c0_19 = arith.constant 0 : index
    %25 = vector.load %arg4[%c0_17, %c128_18, %c0_19] : memref<1x1024x8xf32, #tpu.memory_space<vmem>>, vector<1x128x8xf32>
    %26 = vector.shape_cast %25 : vector<1x128x8xf32> to vector<128x8xf32>
    %27 = vector.shape_cast %24 : vector<128x8xf32> to vector<1x128x8xf32>
    tpu.vector_store %arg4[%c0_17, %c128_18, %c0_19], %27 {strides = array<i32>} : memref<1x1024x8xf32, #tpu.memory_space<vmem>>, vector<1x128x8xf32>,
    %c0_20 = arith.constant 0 : index
    %c256 = arith.constant 256 : index
    %c0_21 = arith.constant 0 : index
    %28 = vector.load %arg1[%c0_20, %c256, %c0_21] : memref<1x1024x147xf32, #tpu.memory_space<vmem>>, vector<1x128x147xf32>
    %29 = vector.shape_cast %28 : vector<1x128x147xf32> to vector<128x147xf32>
    %c0_22 = arith.constant 0 : index
    %c0_23 = arith.constant 0 : index
    %30 = vector.load %arg2[%c0_22, %c0_23] : memref<147x8xf32, #tpu.memory_space<vmem>>, vector<147x8xf32>
    %cst_24 = arith.constant dense<0.000000e+00> : vector<128x8xf32>
    %31 = tpu.matmul %29, %30, %cst_24 {dimension_numbers = #tpu.dot_dimension_numbers<[1], [0], [0], [1], [0, 0, 1, 1], [], []>} : vector<128x147xf32>, vector<147x8xf32>, vector<128x8xf32> -> vector<128x8xf32>
    %32 = vector.broadcast %0 : vector<1x8xf32> to vector<128x8xf32>
    %33 = arith.mulf %31, %32 : vector<128x8xf32>
    %34 = vector.broadcast %1 : vector<1x8xf32> to vector<128x8xf32>
    %35 = arith.addf %33, %34 : vector<128x8xf32>
    %cst_25 = arith.constant 0.000000e+00 : f32
    %36 = vector.broadcast %cst_25 : f32 to vector<128x8xf32>
    %37 = arith.maximumf %35, %36 : vector<128x8xf32>
    %c0_26 = arith.constant 0 : index
    %c256_27 = arith.constant 256 : index
    %c0_28 = arith.constant 0 : index
    %38 = vector.load %arg4[%c0_26, %c256_27, %c0_28] : memref<1x1024x8xf32, #tpu.memory_space<vmem>>, vector<1x128x8xf32>
    %39 = vector.shape_cast %38 : vector<1x128x8xf32> to vector<128x8xf32>
    %40 = vector.shape_cast %37 : vector<128x8xf32> to vector<1x128x8xf32>
    tpu.vector_store %arg4[%c0_26, %c256_27, %c0_28], %40 {strides = array<i32>} : memref<1x1024x8xf32, #tpu.memory_space<vmem>>, vector<1x128x8xf32>,
    %c0_29 = arith.constant 0 : index
    %c384 = arith.constant 384 : index
    %c0_30 = arith.constant 0 : index
    %41 = vector.load %arg1[%c0_29, %c384, %c0_30] : memref<1x1024x147xf32, #tpu.memory_space<vmem>>, vector<1x128x147xf32>
    %42 = vector.shape_cast %41 : vector<1x128x147xf32> to vector<128x147xf32>
    %c0_31 = arith.constant 0 : index
    %c0_32 = arith.constant 0 : index
    %43 = vector.load %arg2[%c0_31, %c0_32] : memref<147x8xf32, #tpu.memory_space<vmem>>, vector<147x8xf32>
    %cst_33 = arith.constant dense<0.000000e+00> : vector<128x8xf32>
    %44 = tpu.matmul %42, %43, %cst_33 {dimension_numbers = #tpu.dot_dimension_numbers<[1], [0], [0], [1], [0, 0, 1, 1], [], []>} : vector<128x147xf32>, vector<147x8xf32>, vector<128x8xf32> -> vector<128x8xf32>
    %45 = vector.broadcast %0 : vector<1x8xf32> to vector<128x8xf32>
    %46 = arith.mulf %44, %45 : vector<128x8xf32>
    %47 = vector.broadcast %1 : vector<1x8xf32> to vector<128x8xf32>
    %48 = arith.addf %46, %47 : vector<128x8xf32>
    %cst_34 = arith.constant 0.000000e+00 : f32
    %49 = vector.broadcast %cst_34 : f32 to vector<128x8xf32>
    %50 = arith.maximumf %48, %49 : vector<128x8xf32>
    %c0_35 = arith.constant 0 : index
    %c384_36 = arith.constant 384 : index
    %c0_37 = arith.constant 0 : index
    %51 = vector.load %arg4[%c0_35, %c384_36, %c0_37] : memref<1x1024x8xf32, #tpu.memory_space<vmem>>, vector<1x128x8xf32>
    %52 = vector.shape_cast %51 : vector<1x128x8xf32> to vector<128x8xf32>
    %53 = vector.shape_cast %50 : vector<128x8xf32> to vector<1x128x8xf32>
    tpu.vector_store %arg4[%c0_35, %c384_36, %c0_37], %53 {strides = array<i32>} : memref<1x1024x8xf32, #tpu.memory_space<vmem>>, vector<1x128x8xf32>,
    %c0_38 = arith.constant 0 : index
    %c512 = arith.constant 512 : index
    %c0_39 = arith.constant 0 : index
    %54 = vector.load %arg1[%c0_38, %c512, %c0_39] : memref<1x1024x147xf32, #tpu.memory_space<vmem>>, vector<1x128x147xf32>
    %55 = vector.shape_cast %54 : vector<1x128x147xf32> to vector<128x147xf32>
    %c0_40 = arith.constant 0 : index
    %c0_41 = arith.constant 0 : index
    %56 = vector.load %arg2[%c0_40, %c0_41] : memref<147x8xf32, #tpu.memory_space<vmem>>, vector<147x8xf32>
    %cst_42 = arith.constant dense<0.000000e+00> : vector<128x8xf32>
    %57 = tpu.matmul %55, %56, %cst_42 {dimension_numbers = #tpu.dot_dimension_numbers<[1], [0], [0], [1], [0, 0, 1, 1], [], []>} : vector<128x147xf32>, vector<147x8xf32>, vector<128x8xf32> -> vector<128x8xf32>
    %58 = vector.broadcast %0 : vector<1x8xf32> to vector<128x8xf32>
    %59 = arith.mulf %57, %58 : vector<128x8xf32>
    %60 = vector.broadcast %1 : vector<1x8xf32> to vector<128x8xf32>
    %61 = arith.addf %59, %60 : vector<128x8xf32>
    %cst_43 = arith.constant 0.000000e+00 : f32
    %62 = vector.broadcast %cst_43 : f32 to vector<128x8xf32>
    %63 = arith.maximumf %61, %62 : vector<128x8xf32>
    %c0_44 = arith.constant 0 : index
    %c512_45 = arith.constant 512 : index
    %c0_46 = arith.constant 0 : index
    %64 = vector.load %arg4[%c0_44, %c512_45, %c0_46] : memref<1x1024x8xf32, #tpu.memory_space<vmem>>, vector<1x128x8xf32>
    %65 = vector.shape_cast %64 : vector<1x128x8xf32> to vector<128x8xf32>
    %66 = vector.shape_cast %63 : vector<128x8xf32> to vector<1x128x8xf32>
    tpu.vector_store %arg4[%c0_44, %c512_45, %c0_46], %66 {strides = array<i32>} : memref<1x1024x8xf32, #tpu.memory_space<vmem>>, vector<1x128x8xf32>,
    %c0_47 = arith.constant 0 : index
    %c640 = arith.constant 640 : index
    %c0_48 = arith.constant 0 : index
    %67 = vector.load %arg1[%c0_47, %c640, %c0_48] : memref<1x1024x147xf32, #tpu.memory_space<vmem>>, vector<1x128x147xf32>
    %68 = vector.shape_cast %67 : vector<1x128x147xf32> to vector<128x147xf32>
    %c0_49 = arith.constant 0 : index
    %c0_50 = arith.constant 0 : index
    %69 = vector.load %arg2[%c0_49, %c0_50] : memref<147x8xf32, #tpu.memory_space<vmem>>, vector<147x8xf32>
    %cst_51 = arith.constant dense<0.000000e+00> : vector<128x8xf32>
    %70 = tpu.matmul %68, %69, %cst_51 {dimension_numbers = #tpu.dot_dimension_numbers<[1], [0], [0], [1], [0, 0, 1, 1], [], []>} : vector<128x147xf32>, vector<147x8xf32>, vector<128x8xf32> -> vector<128x8xf32>
    %71 = vector.broadcast %0 : vector<1x8xf32> to vector<128x8xf32>
    %72 = arith.mulf %70, %71 : vector<128x8xf32>
    %73 = vector.broadcast %1 : vector<1x8xf32> to vector<128x8xf32>
    %74 = arith.addf %72, %73 : vector<128x8xf32>
    %cst_52 = arith.constant 0.000000e+00 : f32
    %75 = vector.broadcast %cst_52 : f32 to vector<128x8xf32>
    %76 = arith.maximumf %74, %75 : vector<128x8xf32>
    %c0_53 = arith.constant 0 : index
    %c640_54 = arith.constant 640 : index
    %c0_55 = arith.constant 0 : index
    %77 = vector.load %arg4[%c0_53, %c640_54, %c0_55] : memref<1x1024x8xf32, #tpu.memory_space<vmem>>, vector<1x128x8xf32>
    %78 = vector.shape_cast %77 : vector<1x128x8xf32> to vector<128x8xf32>
    %79 = vector.shape_cast %76 : vector<128x8xf32> to vector<1x128x8xf32>
    tpu.vector_store %arg4[%c0_53, %c640_54, %c0_55], %79 {strides = array<i32>} : memref<1x1024x8xf32, #tpu.memory_space<vmem>>, vector<1x128x8xf32>,
    %c0_56 = arith.constant 0 : index
    %c768 = arith.constant 768 : index
    %c0_57 = arith.constant 0 : index
    %80 = vector.load %arg1[%c0_56, %c768, %c0_57] : memref<1x1024x147xf32, #tpu.memory_space<vmem>>, vector<1x128x147xf32>
    %81 = vector.shape_cast %80 : vector<1x128x147xf32> to vector<128x147xf32>
    %c0_58 = arith.constant 0 : index
    %c0_59 = arith.constant 0 : index
    %82 = vector.load %arg2[%c0_58, %c0_59] : memref<147x8xf32, #tpu.memory_space<vmem>>, vector<147x8xf32>
    %cst_60 = arith.constant dense<0.000000e+00> : vector<128x8xf32>
    %83 = tpu.matmul %81, %82, %cst_60 {dimension_numbers = #tpu.dot_dimension_numbers<[1], [0], [0], [1], [0, 0, 1, 1], [], []>} : vector<128x147xf32>, vector<147x8xf32>, vector<128x8xf32> -> vector<128x8xf32>
    %84 = vector.broadcast %0 : vector<1x8xf32> to vector<128x8xf32>
    %85 = arith.mulf %83, %84 : vector<128x8xf32>
    %86 = vector.broadcast %1 : vector<1x8xf32> to vector<128x8xf32>
    %87 = arith.addf %85, %86 : vector<128x8xf32>
    %cst_61 = arith.constant 0.000000e+00 : f32
    %88 = vector.broadcast %cst_61 : f32 to vector<128x8xf32>
    %89 = arith.maximumf %87, %88 : vector<128x8xf32>
    %c0_62 = arith.constant 0 : index
    %c768_63 = arith.constant 768 : index
    %c0_64 = arith.constant 0 : index
    %90 = vector.load %arg4[%c0_62, %c768_63, %c0_64] : memref<1x1024x8xf32, #tpu.memory_space<vmem>>, vector<1x128x8xf32>
    %91 = vector.shape_cast %90 : vector<1x128x8xf32> to vector<128x8xf32>
    %92 = vector.shape_cast %89 : vector<128x8xf32> to vector<1x128x8xf32>
    tpu.vector_store %arg4[%c0_62, %c768_63, %c0_64], %92 {strides = array<i32>} : memref<1x1024x8xf32, #tpu.memory_space<vmem>>, vector<1x128x8xf32>,
    %c0_65 = arith.constant 0 : index
    %c896 = arith.constant 896 : index
    %c0_66 = arith.constant 0 : index
    %93 = vector.load %arg1[%c0_65, %c896, %c0_66] : memref<1x1024x147xf32, #tpu.memory_space<vmem>>, vector<1x128x147xf32>
    %94 = vector.shape_cast %93 : vector<1x128x147xf32> to vector<128x147xf32>
    %c0_67 = arith.constant 0 : index
    %c0_68 = arith.constant 0 : index
    %95 = vector.load %arg2[%c0_67, %c0_68] : memref<147x8xf32, #tpu.memory_space<vmem>>, vector<147x8xf32>
    %cst_69 = arith.constant dense<0.000000e+00> : vector<128x8xf32>
    %96 = tpu.matmul %94, %95, %cst_69 {dimension_numbers = #tpu.dot_dimension_numbers<[1], [0], [0], [1], [0, 0, 1, 1], [], []>} : vector<128x147xf32>, vector<147x8xf32>, vector<128x8xf32> -> vector<128x8xf32>
    %97 = vector.broadcast %0 : vector<1x8xf32> to vector<128x8xf32>
    %98 = arith.mulf %96, %97 : vector<128x8xf32>
    %99 = vector.broadcast %1 : vector<1x8xf32> to vector<128x8xf32>
    %100 = arith.addf %98, %99 : vector<128x8xf32>
    %cst_70 = arith.constant 0.000000e+00 : f32
    %101 = vector.broadcast %cst_70 : f32 to vector<128x8xf32>
    %102 = arith.maximumf %100, %101 : vector<128x8xf32>
    %c0_71 = arith.constant 0 : index
    %c896_72 = arith.constant 896 : index
    %c0_73 = arith.constant 0 : index
    %103 = vector.load %arg4[%c0_71, %c896_72, %c0_73] : memref<1x1024x8xf32, #tpu.memory_space<vmem>>, vector<1x128x8xf32>
    %104 = vector.shape_cast %103 : vector<1x128x8xf32> to vector<128x8xf32>
    %105 = vector.shape_cast %102 : vector<128x8xf32> to vector<1x128x8xf32>
    tpu.vector_store %arg4[%c0_71, %c896_72, %c0_73], %105 {strides = array<i32>} : memref<1x1024x8xf32, #tpu.memory_space<vmem>>, vector<1x128x8xf32>,
    return
  }
  func.func @transform_0(%arg0: i32) -> (i32, i32, i32) {
    %c0_i32 = arith.constant 0 : i32
    %c0_i32_0 = arith.constant 0 : i32
    %c0_i32_1 = arith.constant 0 : i32
    return %arg0, %c0_i32, %c0_i32_0 : i32, i32, i32
  }
  func.func @transform_1(%arg0: i32) -> (i32, i32) {
    %c0_i32 = arith.constant 0 : i32
    %c0_i32_0 = arith.constant 0 : i32
    %c0_i32_1 = arith.constant 0 : i32
    return %c0_i32, %c0_i32_0 : i32, i32
  }
  func.func @transform_2(%arg0: i32) -> (i32, i32) {
    %c0_i32 = arith.constant 0 : i32
    %c0_i32_0 = arith.constant 0 : i32
    %c0_i32_1 = arith.constant 0 : i32
    return %c0_i32, %c0_i32_0 : i32, i32
  }
  func.func @transform_3(%arg0: i32) -> (i32, i32, i32) {
    %c0_i32 = arith.constant 0 : i32
    %c0_i32_0 = arith.constant 0 : i32
    %c0_i32_1 = arith.constant 0 : i32
    return %arg0, %c0_i32, %c0_i32_0 : i32, i32, i32
  }
}

module attributes {stable_mosaic.version = 11 : i64} {
  func.func @kernel(%arg0: i32, %arg1: memref<1x256x72xf32, #tpu.memory_space<vmem>>, %arg2: memref<72x16xf32, #tpu.memory_space<vmem>>, %arg3: memref<2x16xf32, #tpu.memory_space<vmem>>, %arg4: memref<1x256x16xf32, #tpu.memory_space<vmem>>) attributes {dimension_semantics = [#tpu.dimension_semantics<parallel>], iteration_bounds = array<i64: 2>, scalar_prefetch = 0 : i64, scratch_operands = 0 : i64, tpu.core_type = #tpu.core_type<tc>, window_params = [{transform_indices = @transform_0, window_bounds = array<i64: 1, 256, 72>}, {pipeline_mode = #tpu.pipeline_mode<synchronous>, transform_indices = @transform_1, window_bounds = array<i64: 72, 16>}, {pipeline_mode = #tpu.pipeline_mode<synchronous>, transform_indices = @transform_2, window_bounds = array<i64: 2, 16>}, {transform_indices = @transform_3, window_bounds = array<i64: 1, 256, 16>}]} {
    %c0 = arith.constant 0 : index
    %c0_0 = arith.constant 0 : index
    %0 = vector.load %arg3[%c0, %c0_0] : memref<2x16xf32, #tpu.memory_space<vmem>>, vector<1x16xf32>
    %c1 = arith.constant 1 : index
    %c0_1 = arith.constant 0 : index
    %1 = vector.load %arg3[%c1, %c0_1] : memref<2x16xf32, #tpu.memory_space<vmem>>, vector<1x16xf32>
    %c0_2 = arith.constant 0 : index
    %c0_3 = arith.constant 0 : index
    %c0_4 = arith.constant 0 : index
    %2 = vector.load %arg1[%c0_2, %c0_3, %c0_4] : memref<1x256x72xf32, #tpu.memory_space<vmem>>, vector<1x128x72xf32>
    %3 = vector.shape_cast %2 : vector<1x128x72xf32> to vector<128x72xf32>
    %c0_5 = arith.constant 0 : index
    %c0_6 = arith.constant 0 : index
    %4 = vector.load %arg2[%c0_5, %c0_6] : memref<72x16xf32, #tpu.memory_space<vmem>>, vector<72x16xf32>
    %cst = arith.constant dense<0.000000e+00> : vector<128x16xf32>
    %5 = tpu.matmul %3, %4, %cst {dimension_numbers = #tpu.dot_dimension_numbers<[1], [0], [0], [1], [0, 0, 1, 1], [], []>} : vector<128x72xf32>, vector<72x16xf32>, vector<128x16xf32> -> vector<128x16xf32>
    %6 = vector.broadcast %0 : vector<1x16xf32> to vector<128x16xf32>
    %7 = arith.mulf %5, %6 : vector<128x16xf32>
    %8 = vector.broadcast %1 : vector<1x16xf32> to vector<128x16xf32>
    %9 = arith.addf %7, %8 : vector<128x16xf32>
    %cst_7 = arith.constant 0.000000e+00 : f32
    %10 = vector.broadcast %cst_7 : f32 to vector<128x16xf32>
    %11 = arith.maximumf %9, %10 : vector<128x16xf32>
    %c0_8 = arith.constant 0 : index
    %c0_9 = arith.constant 0 : index
    %c0_10 = arith.constant 0 : index
    %12 = vector.load %arg4[%c0_8, %c0_9, %c0_10] : memref<1x256x16xf32, #tpu.memory_space<vmem>>, vector<1x128x16xf32>
    %13 = vector.shape_cast %12 : vector<1x128x16xf32> to vector<128x16xf32>
    %14 = vector.shape_cast %11 : vector<128x16xf32> to vector<1x128x16xf32>
    tpu.vector_store %arg4[%c0_8, %c0_9, %c0_10], %14 {strides = array<i32>} : memref<1x256x16xf32, #tpu.memory_space<vmem>>, vector<1x128x16xf32>,
    %c0_11 = arith.constant 0 : index
    %c128 = arith.constant 128 : index
    %c0_12 = arith.constant 0 : index
    %15 = vector.load %arg1[%c0_11, %c128, %c0_12] : memref<1x256x72xf32, #tpu.memory_space<vmem>>, vector<1x128x72xf32>
    %16 = vector.shape_cast %15 : vector<1x128x72xf32> to vector<128x72xf32>
    %c0_13 = arith.constant 0 : index
    %c0_14 = arith.constant 0 : index
    %17 = vector.load %arg2[%c0_13, %c0_14] : memref<72x16xf32, #tpu.memory_space<vmem>>, vector<72x16xf32>
    %cst_15 = arith.constant dense<0.000000e+00> : vector<128x16xf32>
    %18 = tpu.matmul %16, %17, %cst_15 {dimension_numbers = #tpu.dot_dimension_numbers<[1], [0], [0], [1], [0, 0, 1, 1], [], []>} : vector<128x72xf32>, vector<72x16xf32>, vector<128x16xf32> -> vector<128x16xf32>
    %19 = vector.broadcast %0 : vector<1x16xf32> to vector<128x16xf32>
    %20 = arith.mulf %18, %19 : vector<128x16xf32>
    %21 = vector.broadcast %1 : vector<1x16xf32> to vector<128x16xf32>
    %22 = arith.addf %20, %21 : vector<128x16xf32>
    %cst_16 = arith.constant 0.000000e+00 : f32
    %23 = vector.broadcast %cst_16 : f32 to vector<128x16xf32>
    %24 = arith.maximumf %22, %23 : vector<128x16xf32>
    %c0_17 = arith.constant 0 : index
    %c128_18 = arith.constant 128 : index
    %c0_19 = arith.constant 0 : index
    %25 = vector.load %arg4[%c0_17, %c128_18, %c0_19] : memref<1x256x16xf32, #tpu.memory_space<vmem>>, vector<1x128x16xf32>
    %26 = vector.shape_cast %25 : vector<1x128x16xf32> to vector<128x16xf32>
    %27 = vector.shape_cast %24 : vector<128x16xf32> to vector<1x128x16xf32>
    tpu.vector_store %arg4[%c0_17, %c128_18, %c0_19], %27 {strides = array<i32>} : memref<1x256x16xf32, #tpu.memory_space<vmem>>, vector<1x128x16xf32>,
    return
  }
  func.func @transform_0(%arg0: i32) -> (i32, i32, i32) {
    %c0_i32 = arith.constant 0 : i32
    %c0_i32_0 = arith.constant 0 : i32
    %c0_i32_1 = arith.constant 0 : i32
    return %arg0, %c0_i32, %c0_i32_0 : i32, i32, i32
  }
  func.func @transform_1(%arg0: i32) -> (i32, i32) {
    %c0_i32 = arith.constant 0 : i32
    %c0_i32_0 = arith.constant 0 : i32
    %c0_i32_1 = arith.constant 0 : i32
    return %c0_i32, %c0_i32_0 : i32, i32
  }
  func.func @transform_2(%arg0: i32) -> (i32, i32) {
    %c0_i32 = arith.constant 0 : i32
    %c0_i32_0 = arith.constant 0 : i32
    %c0_i32_1 = arith.constant 0 : i32
    return %c0_i32, %c0_i32_0 : i32, i32
  }
  func.func @transform_3(%arg0: i32) -> (i32, i32, i32) {
    %c0_i32 = arith.constant 0 : i32
    %c0_i32_0 = arith.constant 0 : i32
    %c0_i32_1 = arith.constant 0 : i32
    return %arg0, %c0_i32, %c0_i32_0 : i32, i32, i32
  }
}

module attributes {stable_mosaic.version = 11 : i64} {
  func.func @kernel(%arg0: i32, %arg1: memref<1x64x144xf32, #tpu.memory_space<vmem>>, %arg2: memref<144x32xf32, #tpu.memory_space<vmem>>, %arg3: memref<2x32xf32, #tpu.memory_space<vmem>>, %arg4: memref<1x64x32xf32, #tpu.memory_space<vmem>>) attributes {dimension_semantics = [#tpu.dimension_semantics<parallel>], iteration_bounds = array<i64: 2>, scalar_prefetch = 0 : i64, scratch_operands = 0 : i64, tpu.core_type = #tpu.core_type<tc>, window_params = [{transform_indices = @transform_0, window_bounds = array<i64: 1, 64, 144>}, {pipeline_mode = #tpu.pipeline_mode<synchronous>, transform_indices = @transform_1, window_bounds = array<i64: 144, 32>}, {pipeline_mode = #tpu.pipeline_mode<synchronous>, transform_indices = @transform_2, window_bounds = array<i64: 2, 32>}, {transform_indices = @transform_3, window_bounds = array<i64: 1, 64, 32>}]} {
    %c0 = arith.constant 0 : index
    %c0_0 = arith.constant 0 : index
    %0 = vector.load %arg3[%c0, %c0_0] : memref<2x32xf32, #tpu.memory_space<vmem>>, vector<1x32xf32>
    %c1 = arith.constant 1 : index
    %c0_1 = arith.constant 0 : index
    %1 = vector.load %arg3[%c1, %c0_1] : memref<2x32xf32, #tpu.memory_space<vmem>>, vector<1x32xf32>
    %c0_2 = arith.constant 0 : index
    %c0_3 = arith.constant 0 : index
    %c0_4 = arith.constant 0 : index
    %2 = vector.load %arg1[%c0_2, %c0_3, %c0_4] : memref<1x64x144xf32, #tpu.memory_space<vmem>>, vector<1x64x144xf32>
    %3 = vector.shape_cast %2 : vector<1x64x144xf32> to vector<64x144xf32>
    %c0_5 = arith.constant 0 : index
    %c0_6 = arith.constant 0 : index
    %4 = vector.load %arg2[%c0_5, %c0_6] : memref<144x32xf32, #tpu.memory_space<vmem>>, vector<144x32xf32>
    %cst = arith.constant dense<0.000000e+00> : vector<64x32xf32>
    %5 = tpu.matmul %3, %4, %cst {dimension_numbers = #tpu.dot_dimension_numbers<[1], [0], [0], [1], [0, 0, 1, 1], [], []>} : vector<64x144xf32>, vector<144x32xf32>, vector<64x32xf32> -> vector<64x32xf32>
    %6 = vector.broadcast %0 : vector<1x32xf32> to vector<64x32xf32>
    %7 = arith.mulf %5, %6 : vector<64x32xf32>
    %8 = vector.broadcast %1 : vector<1x32xf32> to vector<64x32xf32>
    %9 = arith.addf %7, %8 : vector<64x32xf32>
    %cst_7 = arith.constant 0.000000e+00 : f32
    %10 = vector.broadcast %cst_7 : f32 to vector<64x32xf32>
    %11 = arith.maximumf %9, %10 : vector<64x32xf32>
    %c0_8 = arith.constant 0 : index
    %c0_9 = arith.constant 0 : index
    %c0_10 = arith.constant 0 : index
    %12 = vector.load %arg4[%c0_8, %c0_9, %c0_10] : memref<1x64x32xf32, #tpu.memory_space<vmem>>, vector<1x64x32xf32>
    %13 = vector.shape_cast %12 : vector<1x64x32xf32> to vector<64x32xf32>
    %14 = vector.shape_cast %11 : vector<64x32xf32> to vector<1x64x32xf32>
    tpu.vector_store %arg4[%c0_8, %c0_9, %c0_10], %14 {strides = array<i32>} : memref<1x64x32xf32, #tpu.memory_space<vmem>>, vector<1x64x32xf32>,
    return
  }
  func.func @transform_0(%arg0: i32) -> (i32, i32, i32) {
    %c0_i32 = arith.constant 0 : i32
    %c0_i32_0 = arith.constant 0 : i32
    %c0_i32_1 = arith.constant 0 : i32
    return %arg0, %c0_i32, %c0_i32_0 : i32, i32, i32
  }
  func.func @transform_1(%arg0: i32) -> (i32, i32) {
    %c0_i32 = arith.constant 0 : i32
    %c0_i32_0 = arith.constant 0 : i32
    %c0_i32_1 = arith.constant 0 : i32
    return %c0_i32, %c0_i32_0 : i32, i32
  }
  func.func @transform_2(%arg0: i32) -> (i32, i32) {
    %c0_i32 = arith.constant 0 : i32
    %c0_i32_0 = arith.constant 0 : i32
    %c0_i32_1 = arith.constant 0 : i32
    return %c0_i32, %c0_i32_0 : i32, i32
  }
  func.func @transform_3(%arg0: i32) -> (i32, i32, i32) {
    %c0_i32 = arith.constant 0 : i32
    %c0_i32_0 = arith.constant 0 : i32
    %c0_i32_1 = arith.constant 0 : i32
    return %arg0, %c0_i32, %c0_i32_0 : i32, i32, i32
  }
}

module attributes {stable_mosaic.version = 11 : i64} {
  func.func @kernel(%arg0: i32, %arg1: memref<1x16x288xf32, #tpu.memory_space<vmem>>, %arg2: memref<288x64xf32, #tpu.memory_space<vmem>>, %arg3: memref<2x64xf32, #tpu.memory_space<vmem>>, %arg4: memref<1x16x64xf32, #tpu.memory_space<vmem>>) attributes {dimension_semantics = [#tpu.dimension_semantics<parallel>], iteration_bounds = array<i64: 2>, scalar_prefetch = 0 : i64, scratch_operands = 0 : i64, tpu.core_type = #tpu.core_type<tc>, window_params = [{transform_indices = @transform_0, window_bounds = array<i64: 1, 16, 288>}, {pipeline_mode = #tpu.pipeline_mode<synchronous>, transform_indices = @transform_1, window_bounds = array<i64: 288, 64>}, {pipeline_mode = #tpu.pipeline_mode<synchronous>, transform_indices = @transform_2, window_bounds = array<i64: 2, 64>}, {transform_indices = @transform_3, window_bounds = array<i64: 1, 16, 64>}]} {
    %c0 = arith.constant 0 : index
    %c0_0 = arith.constant 0 : index
    %0 = vector.load %arg3[%c0, %c0_0] : memref<2x64xf32, #tpu.memory_space<vmem>>, vector<1x64xf32>
    %c1 = arith.constant 1 : index
    %c0_1 = arith.constant 0 : index
    %1 = vector.load %arg3[%c1, %c0_1] : memref<2x64xf32, #tpu.memory_space<vmem>>, vector<1x64xf32>
    %c0_2 = arith.constant 0 : index
    %c0_3 = arith.constant 0 : index
    %c0_4 = arith.constant 0 : index
    %2 = vector.load %arg1[%c0_2, %c0_3, %c0_4] : memref<1x16x288xf32, #tpu.memory_space<vmem>>, vector<1x16x288xf32>
    %3 = vector.shape_cast %2 : vector<1x16x288xf32> to vector<16x288xf32>
    %c0_5 = arith.constant 0 : index
    %c0_6 = arith.constant 0 : index
    %4 = vector.load %arg2[%c0_5, %c0_6] : memref<288x64xf32, #tpu.memory_space<vmem>>, vector<288x64xf32>
    %cst = arith.constant dense<0.000000e+00> : vector<16x64xf32>
    %5 = tpu.matmul %3, %4, %cst {dimension_numbers = #tpu.dot_dimension_numbers<[1], [0], [0], [1], [0, 0, 1, 1], [], []>} : vector<16x288xf32>, vector<288x64xf32>, vector<16x64xf32> -> vector<16x64xf32>
    %6 = vector.broadcast %0 : vector<1x64xf32> to vector<16x64xf32>
    %7 = arith.mulf %5, %6 : vector<16x64xf32>
    %8 = vector.broadcast %1 : vector<1x64xf32> to vector<16x64xf32>
    %9 = arith.addf %7, %8 : vector<16x64xf32>
    %cst_7 = arith.constant 0.000000e+00 : f32
    %10 = vector.broadcast %cst_7 : f32 to vector<16x64xf32>
    %11 = arith.maximumf %9, %10 : vector<16x64xf32>
    %c0_8 = arith.constant 0 : index
    %c0_9 = arith.constant 0 : index
    %c0_10 = arith.constant 0 : index
    %12 = vector.load %arg4[%c0_8, %c0_9, %c0_10] : memref<1x16x64xf32, #tpu.memory_space<vmem>>, vector<1x16x64xf32>
    %13 = vector.shape_cast %12 : vector<1x16x64xf32> to vector<16x64xf32>
    %14 = vector.shape_cast %11 : vector<16x64xf32> to vector<1x16x64xf32>
    tpu.vector_store %arg4[%c0_8, %c0_9, %c0_10], %14 {strides = array<i32>} : memref<1x16x64xf32, #tpu.memory_space<vmem>>, vector<1x16x64xf32>,
    return
  }
  func.func @transform_0(%arg0: i32) -> (i32, i32, i32) {
    %c0_i32 = arith.constant 0 : i32
    %c0_i32_0 = arith.constant 0 : i32
    %c0_i32_1 = arith.constant 0 : i32
    return %arg0, %c0_i32, %c0_i32_0 : i32, i32, i32
  }
  func.func @transform_1(%arg0: i32) -> (i32, i32) {
    %c0_i32 = arith.constant 0 : i32
    %c0_i32_0 = arith.constant 0 : i32
    %c0_i32_1 = arith.constant 0 : i32
    return %c0_i32, %c0_i32_0 : i32, i32
  }
  func.func @transform_2(%arg0: i32) -> (i32, i32) {
    %c0_i32 = arith.constant 0 : i32
    %c0_i32_0 = arith.constant 0 : i32
    %c0_i32_1 = arith.constant 0 : i32
    return %c0_i32, %c0_i32_0 : i32, i32
  }
  func.func @transform_3(%arg0: i32) -> (i32, i32, i32) {
    %c0_i32 = arith.constant 0 : i32
    %c0_i32_0 = arith.constant 0 : i32
    %c0_i32_1 = arith.constant 0 : i32
    return %arg0, %c0_i32, %c0_i32_0 : i32, i32, i32
  }
}

module attributes {stable_mosaic.version = 11 : i64} {
  func.func @kernel(%arg0: i32, %arg1: memref<1x16x64xf32, #tpu.memory_space<vmem>>, %arg2: memref<64x64xf32, #tpu.memory_space<vmem>>, %arg3: memref<1x64xf32, #tpu.memory_space<vmem>>, %arg4: memref<17x64xf32, #tpu.memory_space<vmem>>, %arg5: memref<17x16xf32, #tpu.memory_space<vmem>>, %arg6: memref<2x4x64x16xf32, #tpu.memory_space<vmem>>, %arg7: memref<2x4x64x16xf32, #tpu.memory_space<vmem>>, %arg8: memref<2x4x64x16xf32, #tpu.memory_space<vmem>>, %arg9: memref<2x4x16x64xf32, #tpu.memory_space<vmem>>, %arg10: memref<2x1x64xf32, #tpu.memory_space<vmem>>, %arg11: memref<2x1x64xf32, #tpu.memory_space<vmem>>, %arg12: memref<2x64x32xf32, #tpu.memory_space<vmem>>, %arg13: memref<2x1x32xf32, #tpu.memory_space<vmem>>, %arg14: memref<2x32x64xf32, #tpu.memory_space<vmem>>, %arg15: memref<2x1x64xf32, #tpu.memory_space<vmem>>, %arg16: memref<2x1x64xf32, #tpu.memory_space<vmem>>, %arg17: memref<2x1x64xf32, #tpu.memory_space<vmem>>, %arg18: memref<1x16x64xf32, #tpu.memory_space<vmem>>) attributes {dimension_semantics = [#tpu.dimension_semantics<parallel>], iteration_bounds = array<i64: 2>, scalar_prefetch = 0 : i64, scratch_operands = 0 : i64, tpu.core_type = #tpu.core_type<tc>, window_params = [{transform_indices = @transform_0, window_bounds = array<i64: 1, 16, 64>}, {pipeline_mode = #tpu.pipeline_mode<synchronous>, transform_indices = @transform_1, window_bounds = array<i64: 64, 64>}, {pipeline_mode = #tpu.pipeline_mode<synchronous>, transform_indices = @transform_2, window_bounds = array<i64: 1, 64>}, {pipeline_mode = #tpu.pipeline_mode<synchronous>, transform_indices = @transform_3, window_bounds = array<i64: 17, 64>}, {pipeline_mode = #tpu.pipeline_mode<synchronous>, transform_indices = @transform_4, window_bounds = array<i64: 17, 16>}, {pipeline_mode = #tpu.pipeline_mode<synchronous>, transform_indices = @transform_5, window_bounds = array<i64: 2, 4, 64, 16>}, {pipeline_mode = #tpu.pipeline_mode<synchronous>, transform_indices = @transform_6, window_bounds = array<i64: 2, 4, 64, 16>}, {pipeline_mode = #tpu.pipeline_mode<synchronous>, transform_indices = @transform_7, window_bounds = array<i64: 2, 4, 64, 16>}, {pipeline_mode = #tpu.pipeline_mode<synchronous>, transform_indices = @transform_8, window_bounds = array<i64: 2, 4, 16, 64>}, {pipeline_mode = #tpu.pipeline_mode<synchronous>, transform_indices = @transform_9, window_bounds = array<i64: 2, 1, 64>}, {pipeline_mode = #tpu.pipeline_mode<synchronous>, transform_indices = @transform_10, window_bounds = array<i64: 2, 1, 64>}, {pipeline_mode = #tpu.pipeline_mode<synchronous>, transform_indices = @transform_11, window_bounds = array<i64: 2, 64, 32>}, {pipeline_mode = #tpu.pipeline_mode<synchronous>, transform_indices = @transform_12, window_bounds = array<i64: 2, 1, 32>}, {pipeline_mode = #tpu.pipeline_mode<synchronous>, transform_indices = @transform_13, window_bounds = array<i64: 2, 32, 64>}, {pipeline_mode = #tpu.pipeline_mode<synchronous>, transform_indices = @transform_14, window_bounds = array<i64: 2, 1, 64>}, {pipeline_mode = #tpu.pipeline_mode<synchronous>, transform_indices = @transform_15, window_bounds = array<i64: 2, 1, 64>}, {pipeline_mode = #tpu.pipeline_mode<synchronous>, transform_indices = @transform_16, window_bounds = array<i64: 2, 1, 64>}, {transform_indices = @transform_17, window_bounds = array<i64: 1, 16, 64>}]} {
    %c0 = arith.constant 0 : index
    %c0_0 = arith.constant 0 : index
    %c0_1 = arith.constant 0 : index
    %0 = vector.load %arg1[%c0, %c0_0, %c0_1] : memref<1x16x64xf32, #tpu.memory_space<vmem>>, vector<1x16x64xf32>
    %1 = vector.shape_cast %0 : vector<1x16x64xf32> to vector<16x64xf32>
    %c0_2 = arith.constant 0 : index
    %c0_3 = arith.constant 0 : index
    %2 = vector.load %arg2[%c0_2, %c0_3] : memref<64x64xf32, #tpu.memory_space<vmem>>, vector<64x64xf32>
    %cst = arith.constant dense<0.000000e+00> : vector<16x64xf32>
    %3 = tpu.matmul %1, %2, %cst {dimension_numbers = #tpu.dot_dimension_numbers<[1], [0], [0], [1], [0, 0, 1, 1], [], []>} : vector<16x64xf32>, vector<64x64xf32>, vector<16x64xf32> -> vector<16x64xf32>
    %c0_4 = arith.constant 0 : index
    %c0_5 = arith.constant 0 : index
    %4 = vector.load %arg3[%c0_4, %c0_5] : memref<1x64xf32, #tpu.memory_space<vmem>>, vector<1x64xf32>
    %5 = vector.broadcast %4 : vector<1x64xf32> to vector<16x64xf32>
    %6 = arith.addf %3, %5 : vector<16x64xf32>
    %c0_6 = arith.constant 0 : index
    %c0_7 = arith.constant 0 : index
    %7 = vector.load %arg4[%c0_6, %c0_7] : memref<17x64xf32, #tpu.memory_space<vmem>>, vector<17x64xf32>
    %c0_8 = arith.constant 0 : index
    %c0_9 = arith.constant 0 : index
    %8 = vector.load %arg5[%c0_8, %c0_9] : memref<17x16xf32, #tpu.memory_space<vmem>>, vector<17x16xf32>
    %cst_10 = arith.constant dense<0.000000e+00> : vector<17x64xf32>
    %9 = tpu.matmul %8, %6, %cst_10 {dimension_numbers = #tpu.dot_dimension_numbers<[1], [0], [0], [1], [0, 0, 1, 1], [], []>} : vector<17x16xf32>, vector<16x64xf32>, vector<17x64xf32> -> vector<17x64xf32>
    %10 = arith.addf %7, %9 : vector<17x64xf32>
    %cst_11 = arith.constant 0.000000e+00 : f32
    %11 = vector.broadcast %cst_11 : f32 to vector<17x64xf32>
    %c0_12 = arith.constant 0 : index
    %c0_13 = arith.constant 0 : index
    %c0_14 = arith.constant 0 : index
    %c0_15 = arith.constant 0 : index
    %12 = vector.load %arg6[%c0_12, %c0_13, %c0_14, %c0_15] : memref<2x4x64x16xf32, #tpu.memory_space<vmem>>, vector<1x1x64x16xf32>
    %13 = vector.shape_cast %12 : vector<1x1x64x16xf32> to vector<64x16xf32>
    %cst_16 = arith.constant dense<0.000000e+00> : vector<17x16xf32>
    %14 = tpu.matmul %10, %13, %cst_16 {dimension_numbers = #tpu.dot_dimension_numbers<[1], [0], [0], [1], [0, 0, 1, 1], [], []>} : vector<17x64xf32>, vector<64x16xf32>, vector<17x16xf32> -> vector<17x16xf32>
    %c0_17 = arith.constant 0 : index
    %c0_18 = arith.constant 0 : index
    %c0_19 = arith.constant 0 : index
    %c0_20 = arith.constant 0 : index
    %15 = vector.load %arg7[%c0_17, %c0_18, %c0_19, %c0_20] : memref<2x4x64x16xf32, #tpu.memory_space<vmem>>, vector<1x1x64x16xf32>
    %16 = vector.shape_cast %15 : vector<1x1x64x16xf32> to vector<64x16xf32>
    %cst_21 = arith.constant dense<0.000000e+00> : vector<17x16xf32>
    %17 = tpu.matmul %10, %16, %cst_21 {dimension_numbers = #tpu.dot_dimension_numbers<[1], [0], [0], [1], [0, 0, 1, 1], [], []>} : vector<17x64xf32>, vector<64x16xf32>, vector<17x16xf32> -> vector<17x16xf32>
    %c0_22 = arith.constant 0 : index
    %c0_23 = arith.constant 0 : index
    %c0_24 = arith.constant 0 : index
    %c0_25 = arith.constant 0 : index
    %18 = vector.load %arg8[%c0_22, %c0_23, %c0_24, %c0_25] : memref<2x4x64x16xf32, #tpu.memory_space<vmem>>, vector<1x1x64x16xf32>
    %19 = vector.shape_cast %18 : vector<1x1x64x16xf32> to vector<64x16xf32>
    %cst_26 = arith.constant dense<0.000000e+00> : vector<17x16xf32>
    %20 = tpu.matmul %10, %19, %cst_26 {dimension_numbers = #tpu.dot_dimension_numbers<[1], [0], [0], [1], [0, 0, 1, 1], [], []>} : vector<17x64xf32>, vector<64x16xf32>, vector<17x16xf32> -> vector<17x16xf32>
    %cst_27 = arith.constant dense<0.000000e+00> : vector<17x17xf32>
    %21 = tpu.matmul %14, %17, %cst_27 {dimension_numbers = #tpu.dot_dimension_numbers<[1], [1], [0], [0], [0, 0, 1, 0], [], []>} : vector<17x16xf32>, vector<17x16xf32>, vector<17x17xf32> -> vector<17x17xf32>
    %cst_28 = arith.constant 2.500000e-01 : f32
    %22 = vector.broadcast %cst_28 : f32 to vector<17x17xf32>
    %23 = arith.mulf %21, %22 : vector<17x17xf32>
    %cst_29 = arith.constant dense<0xFF800000> : vector<17xf32>
    %24 = vector.multi_reduction <maximumf>, %23, %cst_29 [1] : vector<17x17xf32> to vector<17xf32>
    %25 = vector.shape_cast %24 : vector<17xf32> to vector<17x1xf32>
    %26 = vector.broadcast %25 : vector<17x1xf32> to vector<17x17xf32>
    %27 = arith.subf %23, %26 : vector<17x17xf32>
    %28 = math.exp %27 : vector<17x17xf32>
    %cst_30 = arith.constant dense<0.000000e+00> : vector<17xf32>
    %29 = vector.multi_reduction <add>, %28, %cst_30 [1] : vector<17x17xf32> to vector<17xf32>
    %30 = vector.shape_cast %29 : vector<17xf32> to vector<17x1xf32>
    %31 = vector.broadcast %30 : vector<17x1xf32> to vector<17x17xf32>
    %32 = arith.divf %28, %31 : vector<17x17xf32>
    %cst_31 = arith.constant dense<0.000000e+00> : vector<17x16xf32>
    %33 = tpu.matmul %32, %20, %cst_31 {dimension_numbers = #tpu.dot_dimension_numbers<[1], [0], [0], [1], [0, 0, 1, 1], [], []>} : vector<17x17xf32>, vector<17x16xf32>, vector<17x16xf32> -> vector<17x16xf32>
    %c0_32 = arith.constant 0 : index
    %c0_33 = arith.constant 0 : index
    %c0_34 = arith.constant 0 : index
    %c0_35 = arith.constant 0 : index
    %34 = vector.load %arg9[%c0_32, %c0_33, %c0_34, %c0_35] : memref<2x4x16x64xf32, #tpu.memory_space<vmem>>, vector<1x1x16x64xf32>
    %35 = vector.shape_cast %34 : vector<1x1x16x64xf32> to vector<16x64xf32>
    %cst_36 = arith.constant dense<0.000000e+00> : vector<17x64xf32>
    %36 = tpu.matmul %33, %35, %cst_36 {dimension_numbers = #tpu.dot_dimension_numbers<[1], [0], [0], [1], [0, 0, 1, 1], [], []>} : vector<17x16xf32>, vector<16x64xf32>, vector<17x64xf32> -> vector<17x64xf32>
    %37 = arith.addf %11, %36 : vector<17x64xf32>
    %c0_37 = arith.constant 0 : index
    %c1 = arith.constant 1 : index
    %c0_38 = arith.constant 0 : index
    %c0_39 = arith.constant 0 : index
    %38 = vector.load %arg6[%c0_37, %c1, %c0_38, %c0_39] : memref<2x4x64x16xf32, #tpu.memory_space<vmem>>, vector<1x1x64x16xf32>
    %39 = vector.shape_cast %38 : vector<1x1x64x16xf32> to vector<64x16xf32>
    %cst_40 = arith.constant dense<0.000000e+00> : vector<17x16xf32>
    %40 = tpu.matmul %10, %39, %cst_40 {dimension_numbers = #tpu.dot_dimension_numbers<[1], [0], [0], [1], [0, 0, 1, 1], [], []>} : vector<17x64xf32>, vector<64x16xf32>, vector<17x16xf32> -> vector<17x16xf32>
    %c0_41 = arith.constant 0 : index
    %c1_42 = arith.constant 1 : index
    %c0_43 = arith.constant 0 : index
    %c0_44 = arith.constant 0 : index
    %41 = vector.load %arg7[%c0_41, %c1_42, %c0_43, %c0_44] : memref<2x4x64x16xf32, #tpu.memory_space<vmem>>, vector<1x1x64x16xf32>
    %42 = vector.shape_cast %41 : vector<1x1x64x16xf32> to vector<64x16xf32>
    %cst_45 = arith.constant dense<0.000000e+00> : vector<17x16xf32>
    %43 = tpu.matmul %10, %42, %cst_45 {dimension_numbers = #tpu.dot_dimension_numbers<[1], [0], [0], [1], [0, 0, 1, 1], [], []>} : vector<17x64xf32>, vector<64x16xf32>, vector<17x16xf32> -> vector<17x16xf32>
    %c0_46 = arith.constant 0 : index
    %c1_47 = arith.constant 1 : index
    %c0_48 = arith.constant 0 : index
    %c0_49 = arith.constant 0 : index
    %44 = vector.load %arg8[%c0_46, %c1_47, %c0_48, %c0_49] : memref<2x4x64x16xf32, #tpu.memory_space<vmem>>, vector<1x1x64x16xf32>
    %45 = vector.shape_cast %44 : vector<1x1x64x16xf32> to vector<64x16xf32>
    %cst_50 = arith.constant dense<0.000000e+00> : vector<17x16xf32>
    %46 = tpu.matmul %10, %45, %cst_50 {dimension_numbers = #tpu.dot_dimension_numbers<[1], [0], [0], [1], [0, 0, 1, 1], [], []>} : vector<17x64xf32>, vector<64x16xf32>, vector<17x16xf32> -> vector<17x16xf32>
    %cst_51 = arith.constant dense<0.000000e+00> : vector<17x17xf32>
    %47 = tpu.matmul %40, %43, %cst_51 {dimension_numbers = #tpu.dot_dimension_numbers<[1], [1], [0], [0], [0, 0, 1, 0], [], []>} : vector<17x16xf32>, vector<17x16xf32>, vector<17x17xf32> -> vector<17x17xf32>
    %cst_52 = arith.constant 2.500000e-01 : f32
    %48 = vector.broadcast %cst_52 : f32 to vector<17x17xf32>
    %49 = arith.mulf %47, %48 : vector<17x17xf32>
    %cst_53 = arith.constant dense<0xFF800000> : vector<17xf32>
    %50 = vector.multi_reduction <maximumf>, %49, %cst_53 [1] : vector<17x17xf32> to vector<17xf32>
    %51 = vector.shape_cast %50 : vector<17xf32> to vector<17x1xf32>
    %52 = vector.broadcast %51 : vector<17x1xf32> to vector<17x17xf32>
    %53 = arith.subf %49, %52 : vector<17x17xf32>
    %54 = math.exp %53 : vector<17x17xf32>
    %cst_54 = arith.constant dense<0.000000e+00> : vector<17xf32>
    %55 = vector.multi_reduction <add>, %54, %cst_54 [1] : vector<17x17xf32> to vector<17xf32>
    %56 = vector.shape_cast %55 : vector<17xf32> to vector<17x1xf32>
    %57 = vector.broadcast %56 : vector<17x1xf32> to vector<17x17xf32>
    %58 = arith.divf %54, %57 : vector<17x17xf32>
    %cst_55 = arith.constant dense<0.000000e+00> : vector<17x16xf32>
    %59 = tpu.matmul %58, %46, %cst_55 {dimension_numbers = #tpu.dot_dimension_numbers<[1], [0], [0], [1], [0, 0, 1, 1], [], []>} : vector<17x17xf32>, vector<17x16xf32>, vector<17x16xf32> -> vector<17x16xf32>
    %c0_56 = arith.constant 0 : index
    %c1_57 = arith.constant 1 : index
    %c0_58 = arith.constant 0 : index
    %c0_59 = arith.constant 0 : index
    %60 = vector.load %arg9[%c0_56, %c1_57, %c0_58, %c0_59] : memref<2x4x16x64xf32, #tpu.memory_space<vmem>>, vector<1x1x16x64xf32>
    %61 = vector.shape_cast %60 : vector<1x1x16x64xf32> to vector<16x64xf32>
    %cst_60 = arith.constant dense<0.000000e+00> : vector<17x64xf32>
    %62 = tpu.matmul %59, %61, %cst_60 {dimension_numbers = #tpu.dot_dimension_numbers<[1], [0], [0], [1], [0, 0, 1, 1], [], []>} : vector<17x16xf32>, vector<16x64xf32>, vector<17x64xf32> -> vector<17x64xf32>
    %63 = arith.addf %37, %62 : vector<17x64xf32>
    %c0_61 = arith.constant 0 : index
    %c2 = arith.constant 2 : index
    %c0_62 = arith.constant 0 : index
    %c0_63 = arith.constant 0 : index
    %64 = vector.load %arg6[%c0_61, %c2, %c0_62, %c0_63] : memref<2x4x64x16xf32, #tpu.memory_space<vmem>>, vector<1x1x64x16xf32>
    %65 = vector.shape_cast %64 : vector<1x1x64x16xf32> to vector<64x16xf32>
    %cst_64 = arith.constant dense<0.000000e+00> : vector<17x16xf32>
    %66 = tpu.matmul %10, %65, %cst_64 {dimension_numbers = #tpu.dot_dimension_numbers<[1], [0], [0], [1], [0, 0, 1, 1], [], []>} : vector<17x64xf32>, vector<64x16xf32>, vector<17x16xf32> -> vector<17x16xf32>
    %c0_65 = arith.constant 0 : index
    %c2_66 = arith.constant 2 : index
    %c0_67 = arith.constant 0 : index
    %c0_68 = arith.constant 0 : index
    %67 = vector.load %arg7[%c0_65, %c2_66, %c0_67, %c0_68] : memref<2x4x64x16xf32, #tpu.memory_space<vmem>>, vector<1x1x64x16xf32>
    %68 = vector.shape_cast %67 : vector<1x1x64x16xf32> to vector<64x16xf32>
    %cst_69 = arith.constant dense<0.000000e+00> : vector<17x16xf32>
    %69 = tpu.matmul %10, %68, %cst_69 {dimension_numbers = #tpu.dot_dimension_numbers<[1], [0], [0], [1], [0, 0, 1, 1], [], []>} : vector<17x64xf32>, vector<64x16xf32>, vector<17x16xf32> -> vector<17x16xf32>
    %c0_70 = arith.constant 0 : index
    %c2_71 = arith.constant 2 : index
    %c0_72 = arith.constant 0 : index
    %c0_73 = arith.constant 0 : index
    %70 = vector.load %arg8[%c0_70, %c2_71, %c0_72, %c0_73] : memref<2x4x64x16xf32, #tpu.memory_space<vmem>>, vector<1x1x64x16xf32>
    %71 = vector.shape_cast %70 : vector<1x1x64x16xf32> to vector<64x16xf32>
    %cst_74 = arith.constant dense<0.000000e+00> : vector<17x16xf32>
    %72 = tpu.matmul %10, %71, %cst_74 {dimension_numbers = #tpu.dot_dimension_numbers<[1], [0], [0], [1], [0, 0, 1, 1], [], []>} : vector<17x64xf32>, vector<64x16xf32>, vector<17x16xf32> -> vector<17x16xf32>
    %cst_75 = arith.constant dense<0.000000e+00> : vector<17x17xf32>
    %73 = tpu.matmul %66, %69, %cst_75 {dimension_numbers = #tpu.dot_dimension_numbers<[1], [1], [0], [0], [0, 0, 1, 0], [], []>} : vector<17x16xf32>, vector<17x16xf32>, vector<17x17xf32> -> vector<17x17xf32>
    %cst_76 = arith.constant 2.500000e-01 : f32
    %74 = vector.broadcast %cst_76 : f32 to vector<17x17xf32>
    %75 = arith.mulf %73, %74 : vector<17x17xf32>
    %cst_77 = arith.constant dense<0xFF800000> : vector<17xf32>
    %76 = vector.multi_reduction <maximumf>, %75, %cst_77 [1] : vector<17x17xf32> to vector<17xf32>
    %77 = vector.shape_cast %76 : vector<17xf32> to vector<17x1xf32>
    %78 = vector.broadcast %77 : vector<17x1xf32> to vector<17x17xf32>
    %79 = arith.subf %75, %78 : vector<17x17xf32>
    %80 = math.exp %79 : vector<17x17xf32>
    %cst_78 = arith.constant dense<0.000000e+00> : vector<17xf32>
    %81 = vector.multi_reduction <add>, %80, %cst_78 [1] : vector<17x17xf32> to vector<17xf32>
    %82 = vector.shape_cast %81 : vector<17xf32> to vector<17x1xf32>
    %83 = vector.broadcast %82 : vector<17x1xf32> to vector<17x17xf32>
    %84 = arith.divf %80, %83 : vector<17x17xf32>
    %cst_79 = arith.constant dense<0.000000e+00> : vector<17x16xf32>
    %85 = tpu.matmul %84, %72, %cst_79 {dimension_numbers = #tpu.dot_dimension_numbers<[1], [0], [0], [1], [0, 0, 1, 1], [], []>} : vector<17x17xf32>, vector<17x16xf32>, vector<17x16xf32> -> vector<17x16xf32>
    %c0_80 = arith.constant 0 : index
    %c2_81 = arith.constant 2 : index
    %c0_82 = arith.constant 0 : index
    %c0_83 = arith.constant 0 : index
    %86 = vector.load %arg9[%c0_80, %c2_81, %c0_82, %c0_83] : memref<2x4x16x64xf32, #tpu.memory_space<vmem>>, vector<1x1x16x64xf32>
    %87 = vector.shape_cast %86 : vector<1x1x16x64xf32> to vector<16x64xf32>
    %cst_84 = arith.constant dense<0.000000e+00> : vector<17x64xf32>
    %88 = tpu.matmul %85, %87, %cst_84 {dimension_numbers = #tpu.dot_dimension_numbers<[1], [0], [0], [1], [0, 0, 1, 1], [], []>} : vector<17x16xf32>, vector<16x64xf32>, vector<17x64xf32> -> vector<17x64xf32>
    %89 = arith.addf %63, %88 : vector<17x64xf32>
    %c0_85 = arith.constant 0 : index
    %c3 = arith.constant 3 : index
    %c0_86 = arith.constant 0 : index
    %c0_87 = arith.constant 0 : index
    %90 = vector.load %arg6[%c0_85, %c3, %c0_86, %c0_87] : memref<2x4x64x16xf32, #tpu.memory_space<vmem>>, vector<1x1x64x16xf32>
    %91 = vector.shape_cast %90 : vector<1x1x64x16xf32> to vector<64x16xf32>
    %cst_88 = arith.constant dense<0.000000e+00> : vector<17x16xf32>
    %92 = tpu.matmul %10, %91, %cst_88 {dimension_numbers = #tpu.dot_dimension_numbers<[1], [0], [0], [1], [0, 0, 1, 1], [], []>} : vector<17x64xf32>, vector<64x16xf32>, vector<17x16xf32> -> vector<17x16xf32>
    %c0_89 = arith.constant 0 : index
    %c3_90 = arith.constant 3 : index
    %c0_91 = arith.constant 0 : index
    %c0_92 = arith.constant 0 : index
    %93 = vector.load %arg7[%c0_89, %c3_90, %c0_91, %c0_92] : memref<2x4x64x16xf32, #tpu.memory_space<vmem>>, vector<1x1x64x16xf32>
    %94 = vector.shape_cast %93 : vector<1x1x64x16xf32> to vector<64x16xf32>
    %cst_93 = arith.constant dense<0.000000e+00> : vector<17x16xf32>
    %95 = tpu.matmul %10, %94, %cst_93 {dimension_numbers = #tpu.dot_dimension_numbers<[1], [0], [0], [1], [0, 0, 1, 1], [], []>} : vector<17x64xf32>, vector<64x16xf32>, vector<17x16xf32> -> vector<17x16xf32>
    %c0_94 = arith.constant 0 : index
    %c3_95 = arith.constant 3 : index
    %c0_96 = arith.constant 0 : index
    %c0_97 = arith.constant 0 : index
    %96 = vector.load %arg8[%c0_94, %c3_95, %c0_96, %c0_97] : memref<2x4x64x16xf32, #tpu.memory_space<vmem>>, vector<1x1x64x16xf32>
    %97 = vector.shape_cast %96 : vector<1x1x64x16xf32> to vector<64x16xf32>
    %cst_98 = arith.constant dense<0.000000e+00> : vector<17x16xf32>
    %98 = tpu.matmul %10, %97, %cst_98 {dimension_numbers = #tpu.dot_dimension_numbers<[1], [0], [0], [1], [0, 0, 1, 1], [], []>} : vector<17x64xf32>, vector<64x16xf32>, vector<17x16xf32> -> vector<17x16xf32>
    %cst_99 = arith.constant dense<0.000000e+00> : vector<17x17xf32>
    %99 = tpu.matmul %92, %95, %cst_99 {dimension_numbers = #tpu.dot_dimension_numbers<[1], [1], [0], [0], [0, 0, 1, 0], [], []>} : vector<17x16xf32>, vector<17x16xf32>, vector<17x17xf32> -> vector<17x17xf32>
    %cst_100 = arith.constant 2.500000e-01 : f32
    %100 = vector.broadcast %cst_100 : f32 to vector<17x17xf32>
    %101 = arith.mulf %99, %100 : vector<17x17xf32>
    %cst_101 = arith.constant dense<0xFF800000> : vector<17xf32>
    %102 = vector.multi_reduction <maximumf>, %101, %cst_101 [1] : vector<17x17xf32> to vector<17xf32>
    %103 = vector.shape_cast %102 : vector<17xf32> to vector<17x1xf32>
    %104 = vector.broadcast %103 : vector<17x1xf32> to vector<17x17xf32>
    %105 = arith.subf %101, %104 : vector<17x17xf32>
    %106 = math.exp %105 : vector<17x17xf32>
    %cst_102 = arith.constant dense<0.000000e+00> : vector<17xf32>
    %107 = vector.multi_reduction <add>, %106, %cst_102 [1] : vector<17x17xf32> to vector<17xf32>
    %108 = vector.shape_cast %107 : vector<17xf32> to vector<17x1xf32>
    %109 = vector.broadcast %108 : vector<17x1xf32> to vector<17x17xf32>
    %110 = arith.divf %106, %109 : vector<17x17xf32>
    %cst_103 = arith.constant dense<0.000000e+00> : vector<17x16xf32>
    %111 = tpu.matmul %110, %98, %cst_103 {dimension_numbers = #tpu.dot_dimension_numbers<[1], [0], [0], [1], [0, 0, 1, 1], [], []>} : vector<17x17xf32>, vector<17x16xf32>, vector<17x16xf32> -> vector<17x16xf32>
    %c0_104 = arith.constant 0 : index
    %c3_105 = arith.constant 3 : index
    %c0_106 = arith.constant 0 : index
    %c0_107 = arith.constant 0 : index
    %112 = vector.load %arg9[%c0_104, %c3_105, %c0_106, %c0_107] : memref<2x4x16x64xf32, #tpu.memory_space<vmem>>, vector<1x1x16x64xf32>
    %113 = vector.shape_cast %112 : vector<1x1x16x64xf32> to vector<16x64xf32>
    %cst_108 = arith.constant dense<0.000000e+00> : vector<17x64xf32>
    %114 = tpu.matmul %111, %113, %cst_108 {dimension_numbers = #tpu.dot_dimension_numbers<[1], [0], [0], [1], [0, 0, 1, 1], [], []>} : vector<17x16xf32>, vector<16x64xf32>, vector<17x64xf32> -> vector<17x64xf32>
    %115 = arith.addf %89, %114 : vector<17x64xf32>
    %116 = arith.addf %10, %115 : vector<17x64xf32>
    %c0_109 = arith.constant 0 : index
    %c0_110 = arith.constant 0 : index
    %c0_111 = arith.constant 0 : index
    %117 = vector.load %arg10[%c0_109, %c0_110, %c0_111] : memref<2x1x64xf32, #tpu.memory_space<vmem>>, vector<1x1x64xf32>
    %118 = vector.shape_cast %117 : vector<1x1x64xf32> to vector<1x64xf32>
    %c0_112 = arith.constant 0 : index
    %c0_113 = arith.constant 0 : index
    %c0_114 = arith.constant 0 : index
    %119 = vector.load %arg11[%c0_112, %c0_113, %c0_114] : memref<2x1x64xf32, #tpu.memory_space<vmem>>, vector<1x1x64xf32>
    %120 = vector.shape_cast %119 : vector<1x1x64xf32> to vector<1x64xf32>
    %cst_115 = arith.constant dense<0.000000e+00> : vector<17xf32>
    %121 = vector.multi_reduction <add>, %116, %cst_115 [1] : vector<17x64xf32> to vector<17xf32>
    %122 = vector.shape_cast %121 : vector<17xf32> to vector<17x1xf32>
    %cst_116 = arith.constant 6.400000e+01 : f32
    %123 = vector.broadcast %cst_116 : f32 to vector<17x1xf32>
    %124 = arith.divf %122, %123 : vector<17x1xf32>
    %125 = vector.broadcast %124 : vector<17x1xf32> to vector<17x64xf32>
    %126 = arith.subf %116, %125 : vector<17x64xf32>
    %127 = arith.mulf %126, %126 : vector<17x64xf32>
    %cst_117 = arith.constant dense<0.000000e+00> : vector<17xf32>
    %128 = vector.multi_reduction <add>, %127, %cst_117 [1] : vector<17x64xf32> to vector<17xf32>
    %129 = vector.shape_cast %128 : vector<17xf32> to vector<17x1xf32>
    %cst_118 = arith.constant 6.400000e+01 : f32
    %130 = vector.broadcast %cst_118 : f32 to vector<17x1xf32>
    %131 = arith.divf %129, %130 : vector<17x1xf32>
    %cst_119 = arith.constant 9.99999974E-6 : f32
    %132 = vector.broadcast %cst_119 : f32 to vector<17x1xf32>
    %133 = arith.addf %131, %132 : vector<17x1xf32>
    %134 = math.rsqrt %133 : vector<17x1xf32>
    %135 = vector.broadcast %134 : vector<17x1xf32> to vector<17x64xf32>
    %136 = arith.mulf %126, %135 : vector<17x64xf32>
    %137 = vector.broadcast %118 : vector<1x64xf32> to vector<17x64xf32>
    %138 = arith.mulf %136, %137 : vector<17x64xf32>
    %139 = vector.broadcast %120 : vector<1x64xf32> to vector<17x64xf32>
    %140 = arith.addf %138, %139 : vector<17x64xf32>
    %c0_120 = arith.constant 0 : index
    %c0_121 = arith.constant 0 : index
    %c0_122 = arith.constant 0 : index
    %141 = vector.load %arg12[%c0_120, %c0_121, %c0_122] : memref<2x64x32xf32, #tpu.memory_space<vmem>>, vector<1x64x32xf32>
    %142 = vector.shape_cast %141 : vector<1x64x32xf32> to vector<64x32xf32>
    %cst_123 = arith.constant dense<0.000000e+00> : vector<17x32xf32>
    %143 = tpu.matmul %140, %142, %cst_123 {dimension_numbers = #tpu.dot_dimension_numbers<[1], [0], [0], [1], [0, 0, 1, 1], [], []>} : vector<17x64xf32>, vector<64x32xf32>, vector<17x32xf32> -> vector<17x32xf32>
    %c0_124 = arith.constant 0 : index
    %c0_125 = arith.constant 0 : index
    %c0_126 = arith.constant 0 : index
    %144 = vector.load %arg13[%c0_124, %c0_125, %c0_126] : memref<2x1x32xf32, #tpu.memory_space<vmem>>, vector<1x1x32xf32>
    %145 = vector.shape_cast %144 : vector<1x1x32xf32> to vector<1x32xf32>
    %146 = vector.broadcast %145 : vector<1x32xf32> to vector<17x32xf32>
    %147 = arith.addf %143, %146 : vector<17x32xf32>
    %cst_127 = arith.constant 5.000000e-01 : f32
    %148 = vector.broadcast %cst_127 : f32 to vector<17x32xf32>
    %149 = arith.mulf %148, %147 : vector<17x32xf32>
    %cst_128 = arith.constant 4.471500e-02 : f32
    %150 = vector.broadcast %cst_128 : f32 to vector<17x32xf32>
    %151 = arith.mulf %150, %147 : vector<17x32xf32>
    %152 = arith.mulf %151, %147 : vector<17x32xf32>
    %153 = arith.mulf %152, %147 : vector<17x32xf32>
    %154 = arith.addf %147, %153 : vector<17x32xf32>
    %cst_129 = arith.constant 0.797884583 : f32
    %155 = vector.broadcast %cst_129 : f32 to vector<17x32xf32>
    %156 = arith.mulf %155, %154 : vector<17x32xf32>
    %157 = math.tanh %156 : vector<17x32xf32>
    %cst_130 = arith.constant 1.000000e+00 : f32
    %158 = vector.broadcast %cst_130 : f32 to vector<17x32xf32>
    %159 = arith.addf %158, %157 : vector<17x32xf32>
    %160 = arith.mulf %149, %159 : vector<17x32xf32>
    %c0_131 = arith.constant 0 : index
    %c0_132 = arith.constant 0 : index
    %c0_133 = arith.constant 0 : index
    %161 = vector.load %arg14[%c0_131, %c0_132, %c0_133] : memref<2x32x64xf32, #tpu.memory_space<vmem>>, vector<1x32x64xf32>
    %162 = vector.shape_cast %161 : vector<1x32x64xf32> to vector<32x64xf32>
    %cst_134 = arith.constant dense<0.000000e+00> : vector<17x64xf32>
    %163 = tpu.matmul %160, %162, %cst_134 {dimension_numbers = #tpu.dot_dimension_numbers<[1], [0], [0], [1], [0, 0, 1, 1], [], []>} : vector<17x32xf32>, vector<32x64xf32>, vector<17x64xf32> -> vector<17x64xf32>
    %c0_135 = arith.constant 0 : index
    %c0_136 = arith.constant 0 : index
    %c0_137 = arith.constant 0 : index
    %164 = vector.load %arg15[%c0_135, %c0_136, %c0_137] : memref<2x1x64xf32, #tpu.memory_space<vmem>>, vector<1x1x64xf32>
    %165 = vector.shape_cast %164 : vector<1x1x64xf32> to vector<1x64xf32>
    %166 = vector.broadcast %165 : vector<1x64xf32> to vector<17x64xf32>
    %167 = arith.addf %163, %166 : vector<17x64xf32>
    %168 = arith.addf %140, %167 : vector<17x64xf32>
    %c0_138 = arith.constant 0 : index
    %c0_139 = arith.constant 0 : index
    %c0_140 = arith.constant 0 : index
    %169 = vector.load %arg16[%c0_138, %c0_139, %c0_140] : memref<2x1x64xf32, #tpu.memory_space<vmem>>, vector<1x1x64xf32>
    %170 = vector.shape_cast %169 : vector<1x1x64xf32> to vector<1x64xf32>
    %c0_141 = arith.constant 0 : index
    %c0_142 = arith.constant 0 : index
    %c0_143 = arith.constant 0 : index
    %171 = vector.load %arg17[%c0_141, %c0_142, %c0_143] : memref<2x1x64xf32, #tpu.memory_space<vmem>>, vector<1x1x64xf32>
    %172 = vector.shape_cast %171 : vector<1x1x64xf32> to vector<1x64xf32>
    %cst_144 = arith.constant dense<0.000000e+00> : vector<17xf32>
    %173 = vector.multi_reduction <add>, %168, %cst_144 [1] : vector<17x64xf32> to vector<17xf32>
    %174 = vector.shape_cast %173 : vector<17xf32> to vector<17x1xf32>
    %cst_145 = arith.constant 6.400000e+01 : f32
    %175 = vector.broadcast %cst_145 : f32 to vector<17x1xf32>
    %176 = arith.divf %174, %175 : vector<17x1xf32>
    %177 = vector.broadcast %176 : vector<17x1xf32> to vector<17x64xf32>
    %178 = arith.subf %168, %177 : vector<17x64xf32>
    %179 = arith.mulf %178, %178 : vector<17x64xf32>
    %cst_146 = arith.constant dense<0.000000e+00> : vector<17xf32>
    %180 = vector.multi_reduction <add>, %179, %cst_146 [1] : vector<17x64xf32> to vector<17xf32>
    %181 = vector.shape_cast %180 : vector<17xf32> to vector<17x1xf32>
    %cst_147 = arith.constant 6.400000e+01 : f32
    %182 = vector.broadcast %cst_147 : f32 to vector<17x1xf32>
    %183 = arith.divf %181, %182 : vector<17x1xf32>
    %cst_148 = arith.constant 9.99999974E-6 : f32
    %184 = vector.broadcast %cst_148 : f32 to vector<17x1xf32>
    %185 = arith.addf %183, %184 : vector<17x1xf32>
    %186 = math.rsqrt %185 : vector<17x1xf32>
    %187 = vector.broadcast %186 : vector<17x1xf32> to vector<17x64xf32>
    %188 = arith.mulf %178, %187 : vector<17x64xf32>
    %189 = vector.broadcast %170 : vector<1x64xf32> to vector<17x64xf32>
    %190 = arith.mulf %188, %189 : vector<17x64xf32>
    %191 = vector.broadcast %172 : vector<1x64xf32> to vector<17x64xf32>
    %192 = arith.addf %190, %191 : vector<17x64xf32>
    %cst_149 = arith.constant 0.000000e+00 : f32
    %193 = vector.broadcast %cst_149 : f32 to vector<17x64xf32>
    %c1_150 = arith.constant 1 : index
    %c0_151 = arith.constant 0 : index
    %c0_152 = arith.constant 0 : index
    %c0_153 = arith.constant 0 : index
    %194 = vector.load %arg6[%c1_150, %c0_151, %c0_152, %c0_153] : memref<2x4x64x16xf32, #tpu.memory_space<vmem>>, vector<1x1x64x16xf32>
    %195 = vector.shape_cast %194 : vector<1x1x64x16xf32> to vector<64x16xf32>
    %cst_154 = arith.constant dense<0.000000e+00> : vector<17x16xf32>
    %196 = tpu.matmul %192, %195, %cst_154 {dimension_numbers = #tpu.dot_dimension_numbers<[1], [0], [0], [1], [0, 0, 1, 1], [], []>} : vector<17x64xf32>, vector<64x16xf32>, vector<17x16xf32> -> vector<17x16xf32>
    %c1_155 = arith.constant 1 : index
    %c0_156 = arith.constant 0 : index
    %c0_157 = arith.constant 0 : index
    %c0_158 = arith.constant 0 : index
    %197 = vector.load %arg7[%c1_155, %c0_156, %c0_157, %c0_158] : memref<2x4x64x16xf32, #tpu.memory_space<vmem>>, vector<1x1x64x16xf32>
    %198 = vector.shape_cast %197 : vector<1x1x64x16xf32> to vector<64x16xf32>
    %cst_159 = arith.constant dense<0.000000e+00> : vector<17x16xf32>
    %199 = tpu.matmul %192, %198, %cst_159 {dimension_numbers = #tpu.dot_dimension_numbers<[1], [0], [0], [1], [0, 0, 1, 1], [], []>} : vector<17x64xf32>, vector<64x16xf32>, vector<17x16xf32> -> vector<17x16xf32>
    %c1_160 = arith.constant 1 : index
    %c0_161 = arith.constant 0 : index
    %c0_162 = arith.constant 0 : index
    %c0_163 = arith.constant 0 : index
    %200 = vector.load %arg8[%c1_160, %c0_161, %c0_162, %c0_163] : memref<2x4x64x16xf32, #tpu.memory_space<vmem>>, vector<1x1x64x16xf32>
    %201 = vector.shape_cast %200 : vector<1x1x64x16xf32> to vector<64x16xf32>
    %cst_164 = arith.constant dense<0.000000e+00> : vector<17x16xf32>
    %202 = tpu.matmul %192, %201, %cst_164 {dimension_numbers = #tpu.dot_dimension_numbers<[1], [0], [0], [1], [0, 0, 1, 1], [], []>} : vector<17x64xf32>, vector<64x16xf32>, vector<17x16xf32> -> vector<17x16xf32>
    %cst_165 = arith.constant dense<0.000000e+00> : vector<17x17xf32>
    %203 = tpu.matmul %196, %199, %cst_165 {dimension_numbers = #tpu.dot_dimension_numbers<[1], [1], [0], [0], [0, 0, 1, 0], [], []>} : vector<17x16xf32>, vector<17x16xf32>, vector<17x17xf32> -> vector<17x17xf32>
    %cst_166 = arith.constant 2.500000e-01 : f32
    %204 = vector.broadcast %cst_166 : f32 to vector<17x17xf32>
    %205 = arith.mulf %203, %204 : vector<17x17xf32>
    %cst_167 = arith.constant dense<0xFF800000> : vector<17xf32>
    %206 = vector.multi_reduction <maximumf>, %205, %cst_167 [1] : vector<17x17xf32> to vector<17xf32>
    %207 = vector.shape_cast %206 : vector<17xf32> to vector<17x1xf32>
    %208 = vector.broadcast %207 : vector<17x1xf32> to vector<17x17xf32>
    %209 = arith.subf %205, %208 : vector<17x17xf32>
    %210 = math.exp %209 : vector<17x17xf32>
    %cst_168 = arith.constant dense<0.000000e+00> : vector<17xf32>
    %211 = vector.multi_reduction <add>, %210, %cst_168 [1] : vector<17x17xf32> to vector<17xf32>
    %212 = vector.shape_cast %211 : vector<17xf32> to vector<17x1xf32>
    %213 = vector.broadcast %212 : vector<17x1xf32> to vector<17x17xf32>
    %214 = arith.divf %210, %213 : vector<17x17xf32>
    %cst_169 = arith.constant dense<0.000000e+00> : vector<17x16xf32>
    %215 = tpu.matmul %214, %202, %cst_169 {dimension_numbers = #tpu.dot_dimension_numbers<[1], [0], [0], [1], [0, 0, 1, 1], [], []>} : vector<17x17xf32>, vector<17x16xf32>, vector<17x16xf32> -> vector<17x16xf32>
    %c1_170 = arith.constant 1 : index
    %c0_171 = arith.constant 0 : index
    %c0_172 = arith.constant 0 : index
    %c0_173 = arith.constant 0 : index
    %216 = vector.load %arg9[%c1_170, %c0_171, %c0_172, %c0_173] : memref<2x4x16x64xf32, #tpu.memory_space<vmem>>, vector<1x1x16x64xf32>
    %217 = vector.shape_cast %216 : vector<1x1x16x64xf32> to vector<16x64xf32>
    %cst_174 = arith.constant dense<0.000000e+00> : vector<17x64xf32>
    %218 = tpu.matmul %215, %217, %cst_174 {dimension_numbers = #tpu.dot_dimension_numbers<[1], [0], [0], [1], [0, 0, 1, 1], [], []>} : vector<17x16xf32>, vector<16x64xf32>, vector<17x64xf32> -> vector<17x64xf32>
    %219 = arith.addf %193, %218 : vector<17x64xf32>
    %c1_175 = arith.constant 1 : index
    %c1_176 = arith.constant 1 : index
    %c0_177 = arith.constant 0 : index
    %c0_178 = arith.constant 0 : index
    %220 = vector.load %arg6[%c1_175, %c1_176, %c0_177, %c0_178] : memref<2x4x64x16xf32, #tpu.memory_space<vmem>>, vector<1x1x64x16xf32>
    %221 = vector.shape_cast %220 : vector<1x1x64x16xf32> to vector<64x16xf32>
    %cst_179 = arith.constant dense<0.000000e+00> : vector<17x16xf32>
    %222 = tpu.matmul %192, %221, %cst_179 {dimension_numbers = #tpu.dot_dimension_numbers<[1], [0], [0], [1], [0, 0, 1, 1], [], []>} : vector<17x64xf32>, vector<64x16xf32>, vector<17x16xf32> -> vector<17x16xf32>
    %c1_180 = arith.constant 1 : index
    %c1_181 = arith.constant 1 : index
    %c0_182 = arith.constant 0 : index
    %c0_183 = arith.constant 0 : index
    %223 = vector.load %arg7[%c1_180, %c1_181, %c0_182, %c0_183] : memref<2x4x64x16xf32, #tpu.memory_space<vmem>>, vector<1x1x64x16xf32>
    %224 = vector.shape_cast %223 : vector<1x1x64x16xf32> to vector<64x16xf32>
    %cst_184 = arith.constant dense<0.000000e+00> : vector<17x16xf32>
    %225 = tpu.matmul %192, %224, %cst_184 {dimension_numbers = #tpu.dot_dimension_numbers<[1], [0], [0], [1], [0, 0, 1, 1], [], []>} : vector<17x64xf32>, vector<64x16xf32>, vector<17x16xf32> -> vector<17x16xf32>
    %c1_185 = arith.constant 1 : index
    %c1_186 = arith.constant 1 : index
    %c0_187 = arith.constant 0 : index
    %c0_188 = arith.constant 0 : index
    %226 = vector.load %arg8[%c1_185, %c1_186, %c0_187, %c0_188] : memref<2x4x64x16xf32, #tpu.memory_space<vmem>>, vector<1x1x64x16xf32>
    %227 = vector.shape_cast %226 : vector<1x1x64x16xf32> to vector<64x16xf32>
    %cst_189 = arith.constant dense<0.000000e+00> : vector<17x16xf32>
    %228 = tpu.matmul %192, %227, %cst_189 {dimension_numbers = #tpu.dot_dimension_numbers<[1], [0], [0], [1], [0, 0, 1, 1], [], []>} : vector<17x64xf32>, vector<64x16xf32>, vector<17x16xf32> -> vector<17x16xf32>
    %cst_190 = arith.constant dense<0.000000e+00> : vector<17x17xf32>
    %229 = tpu.matmul %222, %225, %cst_190 {dimension_numbers = #tpu.dot_dimension_numbers<[1], [1], [0], [0], [0, 0, 1, 0], [], []>} : vector<17x16xf32>, vector<17x16xf32>, vector<17x17xf32> -> vector<17x17xf32>
    %cst_191 = arith.constant 2.500000e-01 : f32
    %230 = vector.broadcast %cst_191 : f32 to vector<17x17xf32>
    %231 = arith.mulf %229, %230 : vector<17x17xf32>
    %cst_192 = arith.constant dense<0xFF800000> : vector<17xf32>
    %232 = vector.multi_reduction <maximumf>, %231, %cst_192 [1] : vector<17x17xf32> to vector<17xf32>
    %233 = vector.shape_cast %232 : vector<17xf32> to vector<17x1xf32>
    %234 = vector.broadcast %233 : vector<17x1xf32> to vector<17x17xf32>
    %235 = arith.subf %231, %234 : vector<17x17xf32>
    %236 = math.exp %235 : vector<17x17xf32>
    %cst_193 = arith.constant dense<0.000000e+00> : vector<17xf32>
    %237 = vector.multi_reduction <add>, %236, %cst_193 [1] : vector<17x17xf32> to vector<17xf32>
    %238 = vector.shape_cast %237 : vector<17xf32> to vector<17x1xf32>
    %239 = vector.broadcast %238 : vector<17x1xf32> to vector<17x17xf32>
    %240 = arith.divf %236, %239 : vector<17x17xf32>
    %cst_194 = arith.constant dense<0.000000e+00> : vector<17x16xf32>
    %241 = tpu.matmul %240, %228, %cst_194 {dimension_numbers = #tpu.dot_dimension_numbers<[1], [0], [0], [1], [0, 0, 1, 1], [], []>} : vector<17x17xf32>, vector<17x16xf32>, vector<17x16xf32> -> vector<17x16xf32>
    %c1_195 = arith.constant 1 : index
    %c1_196 = arith.constant 1 : index
    %c0_197 = arith.constant 0 : index
    %c0_198 = arith.constant 0 : index
    %242 = vector.load %arg9[%c1_195, %c1_196, %c0_197, %c0_198] : memref<2x4x16x64xf32, #tpu.memory_space<vmem>>, vector<1x1x16x64xf32>
    %243 = vector.shape_cast %242 : vector<1x1x16x64xf32> to vector<16x64xf32>
    %cst_199 = arith.constant dense<0.000000e+00> : vector<17x64xf32>
    %244 = tpu.matmul %241, %243, %cst_199 {dimension_numbers = #tpu.dot_dimension_numbers<[1], [0], [0], [1], [0, 0, 1, 1], [], []>} : vector<17x16xf32>, vector<16x64xf32>, vector<17x64xf32> -> vector<17x64xf32>
    %245 = arith.addf %219, %244 : vector<17x64xf32>
    %c1_200 = arith.constant 1 : index
    %c2_201 = arith.constant 2 : index
    %c0_202 = arith.constant 0 : index
    %c0_203 = arith.constant 0 : index
    %246 = vector.load %arg6[%c1_200, %c2_201, %c0_202, %c0_203] : memref<2x4x64x16xf32, #tpu.memory_space<vmem>>, vector<1x1x64x16xf32>
    %247 = vector.shape_cast %246 : vector<1x1x64x16xf32> to vector<64x16xf32>
    %cst_204 = arith.constant dense<0.000000e+00> : vector<17x16xf32>
    %248 = tpu.matmul %192, %247, %cst_204 {dimension_numbers = #tpu.dot_dimension_numbers<[1], [0], [0], [1], [0, 0, 1, 1], [], []>} : vector<17x64xf32>, vector<64x16xf32>, vector<17x16xf32> -> vector<17x16xf32>
    %c1_205 = arith.constant 1 : index
    %c2_206 = arith.constant 2 : index
    %c0_207 = arith.constant 0 : index
    %c0_208 = arith.constant 0 : index
    %249 = vector.load %arg7[%c1_205, %c2_206, %c0_207, %c0_208] : memref<2x4x64x16xf32, #tpu.memory_space<vmem>>, vector<1x1x64x16xf32>
    %250 = vector.shape_cast %249 : vector<1x1x64x16xf32> to vector<64x16xf32>
    %cst_209 = arith.constant dense<0.000000e+00> : vector<17x16xf32>
    %251 = tpu.matmul %192, %250, %cst_209 {dimension_numbers = #tpu.dot_dimension_numbers<[1], [0], [0], [1], [0, 0, 1, 1], [], []>} : vector<17x64xf32>, vector<64x16xf32>, vector<17x16xf32> -> vector<17x16xf32>
    %c1_210 = arith.constant 1 : index
    %c2_211 = arith.constant 2 : index
    %c0_212 = arith.constant 0 : index
    %c0_213 = arith.constant 0 : index
    %252 = vector.load %arg8[%c1_210, %c2_211, %c0_212, %c0_213] : memref<2x4x64x16xf32, #tpu.memory_space<vmem>>, vector<1x1x64x16xf32>
    %253 = vector.shape_cast %252 : vector<1x1x64x16xf32> to vector<64x16xf32>
    %cst_214 = arith.constant dense<0.000000e+00> : vector<17x16xf32>
    %254 = tpu.matmul %192, %253, %cst_214 {dimension_numbers = #tpu.dot_dimension_numbers<[1], [0], [0], [1], [0, 0, 1, 1], [], []>} : vector<17x64xf32>, vector<64x16xf32>, vector<17x16xf32> -> vector<17x16xf32>
    %cst_215 = arith.constant dense<0.000000e+00> : vector<17x17xf32>
    %255 = tpu.matmul %248, %251, %cst_215 {dimension_numbers = #tpu.dot_dimension_numbers<[1], [1], [0], [0], [0, 0, 1, 0], [], []>} : vector<17x16xf32>, vector<17x16xf32>, vector<17x17xf32> -> vector<17x17xf32>
    %cst_216 = arith.constant 2.500000e-01 : f32
    %256 = vector.broadcast %cst_216 : f32 to vector<17x17xf32>
    %257 = arith.mulf %255, %256 : vector<17x17xf32>
    %cst_217 = arith.constant dense<0xFF800000> : vector<17xf32>
    %258 = vector.multi_reduction <maximumf>, %257, %cst_217 [1] : vector<17x17xf32> to vector<17xf32>
    %259 = vector.shape_cast %258 : vector<17xf32> to vector<17x1xf32>
    %260 = vector.broadcast %259 : vector<17x1xf32> to vector<17x17xf32>
    %261 = arith.subf %257, %260 : vector<17x17xf32>
    %262 = math.exp %261 : vector<17x17xf32>
    %cst_218 = arith.constant dense<0.000000e+00> : vector<17xf32>
    %263 = vector.multi_reduction <add>, %262, %cst_218 [1] : vector<17x17xf32> to vector<17xf32>
    %264 = vector.shape_cast %263 : vector<17xf32> to vector<17x1xf32>
    %265 = vector.broadcast %264 : vector<17x1xf32> to vector<17x17xf32>
    %266 = arith.divf %262, %265 : vector<17x17xf32>
    %cst_219 = arith.constant dense<0.000000e+00> : vector<17x16xf32>
    %267 = tpu.matmul %266, %254, %cst_219 {dimension_numbers = #tpu.dot_dimension_numbers<[1], [0], [0], [1], [0, 0, 1, 1], [], []>} : vector<17x17xf32>, vector<17x16xf32>, vector<17x16xf32> -> vector<17x16xf32>
    %c1_220 = arith.constant 1 : index
    %c2_221 = arith.constant 2 : index
    %c0_222 = arith.constant 0 : index
    %c0_223 = arith.constant 0 : index
    %268 = vector.load %arg9[%c1_220, %c2_221, %c0_222, %c0_223] : memref<2x4x16x64xf32, #tpu.memory_space<vmem>>, vector<1x1x16x64xf32>
    %269 = vector.shape_cast %268 : vector<1x1x16x64xf32> to vector<16x64xf32>
    %cst_224 = arith.constant dense<0.000000e+00> : vector<17x64xf32>
    %270 = tpu.matmul %267, %269, %cst_224 {dimension_numbers = #tpu.dot_dimension_numbers<[1], [0], [0], [1], [0, 0, 1, 1], [], []>} : vector<17x16xf32>, vector<16x64xf32>, vector<17x64xf32> -> vector<17x64xf32>
    %271 = arith.addf %245, %270 : vector<17x64xf32>
    %c1_225 = arith.constant 1 : index
    %c3_226 = arith.constant 3 : index
    %c0_227 = arith.constant 0 : index
    %c0_228 = arith.constant 0 : index
    %272 = vector.load %arg6[%c1_225, %c3_226, %c0_227, %c0_228] : memref<2x4x64x16xf32, #tpu.memory_space<vmem>>, vector<1x1x64x16xf32>
    %273 = vector.shape_cast %272 : vector<1x1x64x16xf32> to vector<64x16xf32>
    %cst_229 = arith.constant dense<0.000000e+00> : vector<17x16xf32>
    %274 = tpu.matmul %192, %273, %cst_229 {dimension_numbers = #tpu.dot_dimension_numbers<[1], [0], [0], [1], [0, 0, 1, 1], [], []>} : vector<17x64xf32>, vector<64x16xf32>, vector<17x16xf32> -> vector<17x16xf32>
    %c1_230 = arith.constant 1 : index
    %c3_231 = arith.constant 3 : index
    %c0_232 = arith.constant 0 : index
    %c0_233 = arith.constant 0 : index
    %275 = vector.load %arg7[%c1_230, %c3_231, %c0_232, %c0_233] : memref<2x4x64x16xf32, #tpu.memory_space<vmem>>, vector<1x1x64x16xf32>
    %276 = vector.shape_cast %275 : vector<1x1x64x16xf32> to vector<64x16xf32>
    %cst_234 = arith.constant dense<0.000000e+00> : vector<17x16xf32>
    %277 = tpu.matmul %192, %276, %cst_234 {dimension_numbers = #tpu.dot_dimension_numbers<[1], [0], [0], [1], [0, 0, 1, 1], [], []>} : vector<17x64xf32>, vector<64x16xf32>, vector<17x16xf32> -> vector<17x16xf32>
    %c1_235 = arith.constant 1 : index
    %c3_236 = arith.constant 3 : index
    %c0_237 = arith.constant 0 : index
    %c0_238 = arith.constant 0 : index
    %278 = vector.load %arg8[%c1_235, %c3_236, %c0_237, %c0_238] : memref<2x4x64x16xf32, #tpu.memory_space<vmem>>, vector<1x1x64x16xf32>
    %279 = vector.shape_cast %278 : vector<1x1x64x16xf32> to vector<64x16xf32>
    %cst_239 = arith.constant dense<0.000000e+00> : vector<17x16xf32>
    %280 = tpu.matmul %192, %279, %cst_239 {dimension_numbers = #tpu.dot_dimension_numbers<[1], [0], [0], [1], [0, 0, 1, 1], [], []>} : vector<17x64xf32>, vector<64x16xf32>, vector<17x16xf32> -> vector<17x16xf32>
    %cst_240 = arith.constant dense<0.000000e+00> : vector<17x17xf32>
    %281 = tpu.matmul %274, %277, %cst_240 {dimension_numbers = #tpu.dot_dimension_numbers<[1], [1], [0], [0], [0, 0, 1, 0], [], []>} : vector<17x16xf32>, vector<17x16xf32>, vector<17x17xf32> -> vector<17x17xf32>
    %cst_241 = arith.constant 2.500000e-01 : f32
    %282 = vector.broadcast %cst_241 : f32 to vector<17x17xf32>
    %283 = arith.mulf %281, %282 : vector<17x17xf32>
    %cst_242 = arith.constant dense<0xFF800000> : vector<17xf32>
    %284 = vector.multi_reduction <maximumf>, %283, %cst_242 [1] : vector<17x17xf32> to vector<17xf32>
    %285 = vector.shape_cast %284 : vector<17xf32> to vector<17x1xf32>
    %286 = vector.broadcast %285 : vector<17x1xf32> to vector<17x17xf32>
    %287 = arith.subf %283, %286 : vector<17x17xf32>
    %288 = math.exp %287 : vector<17x17xf32>
    %cst_243 = arith.constant dense<0.000000e+00> : vector<17xf32>
    %289 = vector.multi_reduction <add>, %288, %cst_243 [1] : vector<17x17xf32> to vector<17xf32>
    %290 = vector.shape_cast %289 : vector<17xf32> to vector<17x1xf32>
    %291 = vector.broadcast %290 : vector<17x1xf32> to vector<17x17xf32>
    %292 = arith.divf %288, %291 : vector<17x17xf32>
    %cst_244 = arith.constant dense<0.000000e+00> : vector<17x16xf32>
    %293 = tpu.matmul %292, %280, %cst_244 {dimension_numbers = #tpu.dot_dimension_numbers<[1], [0], [0], [1], [0, 0, 1, 1], [], []>} : vector<17x17xf32>, vector<17x16xf32>, vector<17x16xf32> -> vector<17x16xf32>
    %c1_245 = arith.constant 1 : index
    %c3_246 = arith.constant 3 : index
    %c0_247 = arith.constant 0 : index
    %c0_248 = arith.constant 0 : index
    %294 = vector.load %arg9[%c1_245, %c3_246, %c0_247, %c0_248] : memref<2x4x16x64xf32, #tpu.memory_space<vmem>>, vector<1x1x16x64xf32>
    %295 = vector.shape_cast %294 : vector<1x1x16x64xf32> to vector<16x64xf32>
    %cst_249 = arith.constant dense<0.000000e+00> : vector<17x64xf32>
    %296 = tpu.matmul %293, %295, %cst_249 {dimension_numbers = #tpu.dot_dimension_numbers<[1], [0], [0], [1], [0, 0, 1, 1], [], []>} : vector<17x16xf32>, vector<16x64xf32>, vector<17x64xf32> -> vector<17x64xf32>
    %297 = arith.addf %271, %296 : vector<17x64xf32>
    %298 = arith.addf %192, %297 : vector<17x64xf32>
    %c1_250 = arith.constant 1 : index
    %c0_251 = arith.constant 0 : index
    %c0_252 = arith.constant 0 : index
    %299 = vector.load %arg10[%c1_250, %c0_251, %c0_252] : memref<2x1x64xf32, #tpu.memory_space<vmem>>, vector<1x1x64xf32>
    %300 = vector.shape_cast %299 : vector<1x1x64xf32> to vector<1x64xf32>
    %c1_253 = arith.constant 1 : index
    %c0_254 = arith.constant 0 : index
    %c0_255 = arith.constant 0 : index
    %301 = vector.load %arg11[%c1_253, %c0_254, %c0_255] : memref<2x1x64xf32, #tpu.memory_space<vmem>>, vector<1x1x64xf32>
    %302 = vector.shape_cast %301 : vector<1x1x64xf32> to vector<1x64xf32>
    %cst_256 = arith.constant dense<0.000000e+00> : vector<17xf32>
    %303 = vector.multi_reduction <add>, %298, %cst_256 [1] : vector<17x64xf32> to vector<17xf32>
    %304 = vector.shape_cast %303 : vector<17xf32> to vector<17x1xf32>
    %cst_257 = arith.constant 6.400000e+01 : f32
    %305 = vector.broadcast %cst_257 : f32 to vector<17x1xf32>
    %306 = arith.divf %304, %305 : vector<17x1xf32>
    %307 = vector.broadcast %306 : vector<17x1xf32> to vector<17x64xf32>
    %308 = arith.subf %298, %307 : vector<17x64xf32>
    %309 = arith.mulf %308, %308 : vector<17x64xf32>
    %cst_258 = arith.constant dense<0.000000e+00> : vector<17xf32>
    %310 = vector.multi_reduction <add>, %309, %cst_258 [1] : vector<17x64xf32> to vector<17xf32>
    %311 = vector.shape_cast %310 : vector<17xf32> to vector<17x1xf32>
    %cst_259 = arith.constant 6.400000e+01 : f32
    %312 = vector.broadcast %cst_259 : f32 to vector<17x1xf32>
    %313 = arith.divf %311, %312 : vector<17x1xf32>
    %cst_260 = arith.constant 9.99999974E-6 : f32
    %314 = vector.broadcast %cst_260 : f32 to vector<17x1xf32>
    %315 = arith.addf %313, %314 : vector<17x1xf32>
    %316 = math.rsqrt %315 : vector<17x1xf32>
    %317 = vector.broadcast %316 : vector<17x1xf32> to vector<17x64xf32>
    %318 = arith.mulf %308, %317 : vector<17x64xf32>
    %319 = vector.broadcast %300 : vector<1x64xf32> to vector<17x64xf32>
    %320 = arith.mulf %318, %319 : vector<17x64xf32>
    %321 = vector.broadcast %302 : vector<1x64xf32> to vector<17x64xf32>
    %322 = arith.addf %320, %321 : vector<17x64xf32>
    %c1_261 = arith.constant 1 : index
    %c0_262 = arith.constant 0 : index
    %c0_263 = arith.constant 0 : index
    %323 = vector.load %arg12[%c1_261, %c0_262, %c0_263] : memref<2x64x32xf32, #tpu.memory_space<vmem>>, vector<1x64x32xf32>
    %324 = vector.shape_cast %323 : vector<1x64x32xf32> to vector<64x32xf32>
    %cst_264 = arith.constant dense<0.000000e+00> : vector<17x32xf32>
    %325 = tpu.matmul %322, %324, %cst_264 {dimension_numbers = #tpu.dot_dimension_numbers<[1], [0], [0], [1], [0, 0, 1, 1], [], []>} : vector<17x64xf32>, vector<64x32xf32>, vector<17x32xf32> -> vector<17x32xf32>
    %c1_265 = arith.constant 1 : index
    %c0_266 = arith.constant 0 : index
    %c0_267 = arith.constant 0 : index
    %326 = vector.load %arg13[%c1_265, %c0_266, %c0_267] : memref<2x1x32xf32, #tpu.memory_space<vmem>>, vector<1x1x32xf32>
    %327 = vector.shape_cast %326 : vector<1x1x32xf32> to vector<1x32xf32>
    %328 = vector.broadcast %327 : vector<1x32xf32> to vector<17x32xf32>
    %329 = arith.addf %325, %328 : vector<17x32xf32>
    %cst_268 = arith.constant 5.000000e-01 : f32
    %330 = vector.broadcast %cst_268 : f32 to vector<17x32xf32>
    %331 = arith.mulf %330, %329 : vector<17x32xf32>
    %cst_269 = arith.constant 4.471500e-02 : f32
    %332 = vector.broadcast %cst_269 : f32 to vector<17x32xf32>
    %333 = arith.mulf %332, %329 : vector<17x32xf32>
    %334 = arith.mulf %333, %329 : vector<17x32xf32>
    %335 = arith.mulf %334, %329 : vector<17x32xf32>
    %336 = arith.addf %329, %335 : vector<17x32xf32>
    %cst_270 = arith.constant 0.797884583 : f32
    %337 = vector.broadcast %cst_270 : f32 to vector<17x32xf32>
    %338 = arith.mulf %337, %336 : vector<17x32xf32>
    %339 = math.tanh %338 : vector<17x32xf32>
    %cst_271 = arith.constant 1.000000e+00 : f32
    %340 = vector.broadcast %cst_271 : f32 to vector<17x32xf32>
    %341 = arith.addf %340, %339 : vector<17x32xf32>
    %342 = arith.mulf %331, %341 : vector<17x32xf32>
    %c1_272 = arith.constant 1 : index
    %c0_273 = arith.constant 0 : index
    %c0_274 = arith.constant 0 : index
    %343 = vector.load %arg14[%c1_272, %c0_273, %c0_274] : memref<2x32x64xf32, #tpu.memory_space<vmem>>, vector<1x32x64xf32>
    %344 = vector.shape_cast %343 : vector<1x32x64xf32> to vector<32x64xf32>
    %cst_275 = arith.constant dense<0.000000e+00> : vector<17x64xf32>
    %345 = tpu.matmul %342, %344, %cst_275 {dimension_numbers = #tpu.dot_dimension_numbers<[1], [0], [0], [1], [0, 0, 1, 1], [], []>} : vector<17x32xf32>, vector<32x64xf32>, vector<17x64xf32> -> vector<17x64xf32>
    %c1_276 = arith.constant 1 : index
    %c0_277 = arith.constant 0 : index
    %c0_278 = arith.constant 0 : index
    %346 = vector.load %arg15[%c1_276, %c0_277, %c0_278] : memref<2x1x64xf32, #tpu.memory_space<vmem>>, vector<1x1x64xf32>
    %347 = vector.shape_cast %346 : vector<1x1x64xf32> to vector<1x64xf32>
    %348 = vector.broadcast %347 : vector<1x64xf32> to vector<17x64xf32>
    %349 = arith.addf %345, %348 : vector<17x64xf32>
    %350 = arith.addf %322, %349 : vector<17x64xf32>
    %c1_279 = arith.constant 1 : index
    %c0_280 = arith.constant 0 : index
    %c0_281 = arith.constant 0 : index
    %351 = vector.load %arg16[%c1_279, %c0_280, %c0_281] : memref<2x1x64xf32, #tpu.memory_space<vmem>>, vector<1x1x64xf32>
    %352 = vector.shape_cast %351 : vector<1x1x64xf32> to vector<1x64xf32>
    %c1_282 = arith.constant 1 : index
    %c0_283 = arith.constant 0 : index
    %c0_284 = arith.constant 0 : index
    %353 = vector.load %arg17[%c1_282, %c0_283, %c0_284] : memref<2x1x64xf32, #tpu.memory_space<vmem>>, vector<1x1x64xf32>
    %354 = vector.shape_cast %353 : vector<1x1x64xf32> to vector<1x64xf32>
    %cst_285 = arith.constant dense<0.000000e+00> : vector<17xf32>
    %355 = vector.multi_reduction <add>, %350, %cst_285 [1] : vector<17x64xf32> to vector<17xf32>
    %356 = vector.shape_cast %355 : vector<17xf32> to vector<17x1xf32>
    %cst_286 = arith.constant 6.400000e+01 : f32
    %357 = vector.broadcast %cst_286 : f32 to vector<17x1xf32>
    %358 = arith.divf %356, %357 : vector<17x1xf32>
    %359 = vector.broadcast %358 : vector<17x1xf32> to vector<17x64xf32>
    %360 = arith.subf %350, %359 : vector<17x64xf32>
    %361 = arith.mulf %360, %360 : vector<17x64xf32>
    %cst_287 = arith.constant dense<0.000000e+00> : vector<17xf32>
    %362 = vector.multi_reduction <add>, %361, %cst_287 [1] : vector<17x64xf32> to vector<17xf32>
    %363 = vector.shape_cast %362 : vector<17xf32> to vector<17x1xf32>
    %cst_288 = arith.constant 6.400000e+01 : f32
    %364 = vector.broadcast %cst_288 : f32 to vector<17x1xf32>
    %365 = arith.divf %363, %364 : vector<17x1xf32>
    %cst_289 = arith.constant 9.99999974E-6 : f32
    %366 = vector.broadcast %cst_289 : f32 to vector<17x1xf32>
    %367 = arith.addf %365, %366 : vector<17x1xf32>
    %368 = math.rsqrt %367 : vector<17x1xf32>
    %369 = vector.broadcast %368 : vector<17x1xf32> to vector<17x64xf32>
    %370 = arith.mulf %360, %369 : vector<17x64xf32>
    %371 = vector.broadcast %352 : vector<1x64xf32> to vector<17x64xf32>
    %372 = arith.mulf %370, %371 : vector<17x64xf32>
    %373 = vector.broadcast %354 : vector<1x64xf32> to vector<17x64xf32>
    %374 = arith.addf %372, %373 : vector<17x64xf32>
    %375 = vector.extract_strided_slice %374 {offsets = [1, 0], sizes = [16, 64], strides = [1, 1]} : vector<17x64xf32> to vector<16x64xf32>
    %c0_290 = arith.constant 0 : index
    %c0_291 = arith.constant 0 : index
    %c0_292 = arith.constant 0 : index
    %376 = vector.load %arg18[%c0_290, %c0_291, %c0_292] : memref<1x16x64xf32, #tpu.memory_space<vmem>>, vector<1x16x64xf32>
    %377 = vector.shape_cast %376 : vector<1x16x64xf32> to vector<16x64xf32>
    %378 = vector.shape_cast %375 : vector<16x64xf32> to vector<1x16x64xf32>
    tpu.vector_store %arg18[%c0_290, %c0_291, %c0_292], %378 {strides = array<i32>} : memref<1x16x64xf32, #tpu.memory_space<vmem>>, vector<1x16x64xf32>,
    return
  }
  func.func @transform_0(%arg0: i32) -> (i32, i32, i32) {
    %c0_i32 = arith.constant 0 : i32
    %c0_i32_0 = arith.constant 0 : i32
    %c0_i32_1 = arith.constant 0 : i32
    return %arg0, %c0_i32, %c0_i32_0 : i32, i32, i32
  }
  func.func @transform_1(%arg0: i32) -> (i32, i32) {
    %c0_i32 = arith.constant 0 : i32
    %c0_i32_0 = arith.constant 0 : i32
    %c0_i32_1 = arith.constant 0 : i32
    return %c0_i32, %c0_i32_0 : i32, i32
  }
  func.func @transform_2(%arg0: i32) -> (i32, i32) {
    %c0_i32 = arith.constant 0 : i32
    %c0_i32_0 = arith.constant 0 : i32
    %c0_i32_1 = arith.constant 0 : i32
    return %c0_i32, %c0_i32_0 : i32, i32
  }
  func.func @transform_3(%arg0: i32) -> (i32, i32) {
    %c0_i32 = arith.constant 0 : i32
    %c0_i32_0 = arith.constant 0 : i32
    %c0_i32_1 = arith.constant 0 : i32
    return %c0_i32, %c0_i32_0 : i32, i32
  }
  func.func @transform_4(%arg0: i32) -> (i32, i32) {
    %c0_i32 = arith.constant 0 : i32
    %c0_i32_0 = arith.constant 0 : i32
    %c0_i32_1 = arith.constant 0 : i32
    return %c0_i32, %c0_i32_0 : i32, i32
  }
  func.func @transform_5(%arg0: i32) -> (i32, i32, i32, i32) {
    %c0_i32 = arith.constant 0 : i32
    %c0_i32_0 = arith.constant 0 : i32
    %c0_i32_1 = arith.constant 0 : i32
    %c0_i32_2 = arith.constant 0 : i32
    %c0_i32_3 = arith.constant 0 : i32
    return %c0_i32, %c0_i32_0, %c0_i32_1, %c0_i32_2 : i32, i32, i32, i32
  }
  func.func @transform_6(%arg0: i32) -> (i32, i32, i32, i32) {
    %c0_i32 = arith.constant 0 : i32
    %c0_i32_0 = arith.constant 0 : i32
    %c0_i32_1 = arith.constant 0 : i32
    %c0_i32_2 = arith.constant 0 : i32
    %c0_i32_3 = arith.constant 0 : i32
    return %c0_i32, %c0_i32_0, %c0_i32_1, %c0_i32_2 : i32, i32, i32, i32
  }
  func.func @transform_7(%arg0: i32) -> (i32, i32, i32, i32) {
    %c0_i32 = arith.constant 0 : i32
    %c0_i32_0 = arith.constant 0 : i32
    %c0_i32_1 = arith.constant 0 : i32
    %c0_i32_2 = arith.constant 0 : i32
    %c0_i32_3 = arith.constant 0 : i32
    return %c0_i32, %c0_i32_0, %c0_i32_1, %c0_i32_2 : i32, i32, i32, i32
  }
  func.func @transform_8(%arg0: i32) -> (i32, i32, i32, i32) {
    %c0_i32 = arith.constant 0 : i32
    %c0_i32_0 = arith.constant 0 : i32
    %c0_i32_1 = arith.constant 0 : i32
    %c0_i32_2 = arith.constant 0 : i32
    %c0_i32_3 = arith.constant 0 : i32
    return %c0_i32, %c0_i32_0, %c0_i32_1, %c0_i32_2 : i32, i32, i32, i32
  }
  func.func @transform_9(%arg0: i32) -> (i32, i32, i32) {
    %c0_i32 = arith.constant 0 : i32
    %c0_i32_0 = arith.constant 0 : i32
    %c0_i32_1 = arith.constant 0 : i32
    %c0_i32_2 = arith.constant 0 : i32
    return %c0_i32, %c0_i32_0, %c0_i32_1 : i32, i32, i32
  }
  func.func @transform_10(%arg0: i32) -> (i32, i32, i32) {
    %c0_i32 = arith.constant 0 : i32
    %c0_i32_0 = arith.constant 0 : i32
    %c0_i32_1 = arith.constant 0 : i32
    %c0_i32_2 = arith.constant 0 : i32
    return %c0_i32, %c0_i32_0, %c0_i32_1 : i32, i32, i32
  }
  func.func @transform_11(%arg0: i32) -> (i32, i32, i32) {
    %c0_i32 = arith.constant 0 : i32
    %c0_i32_0 = arith.constant 0 : i32
    %c0_i32_1 = arith.constant 0 : i32
    %c0_i32_2 = arith.constant 0 : i32
    return %c0_i32, %c0_i32_0, %c0_i32_1 : i32, i32, i32
  }
  func.func @transform_12(%arg0: i32) -> (i32, i32, i32) {
    %c0_i32 = arith.constant 0 : i32
    %c0_i32_0 = arith.constant 0 : i32
    %c0_i32_1 = arith.constant 0 : i32
    %c0_i32_2 = arith.constant 0 : i32
    return %c0_i32, %c0_i32_0, %c0_i32_1 : i32, i32, i32
  }
  func.func @transform_13(%arg0: i32) -> (i32, i32, i32) {
    %c0_i32 = arith.constant 0 : i32
    %c0_i32_0 = arith.constant 0 : i32
    %c0_i32_1 = arith.constant 0 : i32
    %c0_i32_2 = arith.constant 0 : i32
    return %c0_i32, %c0_i32_0, %c0_i32_1 : i32, i32, i32
  }
  func.func @transform_14(%arg0: i32) -> (i32, i32, i32) {
    %c0_i32 = arith.constant 0 : i32
    %c0_i32_0 = arith.constant 0 : i32
    %c0_i32_1 = arith.constant 0 : i32
    %c0_i32_2 = arith.constant 0 : i32
    return %c0_i32, %c0_i32_0, %c0_i32_1 : i32, i32, i32
  }
  func.func @transform_15(%arg0: i32) -> (i32, i32, i32) {
    %c0_i32 = arith.constant 0 : i32
    %c0_i32_0 = arith.constant 0 : i32
    %c0_i32_1 = arith.constant 0 : i32
    %c0_i32_2 = arith.constant 0 : i32
    return %c0_i32, %c0_i32_0, %c0_i32_1 : i32, i32, i32
  }
  func.func @transform_16(%arg0: i32) -> (i32, i32, i32) {
    %c0_i32 = arith.constant 0 : i32
    %c0_i32_0 = arith.constant 0 : i32
    %c0_i32_1 = arith.constant 0 : i32
    %c0_i32_2 = arith.constant 0 : i32
    return %c0_i32, %c0_i32_0, %c0_i32_1 : i32, i32, i32
  }
  func.func @transform_17(%arg0: i32) -> (i32, i32, i32) {
    %c0_i32 = arith.constant 0 : i32
    %c0_i32_0 = arith.constant 0 : i32
    %c0_i32_1 = arith.constant 0 : i32
    return %arg0, %c0_i32, %c0_i32_0 : i32, i32, i32
  }
}

module attributes {stable_mosaic.version = 11 : i64} {
  func.func @kernel(%arg0: i32, %arg1: memref<1x16x576xf32, #tpu.memory_space<vmem>>, %arg2: memref<576x512xf32, #tpu.memory_space<vmem>>, %arg3: memref<2x512xf32, #tpu.memory_space<vmem>>, %arg4: memref<1x16x512xf32, #tpu.memory_space<vmem>>) attributes {dimension_semantics = [#tpu.dimension_semantics<parallel>], iteration_bounds = array<i64: 2>, scalar_prefetch = 0 : i64, scratch_operands = 0 : i64, tpu.core_type = #tpu.core_type<tc>, window_params = [{transform_indices = @transform_0, window_bounds = array<i64: 1, 16, 576>}, {pipeline_mode = #tpu.pipeline_mode<synchronous>, transform_indices = @transform_1, window_bounds = array<i64: 576, 512>}, {pipeline_mode = #tpu.pipeline_mode<synchronous>, transform_indices = @transform_2, window_bounds = array<i64: 2, 512>}, {transform_indices = @transform_3, window_bounds = array<i64: 1, 16, 512>}]} {
    %c0 = arith.constant 0 : index
    %c0_0 = arith.constant 0 : index
    %0 = vector.load %arg3[%c0, %c0_0] : memref<2x512xf32, #tpu.memory_space<vmem>>, vector<1x512xf32>
    %c1 = arith.constant 1 : index
    %c0_1 = arith.constant 0 : index
    %1 = vector.load %arg3[%c1, %c0_1] : memref<2x512xf32, #tpu.memory_space<vmem>>, vector<1x512xf32>
    %c0_2 = arith.constant 0 : index
    %c0_3 = arith.constant 0 : index
    %c0_4 = arith.constant 0 : index
    %2 = vector.load %arg1[%c0_2, %c0_3, %c0_4] : memref<1x16x576xf32, #tpu.memory_space<vmem>>, vector<1x16x576xf32>
    %3 = vector.shape_cast %2 : vector<1x16x576xf32> to vector<16x576xf32>
    %c0_5 = arith.constant 0 : index
    %c0_6 = arith.constant 0 : index
    %4 = vector.load %arg2[%c0_5, %c0_6] : memref<576x512xf32, #tpu.memory_space<vmem>>, vector<576x512xf32>
    %cst = arith.constant dense<0.000000e+00> : vector<16x512xf32>
    %5 = tpu.matmul %3, %4, %cst {dimension_numbers = #tpu.dot_dimension_numbers<[1], [0], [0], [1], [0, 0, 1, 1], [], []>} : vector<16x576xf32>, vector<576x512xf32>, vector<16x512xf32> -> vector<16x512xf32>
    %6 = vector.broadcast %0 : vector<1x512xf32> to vector<16x512xf32>
    %7 = arith.mulf %5, %6 : vector<16x512xf32>
    %8 = vector.broadcast %1 : vector<1x512xf32> to vector<16x512xf32>
    %9 = arith.addf %7, %8 : vector<16x512xf32>
    %cst_7 = arith.constant 0.000000e+00 : f32
    %10 = vector.broadcast %cst_7 : f32 to vector<16x512xf32>
    %11 = arith.maximumf %9, %10 : vector<16x512xf32>
    %c0_8 = arith.constant 0 : index
    %c0_9 = arith.constant 0 : index
    %c0_10 = arith.constant 0 : index
    %12 = vector.load %arg4[%c0_8, %c0_9, %c0_10] : memref<1x16x512xf32, #tpu.memory_space<vmem>>, vector<1x16x512xf32>
    %13 = vector.shape_cast %12 : vector<1x16x512xf32> to vector<16x512xf32>
    %14 = vector.shape_cast %11 : vector<16x512xf32> to vector<1x16x512xf32>
    tpu.vector_store %arg4[%c0_8, %c0_9, %c0_10], %14 {strides = array<i32>} : memref<1x16x512xf32, #tpu.memory_space<vmem>>, vector<1x16x512xf32>,
    return
  }
  func.func @transform_0(%arg0: i32) -> (i32, i32, i32) {
    %c0_i32 = arith.constant 0 : i32
    %c0_i32_0 = arith.constant 0 : i32
    %c0_i32_1 = arith.constant 0 : i32
    return %arg0, %c0_i32, %c0_i32_0 : i32, i32, i32
  }
  func.func @transform_1(%arg0: i32) -> (i32, i32) {
    %c0_i32 = arith.constant 0 : i32
    %c0_i32_0 = arith.constant 0 : i32
    %c0_i32_1 = arith.constant 0 : i32
    return %c0_i32, %c0_i32_0 : i32, i32
  }
  func.func @transform_2(%arg0: i32) -> (i32, i32) {
    %c0_i32 = arith.constant 0 : i32
    %c0_i32_0 = arith.constant 0 : i32
    %c0_i32_1 = arith.constant 0 : i32
    return %c0_i32, %c0_i32_0 : i32, i32
  }
  func.func @transform_3(%arg0: i32) -> (i32, i32, i32) {
    %c0_i32 = arith.constant 0 : i32
    %c0_i32_0 = arith.constant 0 : i32
    %c0_i32_1 = arith.constant 0 : i32
    return %arg0, %c0_i32, %c0_i32_0 : i32, i32, i32
  }
}

</mosaic_0001>

<bundles_post_ra>
// kernel: encoder_forward.6
= control target key start
LH: loop header
LB: loop body
LE: loop exit
PB: predicated region body
PF: predicated region fallthrough
CT: control target
= control target key end

     0   :  { %s2918_s12 = smov 0   ;;  %s4299_s0 = inlined_call_operand.vmem [shape: f32[2,1024,147], index: 0, kind: input, shape index: {}]   ;;  %s4300_s1 = inlined_call_operand.vmem [shape: f32[147,8], index: 1, kind: input, shape index: {}]   ;;  %s4301_s2 = inlined_call_operand.vmem [shape: f32[2,8], index: 2, kind: input, shape index: {}]   ;;  %s4302_s3 = inlined_call_operand.vmem [shape: f32[2,1024,8], index: 3, kind: output, shape index: {}]  }
   0x1 LB: > { %s2727_s13 = sadd.s32 4294967295, %s2895_s12   ;;  %p2731_p0 = scmp.ge.s32.totalorder %s2895_s12, 1  ;;  %s2895_s12 = sphi %s2918_s12, %s13_s12  }
   0x2   : > { %p137_p1 = scmp.lt.s32.totalorder %s2895_s12, 3 }
   0x4   : > { %p138_p2 = pnand %p2731_p0, %p137_p1 }
   0x5   : > { %p161_p3 = scmp.lt.s32.totalorder (!%p138_p2), %s2727_s13, 1 }
   0x6   : > { %141 = sbr.rel (%p138_p2) target bundleno = 521 (0x209), region = 32 }
   0xb   : > { %v2929_v0 = vld [vmem:[%s4300_s1 + $0x78] sm:$0xff]  ;;  %v2897_v1 = vmov 0.0   ;;  %v2936_v2 = vld [vmem:[%s4300_s1 + $0x70] sm:$0xff]  ;;  %v2945_v3 = vld [vmem:[%s4300_s1 + $0x68] sm:$0xff]  ;;  %s4304_s13 = smov (!%p161_p3, %s2727_s13), 1  ;;  %vm273_vm0 = vcmask 1042432  }
   0xc   : > { %277 = vmatprep.subr.mxu0 %v2897_v1  ;;  %597 = vmatprep.subr.mxu1 %v2897_v1  ;;  %v2954_v4 = vld [vmem:[%s4300_s1 + $0x60] sm:$0xff]  ;;  %v2963_v5 = vld [vmem:[%s4300_s1 + $0x58] sm:$0xff]  ;;  %v2972_v6 = vld [vmem:[%s4300_s1 + $0x50] sm:$0xff]  ;;  %s2876_s21 = sshll.u32 %s4304_s13, 11  ;;  %vm224_vm1 = vcmask 154624   ;;  %s2877_s26 = sshll.u32 %s4304_s13, 10 }
   0xd   : > { %278 = vmatpush1.msra.mxu0 %v2929_v0  ;;  %598 = vmatpush1.msra.mxu1 %v2929_v0  ;;  %v2981_v7 = vld [vmem:[%s4300_s1 + $0x48] sm:$0xff]  ;;  %v2990_v8 = vld [vmem:[%s4300_s1 + $0x40] sm:$0xff]  ;;  %v2999_v9 = vld [vmem:[%s4300_s1 + $0x38] sm:$0xff]  ;;  %s3086_s28 = scalar_lea.vmem %s4299_s0, %s2876_s21  ;;  %s3648_s4 = scalar_lea.vmem %s4302_s3, %s2877_s26  ;;  %vm478_vm2 = vcmask 64512  }
   0xe   : > { %279 = vmatprep.subr.mxu0 %v2897_v1  ;;  %599 = vmatprep.subr.mxu1 %v2897_v1  ;;  %v3008_v10 = vld [vmem:[%s4300_s1 + $0x30] sm:$0xff]  ;;  %v3017_v11 = vld [vmem:[%s4300_s1 + $0x28] sm:$0xff]  ;;  %v3026_v12 = vld [vmem:[%s4300_s1 + $0x20] sm:$0xff] }
   0xf   : > { %280 = vmatpush1.msra.mxu0 %v2936_v2  ;;  %600 = vmatpush1.msra.mxu1 %v2936_v2  ;;  %v3037_v13 = vld [vmem:[%s4300_s1 + $0x18] sm:$0xff]  ;;  %v3046_v14 = vld [vmem:[%s4300_s1 + $0x10] sm:$0xff]  ;;  %v3059_v15 = vld [vmem:[%s4300_s1 + $0x8] sm:$0xff] }
  0x10   : > { %281 = vmatprep.subr.mxu0 %v2897_v1  ;;  %601 = vmatprep.subr.mxu1 %v2897_v1  ;;  %v3068_v16 = vld [vmem:[%s4300_s1] sm:$0xff]  ;;  %v223_v17 = vld [vmem:[%s4300_s1 + $0x90] sm:$0x7]  ;;  %v3093_v19 = vld [vmem:[%s4300_s1 + $0x88] sm:$0xff] }
  0x11   : > { %282 = vmatpush1.msra.mxu0 %v2945_v3  ;;  %602 = vmatpush1.msra.mxu1 %v2945_v3  ;;  %v545_v18 = vld [vmem:[%s4300_s1 + $0x90] sm:$0x7]  ;;  %v3102_v20 = vld [vmem:[%s4300_s1 + $0x80] sm:$0xff]  ;;  %v174_v21 = vld [vmem:[%s3086_s28 + $0x8] sm:$0xff] }
  0x12   : > { %283 = vmatprep.subr.mxu0 %v2897_v1  ;;  %603 = vmatprep.subr.mxu1 %v2897_v1  ;;  %v496_v22 = vld [vmem:[%s3086_s28 + $0x108] sm:$0xff]  ;;  %v173_v23 = vld [vmem:[%s3086_s28] sm:$0xff]  ;;  %v176_v25 = vld [vmem:[%s3086_s28 + $0x18] sm:$0xff] }
  0x13   : > { %284 = vmatpush1.msra.mxu0 %v2954_v4  ;;  %604 = vmatpush1.msra.mxu1 %v2954_v4  ;;  %v495_v24 = vld [vmem:[%s3086_s28 + $0x100] sm:$0xff]  ;;  %v498_v26 = vld [vmem:[%s3086_s28 + $0x118] sm:$0xff]  ;;  %v175_v27 = vld [vmem:[%s3086_s28 + $0x10] sm:$0xff] }
  0x14   : > { %285 = vmatprep.subr.mxu0 %v2897_v1  ;;  %605 = vmatprep.subr.mxu1 %v2897_v1  ;;  %v497_v28 = vld [vmem:[%s3086_s28 + $0x110] sm:$0xff]  ;;  %v178_v29 = vld [vmem:[%s3086_s28 + $0x28] sm:$0xff]  ;;  %v177_v31 = vld [vmem:[%s3086_s28 + $0x20] sm:$0xff] }
  0x15   : > { %286 = vmatpush1.msra.mxu0 %v2963_v5  ;;  %606 = vmatpush1.msra.mxu1 %v2963_v5  ;;  %v500_v30 = vld [vmem:[%s3086_s28 + $0x128] sm:$0xff]  ;;  %v499_v32 = vld [vmem:[%s3086_s28 + $0x120] sm:$0xff]  ;;  %v180_v33 = vld [vmem:[%s3086_s28 + $0x38] sm:$0xff] }
  0x16   : > { %287 = vmatprep.subr.mxu0 %v2897_v1  ;;  %607 = vmatprep.subr.mxu1 %v2897_v1  ;;  %v502_v34 = vld [vmem:[%s3086_s28 + $0x138] sm:$0xff]  ;;  %v179_v35 = vld [vmem:[%s3086_s28 + $0x30] sm:$0xff]  ;;  %v182_v37 = vld [vmem:[%s3086_s28 + $0x48] sm:$0xff] }
  0x17   : > { %288 = vmatpush1.msra.mxu0 %v2972_v6  ;;  %608 = vmatpush1.msra.mxu1 %v2972_v6  ;;  %v501_v36 = vld [vmem:[%s3086_s28 + $0x130] sm:$0xff]  ;;  %v504_v38 = vld [vmem:[%s3086_s28 + $0x148] sm:$0xff]  ;;  %v181_v39 = vld [vmem:[%s3086_s28 + $0x40] sm:$0xff] }
  0x18   : > { %289 = vmatprep.subr.mxu0 %v2897_v1  ;;  %609 = vmatprep.subr.mxu1 %v2897_v1  ;;  %v503_v40 = vld [vmem:[%s3086_s28 + $0x140] sm:$0xff]  ;;  %v184_v41 = vld [vmem:[%s3086_s28 + $0x58] sm:$0xff]  ;;  %v183_v43 = vld [vmem:[%s3086_s28 + $0x50] sm:$0xff] }
  0x19   : > { %290 = vmatpush1.msra.mxu0 %v2981_v7  ;;  %610 = vmatpush1.msra.mxu1 %v2981_v7  ;;  %v506_v42 = vld [vmem:[%s3086_s28 + $0x158] sm:$0xff]  ;;  %v505_v44 = vld [vmem:[%s3086_s28 + $0x150] sm:$0xff]  ;;  %v186_v45 = vld [vmem:[%s3086_s28 + $0x68] sm:$0xff] }
  0x1a   : > { %291 = vmatprep.subr.mxu0 %v2897_v1  ;;  %611 = vmatprep.subr.mxu1 %v2897_v1  ;;  %v508_v46 = vld [vmem:[%s3086_s28 + $0x168] sm:$0xff]  ;;  %v185_v47 = vld [vmem:[%s3086_s28 + $0x60] sm:$0xff]  ;;  %v188_v49 = vld [vmem:[%s3086_s28 + $0x78] sm:$0xff] }
  0x1b   : > { %292 = vmatpush1.msra.mxu0 %v2990_v8  ;;  %612 = vmatpush1.msra.mxu1 %v2990_v8  ;;  %v507_v48 = vld [vmem:[%s3086_s28 + $0x160] sm:$0xff]  ;;  %v510_v50 = vld [vmem:[%s3086_s28 + $0x178] sm:$0xff]  ;;  %v187_v51 = vld [vmem:[%s3086_s28 + $0x70] sm:$0xff] }
  0x1c   : > { %293 = vmatprep.subr.mxu0 %v2897_v1  ;;  %613 = vmatprep.subr.mxu1 %v2897_v1  ;;  %v509_v52 = vld [vmem:[%s3086_s28 + $0x170] sm:$0xff]  ;;  %v190_v53 = vld [vmem:[%s3086_s28 + $0x88] sm:$0xff]  ;;  %v189_v55 = vld [vmem:[%s3086_s28 + $0x80] sm:$0xff] }
  0x1d   : > { %294 = vmatpush1.msra.mxu0 %v2999_v9  ;;  %614 = vmatpush1.msra.mxu1 %v2999_v9  ;;  %v512_v54 = vld [vmem:[%s3086_s28 + $0x188] sm:$0xff]  ;;  %v511_v56 = vld [vmem:[%s3086_s28 + $0x180] sm:$0xff]  ;;  %v192_v57 = vld [vmem:[%s3086_s28 + $0x98] sm:$0xff] }
  0x1e   : > { %295 = vmatprep.subr.mxu0 %v2897_v1  ;;  %615 = vmatprep.subr.mxu1 %v2897_v1  ;;  %v514_v58 = vld [vmem:[%s3086_s28 + $0x198] sm:$0xff]  ;;  %v191_v59 = vld [vmem:[%s3086_s28 + $0x90] sm:$0xff]  ;;  %v194_v61 = vld [vmem:[%s3086_s28 + $0xa8] sm:$0xff] }
  0x1f   : > { %296 = vmatpush1.msra.mxu0 %v3008_v10  ;;  %616 = vmatpush1.msra.mxu1 %v3008_v10  ;;  %v513_v60 = vld [vmem:[%s3086_s28 + $0x190] sm:$0xff]  ;;  %v516_v62 = vld [vmem:[%s3086_s28 + $0x1a8] sm:$0xff]  ;;  %v193_v63 = vld [vmem:[%s3086_s28 + $0xa0] sm:$0xff] }
  0x20   : > { %297 = vmatprep.subr.mxu0 %v2897_v1  ;;  %617 = vmatprep.subr.mxu1 %v2897_v1 }
  0x21   : > { %298 = vmatpush1.msra.mxu0 %v3017_v11  ;;  %618 = vmatpush1.msra.mxu1 %v3017_v11 }
  0x22   : > { %299 = vmatprep.subr.mxu0 %v2897_v1  ;;  %619 = vmatprep.subr.mxu1 %v2897_v1 }
  0x23   : > { %300 = vmatpush1.msra.mxu0 %v3026_v12  ;;  %620 = vmatpush1.msra.mxu1 %v3026_v12 }
  0x24   : > { %301 = vmatprep.subr.mxu0 %v2897_v1  ;;  %621 = vmatprep.subr.mxu1 %v2897_v1 }
  0x25   : > { %302 = vmatpush1.msra.mxu0 %v3037_v13  ;;  %622 = vmatpush1.msra.mxu1 %v3037_v13 }
  0x26   : > { %303 = vmatprep.subr.mxu0 %v2897_v1  ;;  %623 = vmatprep.subr.mxu1 %v2897_v1 }
  0x27   : > { %304 = vmatpush1.msra.mxu0 %v3046_v14  ;;  %624 = vmatpush1.msra.mxu1 %v3046_v14 }
  0x28   : > { %305 = vmatprep.subr.mxu0 %v2897_v1  ;;  %625 = vmatprep.subr.mxu1 %v2897_v1 }
  0x29   : > { %306 = vmatpush1.msra.mxu0 %v3059_v15  ;;  %626 = vmatpush1.msra.mxu1 %v3059_v15 }
  0x2a   : > { %307 = vmatprep.subr.mxu0 %v2897_v1  ;;  %627 = vmatprep.subr.mxu1 %v2897_v1 }
  0x2b   : > { %308 = vmatpush1.msra.mxu0 %v3068_v16  ;;  %628 = vmatpush1.msra.mxu1 %v3068_v16 }
  0x2c   : > { %335 = vmatprep.subr.mxu0 %v2897_v1  ;;  %655 = vmatprep.subr.mxu1 %v2897_v1 }
  0x2d   : > { %2736 = vmatpush2.msk.msra.mxu0 %vm273_vm0, %v223_v17  ;;  %2755 = vmatpush2.msk.msra.mxu1 %vm273_vm0, %v545_v18  ;;  %v515_v17 = vld [vmem:[%s3086_s28 + $0x1a0] sm:$0xff]  ;;  %v196_v18 = vld [vmem:[%s3086_s28 + $0xb8] sm:$0xff] }
  0x2e   : > { %337 = vmatprep.subr.mxu0 %v2897_v1  ;;  %657 = vmatprep.subr.mxu1 %v2897_v1 }
  0x2f   : > { %338 = vmatpush2.msra.mxu0 %v3093_v19  ;;  %658 = vmatpush2.msra.mxu1 %v3093_v19 }
  0x30   : > { %339 = vmatprep.subr.mxu0 %v2897_v1  ;;  %659 = vmatprep.subr.mxu1 %v2897_v1 }
  0x31   : > { %340 = vmatpush2.msra.mxu0 %v3102_v20  ;;  %2737 = vmatprep.mubr.msk.f32.mxu0 %vm224_vm1, %v174_v21  ;;  %v518_v21 = vld [vmem:[%s3086_s28 + $0x1b8] sm:$0xff] }
  0x32   : > { %660 = vmatpush2.msra.mxu1 %v3102_v20  ;;  %2756 = vmatprep.mubr.msk.f32.mxu1 %vm224_vm1, %v496_v22  ;;  %v195_v22 = vld [vmem:[%s3086_s28 + $0xb0] sm:$0xff] }
  0x33   : > { %342 = vmatmul.mubr.f32.vlgmr.msra.gmra.mxu0 %v173_v23  ;;  %662 = vmatmul.mubr.f32.vlgmr.msra.gmra.mxu1 %v495_v24  ;;  %v517_v23 = vld [vmem:[%s3086_s28 + $0x1b0] sm:$0xff]  ;;  %v198_v24 = vld [vmem:[%s3086_s28 + $0xc8] sm:$0xff] }
  0x34   : > { %908 = vmatprep.subr.mxu0 %v2897_v1  ;;  %1219 = vmatprep.subr.mxu1 %v2897_v1 }
  0x35   : > { %909 = vmatpush1.msra.mxu0 %v2929_v0  ;;  %1220 = vmatpush1.msra.mxu1 %v2929_v0 }
  0x36   : > { %2738 = vmatprep.mubr.msk.f32.mxu0 %vm224_vm1, %v176_v25  ;;  %2757 = vmatprep.mubr.msk.f32.mxu1 %vm224_vm1, %v498_v26  ;;  %v520_v25 = vld [vmem:[%s3086_s28 + $0x1c8] sm:$0xff]  ;;  %v197_v26 = vld [vmem:[%s3086_s28 + $0xc0] sm:$0xff] }
  0x37   : > { %347 = vmatmul.mubr.f32.gmra.mxu0 %v175_v27  ;;  %667 = vmatmul.mubr.f32.gmra.mxu1 %v497_v28  ;;  %v519_v27 = vld [vmem:[%s3086_s28 + $0x1c0] sm:$0xff]  ;;  %v200_v28 = vld [vmem:[%s3086_s28 + $0xd8] sm:$0xff] }
  0x38   : > { %910 = vmatprep.subr.mxu0 %v2897_v1  ;;  %1221 = vmatprep.subr.mxu1 %v2897_v1 }
  0x39   : > { %911 = vmatpush1.msra.mxu0 %v2936_v2  ;;  %1222 = vmatpush1.msra.mxu1 %v2936_v2 }
  0x3a   : > { %2739 = vmatprep.mubr.msk.f32.mxu0 %vm224_vm1, %v178_v29  ;;  %2758 = vmatprep.mubr.msk.f32.mxu1 %vm224_vm1, %v500_v30  ;;  %v522_v29 = vld [vmem:[%s3086_s28 + $0x1d8] sm:$0xff]  ;;  %v199_v30 = vld [vmem:[%s3086_s28 + $0xd0] sm:$0xff] }
  0x3b   : > { %912 = vmatprep.subr.mxu0 %v2897_v1  ;;  %1223 = vmatprep.subr.mxu1 %v2897_v1 }
  0x3c   : > { %352 = vmatmul.mubr.f32.gmra.mxu0 %v177_v31  ;;  %672 = vmatmul.mubr.f32.gmra.mxu1 %v499_v32  ;;  %v521_v31 = vld [vmem:[%s3086_s28 + $0x1d0] sm:$0xff]  ;;  %v202_v32 = vld [vmem:[%s3086_s28 + $0xe8] sm:$0xff] }
  0x3d   : > { %913 = vmatpush1.msra.mxu0 %v2945_v3  ;;  %1224 = vmatpush1.msra.mxu1 %v2945_v3 }
  0x3e   : > { %2740 = vmatprep.mubr.msk.f32.mxu0 %vm224_vm1, %v180_v33  ;;  %2759 = vmatprep.mubr.msk.f32.mxu1 %vm224_vm1, %v502_v34  ;;  %v524_v33 = vld [vmem:[%s3086_s28 + $0x1e8] sm:$0xff]  ;;  %v856_v34 = vld [vmem:[%s4300_s1 + $0x90] sm:$0x7] }
  0x3f   : > { %914 = vmatprep.subr.mxu0 %v2897_v1  ;;  %1225 = vmatprep.subr.mxu1 %v2897_v1 }
  0x40   : > { %357 = vmatmul.mubr.f32.gmra.mxu0 %v179_v35  ;;  %677 = vmatmul.mubr.f32.gmra.mxu1 %v501_v36  ;;  %v1167_v35 = vld [vmem:[%s4300_s1 + $0x90] sm:$0x7]  ;;  %v201_v36 = vld [vmem:[%s3086_s28 + $0xe0] sm:$0xff] }
  0x41   : > { %915 = vmatpush1.msra.mxu0 %v2954_v4  ;;  %1226 = vmatpush1.msra.mxu1 %v2954_v4 }
  0x42   : > { %916 = vmatprep.subr.mxu0 %v2897_v1  ;;  %1227 = vmatprep.subr.mxu1 %v2897_v1 }
  0x43   : > { %2741 = vmatprep.mubr.msk.f32.mxu0 %vm224_vm1, %v182_v37  ;;  %2760 = vmatprep.mubr.msk.f32.mxu1 %vm224_vm1, %v504_v38  ;;  %v523_v37 = vld [vmem:[%s3086_s28 + $0x1e0] sm:$0xff]  ;;  %v204_v38 = vld [vmem:[%s3086_s28 + $0xf8] sm:$0xff] }
  0x44   : > { %917 = vmatpush1.msra.mxu0 %v2963_v5  ;;  %1228 = vmatpush1.msra.mxu1 %v2963_v5 }
  0x45   : > { %362 = vmatmul.mubr.f32.gmra.mxu0 %v181_v39  ;;  %682 = vmatmul.mubr.f32.gmra.mxu1 %v503_v40  ;;  %v526_v39 = vld [vmem:[%s3086_s28 + $0x1f8] sm:$0xff]  ;;  %v203_v40 = vld [vmem:[%s3086_s28 + $0xf0] sm:$0xff] }
  0x46   : > { %918 = vmatprep.subr.mxu0 %v2897_v1  ;;  %1229 = vmatprep.subr.mxu1 %v2897_v1 }
  0x47   : > { %919 = vmatpush1.msra.mxu0 %v2972_v6  ;;  %1230 = vmatpush1.msra.mxu1 %v2972_v6 }
  0x48   : > { %2742 = vmatprep.mubr.msk.f32.mxu0 %vm224_vm1, %v184_v41  ;;  %2761 = vmatprep.mubr.msk.f32.mxu1 %vm224_vm1, %v506_v42  ;;  %v525_v41 = vld [vmem:[%s3086_s28 + $0x1f0] sm:$0xff]  ;;  %v807_v42 = vld [vmem:[%s3086_s28 + $0x208] sm:$0xff] }
  0x49   : > { %367 = vmatmul.mubr.f32.gmra.mxu0 %v183_v43  ;;  %687 = vmatmul.mubr.f32.gmra.mxu1 %v505_v44  ;;  %v1118_v43 = vld [vmem:[%s3086_s28 + $0x308] sm:$0xff]  ;;  %v806_v44 = vld [vmem:[%s3086_s28 + $0x200] sm:$0xff] }
  0x4a   : > { %920 = vmatprep.subr.mxu0 %v2897_v1  ;;  %1231 = vmatprep.subr.mxu1 %v2897_v1 }
  0x4b   : > { %921 = vmatpush1.msra.mxu0 %v2981_v7  ;;  %1232 = vmatpush1.msra.mxu1 %v2981_v7 }
  0x4c   : > { %2743 = vmatprep.mubr.msk.f32.mxu0 %vm224_vm1, %v186_v45  ;;  %2762 = vmatprep.mubr.msk.f32.mxu1 %vm224_vm1, %v508_v46  ;;  %v1117_v45 = vld [vmem:[%s3086_s28 + $0x300] sm:$0xff]  ;;  %v809_v46 = vld [vmem:[%s3086_s28 + $0x218] sm:$0xff] }
  0x4d   : > { %372 = vmatmul.mubr.f32.gmra.mxu0 %v185_v47  ;;  %692 = vmatmul.mubr.f32.gmra.mxu1 %v507_v48  ;;  %v1120_v47 = vld [vmem:[%s3086_s28 + $0x318] sm:$0xff]  ;;  %v808_v48 = vld [vmem:[%s3086_s28 + $0x210] sm:$0xff] }
  0x4e   : > { %922 = vmatprep.subr.mxu0 %v2897_v1  ;;  %1233 = vmatprep.subr.mxu1 %v2897_v1 }
  0x4f   : > { %923 = vmatpush1.msra.mxu0 %v2990_v8  ;;  %1234 = vmatpush1.msra.mxu1 %v2990_v8 }
  0x50   : > { %2744 = vmatprep.mubr.msk.f32.mxu0 %vm224_vm1, %v188_v49  ;;  %2763 = vmatprep.mubr.msk.f32.mxu1 %vm224_vm1, %v510_v50  ;;  %v1119_v49 = vld [vmem:[%s3086_s28 + $0x310] sm:$0xff]  ;;  %v811_v50 = vld [vmem:[%s3086_s28 + $0x228] sm:$0xff] }
  0x51   : > { %924 = vmatprep.subr.mxu0 %v2897_v1  ;;  %1235 = vmatprep.subr.mxu1 %v2897_v1 }
  0x52   : > { %377 = vmatmul.mubr.f32.gmra.mxu0 %v187_v51  ;;  %697 = vmatmul.mubr.f32.gmra.mxu1 %v509_v52  ;;  %v1122_v51 = vld [vmem:[%s3086_s28 + $0x328] sm:$0xff]  ;;  %v1121_v52 = vld [vmem:[%s3086_s28 + $0x320] sm:$0xff] }
  0x53   : > { %925 = vmatpush1.msra.mxu0 %v2999_v9  ;;  %1236 = vmatpush1.msra.mxu1 %v2999_v9 }
  0x54   : > { %2745 = vmatprep.mubr.msk.f32.mxu0 %vm224_vm1, %v190_v53  ;;  %2764 = vmatprep.mubr.msk.f32.mxu1 %vm224_vm1, %v512_v54  ;;  %v813_v53 = vld [vmem:[%s3086_s28 + $0x238] sm:$0xff] }
  0x55   : > { %926 = vmatprep.subr.mxu0 %v2897_v1  ;;  %1237 = vmatprep.subr.mxu1 %v2897_v1  ;;  %v1124_v54 = vld [vmem:[%s3086_s28 + $0x338] sm:$0xff] }
  0x56   : > { %382 = vmatmul.mubr.f32.gmra.mxu0 %v189_v55  ;;  %702 = vmatmul.mubr.f32.gmra.mxu1 %v511_v56  ;;  %v1123_v55 = vld [vmem:[%s3086_s28 + $0x330] sm:$0xff]  ;;  %v815_v56 = vld [vmem:[%s3086_s28 + $0x248] sm:$0xff] }
  0x57   : > { %927 = vmatpush1.msra.mxu0 %v3008_v10  ;;  %1238 = vmatpush1.msra.mxu1 %v3008_v10 }
  0x58   : > { %928 = vmatprep.subr.mxu0 %v2897_v1  ;;  %1239 = vmatprep.subr.mxu1 %v2897_v1 }
  0x59   : > { %2746 = vmatprep.mubr.msk.f32.mxu0 %vm224_vm1, %v192_v57  ;;  %2765 = vmatprep.mubr.msk.f32.mxu1 %vm224_vm1, %v514_v58  ;;  %v1126_v57 = vld [vmem:[%s3086_s28 + $0x348] sm:$0xff]  ;;  %v1125_v58 = vld [vmem:[%s3086_s28 + $0x340] sm:$0xff] }
  0x5a   : > { %929 = vmatpush1.msra.mxu0 %v3017_v11  ;;  %1240 = vmatpush1.msra.mxu1 %v3017_v11 }
  0x5b   : > { %387 = vmatmul.mubr.f32.gmra.mxu0 %v191_v59  ;;  %707 = vmatmul.mubr.f32.gmra.mxu1 %v513_v60  ;;  %v1128_v59 = vld [vmem:[%s3086_s28 + $0x358] sm:$0xff]  ;;  %v816_v60 = vld [vmem:[%s3086_s28 + $0x250] sm:$0xff] }
  0x5c   : > { %930 = vmatprep.subr.mxu0 %v2897_v1  ;;  %1241 = vmatprep.subr.mxu1 %v2897_v1 }
  0x5d   : > { %2747 = vmatprep.mubr.msk.f32.mxu0 %vm224_vm1, %v194_v61  ;;  %2766 = vmatprep.mubr.msk.f32.mxu1 %vm224_vm1, %v516_v62  ;;  %v1127_v61 = vld [vmem:[%s3086_s28 + $0x350] sm:$0xff]  ;;  %v1130_v62 = vld [vmem:[%s3086_s28 + $0x368] sm:$0xff] }
  0x5e   : > { %931 = vmatpush1.msra.mxu0 %v3026_v12  ;;  %1242 = vmatpush1.msra.mxu1 %v3026_v12 }
  0x5f   : > { %392 = vmatmul.mubr.f32.gmra.mxu0 %v193_v63  ;;  %712 = vmatmul.mubr.f32.gmra.mxu1 %v515_v17  ;;  %v818_v63 = vld [vmem:[%s3086_s28 + $0x260] sm:$0xff] }
  0x60   : > { %932 = vmatprep.subr.mxu0 %v2897_v1  ;;  %1243 = vmatprep.subr.mxu1 %v2897_v1  ;;  %v1129_v17 = vld [vmem:[%s3086_s28 + $0x360] sm:$0xff] }
  0x61   : > { %933 = vmatpush1.msra.mxu0 %v3037_v13  ;;  %1244 = vmatpush1.msra.mxu1 %v3037_v13 }
  0x62   : > { %2748 = vmatprep.mubr.msk.f32.mxu0 %vm224_vm1, %v196_v18  ;;  %2767 = vmatprep.mubr.msk.f32.mxu1 %vm224_vm1, %v518_v21  ;;  %v1132_v18 = vld [vmem:[%s3086_s28 + $0x378] sm:$0xff]  ;;  %v1131_v21 = vld [vmem:[%s3086_s28 + $0x370] sm:$0xff] }
  0x63   : > { %397 = vmatmul.mubr.f32.gmra.mxu0 %v195_v22  ;;  %717 = vmatmul.mubr.f32.gmra.mxu1 %v517_v23  ;;  %v823_v22 = vld [vmem:[%s3086_s28 + $0x288] sm:$0xff] }
  0x64   : > { %934 = vmatprep.subr.mxu0 %v2897_v1  ;;  %1245 = vmatprep.subr.mxu1 %v2897_v1  ;;  %v1134_v23 = vld [vmem:[%s3086_s28 + $0x388] sm:$0xff] }
  0x65   : > { %935 = vmatpush1.msra.mxu0 %v3046_v14  ;;  %1246 = vmatpush1.msra.mxu1 %v3046_v14 }
  0x66   : > { %2749 = vmatprep.mubr.msk.f32.mxu0 %vm224_vm1, %v198_v24  ;;  %2768 = vmatprep.mubr.msk.f32.mxu1 %vm224_vm1, %v520_v25  ;;  %v1133_v24 = vld [vmem:[%s3086_s28 + $0x380] sm:$0xff]  ;;  %v825_v25 = vld [vmem:[%s3086_s28 + $0x298] sm:$0xff] }
  0x67   : > { %402 = vmatmul.mubr.f32.gmra.mxu0 %v197_v26  ;;  %722 = vmatmul.mubr.f32.gmra.mxu1 %v519_v27  ;;  %v1136_v26 = vld [vmem:[%s3086_s28 + $0x398] sm:$0xff]  ;;  %v1135_v27 = vld [vmem:[%s3086_s28 + $0x390] sm:$0xff] }
  0x68   : > { %936 = vmatprep.subr.mxu0 %v2897_v1  ;;  %1247 = vmatprep.subr.mxu1 %v2897_v1 }
  0x69   : > { %937 = vmatpush1.msra.mxu0 %v3059_v15  ;;  %1248 = vmatpush1.msra.mxu1 %v3059_v15 }
  0x6a   : > { %2750 = vmatprep.mubr.msk.f32.mxu0 %vm224_vm1, %v200_v28  ;;  %2769 = vmatprep.mubr.msk.f32.mxu1 %vm224_vm1, %v522_v29  ;;  %v827_v28 = vld [vmem:[%s3086_s28 + $0x2a8] sm:$0xff] }
  0x6b   : > { %938 = vmatprep.subr.mxu0 %v2897_v1  ;;  %1249 = vmatprep.subr.mxu1 %v2897_v1  ;;  %v1138_v29 = vld [vmem:[%s3086_s28 + $0x3a8] sm:$0xff] }
  0x6c   : > { %407 = vmatmul.mubr.f32.gmra.mxu0 %v199_v30  ;;  %727 = vmatmul.mubr.f32.gmra.mxu1 %v521_v31  ;;  %v1137_v30 = vld [vmem:[%s3086_s28 + $0x3a0] sm:$0xff]  ;;  %v1140_v31 = vld [vmem:[%s3086_s28 + $0x3b8] sm:$0xff] }
  0x6d   : > { %939 = vmatpush1.msra.mxu0 %v3068_v16  ;;  %1250 = vmatpush1.msra.mxu1 %v3068_v16 }
  0x6e   : > { %966 = vmatprep.subr.mxu0 %v2897_v1  ;;  %1277 = vmatprep.subr.mxu1 %v2897_v1 }
  0x6f   : > { %2751 = vmatprep.mubr.msk.f32.mxu0 %vm224_vm1, %v202_v32  ;;  %2770 = vmatprep.mubr.msk.f32.mxu1 %vm224_vm1, %v524_v33  ;;  %v828_v32 = vld [vmem:[%s3086_s28 + $0x2b0] sm:$0xff] }
  0x70   : > { %2772 = vmatpush2.msk.msra.mxu0 %vm273_vm0, %v856_v34  ;;  %2789 = vmatpush2.msk.msra.mxu1 %vm273_vm0, %v1167_v35  ;;  %v1139_v33 = vld [vmem:[%s3086_s28 + $0x3b0] sm:$0xff]  ;;  %v1142_v34 = vld [vmem:[%s3086_s28 + $0x3c8] sm:$0xff]  ;;  %v830_v35 = vld [vmem:[%s3086_s28 + $0x2c0] sm:$0xff] }
  0x71   : > { %412 = vmatmul.mubr.f32.gmra.mxu0 %v201_v36  ;;  %732 = vmatmul.mubr.f32.gmra.mxu1 %v523_v37  ;;  %v1141_v36 = vld [vmem:[%s3086_s28 + $0x3c0] sm:$0xff]  ;;  %v1144_v37 = vld [vmem:[%s3086_s28 + $0x3d8] sm:$0xff] }
  0x72   : > { %968 = vmatprep.subr.mxu0 %v2897_v1  ;;  %1279 = vmatprep.subr.mxu1 %v2897_v1 }
  0x73   : > { %2752 = vmatprep.mubr.msk.f32.mxu0 %vm224_vm1, %v204_v38  ;;  %2771 = vmatprep.mubr.msk.f32.mxu1 %vm224_vm1, %v526_v39  ;;  %v832_v38 = vld [vmem:[%s3086_s28 + $0x2d0] sm:$0xff]  ;;  %v835_v39 = vld [vmem:[%s3086_s28 + $0x2e8] sm:$0xff] }
  0x74   : > { %969 = vmatpush2.msra.mxu0 %v3093_v19  ;;  %1280 = vmatpush2.msra.mxu1 %v3093_v19 }
  0x75   : > { %417 = vmatmul.mubr.f32.gmra.mxu0 %v203_v40  ;;  %737 = vmatmul.mubr.f32.gmra.mxu1 %v525_v41  ;;  %v1146_v40 = vld [vmem:[%s3086_s28 + $0x3e8] sm:$0xff]  ;;  %v1789_v41 = vld [vmem:[%s4300_s1 + $0x90] sm:$0x7] }
  0x76   : > { %970 = vmatprep.subr.mxu0 %v2897_v1  ;;  %1281 = vmatprep.subr.mxu1 %v2897_v1 }
  0x77   : > { %971 = vmatpush2.msra.mxu0 %v3102_v20  ;;  %1282 = vmatpush2.msra.mxu1 %v3102_v20 }
  0x78   : > { %2773 = vmatprep.mubr.msk.f32.mxu0 %vm224_vm1, %v807_v42  ;;  %2790 = vmatprep.mubr.msk.f32.mxu1 %vm224_vm1, %v1118_v43  ;;  %v834_v42 = vld [vmem:[%s3086_s28 + $0x2e0] sm:$0xff] }
  0x79   : > { %973 = vmatmul.mubr.f32.vlgmr.msra.gmra.mxu0 %v806_v44  ;;  %1284 = vmatmul.mubr.f32.vlgmr.msra.gmra.mxu1 %v1117_v45  ;;  %v1145_v43 = vld [vmem:[%s3086_s28 + $0x3e0] sm:$0xff]  ;;  %v1148_v44 = vld [vmem:[%s3086_s28 + $0x3f8] sm:$0xff]  ;;  %v836_v45 = vld [vmem:[%s3086_s28 + $0x2f0] sm:$0xff] }
  0x7a   : > { %1530 = vmatprep.subr.mxu0 %v2897_v1  ;;  %1841 = vmatprep.subr.mxu1 %v2897_v1 }
  0x7b   : > { %1531 = vmatpush1.msra.mxu0 %v2929_v0  ;;  %1842 = vmatpush1.msra.mxu1 %v2929_v0  ;;  %v810_v0 = vld [vmem:[%s3086_s28 + $0x220] sm:$0xff] }
  0x7c   : > { %2774 = vmatprep.mubr.msk.f32.mxu0 %vm224_vm1, %v809_v46  ;;  %2791 = vmatprep.mubr.msk.f32.mxu1 %vm224_vm1, %v1120_v47  ;;  %v1147_v46 = vld [vmem:[%s3086_s28 + $0x3f0] sm:$0xff]  ;;  %v1429_v47 = vld [vmem:[%s3086_s28 + $0x408] sm:$0xff] }
  0x7d   : > { %978 = vmatmul.mubr.f32.gmra.mxu0 %v808_v48  ;;  %1289 = vmatmul.mubr.f32.gmra.mxu1 %v1119_v49  ;;  %v1740_v48 = vld [vmem:[%s3086_s28 + $0x508] sm:$0xff]  ;;  %v1428_v49 = vld [vmem:[%s3086_s28 + $0x400] sm:$0xff] }
  0x7e   : > { %1532 = vmatprep.subr.mxu0 %v2897_v1  ;;  %1843 = vmatprep.subr.mxu1 %v2897_v1 }
  0x7f   : > { %1533 = vmatpush1.msra.mxu0 %v2936_v2  ;;  %1844 = vmatpush1.msra.mxu1 %v2936_v2  ;;  %v812_v2 = vld [vmem:[%s3086_s28 + $0x230] sm:$0xff] }
  0x80   : > { %2775 = vmatprep.mubr.msk.f32.mxu0 %vm224_vm1, %v811_v50  ;;  %2792 = vmatprep.mubr.msk.f32.mxu1 %vm224_vm1, %v1122_v51  ;;  %v1739_v50 = vld [vmem:[%s3086_s28 + $0x500] sm:$0xff]  ;;  %v1431_v51 = vld [vmem:[%s3086_s28 + $0x418] sm:$0xff] }
  0x81   : > { %1534 = vmatprep.subr.mxu0 %v2897_v1  ;;  %1845 = vmatprep.subr.mxu1 %v2897_v1 }
  0x82   : > { %983 = vmatmul.mubr.f32.gmra.mxu0 %v810_v0  ;;  %1294 = vmatmul.mubr.f32.gmra.mxu1 %v1121_v52  ;;  %v1742_v0 = vld [vmem:[%s3086_s28 + $0x518] sm:$0xff]  ;;  %v1741_v52 = vld [vmem:[%s3086_s28 + $0x510] sm:$0xff] }
  0x83   : > { %1535 = vmatpush1.msra.mxu0 %v2945_v3  ;;  %1846 = vmatpush1.msra.mxu1 %v2945_v3  ;;  %v814_v3 = vld [vmem:[%s3086_s28 + $0x240] sm:$0xff] }
  0x84   : > { %2776 = vmatprep.mubr.msk.f32.mxu0 %vm224_vm1, %v813_v53  ;;  %2793 = vmatprep.mubr.msk.f32.mxu1 %vm224_vm1, %v1124_v54  ;;  %v2096_v53 = vld [vmem:[%s4300_s1 + $0x70] sm:$0xff]  ;;  %v1433_v54 = vld [vmem:[%s3086_s28 + $0x428] sm:$0xff] }
  0x85   : > { %1536 = vmatprep.subr.mxu0 %v2897_v1  ;;  %1847 = vmatprep.subr.mxu1 %v2897_v1 }
  0x86   : > { %988 = vmatmul.mubr.f32.gmra.mxu0 %v812_v2  ;;  %1299 = vmatmul.mubr.f32.gmra.mxu1 %v1123_v55  ;;  %v1744_v2 = vld [vmem:[%s3086_s28 + $0x528] sm:$0xff]  ;;  %v1432_v55 = vld [vmem:[%s3086_s28 + $0x420] sm:$0xff] }
  0x87   : > { %1537 = vmatpush1.msra.mxu0 %v2954_v4  ;;  %1848 = vmatpush1.msra.mxu1 %v2954_v4  ;;  %v817_v4 = vld [vmem:[%s3086_s28 + $0x258] sm:$0xff] }
  0x88   : > { %1538 = vmatprep.subr.mxu0 %v2897_v1  ;;  %1849 = vmatprep.subr.mxu1 %v2897_v1 }
  0x89   : > { %2777 = vmatprep.mubr.msk.f32.mxu0 %vm224_vm1, %v815_v56  ;;  %2794 = vmatprep.mubr.msk.f32.mxu1 %vm224_vm1, %v1126_v57  ;;  %v1743_v56 = vld [vmem:[%s3086_s28 + $0x520] sm:$0xff]  ;;  %v2095_v57 = vld [vmem:[%s4300_s1 + $0x68] sm:$0xff] }
  0x8a   : > { %1539 = vmatpush1.msra.mxu0 %v2963_v5  ;;  %1850 = vmatpush1.msra.mxu1 %v2963_v5  ;;  %v819_v5 = vld [vmem:[%s3086_s28 + $0x268] sm:$0xff] }
  0x8b   : > { %993 = vmatmul.mubr.f32.gmra.mxu0 %v814_v3  ;;  %1304 = vmatmul.mubr.f32.gmra.mxu1 %v1125_v58  ;;  %v1435_v3 = vld [vmem:[%s3086_s28 + $0x438] sm:$0xff] }
  0x8c   : > { %1540 = vmatprep.subr.mxu0 %v2897_v1  ;;  %1851 = vmatprep.subr.mxu1 %v2897_v1  ;;  %v1746_v58 = vld [vmem:[%s3086_s28 + $0x538] sm:$0xff] }
  0x8d   : > { %1541 = vmatpush1.msra.mxu0 %v2972_v6  ;;  %1852 = vmatpush1.msra.mxu1 %v2972_v6  ;;  %v821_v6 = vld [vmem:[%s3086_s28 + $0x278] sm:$0xff] }
  0x8e   : > { %2778 = vmatprep.mubr.msk.f32.mxu0 %vm224_vm1, %v817_v4  ;;  %2795 = vmatprep.mubr.msk.f32.mxu1 %vm224_vm1, %v1128_v59  ;;  %v1434_v4 = vld [vmem:[%s3086_s28 + $0x430] sm:$0xff] }
  0x8f   : > { %998 = vmatmul.mubr.f32.gmra.mxu0 %v816_v60  ;;  %1309 = vmatmul.mubr.f32.gmra.mxu1 %v1127_v61  ;;  %v1745_v59 = vld [vmem:[%s3086_s28 + $0x530] sm:$0xff]  ;;  %v2094_v60 = vld [vmem:[%s4300_s1 + $0x60] sm:$0xff]  ;;  %v1437_v61 = vld [vmem:[%s3086_s28 + $0x448] sm:$0xff] }
  0x90   : > { %1542 = vmatprep.subr.mxu0 %v2897_v1  ;;  %1853 = vmatprep.subr.mxu1 %v2897_v1 }
  0x91   : > { %1543 = vmatpush1.msra.mxu0 %v2981_v7  ;;  %1854 = vmatpush1.msra.mxu1 %v2981_v7  ;;  %v820_v7 = vld [vmem:[%s3086_s28 + $0x270] sm:$0xff] }
  0x92   : > { %2779 = vmatprep.mubr.msk.f32.mxu0 %vm224_vm1, %v819_v5  ;;  %2796 = vmatprep.mubr.msk.f32.mxu1 %vm224_vm1, %v1130_v62  ;;  %v1748_v5 = vld [vmem:[%s3086_s28 + $0x548] sm:$0xff]  ;;  %v2093_v62 = vld [vmem:[%s4300_s1 + $0x58] sm:$0xff] }
  0x93   : > { %1003 = vmatmul.mubr.f32.gmra.mxu0 %v818_v63  ;;  %1314 = vmatmul.mubr.f32.gmra.mxu1 %v1129_v17  ;;  %v1436_v63 = vld [vmem:[%s3086_s28 + $0x440] sm:$0xff] }
  0x94   : > { %1544 = vmatprep.subr.mxu0 %v2897_v1  ;;  %1855 = vmatprep.subr.mxu1 %v2897_v1  ;;  %v1747_v17 = vld [vmem:[%s3086_s28 + $0x540] sm:$0xff] }
  0x95   : > { %1545 = vmatpush1.msra.mxu0 %v2990_v8  ;;  %1856 = vmatpush1.msra.mxu1 %v2990_v8  ;;  %v822_v8 = vld [vmem:[%s3086_s28 + $0x280] sm:$0xff] }
  0x96   : > { %2780 = vmatprep.mubr.msk.f32.mxu0 %vm224_vm1, %v821_v6  ;;  %2797 = vmatprep.mubr.msk.f32.mxu1 %vm224_vm1, %v1132_v18  ;;  %v2092_v6 = vld [vmem:[%s4300_s1 + $0x50] sm:$0xff]  ;;  %v1439_v18 = vld [vmem:[%s3086_s28 + $0x458] sm:$0xff] }
  0x97   : > { %1546 = vmatprep.subr.mxu0 %v2897_v1  ;;  %1857 = vmatprep.subr.mxu1 %v2897_v1 }
  0x98   : > { %1008 = vmatmul.mubr.f32.gmra.mxu0 %v820_v7  ;;  %1319 = vmatmul.mubr.f32.gmra.mxu1 %v1131_v21  ;;  %v1750_v7 = vld [vmem:[%s3086_s28 + $0x558] sm:$0xff]  ;;  %v1438_v21 = vld [vmem:[%s3086_s28 + $0x450] sm:$0xff] }
  0x99   : > { %1547 = vmatpush1.msra.mxu0 %v2999_v9  ;;  %1858 = vmatpush1.msra.mxu1 %v2999_v9  ;;  %v824_v9 = vld [vmem:[%s3086_s28 + $0x290] sm:$0xff] }
  0x9a   : > { %2781 = vmatprep.mubr.msk.f32.mxu0 %vm224_vm1, %v823_v22  ;;  %2798 = vmatprep.mubr.msk.f32.mxu1 %vm224_vm1, %v1134_v23  ;;  %v1749_v22 = vld [vmem:[%s3086_s28 + $0x550] sm:$0xff]  ;;  %v2091_v23 = vld [vmem:[%s4300_s1 + $0x48] sm:$0xff] }
  0x9b   : > { %1548 = vmatprep.subr.mxu0 %v2897_v1  ;;  %1859 = vmatprep.subr.mxu1 %v2897_v1 }
  0x9c   : > { %1013 = vmatmul.mubr.f32.gmra.mxu0 %v822_v8  ;;  %1324 = vmatmul.mubr.f32.gmra.mxu1 %v1133_v24  ;;  %v1441_v8 = vld [vmem:[%s3086_s28 + $0x468] sm:$0xff] }
  0x9d   : > { %1549 = vmatpush1.msra.mxu0 %v3008_v10  ;;  %1860 = vmatpush1.msra.mxu1 %v3008_v10  ;;  %v826_v10 = vld [vmem:[%s3086_s28 + $0x2a0] sm:$0xff]  ;;  %v1752_v24 = vld [vmem:[%s3086_s28 + $0x568] sm:$0xff] }
  0x9e   : > { %1550 = vmatprep.subr.mxu0 %v2897_v1  ;;  %1861 = vmatprep.subr.mxu1 %v2897_v1 }
  0x9f   : > { %2782 = vmatprep.mubr.msk.f32.mxu0 %vm224_vm1, %v825_v25  ;;  %2799 = vmatprep.mubr.msk.f32.mxu1 %vm224_vm1, %v1136_v26  ;;  %v1440_v25 = vld [vmem:[%s3086_s28 + $0x460] sm:$0xff] }
  0xa0   : > { %1551 = vmatpush1.msra.mxu0 %v3017_v11  ;;  %1862 = vmatpush1.msra.mxu1 %v3017_v11  ;;  %v829_v11 = vld [vmem:[%s3086_s28 + $0x2b8] sm:$0xff]  ;;  %v1751_v26 = vld [vmem:[%s3086_s28 + $0x560] sm:$0xff] }
  0xa1   : > { %1018 = vmatmul.mubr.f32.gmra.mxu0 %v824_v9  ;;  %1329 = vmatmul.mubr.f32.gmra.mxu1 %v1135_v27  ;;  %v2090_v9 = vld [vmem:[%s4300_s1 + $0x40] sm:$0xff]  ;;  %v1443_v27 = vld [vmem:[%s3086_s28 + $0x478] sm:$0xff] }
  0xa2   : > { %1552 = vmatprep.subr.mxu0 %v2897_v1  ;;  %1863 = vmatprep.subr.mxu1 %v2897_v1 }
  0xa3   : > { %2783 = vmatprep.mubr.msk.f32.mxu0 %vm224_vm1, %v827_v28  ;;  %2800 = vmatprep.mubr.msk.f32.mxu1 %vm224_vm1, %v1138_v29  ;;  %v1754_v28 = vld [vmem:[%s3086_s28 + $0x578] sm:$0xff]  ;;  %v1442_v29 = vld [vmem:[%s3086_s28 + $0x470] sm:$0xff] }
  0xa4   : > { %1553 = vmatpush1.msra.mxu0 %v3026_v12  ;;  %1864 = vmatpush1.msra.mxu1 %v3026_v12  ;;  %v831_v12 = vld [vmem:[%s3086_s28 + $0x2c8] sm:$0xff] }
  0xa5   : > { %1023 = vmatmul.mubr.f32.gmra.mxu0 %v826_v10  ;;  %1334 = vmatmul.mubr.f32.gmra.mxu1 %v1137_v30  ;;  %v1753_v10 = vld [vmem:[%s3086_s28 + $0x570] sm:$0xff]  ;;  %v2089_v30 = vld [vmem:[%s4300_s1 + $0x38] sm:$0xff] }
  0xa6   : > { %1554 = vmatprep.subr.mxu0 %v2897_v1  ;;  %1865 = vmatprep.subr.mxu1 %v2897_v1 }
  0xa7   : > { %1555 = vmatpush1.msra.mxu0 %v3037_v13  ;;  %1866 = vmatpush1.msra.mxu1 %v3037_v13  ;;  %v833_v13 = vld [vmem:[%s3086_s28 + $0x2d8] sm:$0xff] }
  0xa8   : > { %2784 = vmatprep.mubr.msk.f32.mxu0 %vm224_vm1, %v829_v11  ;;  %2801 = vmatprep.mubr.msk.f32.mxu1 %vm224_vm1, %v1140_v31  ;;  %v1445_v11 = vld [vmem:[%s3086_s28 + $0x488] sm:$0xff] }
  0xa9   : > { %1028 = vmatmul.mubr.f32.gmra.mxu0 %v828_v32  ;;  %1339 = vmatmul.mubr.f32.gmra.mxu1 %v1139_v33  ;;  %v1756_v31 = vld [vmem:[%s3086_s28 + $0x588] sm:$0xff]  ;;  %v1444_v32 = vld [vmem:[%s3086_s28 + $0x480] sm:$0xff] }
  0xaa   : > { %1556 = vmatprep.subr.mxu0 %v2897_v1  ;;  %1867 = vmatprep.subr.mxu1 %v2897_v1  ;;  %v1755_v33 = vld [vmem:[%s3086_s28 + $0x580] sm:$0xff] }
  0xab   : > { %1557 = vmatpush1.msra.mxu0 %v3046_v14  ;;  %1868 = vmatpush1.msra.mxu1 %v3046_v14  ;;  %v1143_v14 = vld [vmem:[%s3086_s28 + $0x3d0] sm:$0xff] }
  0xac   : > { %2785 = vmatprep.mubr.msk.f32.mxu0 %vm224_vm1, %v831_v12  ;;  %2802 = vmatprep.mubr.msk.f32.mxu1 %vm224_vm1, %v1142_v34  ;;  %v2088_v12 = vld [vmem:[%s4300_s1 + $0x30] sm:$0xff]  ;;  %v1447_v34 = vld [vmem:[%s3086_s28 + $0x498] sm:$0xff] }
  0xad   : > { %1033 = vmatmul.mubr.f32.gmra.mxu0 %v830_v35  ;;  %1344 = vmatmul.mubr.f32.gmra.mxu1 %v1141_v36  ;;  %v1758_v35 = vld [vmem:[%s3086_s28 + $0x598] sm:$0xff]  ;;  %v2087_v36 = vld [vmem:[%s4300_s1 + $0x28] sm:$0xff] }
  0xae   : > { %1558 = vmatprep.subr.mxu0 %v2897_v1  ;;  %1869 = vmatprep.subr.mxu1 %v2897_v1 }
  0xaf   : > { %1559 = vmatpush1.msra.mxu0 %v3059_v15  ;;  %1870 = vmatpush1.msra.mxu1 %v3059_v15  ;;  %v1478_v15 = vld [vmem:[%s4300_s1 + $0x90] sm:$0x7] }
  0xb0   : > { %2786 = vmatprep.mubr.msk.f32.mxu0 %vm224_vm1, %v833_v13  ;;  %2803 = vmatprep.mubr.msk.f32.mxu1 %vm224_vm1, %v1144_v37  ;;  %v1446_v13 = vld [vmem:[%s3086_s28 + $0x490] sm:$0xff] }
  0xb1   : > { %1560 = vmatprep.subr.mxu0 %v2897_v1  ;;  %1871 = vmatprep.subr.mxu1 %v2897_v1  ;;  %v1757_v37 = vld [vmem:[%s3086_s28 + $0x590] sm:$0xff] }
  0xb2   : > { %1038 = vmatmul.mubr.f32.gmra.mxu0 %v832_v38  ;;  %1349 = vmatmul.mubr.f32.gmra.mxu1 %v1143_v14  ;;  %v1449_v38 = vld [vmem:[%s3086_s28 + $0x4a8] sm:$0xff] }
  0xb3   : > { %1561 = vmatpush1.msra.mxu0 %v3068_v16  ;;  %1872 = vmatpush1.msra.mxu1 %v3068_v16  ;;  %v837_v16 = vld [vmem:[%s3086_s28 + $0x2f8] sm:$0xff]  ;;  %v1760_v14 = vld [vmem:[%s3086_s28 + $0x5a8] sm:$0xff] }
  0xb4   : > { %1588 = vmatprep.subr.mxu0 %v2897_v1  ;;  %1899 = vmatprep.subr.mxu1 %v2897_v1 }
  0xb5   : > { %2787 = vmatprep.mubr.msk.f32.mxu0 %vm224_vm1, %v835_v39  ;;  %2804 = vmatprep.mubr.msk.f32.mxu1 %vm224_vm1, %v1146_v40  ;;  %v2086_v39 = vld [vmem:[%s4300_s1 + $0x20] sm:$0xff] }
  0xb6   : > { %2806 = vmatpush2.msk.msra.mxu0 %vm273_vm0, %v1478_v15  ;;  %2823 = vmatpush2.msk.msra.mxu1 %vm273_vm0, %v1789_v41  ;;  %v1448_v40 = vld [vmem:[%s3086_s28 + $0x4a0] sm:$0xff]  ;;  %v2085_v41 = vld [vmem:[%s4300_s1 + $0x18] sm:$0xff] }
  0xb7   : > { %1043 = vmatmul.mubr.f32.gmra.mxu0 %v834_v42  ;;  %1354 = vmatmul.mubr.f32.gmra.mxu1 %v1145_v43  ;;  %v1759_v15 = vld [vmem:[%s3086_s28 + $0x5a0] sm:$0xff]  ;;  %v1451_v42 = vld [vmem:[%s3086_s28 + $0x4b8] sm:$0xff] }
  0xb8   : > { %1590 = vmatprep.subr.mxu0 %v2897_v1  ;;  %1901 = vmatprep.subr.mxu1 %v2897_v1  ;;  %v1762_v43 = vld [vmem:[%s3086_s28 + $0x5b8] sm:$0xff] }
  0xb9   : > { %2788 = vmatprep.mubr.msk.f32.mxu0 %vm224_vm1, %v837_v16  ;;  %2805 = vmatprep.mubr.msk.f32.mxu1 %vm224_vm1, %v1148_v44  ;;  %v1450_v16 = vld [vmem:[%s3086_s28 + $0x4b0] sm:$0xff] }
  0xba   : > { %1591 = vmatpush2.msra.mxu0 %v3093_v19  ;;  %1902 = vmatpush2.msra.mxu1 %v3093_v19  ;;  %v2097_v19 = vld [vmem:[%s4300_s1 + $0x78] sm:$0xff]  ;;  %v1761_v44 = vld [vmem:[%s3086_s28 + $0x5b0] sm:$0xff] }
  0xbb   : > { %1048 = vmatmul.mubr.f32.gmra.mxu0 %v836_v45  ;;  %1359 = vmatmul.mubr.f32.gmra.mxu1 %v1147_v46  ;;  %v2084_v45 = vld [vmem:[%s4300_s1 + $0x10] sm:$0xff]  ;;  %v1453_v46 = vld [vmem:[%s3086_s28 + $0x4c8] sm:$0xff] }
  0xbc   : > { %1592 = vmatprep.subr.mxu0 %v2897_v1  ;;  %1903 = vmatprep.subr.mxu1 %v2897_v1 }
  0xbd   : > { %1593 = vmatpush2.msra.mxu0 %v3102_v20  ;;  %1904 = vmatpush2.msra.mxu1 %v3102_v20  ;;  %v1430_v20 = vld [vmem:[%s3086_s28 + $0x410] sm:$0xff] }
  0xbe   : > { %2807 = vmatprep.mubr.msk.f32.mxu0 %vm224_vm1, %v1429_v47  ;;  %2824 = vmatprep.mubr.msk.f32.mxu1 %vm224_vm1, %v1740_v48  ;;  %v1764_v47 = vld [vmem:[%s3086_s28 + $0x5c8] sm:$0xff]  ;;  %v1452_v48 = vld [vmem:[%s3086_s28 + $0x4c0] sm:$0xff] }
  0xbf   : > { %1595 = vmatmul.mubr.f32.vlgmr.msra.gmra.mxu0 %v1428_v49  ;;  %1906 = vmatmul.mubr.f32.vlgmr.msra.gmra.mxu1 %v1739_v50  ;;  %v1763_v49 = vld [vmem:[%s3086_s28 + $0x5c0] sm:$0xff] }
  0xc0   : > { %2152 = vmatprep.subr.mxu0 %v2897_v1  ;;  %2463 = vmatprep.subr.mxu1 %v2897_v1  ;;  %v3615_v50 = vld [vmem:[%s4301_s2] ss:$0 sm:$0xff] }
  0xc1   : > { %2153 = vmatpush1.msra.mxu0 %v2097_v19  ;;  %2464 = vmatpush1.msra.mxu1 %v2097_v19  ;;  %v2083_v19 = vld [vmem:[%s4300_s1 + $0x8] sm:$0xff] }
  0xc2   : > { %2808 = vmatprep.mubr.msk.f32.mxu0 %vm224_vm1, %v1431_v51  ;;  %2825 = vmatprep.mubr.msk.f32.mxu1 %vm224_vm1, %v1742_v0  ;;  %v1455_v51 = vld [vmem:[%s3086_s28 + $0x4d8] sm:$0xff] }
  0xc3   : > { %1600 = vmatmul.mubr.f32.gmra.mxu0 %v1430_v20  ;;  %1911 = vmatmul.mubr.f32.gmra.mxu1 %v1741_v52  ;;  %v1766_v0 = vld [vmem:[%s3086_s28 + $0x5d8] sm:$0xff]  ;;  %v3627_v20 = vld [vmem:[%s4301_s2 + $0x1] ss:$0 sm:$0xff] }
  0xc4   : > { %2154 = vmatprep.subr.mxu0 %v2897_v1  ;;  %2465 = vmatprep.subr.mxu1 %v2897_v1 }
  0xc5   : > { %2155 = vmatpush1.msra.mxu0 %v2096_v53  ;;  %2466 = vmatpush1.msra.mxu1 %v2096_v53 }
  0xc6   : > { %2809 = vmatprep.mubr.msk.f32.mxu0 %vm224_vm1, %v1433_v54  ;;  %2826 = vmatprep.mubr.msk.f32.mxu1 %vm224_vm1, %v1744_v2 }
  0xc7   : > { %2156 = vmatprep.subr.mxu0 %v2897_v1  ;;  %2467 = vmatprep.subr.mxu1 %v2897_v1 }
  0xc8   : > { %1605 = vmatmul.mubr.f32.gmra.mxu0 %v1432_v55  ;;  %1916 = vmatmul.mubr.f32.gmra.mxu1 %v1743_v56  ;;  %v1454_v55 = vld [vmem:[%s3086_s28 + $0x4d0] sm:$0xff] }
  0xc9   : > { %2157 = vmatpush1.msra.mxu0 %v2095_v57  ;;  %2468 = vmatpush1.msra.mxu1 %v2095_v57  ;;  %v1765_v56 = vld [vmem:[%s3086_s28 + $0x5d0] sm:$0xff] }
  0xca   : > { %2810 = vmatprep.mubr.msk.f32.mxu0 %vm224_vm1, %v1435_v3  ;;  %2827 = vmatprep.mubr.msk.f32.mxu1 %vm224_vm1, %v1746_v58  ;;  %v2082_v58 = vld [vmem:[%s4300_s1] sm:$0xff] }
  0xcb   : > { %2158 = vmatprep.subr.mxu0 %v2897_v1  ;;  %2469 = vmatprep.subr.mxu1 %v2897_v1 }
  0xcc   : > { %1610 = vmatmul.mubr.f32.gmra.mxu0 %v1434_v4  ;;  %1921 = vmatmul.mubr.f32.gmra.mxu1 %v1745_v59 }
  0xcd   : > { %2159 = vmatpush1.msra.mxu0 %v2094_v60  ;;  %2470 = vmatpush1.msra.mxu1 %v2094_v60 }
  0xce   : > { %2160 = vmatprep.subr.mxu0 %v2897_v1  ;;  %2471 = vmatprep.subr.mxu1 %v2897_v1 }
  0xcf   : > { %2811 = vmatprep.mubr.msk.f32.mxu0 %vm224_vm1, %v1437_v61  ;;  %2828 = vmatprep.mubr.msk.f32.mxu1 %vm224_vm1, %v1748_v5  ;;  %v1457_v5 = vld [vmem:[%s3086_s28 + $0x4e8] sm:$0xff] }
  0xd0   : > { %2161 = vmatpush1.msra.mxu0 %v2093_v62  ;;  %2472 = vmatpush1.msra.mxu1 %v2093_v62  ;;  %v1768_v62 = vld [vmem:[%s3086_s28 + $0x5e8] sm:$0xff] }
  0xd1   : > { %1615 = vmatmul.mubr.f32.gmra.mxu0 %v1436_v63  ;;  %1926 = vmatmul.mubr.f32.gmra.mxu1 %v1747_v17 }
  0xd2   : > { %2162 = vmatprep.subr.mxu0 %v2897_v1  ;;  %2473 = vmatprep.subr.mxu1 %v2897_v1 }
  0xd3   : > { %2163 = vmatpush1.msra.mxu0 %v2092_v6  ;;  %2474 = vmatpush1.msra.mxu1 %v2092_v6 }
  0xd4   : > { %2812 = vmatprep.mubr.msk.f32.mxu0 %vm224_vm1, %v1439_v18  ;;  %2829 = vmatprep.mubr.msk.f32.mxu1 %vm224_vm1, %v1750_v7  ;;  %v2100_v7 = vld [vmem:[%s4300_s1 + $0x90] sm:$0x7] }
  0xd5   : > { %1620 = vmatmul.mubr.f32.gmra.mxu0 %v1438_v21  ;;  %1931 = vmatmul.mubr.f32.gmra.mxu1 %v1749_v22  ;;  %v2411_v21 = vld [vmem:[%s4300_s1 + $0x90] sm:$0x7] }
  0xd6   : > { %2164 = vmatprep.subr.mxu0 %v2897_v1  ;;  %2475 = vmatprep.subr.mxu1 %v2897_v1 }
  0xd7   : > { %2165 = vmatpush1.msra.mxu0 %v2091_v23  ;;  %2476 = vmatpush1.msra.mxu1 %v2091_v23 }
  0xd8   : > { %2813 = vmatprep.mubr.msk.f32.mxu0 %vm224_vm1, %v1441_v8  ;;  %2830 = vmatprep.mubr.msk.f32.mxu1 %vm224_vm1, %v1752_v24  ;;  %v1456_v8 = vld [vmem:[%s3086_s28 + $0x4e0] sm:$0xff] }
  0xd9   : > { %1625 = vmatmul.mubr.f32.gmra.mxu0 %v1440_v25  ;;  %1936 = vmatmul.mubr.f32.gmra.mxu1 %v1751_v26  ;;  %v1767_v24 = vld [vmem:[%s3086_s28 + $0x5e0] sm:$0xff] }
  0xda   : > { %2166 = vmatprep.subr.mxu0 %v2897_v1  ;;  %2477 = vmatprep.subr.mxu1 %v2897_v1 }
  0xdb   : > { %2167 = vmatpush1.msra.mxu0 %v2090_v9  ;;  %2478 = vmatpush1.msra.mxu1 %v2090_v9  ;;  %v1459_v9 = vld [vmem:[%s3086_s28 + $0x4f8] sm:$0xff] }
  0xdc   : > { %2814 = vmatprep.mubr.msk.f32.mxu0 %vm224_vm1, %v1443_v27  ;;  %2831 = vmatprep.mubr.msk.f32.mxu1 %vm224_vm1, %v1754_v28  ;;  %v1770_v27 = vld [vmem:[%s3086_s28 + $0x5f8] sm:$0xff] }
  0xdd   : > { %2168 = vmatprep.subr.mxu0 %v2897_v1  ;;  %2479 = vmatprep.subr.mxu1 %v2897_v1 }
  0xde   : > { %1630 = vmatmul.mubr.f32.gmra.mxu0 %v1442_v29  ;;  %1941 = vmatmul.mubr.f32.gmra.mxu1 %v1753_v10 }
  0xdf   : > { %2169 = vmatpush1.msra.mxu0 %v2089_v30  ;;  %2480 = vmatpush1.msra.mxu1 %v2089_v30 }
  0xe0   : > { %2815 = vmatprep.mubr.msk.f32.mxu0 %vm224_vm1, %v1445_v11  ;;  %2832 = vmatprep.mubr.msk.f32.mxu1 %vm224_vm1, %v1756_v31  ;;  %v2099_v11 = vld [vmem:[%s4300_s1 + $0x88] sm:$0xff] }
  0xe1   : > { %2170 = vmatprep.subr.mxu0 %v2897_v1  ;;  %2481 = vmatprep.subr.mxu1 %v2897_v1 }
  0xe2   : > { %1635 = vmatmul.mubr.f32.gmra.mxu0 %v1444_v32  ;;  %1946 = vmatmul.mubr.f32.gmra.mxu1 %v1755_v33  ;;  %v1458_v33 = vld [vmem:[%s3086_s28 + $0x4f0] sm:$0xff] }
  0xe3   : > { %2171 = vmatpush1.msra.mxu0 %v2088_v12  ;;  %2482 = vmatpush1.msra.mxu1 %v2088_v12  ;;  %v1769_v12 = vld [vmem:[%s3086_s28 + $0x5f0] sm:$0xff] }
  0xe4   : > { %2172 = vmatprep.subr.mxu0 %v2897_v1  ;;  %2483 = vmatprep.subr.mxu1 %v2897_v1 }
  0xe5   : > { %2816 = vmatprep.mubr.msk.f32.mxu0 %vm224_vm1, %v1447_v34  ;;  %2833 = vmatprep.mubr.msk.f32.mxu1 %vm224_vm1, %v1758_v35 }
  0xe6   : > { %2173 = vmatpush1.msra.mxu0 %v2087_v36  ;;  %2484 = vmatpush1.msra.mxu1 %v2087_v36 }
  0xe7   : > { %1640 = vmatmul.mubr.f32.gmra.mxu0 %v1446_v13  ;;  %1951 = vmatmul.mubr.f32.gmra.mxu1 %v1757_v37  ;;  %v2098_v37 = vld [vmem:[%s4300_s1 + $0x80] sm:$0xff] }
  0xe8   : > { %2174 = vmatprep.subr.mxu0 %v2897_v1  ;;  %2485 = vmatprep.subr.mxu1 %v2897_v1 }
  0xe9   : > { %2817 = vmatprep.mubr.msk.f32.mxu0 %vm224_vm1, %v1449_v38  ;;  %2834 = vmatprep.mubr.msk.f32.mxu1 %vm224_vm1, %v1760_v14 }
  0xea   : > { %2175 = vmatpush1.msra.mxu0 %v2086_v39  ;;  %2486 = vmatpush1.msra.mxu1 %v2086_v39  ;;  %v2051_v39 = vld [vmem:[%s3086_s28 + $0x608] sm:$0xff] }
  0xeb   : > { %1645 = vmatmul.mubr.f32.gmra.mxu0 %v1448_v40  ;;  %1956 = vmatmul.mubr.f32.gmra.mxu1 %v1759_v15  ;;  %v2362_v40 = vld [vmem:[%s3086_s28 + $0x708] sm:$0xff] }
  0xec   : > { %2176 = vmatprep.subr.mxu0 %v2897_v1  ;;  %2487 = vmatprep.subr.mxu1 %v2897_v1 }
  0xed   : > { %2177 = vmatpush1.msra.mxu0 %v2085_v41  ;;  %2488 = vmatpush1.msra.mxu1 %v2085_v41 }
  0xee   : > { %2818 = vmatprep.mubr.msk.f32.mxu0 %vm224_vm1, %v1451_v42  ;;  %2835 = vmatprep.mubr.msk.f32.mxu1 %vm224_vm1, %v1762_v43 }
  0xef   : > { %1650 = vmatmul.mubr.f32.gmra.mxu0 %v1450_v16  ;;  %1961 = vmatmul.mubr.f32.gmra.mxu1 %v1761_v44  ;;  %v2050_v16 = vld [vmem:[%s3086_s28 + $0x600] sm:$0xff] }
  0xf0   : > { %2178 = vmatprep.subr.mxu0 %v2897_v1  ;;  %2489 = vmatprep.subr.mxu1 %v2897_v1  ;;  %v2361_v44 = vld [vmem:[%s3086_s28 + $0x700] sm:$0xff] }
  0xf1   : > { %2179 = vmatpush1.msra.mxu0 %v2084_v45  ;;  %2490 = vmatpush1.msra.mxu1 %v2084_v45 }
  0xf2   : > { %2819 = vmatprep.mubr.msk.f32.mxu0 %vm224_vm1, %v1453_v46  ;;  %2836 = vmatprep.mubr.msk.f32.mxu1 %vm224_vm1, %v1764_v47  ;;  %v2053_v47 = vld [vmem:[%s3086_s28 + $0x618] sm:$0xff] }
  0xf3   : > { %1655 = vmatmul.mubr.f32.gmra.mxu0 %v1452_v48  ;;  %1966 = vmatmul.mubr.f32.gmra.mxu1 %v1763_v49  ;;  %v343_v52 = vpop.f32.mrf.mxu0  ;;  %v663_v53 = vpop.f32.mrf.mxu1  ;;  %v2364_v48 = vld [vmem:[%s3086_s28 + $0x718] sm:$0xff] }
  0xf4   : > { %2180 = vmatprep.subr.mxu0 %v2897_v1  ;;  %2491 = vmatprep.subr.mxu1 %v2897_v1  ;;  %v426_v54 = vmul.f32 %v3615_v50, %v343_v52  ;;  %v742_v2 = vmul.f32 %v3615_v50, %v663_v53  ;;  %v2052_v53 = vld [vmem:[%s3086_s28 + $0x610] sm:$0xff] }
  0xf5   : > { %2181 = vmatpush1.msra.mxu0 %v2083_v19  ;;  %2492 = vmatpush1.msra.mxu1 %v2083_v19  ;;  %v345_v57 = vpop.f32.mrf.mxu0  ;;  %v665_v3 = vpop.f32.mrf.mxu1 }
  0xf6   : > { %2820 = vmatprep.mubr.msk.f32.mxu0 %vm224_vm1, %v1455_v51  ;;  %2837 = vmatprep.mubr.msk.f32.mxu1 %vm224_vm1, %v1766_v0  ;;  %v446_v4 = vadd.f32 %v3627_v20, %v426_v54  ;;  %v758_v59 = vadd.f32 %v3627_v20, %v742_v2  ;;  %v2363_v54 = vld [vmem:[%s3086_s28 + $0x710] sm:$0xff]  ;;  %v2366_v57 = vld [vmem:[%s3086_s28 + $0x728] sm:$0xff] }
  0xf7   : > { %2182 = vmatprep.subr.mxu0 %v2897_v1  ;;  %2493 = vmatprep.subr.mxu1 %v2897_v1  ;;  %v348_v60 = vpop.f32.mrf.mxu0  ;;  %v668_v61 = vpop.f32.mrf.mxu1 }
  0xf8   : > { %1660 = vmatmul.mubr.f32.gmra.mxu0 %v1454_v55  ;;  %1971 = vmatmul.mubr.f32.gmra.mxu1 %v1765_v56  ;;  %v462_v63 = vmax.f32 %v446_v4, 0.0  ;;  %v774_v17 = vmax.f32 %v758_v59, 0.0  ;;  %v427_v6 = vmul.f32 %v3615_v50, %v348_v60  ;;  %v743_v18 = vmul.f32 %v3615_v50, %v668_v61  ;;  %v2055_v56 = vld [vmem:[%s3086_s28 + $0x628] sm:$0xff] }
  0xf9   : > { %2183 = vmatpush1.msra.mxu0 %v2082_v58  ;;  %2494 = vmatpush1.msra.mxu1 %v2082_v58  ;;  %v350_v22 = vpop.f32.mrf.mxu0  ;;  %v670_v23 = vpop.f32.mrf.mxu1 }
  0xfa   : > { %2210 = vmatprep.subr.mxu0 %v2897_v1  ;;  %2521 = vmatprep.subr.mxu1 %v2897_v1  ;;  %479 = vst.msk [vmem:[%s3648_s4] sm:$0xff] %vm478_vm2, %v462_v63  ;;  %790 = vst.msk [vmem:[%s3648_s4 + $0x80] sm:$0xff] %vm478_vm2, %v774_v17  ;;  %v447_v25 = vadd.f32 %v3627_v20, %v427_v6  ;;  %v759_v26 = vadd.f32 %v3627_v20, %v743_v18 }
  0xfb   : > { %2821 = vmatprep.mubr.msk.f32.mxu0 %vm224_vm1, %v1457_v5  ;;  %2838 = vmatprep.mubr.msk.f32.mxu1 %vm224_vm1, %v1768_v62  ;;  %v2054_v5 = vld [vmem:[%s3086_s28 + $0x620] sm:$0xff] }
  0xfc   : > { %2840 = vmatpush2.msk.msra.mxu0 %vm273_vm0, %v2100_v7  ;;  %2857 = vmatpush2.msk.msra.mxu1 %vm273_vm0, %v2411_v21  ;;  %v463_v28 = vmax.f32 %v447_v25, 0.0  ;;  %v775_v29 = vmax.f32 %v759_v26, 0.0  ;;  %v353_v10 = vpop.f32.mrf.mxu0  ;;  %v673_v30 = vpop.f32.mrf.mxu1  ;;  %v2365_v62 = vld [vmem:[%s3086_s28 + $0x720] sm:$0xff]  ;;  %v2057_v7 = vld [vmem:[%s3086_s28 + $0x638] sm:$0xff] }
  0xfd   : > { %1665 = vmatmul.mubr.f32.gmra.mxu0 %v1456_v8  ;;  %1976 = vmatmul.mubr.f32.gmra.mxu1 %v1767_v24  ;;  %v428_v31 = vmul.f32 %v3615_v50, %v353_v10  ;;  %v744_v32 = vmul.f32 %v3615_v50, %v673_v30  ;;  %v2368_v21 = vld [vmem:[%s3086_s28 + $0x738] sm:$0xff] }
  0xfe   : > { %2212 = vmatprep.subr.mxu0 %v2897_v1  ;;  %2523 = vmatprep.subr.mxu1 %v2897_v1  ;;  %480 = vst.msk [vmem:[%s3648_s4 + $0x8] sm:$0xff] %vm478_vm2, %v463_v28  ;;  %791 = vst.msk [vmem:[%s3648_s4 + $0x88] sm:$0xff] %vm478_vm2, %v775_v29  ;;  %v355_v34 = vpop.f32.mrf.mxu0  ;;  %v675_v35 = vpop.f32.mrf.mxu1 }
  0xff   : > { %2822 = vmatprep.mubr.msk.f32.mxu0 %vm224_vm1, %v1459_v9  ;;  %2839 = vmatprep.mubr.msk.f32.mxu1 %vm224_vm1, %v1770_v27  ;;  %v448_v36 = vadd.f32 %v3627_v20, %v428_v31  ;;  %v760_v13 = vadd.f32 %v3627_v20, %v744_v32  ;;  %v2056_v9 = vld [vmem:[%s3086_s28 + $0x630] sm:$0xff]  ;;  %v2370_v31 = vld [vmem:[%s3086_s28 + $0x748] sm:$0xff]  ;;  %v2058_v35 = vld [vmem:[%s3086_s28 + $0x640] sm:$0xff] }
 0x100   : > { %2213 = vmatpush2.msra.mxu0 %v2099_v11  ;;  %2524 = vmatpush2.msra.mxu1 %v2099_v11  ;;  %v358_v38 = vpop.f32.mrf.mxu0  ;;  %v678_v14 = vpop.f32.mrf.mxu1  ;;  %v2367_v27 = vld [vmem:[%s3086_s28 + $0x730] sm:$0xff]  ;;  %v2059_v11 = vld [vmem:[%s3086_s28 + $0x648] sm:$0xff] }
 0x101   : > { %1670 = vmatmul.mubr.f32.gmra.mxu0 %v1458_v33  ;;  %1981 = vmatmul.mubr.f32.gmra.mxu1 %v1769_v12  ;;  %v464_v15 = vmax.f32 %v448_v36, 0.0  ;;  %v776_v41 = vmax.f32 %v760_v13, 0.0  ;;  %v429_v42 = vmul.f32 %v3615_v50, %v358_v38  ;;  %v745_v43 = vmul.f32 %v3615_v50, %v678_v14  ;;  %v2369_v36 = vld [vmem:[%s3086_s28 + $0x740] sm:$0xff] }
 0x102   : > { %2214 = vmatprep.subr.mxu0 %v2897_v1  ;;  %2525 = vmatprep.subr.mxu1 %v2897_v1  ;;  %v360_v45 = vpop.f32.mrf.mxu0  ;;  %v680_v46 = vpop.f32.mrf.mxu1 }
 0x103   : > { %2215 = vmatpush2.msra.mxu0 %v2098_v37  ;;  %2526 = vmatpush2.msra.mxu1 %v2098_v37  ;;  %481 = vst.msk [vmem:[%s3648_s4 + $0x10] sm:$0xff] %vm478_vm2, %v464_v15  ;;  %792 = vst.msk [vmem:[%s3648_s4 + $0x90] sm:$0xff] %vm478_vm2, %v776_v41  ;;  %v449_v49 = vadd.f32 %v3627_v20, %v429_v42  ;;  %v761_v19 = vadd.f32 %v3627_v20, %v745_v43  ;;  %v2060_v45 = vld [vmem:[%s3086_s28 + $0x650] sm:$0xff] }
 0x104   : > { %2841 = vmatprep.mubr.msk.f32.mxu0 %vm224_vm1, %v2051_v39  ;;  %2858 = vmatprep.mubr.msk.f32.mxu1 %vm224_vm1, %v2362_v40  ;;  %v2061_v39 = vld [vmem:[%s3086_s28 + $0x658] sm:$0xff]  ;;  %v2371_v46 = vld [vmem:[%s3086_s28 + $0x750] sm:$0xff] }
 0x105   : > { %2217 = vmatmul.mubr.f32.vlgmr.msra.gmra.mxu0 %v2050_v16  ;;  %2528 = vmatmul.mubr.f32.vlgmr.msra.gmra.mxu1 %v2361_v44  ;;  %v465_v1 = vmax.f32 %v449_v49, 0.0  ;;  %v777_v51 = vmax.f32 %v761_v19, 0.0  ;;  %v363_v0 = vpop.f32.mrf.mxu0  ;;  %v683_v52 = vpop.f32.mrf.mxu1  ;;  %v2372_v40 = vld [vmem:[%s3086_s28 + $0x758] sm:$0xff]  ;;  %v2063_v49 = vld [vmem:[%s3086_s28 + $0x668] sm:$0xff] }
 0x106   : > { %2842 = vmatprep.mubr.msk.f32.mxu0 %vm224_vm1, %v2053_v47  ;;  %2859 = vmatprep.mubr.msk.f32.mxu1 %vm224_vm1, %v2364_v48  ;;  %v430_v2 = vmul.f32 %v3615_v50, %v363_v0  ;;  %v746_v55 = vmul.f32 %v3615_v50, %v683_v52  ;;  %v2374_v19 = vld [vmem:[%s3086_s28 + $0x768] sm:$0xff] }
 0x107   : > { %482 = vst.msk [vmem:[%s3648_s4 + $0x18] sm:$0xff] %vm478_vm2, %v465_v1  ;;  %793 = vst.msk [vmem:[%s3648_s4 + $0x98] sm:$0xff] %vm478_vm2, %v777_v51  ;;  %v365_v3 = vpop.f32.mrf.mxu0  ;;  %v685_v58 = vpop.f32.mrf.mxu1 }
 0x108   : > { %v450_v4 = vadd.f32 %v3627_v20, %v430_v2  ;;  %v762_v59 = vadd.f32 %v3627_v20, %v746_v55  ;;  %v2065_v3 = vld [vmem:[%s3086_s28 + $0x678] sm:$0xff] }
 0x109   : > { %2222 = vmatmul.mubr.f32.gmra.mxu0 %v2052_v53  ;;  %2533 = vmatmul.mubr.f32.gmra.mxu1 %v2363_v54  ;;  %v368_v60 = vpop.f32.mrf.mxu0  ;;  %v688_v61 = vpop.f32.mrf.mxu1  ;;  %v2376_v58 = vld [vmem:[%s3086_s28 + $0x778] sm:$0xff] }
 0x10a   : > { %2843 = vmatprep.mubr.msk.f32.mxu0 %vm224_vm1, %v2055_v56  ;;  %2860 = vmatprep.mubr.msk.f32.mxu1 %vm224_vm1, %v2366_v57  ;;  %v466_v63 = vmax.f32 %v450_v4, 0.0  ;;  %v778_v17 = vmax.f32 %v762_v59, 0.0  ;;  %v431_v6 = vmul.f32 %v3615_v50, %v368_v60  ;;  %v747_v18 = vmul.f32 %v3615_v50, %v688_v61  ;;  %v2062_v56 = vld [vmem:[%s3086_s28 + $0x660] sm:$0xff] }
 0x10b   : > { %v370_v22 = vpop.f32.mrf.mxu0  ;;  %v690_v23 = vpop.f32.mrf.mxu1  ;;  %v2373_v57 = vld [vmem:[%s3086_s28 + $0x760] sm:$0xff] }
 0x10c   : > { %483 = vst.msk [vmem:[%s3648_s4 + $0x20] sm:$0xff] %vm478_vm2, %v466_v63  ;;  %794 = vst.msk [vmem:[%s3648_s4 + $0xa0] sm:$0xff] %vm478_vm2, %v778_v17  ;;  %v451_v8 = vadd.f32 %v3627_v20, %v431_v6  ;;  %v763_v24 = vadd.f32 %v3627_v20, %v747_v18  ;;  %v2064_v6 = vld [vmem:[%s3086_s28 + $0x670] sm:$0xff]  ;;  %v2067_v22 = vld [vmem:[%s3086_s28 + $0x688] sm:$0xff] }
 0x10d   : > { %2227 = vmatmul.mubr.f32.gmra.mxu0 %v2054_v5  ;;  %2538 = vmatmul.mubr.f32.gmra.mxu1 %v2365_v62  ;;  %v373_v25 = vpop.f32.mrf.mxu0  ;;  %v693_v26 = vpop.f32.mrf.mxu1  ;;  %v2375_v18 = vld [vmem:[%s3086_s28 + $0x770] sm:$0xff]  ;;  %v2378_v23 = vld [vmem:[%s3086_s28 + $0x788] sm:$0xff] }
 0x10e   : > { %2844 = vmatprep.mubr.msk.f32.mxu0 %vm224_vm1, %v2057_v7  ;;  %2861 = vmatprep.mubr.msk.f32.mxu1 %vm224_vm1, %v2368_v21  ;;  %v467_v28 = vmax.f32 %v451_v8, 0.0  ;;  %v779_v29 = vmax.f32 %v763_v24, 0.0  ;;  %v432_v10 = vmul.f32 %v3615_v50, %v373_v25  ;;  %v748_v30 = vmul.f32 %v3615_v50, %v693_v26 }
 0x10f   : > { %v375_v32 = vpop.f32.mrf.mxu0  ;;  %v695_v33 = vpop.f32.mrf.mxu1 }
 0x110   : > { %484 = vst.msk [vmem:[%s3648_s4 + $0x28] sm:$0xff] %vm478_vm2, %v467_v28  ;;  %795 = vst.msk [vmem:[%s3648_s4 + $0xa8] sm:$0xff] %vm478_vm2, %v779_v29  ;;  %v452_v12 = vadd.f32 %v3627_v20, %v432_v10  ;;  %v764_v34 = vadd.f32 %v3627_v20, %v748_v30  ;;  %v2066_v10 = vld [vmem:[%s3086_s28 + $0x680] sm:$0xff]  ;;  %v2069_v32 = vld [vmem:[%s3086_s28 + $0x698] sm:$0xff] }
 0x111   : > { %2232 = vmatmul.mubr.f32.gmra.mxu0 %v2056_v9  ;;  %2543 = vmatmul.mubr.f32.gmra.mxu1 %v2367_v27  ;;  %v2377_v30 = vld [vmem:[%s3086_s28 + $0x780] sm:$0xff]  ;;  %v2380_v33 = vld [vmem:[%s3086_s28 + $0x798] sm:$0xff] }
 0x112   : > { %2845 = vmatprep.mubr.msk.f32.mxu0 %vm224_vm1, %v2059_v11  ;;  %2862 = vmatprep.mubr.msk.f32.mxu1 %vm224_vm1, %v2370_v31  ;;  %v468_v13 = vmax.f32 %v452_v12, 0.0  ;;  %v780_v37 = vmax.f32 %v764_v34, 0.0  ;;  %v378_v38 = vpop.f32.mrf.mxu0  ;;  %v698_v14 = vpop.f32.mrf.mxu1 }
 0x113   : > { %v433_v15 = vmul.f32 %v3615_v50, %v378_v38  ;;  %v749_v41 = vmul.f32 %v3615_v50, %v698_v14 }
 0x114   : > { %485 = vst.msk [vmem:[%s3648_s4 + $0x30] sm:$0xff] %vm478_vm2, %v468_v13  ;;  %796 = vst.msk [vmem:[%s3648_s4 + $0xb0] sm:$0xff] %vm478_vm2, %v780_v37  ;;  %v380_v42 = vpop.f32.mrf.mxu0  ;;  %v700_v43 = vpop.f32.mrf.mxu1 }
 0x115   : > { %2237 = vmatmul.mubr.f32.gmra.mxu0 %v2058_v35  ;;  %2548 = vmatmul.mubr.f32.gmra.mxu1 %v2369_v36  ;;  %v453_v16 = vadd.f32 %v3627_v20, %v433_v15  ;;  %v765_v44 = vadd.f32 %v3627_v20, %v749_v41  ;;  %v2071_v42 = vld [vmem:[%s3086_s28 + $0x6a8] sm:$0xff] }
 0x116   : > { %2846 = vmatprep.mubr.msk.f32.mxu0 %vm224_vm1, %v2061_v39  ;;  %2863 = vmatprep.mubr.msk.f32.mxu1 %vm224_vm1, %v2372_v40  ;;  %v383_v47 = vpop.f32.mrf.mxu0  ;;  %v703_v48 = vpop.f32.mrf.mxu1  ;;  %v2068_v39 = vld [vmem:[%s3086_s28 + $0x690] sm:$0xff]  ;;  %v2382_v43 = vld [vmem:[%s3086_s28 + $0x7a8] sm:$0xff] }
 0x117   : > { %v469_v1 = vmax.f32 %v453_v16, 0.0  ;;  %v781_v51 = vmax.f32 %v765_v44, 0.0  ;;  %v434_v0 = vmul.f32 %v3615_v50, %v383_v47  ;;  %v750_v52 = vmul.f32 %v3615_v50, %v703_v48  ;;  %v2379_v40 = vld [vmem:[%s3086_s28 + $0x790] sm:$0xff] }
 0x118   : > { %v385_v53 = vpop.f32.mrf.mxu0  ;;  %v705_v54 = vpop.f32.mrf.mxu1 }
 0x119   : > { %2242 = vmatmul.mubr.f32.gmra.mxu0 %v2060_v45  ;;  %2553 = vmatmul.mubr.f32.gmra.mxu1 %v2371_v46  ;;  %486 = vst.msk [vmem:[%s3648_s4 + $0x38] sm:$0xff] %vm478_vm2, %v469_v1  ;;  %797 = vst.msk [vmem:[%s3648_s4 + $0xb8] sm:$0xff] %vm478_vm2, %v781_v51  ;;  %v454_v2 = vadd.f32 %v3627_v20, %v434_v0  ;;  %v766_v55 = vadd.f32 %v3627_v20, %v750_v52  ;;  %v2070_v1 = vld [vmem:[%s3086_s28 + $0x6a0] sm:$0xff]  ;;  %v2073_v53 = vld [vmem:[%s3086_s28 + $0x6b8] sm:$0xff] }
 0x11a   : > { %2847 = vmatprep.mubr.msk.f32.mxu0 %vm224_vm1, %v2063_v49  ;;  %2864 = vmatprep.mubr.msk.f32.mxu1 %vm224_vm1, %v2374_v19  ;;  %v2381_v51 = vld [vmem:[%s3086_s28 + $0x7a0] sm:$0xff]  ;;  %v2384_v54 = vld [vmem:[%s3086_s28 + $0x7b8] sm:$0xff] }
 0x11b   : > { %v470_v4 = vmax.f32 %v454_v2, 0.0  ;;  %v782_v59 = vmax.f32 %v766_v55, 0.0  ;;  %v388_v60 = vpop.f32.mrf.mxu0  ;;  %v708_v61 = vpop.f32.mrf.mxu1 }
 0x11c   : > { %v435_v5 = vmul.f32 %v3615_v50, %v388_v60  ;;  %v751_v62 = vmul.f32 %v3615_v50, %v708_v61 }
 0x11d   : > { %2247 = vmatmul.mubr.f32.gmra.mxu0 %v2062_v56  ;;  %2558 = vmatmul.mubr.f32.gmra.mxu1 %v2373_v57  ;;  %487 = vst.msk [vmem:[%s3648_s4 + $0x40] sm:$0xff] %vm478_vm2, %v470_v4  ;;  %798 = vst.msk [vmem:[%s3648_s4 + $0xc0] sm:$0xff] %vm478_vm2, %v782_v59  ;;  %v390_v63 = vpop.f32.mrf.mxu0  ;;  %v710_v17 = vpop.f32.mrf.mxu1  ;;  %v2072_v4 = vld [vmem:[%s3086_s28 + $0x6b0] sm:$0xff] }
 0x11e   : > { %2848 = vmatprep.mubr.msk.f32.mxu0 %vm224_vm1, %v2065_v3  ;;  %2865 = vmatprep.mubr.msk.f32.mxu1 %vm224_vm1, %v2376_v58  ;;  %v455_v7 = vadd.f32 %v3627_v20, %v435_v5  ;;  %v767_v21 = vadd.f32 %v3627_v20, %v751_v62  ;;  %v2383_v59 = vld [vmem:[%s3086_s28 + $0x7b0] sm:$0xff]  ;;  %v2075_v5 = vld [vmem:[%s3086_s28 + $0x6c8] sm:$0xff] }
 0x11f   : > { %v393_v8 = vpop.f32.mrf.mxu0  ;;  %v713_v24 = vpop.f32.mrf.mxu1  ;;  %v2386_v62 = vld [vmem:[%s3086_s28 + $0x7c8] sm:$0xff] }
 0x120   : > { %v471_v25 = vmax.f32 %v455_v7, 0.0  ;;  %v783_v26 = vmax.f32 %v767_v21, 0.0  ;;  %v436_v9 = vmul.f32 %v3615_v50, %v393_v8  ;;  %v752_v27 = vmul.f32 %v3615_v50, %v713_v24 }
 0x121   : > { %2252 = vmatmul.mubr.f32.gmra.mxu0 %v2064_v6  ;;  %2563 = vmatmul.mubr.f32.gmra.mxu1 %v2375_v18  ;;  %v395_v28 = vpop.f32.mrf.mxu0  ;;  %v715_v29 = vpop.f32.mrf.mxu1 }
 0x122   : > { %2849 = vmatprep.mubr.msk.f32.mxu0 %vm224_vm1, %v2067_v22  ;;  %2866 = vmatprep.mubr.msk.f32.mxu1 %vm224_vm1, %v2378_v23  ;;  %488 = vst.msk [vmem:[%s3648_s4 + $0x48] sm:$0xff] %vm478_vm2, %v471_v25  ;;  %799 = vst.msk [vmem:[%s3648_s4 + $0xc8] sm:$0xff] %vm478_vm2, %v783_v26  ;;  %v456_v11 = vadd.f32 %v3627_v20, %v436_v9  ;;  %v768_v31 = vadd.f32 %v3627_v20, %v752_v27  ;;  %v2074_v22 = vld [vmem:[%s3086_s28 + $0x6c0] sm:$0xff]  ;;  %v2077_v25 = vld [vmem:[%s3086_s28 + $0x6d8] sm:$0xff] }
 0x123   : > { %v398_v12 = vpop.f32.mrf.mxu0  ;;  %v718_v34 = vpop.f32.mrf.mxu1  ;;  %v2385_v23 = vld [vmem:[%s3086_s28 + $0x7c0] sm:$0xff]  ;;  %v2388_v26 = vld [vmem:[%s3086_s28 + $0x7d8] sm:$0xff] }
 0x124   : > { %v472_v35 = vmax.f32 %v456_v11, 0.0  ;;  %v784_v36 = vmax.f32 %v768_v31, 0.0  ;;  %v437_v13 = vmul.f32 %v3615_v50, %v398_v12  ;;  %v753_v37 = vmul.f32 %v3615_v50, %v718_v34  ;;  %v2076_v11 = vld [vmem:[%s3086_s28 + $0x6d0] sm:$0xff] }
 0x125   : > { %2257 = vmatmul.mubr.f32.gmra.mxu0 %v2066_v10  ;;  %2568 = vmatmul.mubr.f32.gmra.mxu1 %v2377_v30  ;;  %v400_v38 = vpop.f32.mrf.mxu0  ;;  %v720_v14 = vpop.f32.mrf.mxu1  ;;  %v2387_v31 = vld [vmem:[%s3086_s28 + $0x7d0] sm:$0xff] }
 0x126   : > { %2850 = vmatprep.mubr.msk.f32.mxu0 %vm224_vm1, %v2069_v32  ;;  %2867 = vmatprep.mubr.msk.f32.mxu1 %vm224_vm1, %v2380_v33  ;;  %489 = vst.msk [vmem:[%s3648_s4 + $0x50] sm:$0xff] %vm478_vm2, %v472_v35  ;;  %800 = vst.msk [vmem:[%s3648_s4 + $0xd0] sm:$0xff] %vm478_vm2, %v784_v36  ;;  %v457_v15 = vadd.f32 %v3627_v20, %v437_v13  ;;  %v769_v41 = vadd.f32 %v3627_v20, %v753_v37  ;;  %v2079_v35 = vld [vmem:[%s3086_s28 + $0x6e8] sm:$0xff] }
 0x127   : > { %v403_v16 = vpop.f32.mrf.mxu0  ;;  %v723_v44 = vpop.f32.mrf.mxu1  ;;  %v2390_v36 = vld [vmem:[%s3086_s28 + $0x7e8] sm:$0xff] }
 0x128   : > { %v473_v45 = vmax.f32 %v457_v15, 0.0  ;;  %v785_v46 = vmax.f32 %v769_v41, 0.0  ;;  %v438_v47 = vmul.f32 %v3615_v50, %v403_v16  ;;  %v754_v48 = vmul.f32 %v3615_v50, %v723_v44  ;;  %v2078_v15 = vld [vmem:[%s3086_s28 + $0x6e0] sm:$0xff] }
 0x129   : > { %2262 = vmatmul.mubr.f32.gmra.mxu0 %v2068_v39  ;;  %2573 = vmatmul.mubr.f32.gmra.mxu1 %v2379_v40  ;;  %v405_v49 = vpop.f32.mrf.mxu0  ;;  %v725_v19 = vpop.f32.mrf.mxu1  ;;  %v2389_v41 = vld [vmem:[%s3086_s28 + $0x7e0] sm:$0xff] }
 0x12a   : > { %2851 = vmatprep.mubr.msk.f32.mxu0 %vm224_vm1, %v2071_v42  ;;  %2868 = vmatprep.mubr.msk.f32.mxu1 %vm224_vm1, %v2382_v43  ;;  %490 = vst.msk [vmem:[%s3648_s4 + $0x58] sm:$0xff] %vm478_vm2, %v473_v45  ;;  %801 = vst.msk [vmem:[%s3648_s4 + $0xd8] sm:$0xff] %vm478_vm2, %v785_v46  ;;  %v458_v0 = vadd.f32 %v3627_v20, %v438_v47  ;;  %v770_v52 = vadd.f32 %v3627_v20, %v754_v48  ;;  %v2081_v45 = vld [vmem:[%s3086_s28 + $0x6f8] sm:$0xff] }
 0x12b   : > { %v2392_v46 = vld [vmem:[%s3086_s28 + $0x7f8] sm:$0xff] }
 0x12c   : > { %v474_v2 = vmax.f32 %v458_v0, 0.0  ;;  %v786_v55 = vmax.f32 %v770_v52, 0.0  ;;  %v408_v56 = vpop.f32.mrf.mxu0  ;;  %v728_v57 = vpop.f32.mrf.mxu1  ;;  %v2080_v0 = vld [vmem:[%s3086_s28 + $0x6f0] sm:$0xff] }
 0x12d   : > { %2267 = vmatmul.mubr.f32.gmra.mxu0 %v2070_v1  ;;  %2578 = vmatmul.mubr.f32.gmra.mxu1 %v2381_v51  ;;  %v439_v3 = vmul.f32 %v3615_v50, %v408_v56  ;;  %v755_v58 = vmul.f32 %v3615_v50, %v728_v57  ;;  %v2391_v52 = vld [vmem:[%s3086_s28 + $0x7f0] sm:$0xff] }
 0x12e   : > { %2852 = vmatprep.mubr.msk.f32.mxu0 %vm224_vm1, %v2073_v53  ;;  %2869 = vmatprep.mubr.msk.f32.mxu1 %vm224_vm1, %v2384_v54  ;;  %491 = vst.msk [vmem:[%s3648_s4 + $0x60] sm:$0xff] %vm478_vm2, %v474_v2  ;;  %802 = vst.msk [vmem:[%s3648_s4 + $0xe0] sm:$0xff] %vm478_vm2, %v786_v55  ;;  %v410_v60 = vpop.f32.mrf.mxu0  ;;  %v730_v61 = vpop.f32.mrf.mxu1 }
 0x12f   : > { %v459_v63 = vadd.f32 %v3627_v20, %v439_v3  ;;  %v771_v17 = vadd.f32 %v3627_v20, %v755_v58 }
 0x131   : > { %2272 = vmatmul.mubr.f32.gmra.mxu0 %v2072_v4  ;;  %2583 = vmatmul.mubr.f32.gmra.mxu1 %v2383_v59  ;;  %v475_v6 = vmax.f32 %v459_v63, 0.0  ;;  %v787_v18 = vmax.f32 %v771_v17, 0.0  ;;  %v413_v7 = vpop.f32.mrf.mxu0  ;;  %v733_v21 = vpop.f32.mrf.mxu1 }
 0x132   : > { %2853 = vmatprep.mubr.msk.f32.mxu0 %vm224_vm1, %v2075_v5  ;;  %2870 = vmatprep.mubr.msk.f32.mxu1 %vm224_vm1, %v2386_v62  ;;  %v440_v8 = vmul.f32 %v3615_v50, %v413_v7  ;;  %v756_v24 = vmul.f32 %v3615_v50, %v733_v21 }
 0x133   : > { %492 = vst.msk [vmem:[%s3648_s4 + $0x68] sm:$0xff] %vm478_vm2, %v475_v6  ;;  %803 = vst.msk [vmem:[%s3648_s4 + $0xe8] sm:$0xff] %vm478_vm2, %v787_v18  ;;  %v415_v9 = vpop.f32.mrf.mxu0  ;;  %v735_v27 = vpop.f32.mrf.mxu1 }
 0x134   : > { %v460_v28 = vadd.f32 %v3627_v20, %v440_v8  ;;  %v772_v29 = vadd.f32 %v3627_v20, %v756_v24 }
 0x135   : > { %2277 = vmatmul.mubr.f32.gmra.mxu0 %v2074_v22  ;;  %2588 = vmatmul.mubr.f32.gmra.mxu1 %v2385_v23  ;;  %v418_v10 = vpop.f32.mrf.mxu0  ;;  %v738_v30 = vpop.f32.mrf.mxu1 }
 0x136   : > { %2854 = vmatprep.mubr.msk.f32.mxu0 %vm224_vm1, %v2077_v25  ;;  %2871 = vmatprep.mubr.msk.f32.mxu1 %vm224_vm1, %v2388_v26  ;;  %v476_v32 = vmax.f32 %v460_v28, 0.0  ;;  %v788_v33 = vmax.f32 %v772_v29, 0.0  ;;  %v441_v12 = vmul.f32 %v3615_v50, %v418_v10  ;;  %v757_v34 = vmul.f32 %v3615_v50, %v738_v30 }
 0x137   : > { %v420_v13 = vpop.f32.mrf.mxu0  ;;  %v740_v37 = vpop.f32.mrf.mxu1 }
 0x138   : > { %493 = vst.msk [vmem:[%s3648_s4 + $0x70] sm:$0xff] %vm478_vm2, %v476_v32  ;;  %804 = vst.msk [vmem:[%s3648_s4 + $0xf0] sm:$0xff] %vm478_vm2, %v788_v33  ;;  %v461_v38 = vadd.f32 %v3627_v20, %v441_v12  ;;  %v773_v14 = vadd.f32 %v3627_v20, %v757_v34 }
 0x139   : > { %2282 = vmatmul.mubr.f32.gmra.mxu0 %v2076_v11  ;;  %2593 = vmatmul.mubr.f32.gmra.mxu1 %v2387_v31  ;;  %v974_v39 = vpop.f32.mrf.mxu0  ;;  %v1285_v40 = vpop.f32.mrf.mxu1 }
 0x13a   : > { %2855 = vmatprep.mubr.msk.f32.mxu0 %vm224_vm1, %v2079_v35  ;;  %2872 = vmatprep.mubr.msk.f32.mxu1 %vm224_vm1, %v2390_v36  ;;  %v477_v42 = vmax.f32 %v461_v38, 0.0  ;;  %v789_v43 = vmax.f32 %v773_v14, 0.0  ;;  %v1053_v16 = vmul.f32 %v3615_v50, %v974_v39  ;;  %v1364_v44 = vmul.f32 %v3615_v50, %v1285_v40 }
 0x13b   : > { %v976_v47 = vpop.f32.mrf.mxu0  ;;  %v1287_v48 = vpop.f32.mrf.mxu1 }
 0x13c   : > { %494 = vst.msk [vmem:[%s3648_s4 + $0x78] sm:$0xff] %vm478_vm2, %v477_v42  ;;  %805 = vst.msk [vmem:[%s3648_s4 + $0xf8] sm:$0xff] %vm478_vm2, %v789_v43  ;;  %v1069_v49 = vadd.f32 %v3627_v20, %v1053_v16  ;;  %v1380_v19 = vadd.f32 %v3627_v20, %v1364_v44 }
 0x13d   : > { %2287 = vmatmul.mubr.f32.gmra.mxu0 %v2078_v15  ;;  %2598 = vmatmul.mubr.f32.gmra.mxu1 %v2389_v41  ;;  %v979_v1 = vpop.f32.mrf.mxu0  ;;  %v1290_v51 = vpop.f32.mrf.mxu1 }
 0x13e   : > { %2856 = vmatprep.mubr.msk.f32.mxu0 %vm224_vm1, %v2081_v45  ;;  %2873 = vmatprep.mubr.msk.f32.mxu1 %vm224_vm1, %v2392_v46  ;;  %v1085_v53 = vmax.f32 %v1069_v49, 0.0  ;;  %v1396_v54 = vmax.f32 %v1380_v19, 0.0  ;;  %v1054_v2 = vmul.f32 %v3615_v50, %v979_v1  ;;  %v1365_v55 = vmul.f32 %v3615_v50, %v1290_v51 }
 0x13f   : > { %v981_v56 = vpop.f32.mrf.mxu0  ;;  %v1292_v57 = vpop.f32.mrf.mxu1 }
 0x140   : > { %1101 = vst.msk [vmem:[%s3648_s4 + $0x100] sm:$0xff] %vm478_vm2, %v1085_v53  ;;  %1412 = vst.msk [vmem:[%s3648_s4 + $0x180] sm:$0xff] %vm478_vm2, %v1396_v54  ;;  %v1070_v3 = vadd.f32 %v3627_v20, %v1054_v2  ;;  %v1381_v58 = vadd.f32 %v3627_v20, %v1365_v55 }
 0x141   : > { %2292 = vmatmul.mubr.f32.gmra.mxu0 %v2080_v0  ;;  %2603 = vmatmul.mubr.f32.gmra.mxu1 %v2391_v52 }
 0x142   : > { %v1086_v4 = vmax.f32 %v1070_v3, 0.0  ;;  %v1397_v59 = vmax.f32 %v1381_v58, 0.0  ;;  %v984_v60 = vpop.f32.mrf.mxu0  ;;  %v1295_v61 = vpop.f32.mrf.mxu1 }
 0x143   : > { %v1055_v5 = vmul.f32 %v3615_v50, %v984_v60  ;;  %v1366_v62 = vmul.f32 %v3615_v50, %v1295_v61 }
 0x144   : > { %1102 = vst.msk [vmem:[%s3648_s4 + $0x108] sm:$0xff] %vm478_vm2, %v1086_v4  ;;  %1413 = vst.msk [vmem:[%s3648_s4 + $0x188] sm:$0xff] %vm478_vm2, %v1397_v59  ;;  %v986_v63 = vpop.f32.mrf.mxu0  ;;  %v1297_v17 = vpop.f32.mrf.mxu1 }
 0x145   : > { %v1071_v6 = vadd.f32 %v3627_v20, %v1055_v5  ;;  %v1382_v18 = vadd.f32 %v3627_v20, %v1366_v62 }
 0x146   : > { %v989_v7 = vpop.f32.mrf.mxu0  ;;  %v1300_v21 = vpop.f32.mrf.mxu1 }
 0x147   : > { %v1087_v22 = vmax.f32 %v1071_v6, 0.0  ;;  %v1398_v23 = vmax.f32 %v1382_v18, 0.0  ;;  %v1056_v8 = vmul.f32 %v3615_v50, %v989_v7  ;;  %v1367_v24 = vmul.f32 %v3615_v50, %v1300_v21 }
 0x148   : > { %v991_v25 = vpop.f32.mrf.mxu0  ;;  %v1302_v26 = vpop.f32.mrf.mxu1 }
 0x149   : > { %1103 = vst.msk [vmem:[%s3648_s4 + $0x110] sm:$0xff] %vm478_vm2, %v1087_v22  ;;  %1414 = vst.msk [vmem:[%s3648_s4 + $0x190] sm:$0xff] %vm478_vm2, %v1398_v23  ;;  %v1072_v9 = vadd.f32 %v3627_v20, %v1056_v8  ;;  %v1383_v27 = vadd.f32 %v3627_v20, %v1367_v24 }
 0x14b   : > { %v1088_v28 = vmax.f32 %v1072_v9, 0.0  ;;  %v1399_v29 = vmax.f32 %v1383_v27, 0.0  ;;  %v994_v10 = vpop.f32.mrf.mxu0  ;;  %v1305_v30 = vpop.f32.mrf.mxu1 }
 0x14c   : > { %v1057_v11 = vmul.f32 %v3615_v50, %v994_v10  ;;  %v1368_v31 = vmul.f32 %v3615_v50, %v1305_v30 }
 0x14d   : > { %1104 = vst.msk [vmem:[%s3648_s4 + $0x118] sm:$0xff] %vm478_vm2, %v1088_v28  ;;  %1415 = vst.msk [vmem:[%s3648_s4 + $0x198] sm:$0xff] %vm478_vm2, %v1399_v29  ;;  %v996_v32 = vpop.f32.mrf.mxu0  ;;  %v1307_v33 = vpop.f32.mrf.mxu1 }
 0x14e   : > { %v1073_v12 = vadd.f32 %v3627_v20, %v1057_v11  ;;  %v1384_v34 = vadd.f32 %v3627_v20, %v1368_v31 }
 0x14f   : > { %v999_v35 = vpop.f32.mrf.mxu0  ;;  %v1310_v36 = vpop.f32.mrf.mxu1 }
 0x150   : > { %v1089_v13 = vmax.f32 %v1073_v12, 0.0  ;;  %v1400_v37 = vmax.f32 %v1384_v34, 0.0  ;;  %v1058_v38 = vmul.f32 %v3615_v50, %v999_v35  ;;  %v1369_v14 = vmul.f32 %v3615_v50, %v1310_v36 }
 0x151   : > { %v1001_v39 = vpop.f32.mrf.mxu0  ;;  %v1312_v40 = vpop.f32.mrf.mxu1 }
 0x152   : > { %1105 = vst.msk [vmem:[%s3648_s4 + $0x120] sm:$0xff] %vm478_vm2, %v1089_v13  ;;  %1416 = vst.msk [vmem:[%s3648_s4 + $0x1a0] sm:$0xff] %vm478_vm2, %v1400_v37  ;;  %v1074_v15 = vadd.f32 %v3627_v20, %v1058_v38  ;;  %v1385_v41 = vadd.f32 %v3627_v20, %v1369_v14  ;;  %v3990_v37 = vld [vmem:[%s4301_s2] ss:$0 sm:$0xff] }
 0x153   : > { %v1004_v42 = vpop.f32.mrf.mxu0  ;;  %v1315_v43 = vpop.f32.mrf.mxu1 }
 0x154   : > { %v1090_v16 = vmax.f32 %v1074_v15, 0.0  ;;  %v1401_v44 = vmax.f32 %v1385_v41, 0.0  ;;  %v1059_v45 = vmul.f32 %v3615_v50, %v1004_v42  ;;  %v1370_v46 = vmul.f32 %v3615_v50, %v1315_v43 }
 0x155   : > { %v1006_v47 = vpop.f32.mrf.mxu0  ;;  %v1317_v48 = vpop.f32.mrf.mxu1 }
 0x156   : > { %1106 = vst.msk [vmem:[%s3648_s4 + $0x128] sm:$0xff] %vm478_vm2, %v1090_v16  ;;  %1417 = vst.msk [vmem:[%s3648_s4 + $0x1a8] sm:$0xff] %vm478_vm2, %v1401_v44  ;;  %v1075_v49 = vadd.f32 %v3627_v20, %v1059_v45  ;;  %v1386_v19 = vadd.f32 %v3627_v20, %v1370_v46 }
 0x158   : > { %v1091_v1 = vmax.f32 %v1075_v49, 0.0  ;;  %v1402_v51 = vmax.f32 %v1386_v19, 0.0  ;;  %v1009_v0 = vpop.f32.mrf.mxu0  ;;  %v1320_v52 = vpop.f32.mrf.mxu1 }
 0x159   : > { %v1060_v53 = vmul.f32 %v3615_v50, %v1009_v0  ;;  %v1371_v54 = vmul.f32 %v3615_v50, %v1320_v52 }
 0x15a   : > { %1107 = vst.msk [vmem:[%s3648_s4 + $0x130] sm:$0xff] %vm478_vm2, %v1091_v1  ;;  %1418 = vst.msk [vmem:[%s3648_s4 + $0x1b0] sm:$0xff] %vm478_vm2, %v1402_v51  ;;  %v1011_v2 = vpop.f32.mrf.mxu0  ;;  %v1322_v55 = vpop.f32.mrf.mxu1 }
 0x15b   : > { %v1076_v56 = vadd.f32 %v3627_v20, %v1060_v53  ;;  %v1387_v57 = vadd.f32 %v3627_v20, %v1371_v54 }
 0x15c   : > { %v1014_v3 = vpop.f32.mrf.mxu0  ;;  %v1325_v58 = vpop.f32.mrf.mxu1 }
 0x15d   : > { %v1092_v4 = vmax.f32 %v1076_v56, 0.0  ;;  %v1403_v59 = vmax.f32 %v1387_v57, 0.0  ;;  %v1061_v60 = vmul.f32 %v3615_v50, %v1014_v3  ;;  %v1372_v61 = vmul.f32 %v3615_v50, %v1325_v58 }
 0x15e   : > { %v1016_v5 = vpop.f32.mrf.mxu0  ;;  %v1327_v62 = vpop.f32.mrf.mxu1 }
 0x15f   : > { %1108 = vst.msk [vmem:[%s3648_s4 + $0x138] sm:$0xff] %vm478_vm2, %v1092_v4  ;;  %1419 = vst.msk [vmem:[%s3648_s4 + $0x1b8] sm:$0xff] %vm478_vm2, %v1403_v59  ;;  %v1077_v63 = vadd.f32 %v3627_v20, %v1061_v60  ;;  %v1388_v17 = vadd.f32 %v3627_v20, %v1372_v61 }
 0x161   : > { %v1093_v6 = vmax.f32 %v1077_v63, 0.0  ;;  %v1404_v18 = vmax.f32 %v1388_v17, 0.0  ;;  %v1019_v7 = vpop.f32.mrf.mxu0  ;;  %v1330_v21 = vpop.f32.mrf.mxu1 }
 0x162   : > { %v1062_v22 = vmul.f32 %v3615_v50, %v1019_v7  ;;  %v1373_v23 = vmul.f32 %v3615_v50, %v1330_v21 }
 0x163   : > { %1109 = vst.msk [vmem:[%s3648_s4 + $0x140] sm:$0xff] %vm478_vm2, %v1093_v6  ;;  %1420 = vst.msk [vmem:[%s3648_s4 + $0x1c0] sm:$0xff] %vm478_vm2, %v1404_v18  ;;  %v1021_v8 = vpop.f32.mrf.mxu0  ;;  %v1332_v24 = vpop.f32.mrf.mxu1 }
 0x164   : > { %v1078_v25 = vadd.f32 %v3627_v20, %v1062_v22  ;;  %v1389_v26 = vadd.f32 %v3627_v20, %v1373_v23 }
 0x165   : > { %v1024_v9 = vpop.f32.mrf.mxu0  ;;  %v1335_v27 = vpop.f32.mrf.mxu1 }
 0x166   : > { %v1094_v28 = vmax.f32 %v1078_v25, 0.0  ;;  %v1405_v29 = vmax.f32 %v1389_v26, 0.0  ;;  %v1063_v10 = vmul.f32 %v3615_v50, %v1024_v9  ;;  %v1374_v30 = vmul.f32 %v3615_v50, %v1335_v27 }
 0x167   : > { %v1026_v11 = vpop.f32.mrf.mxu0  ;;  %v1337_v31 = vpop.f32.mrf.mxu1 }
 0x168   : > { %1110 = vst.msk [vmem:[%s3648_s4 + $0x148] sm:$0xff] %vm478_vm2, %v1094_v28  ;;  %1421 = vst.msk [vmem:[%s3648_s4 + $0x1c8] sm:$0xff] %vm478_vm2, %v1405_v29  ;;  %v1079_v32 = vadd.f32 %v3627_v20, %v1063_v10  ;;  %v1390_v33 = vadd.f32 %v3627_v20, %v1374_v30 }
 0x169   : > { %v1029_v12 = vpop.f32.mrf.mxu0  ;;  %v1340_v34 = vpop.f32.mrf.mxu1 }
 0x16a   : > { %v1095_v35 = vmax.f32 %v1079_v32, 0.0  ;;  %v1406_v36 = vmax.f32 %v1390_v33, 0.0  ;;  %v1064_v13 = vmul.f32 %v3615_v50, %v1029_v12  ;;  %v1375_v38 = vmul.f32 %v3990_v37, %v1340_v34 }
 0x16b   : > { %v1031_v14 = vpop.f32.mrf.mxu0  ;;  %v1342_v39 = vpop.f32.mrf.mxu1 }
 0x16c   : > { %1111 = vst.msk [vmem:[%s3648_s4 + $0x150] sm:$0xff] %vm478_vm2, %v1095_v35  ;;  %1422 = vst.msk [vmem:[%s3648_s4 + $0x1d0] sm:$0xff] %vm478_vm2, %v1406_v36  ;;  %v1080_v40 = vadd.f32 %v3627_v20, %v1064_v13  ;;  %v1391_v15 = vadd.f32 %v3627_v20, %v1375_v38  ;;  %v4008_v20 = vld [vmem:[%s4301_s2 + $0x1] ss:$0 sm:$0xff] }
 0x16d   : > { %v1034_v50 = vpop.f32.mrf.mxu0  ;;  %v1345_v41 = vpop.f32.mrf.mxu1 }
 0x16e   : > { %v1096_v42 = vmax.f32 %v1080_v40, 0.0  ;;  %v1407_v43 = vmax.f32 %v1391_v15, 0.0  ;;  %v1065_v16 = vmul.f32 %v3990_v37, %v1034_v50  ;;  %v1376_v44 = vmul.f32 %v3990_v37, %v1345_v41 }
 0x16f   : > { %v1036_v45 = vpop.f32.mrf.mxu0  ;;  %v1347_v46 = vpop.f32.mrf.mxu1 }
 0x170   : > { %1112 = vst.msk [vmem:[%s3648_s4 + $0x158] sm:$0xff] %vm478_vm2, %v1096_v42  ;;  %1423 = vst.msk [vmem:[%s3648_s4 + $0x1d8] sm:$0xff] %vm478_vm2, %v1407_v43  ;;  %v1081_v47 = vadd.f32 %v4008_v20, %v1065_v16  ;;  %v1392_v48 = vadd.f32 %v4008_v20, %v1376_v44 }
 0x172   : > { %v1097_v49 = vmax.f32 %v1081_v47, 0.0  ;;  %v1408_v19 = vmax.f32 %v1392_v48, 0.0  ;;  %v1039_v1 = vpop.f32.mrf.mxu0  ;;  %v1350_v51 = vpop.f32.mrf.mxu1 }
 0x173   : > { %v1066_v0 = vmul.f32 %v3990_v37, %v1039_v1  ;;  %v1377_v52 = vmul.f32 %v3990_v37, %v1350_v51 }
 0x174   : > { %1113 = vst.msk [vmem:[%s3648_s4 + $0x160] sm:$0xff] %vm478_vm2, %v1097_v49  ;;  %1424 = vst.msk [vmem:[%s3648_s4 + $0x1e0] sm:$0xff] %vm478_vm2, %v1408_v19  ;;  %v1041_v53 = vpop.f32.mrf.mxu0  ;;  %v1352_v54 = vpop.f32.mrf.mxu1 }
 0x175   : > { %v1082_v2 = vadd.f32 %v4008_v20, %v1066_v0  ;;  %v1393_v55 = vadd.f32 %v4008_v20, %v1377_v52 }
 0x177   : > { %v1098_v56 = vmax.f32 %v1082_v2, 0.0  ;;  %v1409_v57 = vmax.f32 %v1393_v55, 0.0  ;;  %v1044_v3 = vpop.f32.mrf.mxu0  ;;  %v1355_v58 = vpop.f32.mrf.mxu1 }
 0x178   : > { %v1067_v4 = vmul.f32 %v3990_v37, %v1044_v3  ;;  %v1378_v59 = vmul.f32 %v3990_v37, %v1355_v58 }
 0x179   : > { %1114 = vst.msk [vmem:[%s3648_s4 + $0x168] sm:$0xff] %vm478_vm2, %v1098_v56  ;;  %1425 = vst.msk [vmem:[%s3648_s4 + $0x1e8] sm:$0xff] %vm478_vm2, %v1409_v57  ;;  %v1046_v60 = vpop.f32.mrf.mxu0  ;;  %v1357_v61 = vpop.f32.mrf.mxu1 }
 0x17a   : > { %v1083_v5 = vadd.f32 %v4008_v20, %v1067_v4  ;;  %v1394_v62 = vadd.f32 %v4008_v20, %v1378_v59 }
 0x17b   : > { %v1049_v63 = vpop.f32.mrf.mxu0  ;;  %v1360_v17 = vpop.f32.mrf.mxu1 }
 0x17c   : > { %v1099_v6 = vmax.f32 %v1083_v5, 0.0  ;;  %v1410_v18 = vmax.f32 %v1394_v62, 0.0  ;;  %v1068_v7 = vmul.f32 %v3990_v37, %v1049_v63  ;;  %v1379_v21 = vmul.f32 %v3990_v37, %v1360_v17 }
 0x17d   : > { %v1051_v22 = vpop.f32.mrf.mxu0  ;;  %v1362_v23 = vpop.f32.mrf.mxu1 }
 0x17e   : > { %1115 = vst.msk [vmem:[%s3648_s4 + $0x170] sm:$0xff] %vm478_vm2, %v1099_v6  ;;  %1426 = vst.msk [vmem:[%s3648_s4 + $0x1f0] sm:$0xff] %vm478_vm2, %v1410_v18  ;;  %v1084_v8 = vadd.f32 %v4008_v20, %v1068_v7  ;;  %v1395_v24 = vadd.f32 %v4008_v20, %v1379_v21 }
 0x17f   : > { %v1596_v25 = vpop.f32.mrf.mxu0  ;;  %v1907_v26 = vpop.f32.mrf.mxu1 }
 0x180   : > { %v1100_v9 = vmax.f32 %v1084_v8, 0.0  ;;  %v1411_v27 = vmax.f32 %v1395_v24, 0.0  ;;  %v1675_v28 = vmul.f32 %v3990_v37, %v1596_v25  ;;  %v1986_v29 = vmul.f32 %v3990_v37, %v1907_v26 }
 0x181   : > { %v1598_v10 = vpop.f32.mrf.mxu0  ;;  %v1909_v30 = vpop.f32.mrf.mxu1 }
 0x182   : > { %1116 = vst.msk [vmem:[%s3648_s4 + $0x178] sm:$0xff] %vm478_vm2, %v1100_v9  ;;  %1427 = vst.msk [vmem:[%s3648_s4 + $0x1f8] sm:$0xff] %vm478_vm2, %v1411_v27  ;;  %v1691_v11 = vadd.f32 %v4008_v20, %v1675_v28  ;;  %v2002_v31 = vadd.f32 %v4008_v20, %v1986_v29 }
 0x183   : > { %v1601_v32 = vpop.f32.mrf.mxu0  ;;  %v1912_v33 = vpop.f32.mrf.mxu1 }
 0x184   : > { %v1707_v12 = vmax.f32 %v1691_v11, 0.0  ;;  %v2018_v34 = vmax.f32 %v2002_v31, 0.0  ;;  %v1676_v35 = vmul.f32 %v3990_v37, %v1601_v32  ;;  %v1987_v36 = vmul.f32 %v3990_v37, %v1912_v33 }
 0x185   : > { %v1603_v13 = vpop.f32.mrf.mxu0  ;;  %v1914_v38 = vpop.f32.mrf.mxu1 }
 0x186   : > { %1723 = vst.msk [vmem:[%s3648_s4 + $0x200] sm:$0xff] %vm478_vm2, %v1707_v12  ;;  %2034 = vst.msk [vmem:[%s3648_s4 + $0x280] sm:$0xff] %vm478_vm2, %v2018_v34  ;;  %v1692_v14 = vadd.f32 %v4008_v20, %v1676_v35  ;;  %v2003_v39 = vadd.f32 %v4008_v20, %v1987_v36 }
 0x188   : > { %v1708_v40 = vmax.f32 %v1692_v14, 0.0  ;;  %v2019_v15 = vmax.f32 %v2003_v39, 0.0  ;;  %v1606_v50 = vpop.f32.mrf.mxu0  ;;  %v1917_v41 = vpop.f32.mrf.mxu1 }
 0x189   : > { %v1677_v42 = vmul.f32 %v3990_v37, %v1606_v50  ;;  %v1988_v43 = vmul.f32 %v3990_v37, %v1917_v41 }
 0x18a   : > { %1724 = vst.msk [vmem:[%s3648_s4 + $0x208] sm:$0xff] %vm478_vm2, %v1708_v40  ;;  %2035 = vst.msk [vmem:[%s3648_s4 + $0x288] sm:$0xff] %vm478_vm2, %v2019_v15  ;;  %v1608_v16 = vpop.f32.mrf.mxu0  ;;  %v1919_v44 = vpop.f32.mrf.mxu1 }
 0x18b   : > { %v1693_v45 = vadd.f32 %v4008_v20, %v1677_v42  ;;  %v2004_v46 = vadd.f32 %v4008_v20, %v1988_v43 }
 0x18c   : > { %v1611_v47 = vpop.f32.mrf.mxu0  ;;  %v1922_v48 = vpop.f32.mrf.mxu1 }
 0x18d   : > { %v1709_v49 = vmax.f32 %v1693_v45, 0.0  ;;  %v2020_v19 = vmax.f32 %v2004_v46, 0.0  ;;  %v1678_v1 = vmul.f32 %v3990_v37, %v1611_v47  ;;  %v1989_v51 = vmul.f32 %v3990_v37, %v1922_v48 }
 0x18e   : > { %v1613_v0 = vpop.f32.mrf.mxu0  ;;  %v1924_v52 = vpop.f32.mrf.mxu1 }
 0x18f   : > { %1725 = vst.msk [vmem:[%s3648_s4 + $0x210] sm:$0xff] %vm478_vm2, %v1709_v49  ;;  %2036 = vst.msk [vmem:[%s3648_s4 + $0x290] sm:$0xff] %vm478_vm2, %v2020_v19  ;;  %v1694_v53 = vadd.f32 %v4008_v20, %v1678_v1  ;;  %v2005_v54 = vadd.f32 %v4008_v20, %v1989_v51 }
 0x191   : > { %v1710_v2 = vmax.f32 %v1694_v53, 0.0  ;;  %v2021_v55 = vmax.f32 %v2005_v54, 0.0  ;;  %v1616_v56 = vpop.f32.mrf.mxu0  ;;  %v1927_v57 = vpop.f32.mrf.mxu1 }
 0x192   : > { %v1679_v3 = vmul.f32 %v3990_v37, %v1616_v56  ;;  %v1990_v58 = vmul.f32 %v3990_v37, %v1927_v57 }
 0x193   : > { %1726 = vst.msk [vmem:[%s3648_s4 + $0x218] sm:$0xff] %vm478_vm2, %v1710_v2  ;;  %2037 = vst.msk [vmem:[%s3648_s4 + $0x298] sm:$0xff] %vm478_vm2, %v2021_v55  ;;  %v1618_v4 = vpop.f32.mrf.mxu0  ;;  %v1929_v59 = vpop.f32.mrf.mxu1 }
 0x194   : > { %v1695_v60 = vadd.f32 %v4008_v20, %v1679_v3  ;;  %v2006_v61 = vadd.f32 %v4008_v20, %v1990_v58 }
 0x195   : > { %v1621_v5 = vpop.f32.mrf.mxu0  ;;  %v1932_v62 = vpop.f32.mrf.mxu1 }
 0x196   : > { %v1711_v63 = vmax.f32 %v1695_v60, 0.0  ;;  %v2022_v17 = vmax.f32 %v2006_v61, 0.0  ;;  %v1680_v6 = vmul.f32 %v3990_v37, %v1621_v5  ;;  %v1991_v18 = vmul.f32 %v3990_v37, %v1932_v62 }
 0x197   : > { %v1623_v7 = vpop.f32.mrf.mxu0  ;;  %v1934_v21 = vpop.f32.mrf.mxu1 }
 0x198   : > { %1727 = vst.msk [vmem:[%s3648_s4 + $0x220] sm:$0xff] %vm478_vm2, %v1711_v63  ;;  %2038 = vst.msk [vmem:[%s3648_s4 + $0x2a0] sm:$0xff] %vm478_vm2, %v2022_v17  ;;  %v1696_v22 = vadd.f32 %v4008_v20, %v1680_v6  ;;  %v2007_v23 = vadd.f32 %v4008_v20, %v1991_v18 }
 0x199   : > { %v1626_v8 = vpop.f32.mrf.mxu0  ;;  %v1937_v24 = vpop.f32.mrf.mxu1 }
 0x19a   : > { %v1712_v25 = vmax.f32 %v1696_v22, 0.0  ;;  %v2023_v26 = vmax.f32 %v2007_v23, 0.0  ;;  %v1681_v9 = vmul.f32 %v3990_v37, %v1626_v8  ;;  %v1992_v27 = vmul.f32 %v3990_v37, %v1937_v24 }
 0x19b   : > { %v1628_v28 = vpop.f32.mrf.mxu0  ;;  %v1939_v29 = vpop.f32.mrf.mxu1 }
 0x19c   : > { %1728 = vst.msk [vmem:[%s3648_s4 + $0x228] sm:$0xff] %vm478_vm2, %v1712_v25  ;;  %2039 = vst.msk [vmem:[%s3648_s4 + $0x2a8] sm:$0xff] %vm478_vm2, %v2023_v26  ;;  %v1697_v10 = vadd.f32 %v4008_v20, %v1681_v9  ;;  %v2008_v30 = vadd.f32 %v4008_v20, %v1992_v27 }
 0x19e   : > { %v1713_v11 = vmax.f32 %v1697_v10, 0.0  ;;  %v2024_v31 = vmax.f32 %v2008_v30, 0.0  ;;  %v1631_v32 = vpop.f32.mrf.mxu0  ;;  %v1942_v33 = vpop.f32.mrf.mxu1 }
 0x19f   : > { %v1682_v12 = vmul.f32 %v3990_v37, %v1631_v32  ;;  %v1993_v34 = vmul.f32 %v3990_v37, %v1942_v33 }
 0x1a0   : > { %1729 = vst.msk [vmem:[%s3648_s4 + $0x230] sm:$0xff] %vm478_vm2, %v1713_v11  ;;  %2040 = vst.msk [vmem:[%s3648_s4 + $0x2b0] sm:$0xff] %vm478_vm2, %v2024_v31  ;;  %v1633_v35 = vpop.f32.mrf.mxu0  ;;  %v1944_v36 = vpop.f32.mrf.mxu1 }
 0x1a1   : > { %v1698_v13 = vadd.f32 %v4008_v20, %v1682_v12  ;;  %v2009_v38 = vadd.f32 %v4008_v20, %v1993_v34 }
 0x1a2   : > { %v1636_v14 = vpop.f32.mrf.mxu0  ;;  %v1947_v39 = vpop.f32.mrf.mxu1 }
 0x1a3   : > { %v1714_v40 = vmax.f32 %v1698_v13, 0.0  ;;  %v2025_v15 = vmax.f32 %v2009_v38, 0.0  ;;  %v1683_v50 = vmul.f32 %v3990_v37, %v1636_v14  ;;  %v1994_v41 = vmul.f32 %v3990_v37, %v1947_v39 }
 0x1a4   : > { %v1638_v42 = vpop.f32.mrf.mxu0  ;;  %v1949_v43 = vpop.f32.mrf.mxu1 }
 0x1a5   : > { %1730 = vst.msk [vmem:[%s3648_s4 + $0x238] sm:$0xff] %vm478_vm2, %v1714_v40  ;;  %2041 = vst.msk [vmem:[%s3648_s4 + $0x2b8] sm:$0xff] %vm478_vm2, %v2025_v15  ;;  %v1699_v16 = vadd.f32 %v4008_v20, %v1683_v50  ;;  %v2010_v44 = vadd.f32 %v4008_v20, %v1994_v41 }
 0x1a7   : > { %v1715_v45 = vmax.f32 %v1699_v16, 0.0  ;;  %v2026_v46 = vmax.f32 %v2010_v44, 0.0  ;;  %v1641_v47 = vpop.f32.mrf.mxu0  ;;  %v1952_v48 = vpop.f32.mrf.mxu1 }
 0x1a8   : > { %v1684_v49 = vmul.f32 %v3990_v37, %v1641_v47  ;;  %v1995_v19 = vmul.f32 %v3990_v37, %v1952_v48 }
 0x1a9   : > { %1731 = vst.msk [vmem:[%s3648_s4 + $0x240] sm:$0xff] %vm478_vm2, %v1715_v45  ;;  %2042 = vst.msk [vmem:[%s3648_s4 + $0x2c0] sm:$0xff] %vm478_vm2, %v2026_v46  ;;  %v1643_v1 = vpop.f32.mrf.mxu0  ;;  %v1954_v51 = vpop.f32.mrf.mxu1 }
 0x1aa   : > { %v1700_v0 = vadd.f32 %v4008_v20, %v1684_v49  ;;  %v2011_v52 = vadd.f32 %v4008_v20, %v1995_v19 }
 0x1ab   : > { %v1646_v53 = vpop.f32.mrf.mxu0  ;;  %v1957_v54 = vpop.f32.mrf.mxu1 }
 0x1ac   : > { %v1716_v2 = vmax.f32 %v1700_v0, 0.0  ;;  %v2027_v55 = vmax.f32 %v2011_v52, 0.0  ;;  %v1685_v56 = vmul.f32 %v3990_v37, %v1646_v53  ;;  %v1996_v57 = vmul.f32 %v3990_v37, %v1957_v54 }
 0x1ad   : > { %v1648_v3 = vpop.f32.mrf.mxu0  ;;  %v1959_v58 = vpop.f32.mrf.mxu1 }
 0x1ae   : > { %1732 = vst.msk [vmem:[%s3648_s4 + $0x248] sm:$0xff] %vm478_vm2, %v1716_v2  ;;  %2043 = vst.msk [vmem:[%s3648_s4 + $0x2c8] sm:$0xff] %vm478_vm2, %v2027_v55  ;;  %v1701_v4 = vadd.f32 %v4008_v20, %v1685_v56  ;;  %v2012_v59 = vadd.f32 %v4008_v20, %v1996_v57 }
 0x1af   : > { %v1651_v60 = vpop.f32.mrf.mxu0  ;;  %v1962_v61 = vpop.f32.mrf.mxu1 }
 0x1b0   : > { %v1717_v5 = vmax.f32 %v1701_v4, 0.0  ;;  %v2028_v62 = vmax.f32 %v2012_v59, 0.0  ;;  %v1686_v63 = vmul.f32 %v3990_v37, %v1651_v60  ;;  %v1997_v17 = vmul.f32 %v3990_v37, %v1962_v61 }
 0x1b1   : > { %v1653_v6 = vpop.f32.mrf.mxu0  ;;  %v1964_v18 = vpop.f32.mrf.mxu1 }
 0x1b2   : > { %1733 = vst.msk [vmem:[%s3648_s4 + $0x250] sm:$0xff] %vm478_vm2, %v1717_v5  ;;  %2044 = vst.msk [vmem:[%s3648_s4 + $0x2d0] sm:$0xff] %vm478_vm2, %v2028_v62  ;;  %v1702_v7 = vadd.f32 %v4008_v20, %v1686_v63  ;;  %v2013_v21 = vadd.f32 %v4008_v20, %v1997_v17 }
 0x1b3   : > { %v1656_v22 = vpop.f32.mrf.mxu0  ;;  %v1967_v23 = vpop.f32.mrf.mxu1 }
 0x1b4   : > { %v1718_v8 = vmax.f32 %v1702_v7, 0.0  ;;  %v2029_v24 = vmax.f32 %v2013_v21, 0.0  ;;  %v1687_v25 = vmul.f32 %v3990_v37, %v1656_v22  ;;  %v1998_v26 = vmul.f32 %v3990_v37, %v1967_v23 }
 0x1b5   : > { %v1658_v9 = vpop.f32.mrf.mxu0  ;;  %v1969_v27 = vpop.f32.mrf.mxu1 }
 0x1b6   : > { %1734 = vst.msk [vmem:[%s3648_s4 + $0x258] sm:$0xff] %vm478_vm2, %v1718_v8  ;;  %2045 = vst.msk [vmem:[%s3648_s4 + $0x2d8] sm:$0xff] %vm478_vm2, %v2029_v24  ;;  %v1703_v28 = vadd.f32 %v4008_v20, %v1687_v25  ;;  %v2014_v29 = vadd.f32 %v4008_v20, %v1998_v26 }
 0x1b8   : > { %v1719_v10 = vmax.f32 %v1703_v28, 0.0  ;;  %v2030_v30 = vmax.f32 %v2014_v29, 0.0  ;;  %v1661_v11 = vpop.f32.mrf.mxu0  ;;  %v1972_v31 = vpop.f32.mrf.mxu1 }
 0x1b9   : > { %v1688_v32 = vmul.f32 %v3990_v37, %v1661_v11  ;;  %v1999_v33 = vmul.f32 %v3990_v37, %v1972_v31 }
 0x1ba   : > { %1735 = vst.msk [vmem:[%s3648_s4 + $0x260] sm:$0xff] %vm478_vm2, %v1719_v10  ;;  %2046 = vst.msk [vmem:[%s3648_s4 + $0x2e0] sm:$0xff] %vm478_vm2, %v2030_v30  ;;  %v1663_v12 = vpop.f32.mrf.mxu0  ;;  %v1974_v34 = vpop.f32.mrf.mxu1 }
 0x1bb   : > { %v1704_v35 = vadd.f32 %v4008_v20, %v1688_v32  ;;  %v2015_v36 = vadd.f32 %v4008_v20, %v1999_v33 }
 0x1bd   : > { %v1720_v13 = vmax.f32 %v1704_v35, 0.0  ;;  %v2031_v38 = vmax.f32 %v2015_v36, 0.0  ;;  %v1666_v14 = vpop.f32.mrf.mxu0  ;;  %v1977_v39 = vpop.f32.mrf.mxu1 }
 0x1be   : > { %v1689_v40 = vmul.f32 %v3990_v37, %v1666_v14  ;;  %v2000_v15 = vmul.f32 %v3990_v37, %v1977_v39 }
 0x1bf   : > { %1736 = vst.msk [vmem:[%s3648_s4 + $0x268] sm:$0xff] %vm478_vm2, %v1720_v13  ;;  %2047 = vst.msk [vmem:[%s3648_s4 + $0x2e8] sm:$0xff] %vm478_vm2, %v2031_v38  ;;  %v1668_v50 = vpop.f32.mrf.mxu0  ;;  %v1979_v41 = vpop.f32.mrf.mxu1 }
 0x1c0   : > { %v1705_v42 = vadd.f32 %v4008_v20, %v1689_v40  ;;  %v2016_v43 = vadd.f32 %v4008_v20, %v2000_v15 }
 0x1c1   : > { %v1671_v16 = vpop.f32.mrf.mxu0  ;;  %v1982_v44 = vpop.f32.mrf.mxu1 }
 0x1c2   : > { %v1721_v45 = vmax.f32 %v1705_v42, 0.0  ;;  %v2032_v46 = vmax.f32 %v2016_v43, 0.0  ;;  %v1690_v47 = vmul.f32 %v3990_v37, %v1671_v16  ;;  %v2001_v48 = vmul.f32 %v3990_v37, %v1982_v44 }
 0x1c3   : > { %v1673_v49 = vpop.f32.mrf.mxu0  ;;  %v1984_v19 = vpop.f32.mrf.mxu1 }
 0x1c4   : > { %1737 = vst.msk [vmem:[%s3648_s4 + $0x270] sm:$0xff] %vm478_vm2, %v1721_v45  ;;  %2048 = vst.msk [vmem:[%s3648_s4 + $0x2f0] sm:$0xff] %vm478_vm2, %v2032_v46  ;;  %v1706_v1 = vadd.f32 %v4008_v20, %v1690_v47  ;;  %v2017_v51 = vadd.f32 %v4008_v20, %v2001_v48 }
 0x1c5   : > { %v2218_v0 = vpop.f32.mrf.mxu0  ;;  %v2529_v52 = vpop.f32.mrf.mxu1 }
 0x1c6   : > { %v1722_v53 = vmax.f32 %v1706_v1, 0.0  ;;  %v2033_v54 = vmax.f32 %v2017_v51, 0.0  ;;  %v2297_v2 = vmul.f32 %v3990_v37, %v2218_v0  ;;  %v2608_v55 = vmul.f32 %v3990_v37, %v2529_v52 }
 0x1c7   : > { %v2220_v56 = vpop.f32.mrf.mxu0  ;;  %v2531_v57 = vpop.f32.mrf.mxu1 }
 0x1c8   : > { %1738 = vst.msk [vmem:[%s3648_s4 + $0x278] sm:$0xff] %vm478_vm2, %v1722_v53  ;;  %2049 = vst.msk [vmem:[%s3648_s4 + $0x2f8] sm:$0xff] %vm478_vm2, %v2033_v54  ;;  %v2313_v3 = vadd.f32 %v4008_v20, %v2297_v2  ;;  %v2624_v58 = vadd.f32 %v4008_v20, %v2608_v55 }
 0x1c9   : > { %v2223_v4 = vpop.f32.mrf.mxu0  ;;  %v2534_v59 = vpop.f32.mrf.mxu1 }
 0x1ca   : > { %v2329_v60 = vmax.f32 %v2313_v3, 0.0  ;;  %v2640_v61 = vmax.f32 %v2624_v58, 0.0  ;;  %v2298_v5 = vmul.f32 %v3990_v37, %v2223_v4  ;;  %v2609_v62 = vmul.f32 %v3990_v37, %v2534_v59 }
 0x1cb   : > { %v2225_v63 = vpop.f32.mrf.mxu0  ;;  %v2536_v17 = vpop.f32.mrf.mxu1 }
 0x1cc   : > { %2345 = vst.msk [vmem:[%s3648_s4 + $0x300] sm:$0xff] %vm478_vm2, %v2329_v60  ;;  %2656 = vst.msk [vmem:[%s3648_s4 + $0x380] sm:$0xff] %vm478_vm2, %v2640_v61  ;;  %v2314_v6 = vadd.f32 %v4008_v20, %v2298_v5  ;;  %v2625_v18 = vadd.f32 %v4008_v20, %v2609_v62 }
 0x1cd   : > { %v2228_v7 = vpop.f32.mrf.mxu0  ;;  %v2539_v21 = vpop.f32.mrf.mxu1 }
 0x1ce   : > { %v2330_v22 = vmax.f32 %v2314_v6, 0.0  ;;  %v2641_v23 = vmax.f32 %v2625_v18, 0.0  ;;  %v2299_v8 = vmul.f32 %v3990_v37, %v2228_v7  ;;  %v2610_v24 = vmul.f32 %v3990_v37, %v2539_v21 }
 0x1cf   : > { %v2230_v25 = vpop.f32.mrf.mxu0  ;;  %v2541_v26 = vpop.f32.mrf.mxu1 }
 0x1d0   : > { %2346 = vst.msk [vmem:[%s3648_s4 + $0x308] sm:$0xff] %vm478_vm2, %v2330_v22  ;;  %2657 = vst.msk [vmem:[%s3648_s4 + $0x388] sm:$0xff] %vm478_vm2, %v2641_v23  ;;  %v2315_v9 = vadd.f32 %v4008_v20, %v2299_v8  ;;  %v2626_v27 = vadd.f32 %v4008_v20, %v2610_v24 }
 0x1d1   : > { %v2233_v28 = vpop.f32.mrf.mxu0  ;;  %v2544_v29 = vpop.f32.mrf.mxu1 }
 0x1d2   : > { %v2331_v10 = vmax.f32 %v2315_v9, 0.0  ;;  %v2642_v30 = vmax.f32 %v2626_v27, 0.0  ;;  %v2300_v11 = vmul.f32 %v3990_v37, %v2233_v28  ;;  %v2611_v31 = vmul.f32 %v3990_v37, %v2544_v29 }
 0x1d3   : > { %v2235_v32 = vpop.f32.mrf.mxu0  ;;  %v2546_v33 = vpop.f32.mrf.mxu1 }
 0x1d4   : > { %2347 = vst.msk [vmem:[%s3648_s4 + $0x310] sm:$0xff] %vm478_vm2, %v2331_v10  ;;  %2658 = vst.msk [vmem:[%s3648_s4 + $0x390] sm:$0xff] %vm478_vm2, %v2642_v30  ;;  %v2316_v12 = vadd.f32 %v4008_v20, %v2300_v11  ;;  %v2627_v34 = vadd.f32 %v4008_v20, %v2611_v31 }
 0x1d5   : > { %v2238_v35 = vpop.f32.mrf.mxu0  ;;  %v2549_v36 = vpop.f32.mrf.mxu1 }
 0x1d6   : > { %v2332_v13 = vmax.f32 %v2316_v12, 0.0  ;;  %v2643_v38 = vmax.f32 %v2627_v34, 0.0  ;;  %v2301_v14 = vmul.f32 %v3990_v37, %v2238_v35  ;;  %v2612_v39 = vmul.f32 %v3990_v37, %v2549_v36 }
 0x1d7   : > { %v2240_v40 = vpop.f32.mrf.mxu0  ;;  %v2551_v15 = vpop.f32.mrf.mxu1 }
 0x1d8   : > { %2348 = vst.msk [vmem:[%s3648_s4 + $0x318] sm:$0xff] %vm478_vm2, %v2332_v13  ;;  %2659 = vst.msk [vmem:[%s3648_s4 + $0x398] sm:$0xff] %vm478_vm2, %v2643_v38  ;;  %v2317_v50 = vadd.f32 %v4008_v20, %v2301_v14  ;;  %v2628_v41 = vadd.f32 %v4008_v20, %v2612_v39 }
 0x1d9   : > { %v2243_v42 = vpop.f32.mrf.mxu0  ;;  %v2554_v43 = vpop.f32.mrf.mxu1 }
 0x1da   : > { %v2333_v16 = vmax.f32 %v2317_v50, 0.0  ;;  %v2644_v44 = vmax.f32 %v2628_v41, 0.0  ;;  %v2302_v45 = vmul.f32 %v3990_v37, %v2243_v42  ;;  %v2613_v46 = vmul.f32 %v3990_v37, %v2554_v43 }
 0x1db   : > { %v2245_v47 = vpop.f32.mrf.mxu0  ;;  %v2556_v48 = vpop.f32.mrf.mxu1 }
 0x1dc   : > { %2349 = vst.msk [vmem:[%s3648_s4 + $0x320] sm:$0xff] %vm478_vm2, %v2333_v16  ;;  %2660 = vst.msk [vmem:[%s3648_s4 + $0x3a0] sm:$0xff] %vm478_vm2, %v2644_v44  ;;  %v2318_v49 = vadd.f32 %v4008_v20, %v2302_v45  ;;  %v2629_v19 = vadd.f32 %v4008_v20, %v2613_v46 }
 0x1dd   : > { %v2248_v1 = vpop.f32.mrf.mxu0  ;;  %v2559_v51 = vpop.f32.mrf.mxu1 }
 0x1de   : > { %v2334_v0 = vmax.f32 %v2318_v49, 0.0  ;;  %v2645_v52 = vmax.f32 %v2629_v19, 0.0  ;;  %v2303_v53 = vmul.f32 %v3990_v37, %v2248_v1  ;;  %v2614_v54 = vmul.f32 %v3990_v37, %v2559_v51 }
 0x1df   : > { %v2250_v2 = vpop.f32.mrf.mxu0  ;;  %v2561_v55 = vpop.f32.mrf.mxu1 }
 0x1e0   : > { %2350 = vst.msk [vmem:[%s3648_s4 + $0x328] sm:$0xff] %vm478_vm2, %v2334_v0  ;;  %2661 = vst.msk [vmem:[%s3648_s4 + $0x3a8] sm:$0xff] %vm478_vm2, %v2645_v52  ;;  %v2319_v56 = vadd.f32 %v4008_v20, %v2303_v53  ;;  %v2630_v57 = vadd.f32 %v4008_v20, %v2614_v54 }
 0x1e1   : > { %v2253_v3 = vpop.f32.mrf.mxu0  ;;  %v2564_v58 = vpop.f32.mrf.mxu1 }
 0x1e2   : > { %v2335_v4 = vmax.f32 %v2319_v56, 0.0  ;;  %v2646_v59 = vmax.f32 %v2630_v57, 0.0  ;;  %v2304_v60 = vmul.f32 %v3990_v37, %v2253_v3  ;;  %v2615_v61 = vmul.f32 %v3990_v37, %v2564_v58 }
 0x1e3   : > { %v2255_v5 = vpop.f32.mrf.mxu0  ;;  %v2566_v62 = vpop.f32.mrf.mxu1 }
 0x1e4   : > { %2351 = vst.msk [vmem:[%s3648_s4 + $0x330] sm:$0xff] %vm478_vm2, %v2335_v4  ;;  %2662 = vst.msk [vmem:[%s3648_s4 + $0x3b0] sm:$0xff] %vm478_vm2, %v2646_v59  ;;  %v2320_v63 = vadd.f32 %v4008_v20, %v2304_v60  ;;  %v2631_v17 = vadd.f32 %v4008_v20, %v2615_v61 }
 0x1e5   : > { %v2258_v6 = vpop.f32.mrf.mxu0  ;;  %v2569_v18 = vpop.f32.mrf.mxu1 }
 0x1e6   : > { %v2336_v7 = vmax.f32 %v2320_v63, 0.0  ;;  %v2647_v21 = vmax.f32 %v2631_v17, 0.0  ;;  %v2305_v22 = vmul.f32 %v3990_v37, %v2258_v6  ;;  %v2616_v23 = vmul.f32 %v3990_v37, %v2569_v18 }
 0x1e7   : > { %v2260_v8 = vpop.f32.mrf.mxu0  ;;  %v2571_v24 = vpop.f32.mrf.mxu1 }
 0x1e8   : > { %2352 = vst.msk [vmem:[%s3648_s4 + $0x338] sm:$0xff] %vm478_vm2, %v2336_v7  ;;  %2663 = vst.msk [vmem:[%s3648_s4 + $0x3b8] sm:$0xff] %vm478_vm2, %v2647_v21  ;;  %v2321_v25 = vadd.f32 %v4008_v20, %v2305_v22  ;;  %v2632_v26 = vadd.f32 %v4008_v20, %v2616_v23 }
 0x1e9   : > { %v2263_v9 = vpop.f32.mrf.mxu0  ;;  %v2574_v27 = vpop.f32.mrf.mxu1 }
 0x1ea   : > { %v2337_v28 = vmax.f32 %v2321_v25, 0.0  ;;  %v2648_v29 = vmax.f32 %v2632_v26, 0.0  ;;  %v2306_v10 = vmul.f32 %v3990_v37, %v2263_v9  ;;  %v2617_v30 = vmul.f32 %v3990_v37, %v2574_v27 }
 0x1eb   : > { %v2265_v11 = vpop.f32.mrf.mxu0  ;;  %v2576_v31 = vpop.f32.mrf.mxu1 }
 0x1ec   : > { %2353 = vst.msk [vmem:[%s3648_s4 + $0x340] sm:$0xff] %vm478_vm2, %v2337_v28  ;;  %2664 = vst.msk [vmem:[%s3648_s4 + $0x3c0] sm:$0xff] %vm478_vm2, %v2648_v29  ;;  %v2322_v32 = vadd.f32 %v4008_v20, %v2306_v10  ;;  %v2633_v33 = vadd.f32 %v4008_v20, %v2617_v30 }
 0x1ed   : > { %v2268_v12 = vpop.f32.mrf.mxu0  ;;  %v2579_v34 = vpop.f32.mrf.mxu1 }
 0x1ee   : > { %v2338_v35 = vmax.f32 %v2322_v32, 0.0  ;;  %v2649_v36 = vmax.f32 %v2633_v33, 0.0  ;;  %v2307_v13 = vmul.f32 %v3990_v37, %v2268_v12  ;;  %v2618_v38 = vmul.f32 %v3990_v37, %v2579_v34 }
 0x1ef   : > { %v2270_v14 = vpop.f32.mrf.mxu0  ;;  %v2581_v39 = vpop.f32.mrf.mxu1 }
 0x1f0   : > { %2354 = vst.msk [vmem:[%s3648_s4 + $0x348] sm:$0xff] %vm478_vm2, %v2338_v35  ;;  %2665 = vst.msk [vmem:[%s3648_s4 + $0x3c8] sm:$0xff] %vm478_vm2, %v2649_v36  ;;  %v2323_v40 = vadd.f32 %v4008_v20, %v2307_v13  ;;  %v2634_v15 = vadd.f32 %v4008_v20, %v2618_v38 }
 0x1f1   : > { %v2273_v50 = vpop.f32.mrf.mxu0  ;;  %v2584_v41 = vpop.f32.mrf.mxu1 }
 0x1f2   : > { %v2339_v42 = vmax.f32 %v2323_v40, 0.0  ;;  %v2650_v43 = vmax.f32 %v2634_v15, 0.0  ;;  %v2308_v16 = vmul.f32 %v3990_v37, %v2273_v50  ;;  %v2619_v44 = vmul.f32 %v3990_v37, %v2584_v41 }
 0x1f3   : > { %v2275_v45 = vpop.f32.mrf.mxu0  ;;  %v2586_v46 = vpop.f32.mrf.mxu1 }
 0x1f4   : > { %2355 = vst.msk [vmem:[%s3648_s4 + $0x350] sm:$0xff] %vm478_vm2, %v2339_v42  ;;  %2666 = vst.msk [vmem:[%s3648_s4 + $0x3d0] sm:$0xff] %vm478_vm2, %v2650_v43  ;;  %v2324_v47 = vadd.f32 %v4008_v20, %v2308_v16  ;;  %v2635_v48 = vadd.f32 %v4008_v20, %v2619_v44 }
 0x1f5   : > { %v2278_v49 = vpop.f32.mrf.mxu0  ;;  %v2589_v19 = vpop.f32.mrf.mxu1 }
 0x1f6   : > { %v2340_v1 = vmax.f32 %v2324_v47, 0.0  ;;  %v2651_v51 = vmax.f32 %v2635_v48, 0.0  ;;  %v2309_v0 = vmul.f32 %v3990_v37, %v2278_v49  ;;  %v2620_v52 = vmul.f32 %v3990_v37, %v2589_v19 }
 0x1f7   : > { %v2280_v53 = vpop.f32.mrf.mxu0  ;;  %v2591_v54 = vpop.f32.mrf.mxu1 }
 0x1f8   : > { %2356 = vst.msk [vmem:[%s3648_s4 + $0x358] sm:$0xff] %vm478_vm2, %v2340_v1  ;;  %2667 = vst.msk [vmem:[%s3648_s4 + $0x3d8] sm:$0xff] %vm478_vm2, %v2651_v51  ;;  %v2325_v2 = vadd.f32 %v4008_v20, %v2309_v0  ;;  %v2636_v55 = vadd.f32 %v4008_v20, %v2620_v52 }
 0x1f9   : > { %v2283_v56 = vpop.f32.mrf.mxu0  ;;  %v2594_v57 = vpop.f32.mrf.mxu1 }
 0x1fa   : > { %v2341_v3 = vmax.f32 %v2325_v2, 0.0  ;;  %v2652_v58 = vmax.f32 %v2636_v55, 0.0  ;;  %v2310_v4 = vmul.f32 %v3990_v37, %v2283_v56  ;;  %v2621_v59 = vmul.f32 %v3990_v37, %v2594_v57 }
 0x1fb   : > { %v2285_v60 = vpop.f32.mrf.mxu0  ;;  %v2596_v61 = vpop.f32.mrf.mxu1 }
 0x1fc   : > { %2357 = vst.msk [vmem:[%s3648_s4 + $0x360] sm:$0xff] %vm478_vm2, %v2341_v3  ;;  %2668 = vst.msk [vmem:[%s3648_s4 + $0x3e0] sm:$0xff] %vm478_vm2, %v2652_v58  ;;  %v2326_v5 = vadd.f32 %v4008_v20, %v2310_v4  ;;  %v2637_v62 = vadd.f32 %v4008_v20, %v2621_v59 }
 0x1fd   : > { %v2288_v63 = vpop.f32.mrf.mxu0  ;;  %v2599_v17 = vpop.f32.mrf.mxu1 }
 0x1fe   : > { %v2342_v6 = vmax.f32 %v2326_v5, 0.0  ;;  %v2653_v18 = vmax.f32 %v2637_v62, 0.0  ;;  %v2311_v7 = vmul.f32 %v3990_v37, %v2288_v63  ;;  %v2622_v21 = vmul.f32 %v3990_v37, %v2599_v17 }
 0x1ff   : > { %v2290_v22 = vpop.f32.mrf.mxu0  ;;  %v2601_v23 = vpop.f32.mrf.mxu1 }
 0x200   : > { %2358 = vst.msk [vmem:[%s3648_s4 + $0x368] sm:$0xff] %vm478_vm2, %v2342_v6  ;;  %2669 = vst.msk [vmem:[%s3648_s4 + $0x3e8] sm:$0xff] %vm478_vm2, %v2653_v18  ;;  %v2327_v8 = vadd.f32 %v4008_v20, %v2311_v7  ;;  %v2638_v24 = vadd.f32 %v4008_v20, %v2622_v21 }
 0x201   : > { %v2293_v25 = vpop.f32.mrf.mxu0  ;;  %v2604_v26 = vpop.f32.mrf.mxu1 }
 0x202   : > { %v2343_v9 = vmax.f32 %v2327_v8, 0.0  ;;  %v2654_v27 = vmax.f32 %v2638_v24, 0.0  ;;  %v2312_v28 = vmul.f32 %v3990_v37, %v2293_v25  ;;  %v2623_v29 = vmul.f32 %v3990_v37, %v2604_v26 }
 0x203   : > { %v2295_v10 = vpop.f32.mrf.mxu0  ;;  %v2606_v30 = vpop.f32.mrf.mxu1 }
 0x204   : > { %2359 = vst.msk [vmem:[%s3648_s4 + $0x370] sm:$0xff] %vm478_vm2, %v2343_v9  ;;  %2670 = vst.msk [vmem:[%s3648_s4 + $0x3f0] sm:$0xff] %vm478_vm2, %v2654_v27  ;;  %v2328_v11 = vadd.f32 %v4008_v20, %v2312_v28  ;;  %v2639_v31 = vadd.f32 %v4008_v20, %v2623_v29 }
 0x206   : > { %v2344_v32 = vmax.f32 %v2328_v11, 0.0  ;;  %v2655_v33 = vmax.f32 %v2639_v31, 0.0 }
 0x208   : > { %2360 = vst.msk [vmem:[%s3648_s4 + $0x378] sm:$0xff] %vm478_vm2, %v2344_v32  ;;  %2671 = vst.msk [vmem:[%s3648_s4 + $0x3f8] sm:$0xff] %vm478_vm2, %v2655_v33 }
 0x209 PF: > { %s13_s12 = sadd.s32 1, %s2895_s12  }
 0x20a   : > { %p10_p4 = scmp.ge.s32.totalorder %s13_s12, 4  }
 0x20c   :  { %12 = sbr.rel (!%p10_p4) target bundleno = 1 (0x1), region = 62 }

// kernel: encoder_forward.7
= control target key start
LH: loop header
LB: loop body
LE: loop exit
PB: predicated region body
PF: predicated region fallthrough
CT: control target
= control target key end

     0   :  { %s1019_s12 = smov 0   ;;  %s1276_s0 = inlined_call_operand.vmem [shape: f32[2,256,72], index: 0, kind: input, shape index: {}]   ;;  %s1277_s1 = inlined_call_operand.vmem [shape: f32[72,16], index: 1, kind: input, shape index: {}]   ;;  %s1278_s2 = inlined_call_operand.vmem [shape: f32[2,16], index: 2, kind: input, shape index: {}]   ;;  %s1279_s3 = inlined_call_operand.vmem [shape: f32[2,256,16], index: 3, kind: output, shape index: {}]  }
   0x1 LB: > { %s802_s13 = sadd.s32 4294967295, %s997_s12   ;;  %p806_p0 = scmp.ge.s32.totalorder %s997_s12, 1  ;;  %s997_s12 = sphi %s1019_s12, %s13_s12  }
   0x2   : > { %p137_p1 = scmp.lt.s32.totalorder %s997_s12, 3 }
   0x4   : > { %p138_p2 = pnand %p806_p0, %p137_p1 }
   0x5   : > { %p161_p3 = scmp.lt.s32.totalorder (!%p138_p2), %s802_s13, 1 }
   0x6   : > { %141 = sbr.rel (%p138_p2) target bundleno = 261 (0x105), region = 32 }
   0xb   : > { %v197_v0 = vld [vmem:[%s1277_s1 + $0x40] sm:$0xff]  ;;  %v196_v1 = vld [vmem:[%s1277_s1 + $0x38] sm:$0xff]  ;;  %v195_v2 = vld [vmem:[%s1277_s1 + $0x30] sm:$0xff]  ;;  %s1281_s13 = smov (!%p161_p3, %s802_s13), 1  ;;  %vm198_vm0 = vcmask 588800   ;;  %vm448_vm1 = vcmask 130048  }
   0xc   : > { %899 = vmatprep.subr.mxu0 %v197_v0  ;;  %941 = vmatprep.subr.mxu1 %v197_v0  ;;  %v194_v3 = vld [vmem:[%s1277_s1 + $0x28] sm:$0xff]  ;;  %v193_v4 = vld [vmem:[%s1277_s1 + $0x20] sm:$0xff]  ;;  %v192_v5 = vld [vmem:[%s1277_s1 + $0x18] sm:$0xff]  ;;  %s847_s26 = sshll.u32 %s1281_s13, 8 }
   0xd   : > { %900 = vmatpush3.msra.mxu0 %v197_v0  ;;  %942 = vmatpush3.msra.mxu1 %v197_v0  ;;  %v191_v6 = vld [vmem:[%s1277_s1 + $0x10] sm:$0xff]  ;;  %v190_v7 = vld [vmem:[%s1277_s1 + $0x8] sm:$0xff]  ;;  %s1059_s6 = scalar_lea.vmem %s1276_s0, %s847_s26  ;;  %v189_v8 = vld [vmem:[%s1277_s1] sm:$0xff]  ;;  %s1149_s17 = scalar_lea.vmem %s1279_s3, %s847_s26 }
   0xe   : > { %901 = vmatprep.subr.mxu0 %v196_v1  ;;  %943 = vmatprep.subr.mxu1 %v196_v1  ;;  %v173_v9 = vld [vmem:[%s1059_s6] sm:$0xff]  ;;  %v174_v11 = vld [vmem:[%s1059_s6 + $0x8] sm:$0xff]  ;;  %v175_v13 = vld [vmem:[%s1059_s6 + $0x10] sm:$0xff] }
   0xf   : > { %902 = vmatpush3.msra.mxu0 %v196_v1  ;;  %944 = vmatpush3.msra.mxu1 %v196_v1  ;;  %v465_v10 = vld [vmem:[%s1059_s6 + $0x80] sm:$0xff]  ;;  %v466_v12 = vld [vmem:[%s1059_s6 + $0x88] sm:$0xff]  ;;  %v467_v14 = vld [vmem:[%s1059_s6 + $0x90] sm:$0xff] }
  0x10   : > { %903 = vmatprep.subr.mxu0 %v195_v2  ;;  %945 = vmatprep.subr.mxu1 %v195_v2  ;;  %v176_v15 = vld [vmem:[%s1059_s6 + $0x18] sm:$0xff]  ;;  %v177_v17 = vld [vmem:[%s1059_s6 + $0x20] sm:$0xff]  ;;  %v178_v19 = vld [vmem:[%s1059_s6 + $0x28] sm:$0xff] }
  0x11   : > { %904 = vmatpush3.msra.mxu0 %v195_v2  ;;  %946 = vmatpush3.msra.mxu1 %v195_v2  ;;  %v468_v16 = vld [vmem:[%s1059_s6 + $0x98] sm:$0xff]  ;;  %v469_v18 = vld [vmem:[%s1059_s6 + $0xa0] sm:$0xff]  ;;  %v470_v20 = vld [vmem:[%s1059_s6 + $0xa8] sm:$0xff] }
  0x12   : > { %905 = vmatprep.subr.mxu0 %v194_v3  ;;  %947 = vmatprep.subr.mxu1 %v194_v3  ;;  %v179_v21 = vld [vmem:[%s1059_s6 + $0x30] sm:$0xff]  ;;  %v180_v23 = vld [vmem:[%s1059_s6 + $0x38] sm:$0xff]  ;;  %v181_v25 = vld [vmem:[%s1059_s6 + $0x40] sm:$0xff] }
  0x13   : > { %906 = vmatpush3.msra.mxu0 %v194_v3  ;;  %948 = vmatpush3.msra.mxu1 %v194_v3  ;;  %v471_v22 = vld [vmem:[%s1059_s6 + $0xb0] sm:$0xff]  ;;  %v472_v24 = vld [vmem:[%s1059_s6 + $0xb8] sm:$0xff]  ;;  %v473_v26 = vld [vmem:[%s1059_s6 + $0xc0] sm:$0xff] }
  0x14   : > { %907 = vmatprep.subr.mxu0 %v193_v4  ;;  %949 = vmatprep.subr.mxu1 %v193_v4  ;;  %v182_v27 = vld [vmem:[%s1059_s6 + $0x48] sm:$0xff]  ;;  %v183_v29 = vld [vmem:[%s1059_s6 + $0x50] sm:$0xff]  ;;  %v184_v31 = vld [vmem:[%s1059_s6 + $0x58] sm:$0xff] }
  0x15   : > { %908 = vmatpush3.msra.mxu0 %v193_v4  ;;  %950 = vmatpush3.msra.mxu1 %v193_v4  ;;  %v474_v28 = vld [vmem:[%s1059_s6 + $0xc8] sm:$0xff]  ;;  %v475_v30 = vld [vmem:[%s1059_s6 + $0xd0] sm:$0xff]  ;;  %v476_v32 = vld [vmem:[%s1059_s6 + $0xd8] sm:$0xff] }
  0x16   : > { %909 = vmatprep.subr.mxu0 %v192_v5  ;;  %951 = vmatprep.subr.mxu1 %v192_v5  ;;  %v185_v33 = vld [vmem:[%s1059_s6 + $0x60] sm:$0xff]  ;;  %v186_v35 = vld [vmem:[%s1059_s6 + $0x68] sm:$0xff]  ;;  %v187_v37 = vld [vmem:[%s1059_s6 + $0x70] sm:$0xff] }
  0x17   : > { %910 = vmatpush3.msra.mxu0 %v192_v5  ;;  %952 = vmatpush3.msra.mxu1 %v192_v5  ;;  %v477_v34 = vld [vmem:[%s1059_s6 + $0xe0] sm:$0xff]  ;;  %v478_v36 = vld [vmem:[%s1059_s6 + $0xe8] sm:$0xff]  ;;  %v479_v38 = vld [vmem:[%s1059_s6 + $0xf0] sm:$0xff] }
  0x18   : > { %911 = vmatprep.subr.mxu0 %v191_v6  ;;  %953 = vmatprep.subr.mxu1 %v191_v6  ;;  %v188_v39 = vld [vmem:[%s1059_s6 + $0x78] sm:$0xff]  ;;  %v1131_v41 = vld [vmem:[%s1278_s2] ss:$0 sm:$0xff]  ;;  %v1136_v42 = vld [vmem:[%s1278_s2 + $0x1] ss:$0 sm:$0xff] }
  0x19   : > { %912 = vmatpush3.msra.mxu0 %v191_v6  ;;  %954 = vmatpush3.msra.mxu1 %v191_v6  ;;  %v480_v40 = vld [vmem:[%s1059_s6 + $0xf8] sm:$0xff] }
  0x1a   : > { %913 = vmatprep.subr.mxu0 %v190_v7  ;;  %955 = vmatprep.subr.mxu1 %v190_v7 }
  0x1b   : > { %914 = vmatpush3.msra.mxu0 %v190_v7  ;;  %956 = vmatpush3.msra.mxu1 %v190_v7 }
  0x1c   : > { %915 = vmatprep.subr.mxu0 %v189_v8  ;;  %957 = vmatprep.subr.mxu1 %v189_v8 }
  0x1d   : > { %916 = vmatpush3.msra.mxu0 %v189_v8  ;;  %917 = vmatprep.mubr.msk.f32.mxu0 %vm198_vm0, %v173_v9 }
  0x1e   : > { %958 = vmatpush3.msra.mxu1 %v189_v8  ;;  %959 = vmatprep.mubr.msk.f32.mxu1 %vm198_vm0, %v465_v10 }
  0x1f   : > { %918 = vmatmul.mubr.msk.f32.vlgmr.msra.gmra.mxu0 %vm198_vm0, %v174_v11  ;;  %960 = vmatmul.mubr.msk.f32.vlgmr.msra.gmra.mxu1 %vm198_vm0, %v466_v12 }
  0x20   : > { %920 = vmatprep.mubr.msk.f32.mxu0 %vm198_vm0, %v175_v13  ;;  %962 = vmatprep.mubr.msk.f32.mxu1 %vm198_vm0, %v467_v14 }
  0x23   : > { %921 = vmatmul.mubr.msk.f32.gmra.mxu0 %vm198_vm0, %v176_v15  ;;  %963 = vmatmul.mubr.msk.f32.gmra.mxu1 %vm198_vm0, %v468_v16 }
  0x24   : > { %923 = vmatprep.mubr.msk.f32.mxu0 %vm198_vm0, %v177_v17  ;;  %965 = vmatprep.mubr.msk.f32.mxu1 %vm198_vm0, %v469_v18 }
  0x27   : > { %924 = vmatmul.mubr.msk.f32.gmra.mxu0 %vm198_vm0, %v178_v19  ;;  %966 = vmatmul.mubr.msk.f32.gmra.mxu1 %vm198_vm0, %v470_v20 }
  0x28   : > { %926 = vmatprep.mubr.msk.f32.mxu0 %vm198_vm0, %v179_v21  ;;  %968 = vmatprep.mubr.msk.f32.mxu1 %vm198_vm0, %v471_v22 }
  0x2b   : > { %927 = vmatmul.mubr.msk.f32.gmra.mxu0 %vm198_vm0, %v180_v23  ;;  %969 = vmatmul.mubr.msk.f32.gmra.mxu1 %vm198_vm0, %v472_v24 }
  0x2c   : > { %929 = vmatprep.mubr.msk.f32.mxu0 %vm198_vm0, %v181_v25  ;;  %971 = vmatprep.mubr.msk.f32.mxu1 %vm198_vm0, %v473_v26 }
  0x2f   : > { %930 = vmatmul.mubr.msk.f32.gmra.mxu0 %vm198_vm0, %v182_v27  ;;  %972 = vmatmul.mubr.msk.f32.gmra.mxu1 %vm198_vm0, %v474_v28 }
  0x30   : > { %932 = vmatprep.mubr.msk.f32.mxu0 %vm198_vm0, %v183_v29  ;;  %974 = vmatprep.mubr.msk.f32.mxu1 %vm198_vm0, %v475_v30 }
  0x33   : > { %933 = vmatmul.mubr.msk.f32.gmra.mxu0 %vm198_vm0, %v184_v31  ;;  %975 = vmatmul.mubr.msk.f32.gmra.mxu1 %vm198_vm0, %v476_v32 }
  0x34   : > { %935 = vmatprep.mubr.msk.f32.mxu0 %vm198_vm0, %v185_v33  ;;  %977 = vmatprep.mubr.msk.f32.mxu1 %vm198_vm0, %v477_v34 }
  0x37   : > { %936 = vmatmul.mubr.msk.f32.gmra.mxu0 %vm198_vm0, %v186_v35  ;;  %978 = vmatmul.mubr.msk.f32.gmra.mxu1 %vm198_vm0, %v478_v36 }
  0x38   : > { %938 = vmatprep.mubr.msk.f32.mxu0 %vm198_vm0, %v187_v37  ;;  %980 = vmatprep.mubr.msk.f32.mxu1 %vm198_vm0, %v479_v38 }
  0x3b   : > { %939 = vmatmul.mubr.msk.f32.gmra.mxu0 %vm198_vm0, %v188_v39  ;;  %981 = vmatmul.mubr.msk.f32.gmra.mxu1 %vm198_vm0, %v480_v40 }
  0xdf   : > { %v919_v43 = vpop.f32.mrf.mxu0  ;;  %v961_v44 = vpop.f32.mrf.mxu1 }
  0xe0   : > { %v397_v45 = vmul.f32 %v919_v43, %v1131_v41  ;;  %v684_v46 = vmul.f32 %v961_v44, %v1131_v41 }
  0xe1   : > { %v313_v47 = vpop.f32.mrf.mxu0  ;;  %v604_v48 = vpop.f32.mrf.mxu1 }
  0xe2   : > { %v417_v49 = vadd.f32 %v1136_v42, %v397_v45  ;;  %v700_v50 = vadd.f32 %v1136_v42, %v684_v46  ;;  %v396_v51 = vmul.f32 %v1131_v41, %v313_v47  ;;  %v683_v52 = vmul.f32 %v1131_v41, %v604_v48 }
  0xe3   : > { %v922_v53 = vpop.f32.mrf.mxu0  ;;  %v964_v54 = vpop.f32.mrf.mxu1 }
  0xe4   : > { %v433_v55 = vmax.f32 %v417_v49, 0.0  ;;  %v716_v56 = vmax.f32 %v700_v50, 0.0  ;;  %v416_v57 = vadd.f32 %v1136_v42, %v396_v51  ;;  %v699_v58 = vadd.f32 %v1136_v42, %v683_v52 }
  0xe5   : > { %v399_v59 = vmul.f32 %v922_v53, %v1131_v41  ;;  %v686_v60 = vmul.f32 %v964_v54, %v1131_v41  ;;  %v323_v61 = vpop.f32.mrf.mxu0  ;;  %v614_v62 = vpop.f32.mrf.mxu1 }
  0xe6   : > { %450 = vst.msk [vmem:[%s1149_s17 + $0x8] sm:$0xff] %vm448_vm1, %v433_v55  ;;  %732 = vst.msk [vmem:[%s1149_s17 + $0x88] sm:$0xff] %vm448_vm1, %v716_v56  ;;  %v432_v63 = vmax.f32 %v416_v57, 0.0  ;;  %v715_v0 = vmax.f32 %v699_v58, 0.0  ;;  %v398_v1 = vmul.f32 %v1131_v41, %v323_v61  ;;  %v685_v2 = vmul.f32 %v1131_v41, %v614_v62 }
  0xe7   : > { %v419_v3 = vadd.f32 %v1136_v42, %v399_v59  ;;  %v702_v4 = vadd.f32 %v1136_v42, %v686_v60  ;;  %v925_v5 = vpop.f32.mrf.mxu0  ;;  %v967_v6 = vpop.f32.mrf.mxu1 }
  0xe8   : > { %449 = vst.msk [vmem:[%s1149_s17] sm:$0xff] %vm448_vm1, %v432_v63  ;;  %731 = vst.msk [vmem:[%s1149_s17 + $0x80] sm:$0xff] %vm448_vm1, %v715_v0  ;;  %v418_v7 = vadd.f32 %v1136_v42, %v398_v1  ;;  %v701_v8 = vadd.f32 %v1136_v42, %v685_v2  ;;  %v401_v9 = vmul.f32 %v925_v5, %v1131_v41 }
  0xe9   : > { %v688_v10 = vmul.f32 %v967_v6, %v1131_v41  ;;  %v435_v11 = vmax.f32 %v419_v3, 0.0  ;;  %v718_v12 = vmax.f32 %v702_v4, 0.0  ;;  %v333_v13 = vpop.f32.mrf.mxu0  ;;  %v624_v14 = vpop.f32.mrf.mxu1 }
  0xea   : > { %v434_v15 = vmax.f32 %v418_v7, 0.0  ;;  %v717_v16 = vmax.f32 %v701_v8, 0.0  ;;  %v421_v17 = vadd.f32 %v1136_v42, %v401_v9  ;;  %v400_v19 = vmul.f32 %v1131_v41, %v333_v13 }
  0xeb   : > { %v704_v18 = vadd.f32 %v1136_v42, %v688_v10  ;;  %452 = vst.msk [vmem:[%s1149_s17 + $0x18] sm:$0xff] %vm448_vm1, %v435_v11  ;;  %734 = vst.msk [vmem:[%s1149_s17 + $0x98] sm:$0xff] %vm448_vm1, %v718_v12  ;;  %v687_v20 = vmul.f32 %v1131_v41, %v624_v14  ;;  %v928_v21 = vpop.f32.mrf.mxu0  ;;  %v970_v22 = vpop.f32.mrf.mxu1 }
  0xec   : > { %451 = vst.msk [vmem:[%s1149_s17 + $0x10] sm:$0xff] %vm448_vm1, %v434_v15  ;;  %733 = vst.msk [vmem:[%s1149_s17 + $0x90] sm:$0xff] %vm448_vm1, %v717_v16  ;;  %v437_v23 = vmax.f32 %v421_v17, 0.0  ;;  %v403_v25 = vmul.f32 %v928_v21, %v1131_v41  ;;  %v690_v26 = vmul.f32 %v970_v22, %v1131_v41  ;;  %v420_v27 = vadd.f32 %v1136_v42, %v400_v19 }
  0xed   : > { %v720_v24 = vmax.f32 %v704_v18, 0.0  ;;  %v703_v28 = vadd.f32 %v1136_v42, %v687_v20  ;;  %v343_v29 = vpop.f32.mrf.mxu0  ;;  %v634_v30 = vpop.f32.mrf.mxu1 }
  0xee   : > { %454 = vst.msk [vmem:[%s1149_s17 + $0x28] sm:$0xff] %vm448_vm1, %v437_v23  ;;  %v423_v31 = vadd.f32 %v1136_v42, %v403_v25  ;;  %v706_v32 = vadd.f32 %v1136_v42, %v690_v26  ;;  %v402_v33 = vmul.f32 %v1131_v41, %v343_v29  ;;  %v689_v34 = vmul.f32 %v1131_v41, %v634_v30 }
  0xef   : > { %736 = vst.msk [vmem:[%s1149_s17 + $0xa8] sm:$0xff] %vm448_vm1, %v720_v24  ;;  %v436_v35 = vmax.f32 %v420_v27, 0.0  ;;  %v719_v36 = vmax.f32 %v703_v28, 0.0  ;;  %v931_v37 = vpop.f32.mrf.mxu0  ;;  %v973_v38 = vpop.f32.mrf.mxu1 }
  0xf0   : > { %v439_v39 = vmax.f32 %v423_v31, 0.0  ;;  %v722_v40 = vmax.f32 %v706_v32, 0.0  ;;  %v422_v43 = vadd.f32 %v1136_v42, %v402_v33  ;;  %v705_v44 = vadd.f32 %v1136_v42, %v689_v34 }
  0xf1   : > { %453 = vst.msk [vmem:[%s1149_s17 + $0x20] sm:$0xff] %vm448_vm1, %v436_v35  ;;  %735 = vst.msk [vmem:[%s1149_s17 + $0xa0] sm:$0xff] %vm448_vm1, %v719_v36  ;;  %v405_v45 = vmul.f32 %v931_v37, %v1131_v41  ;;  %v692_v46 = vmul.f32 %v973_v38, %v1131_v41  ;;  %v353_v47 = vpop.f32.mrf.mxu0  ;;  %v644_v48 = vpop.f32.mrf.mxu1 }
  0xf2   : > { %456 = vst.msk [vmem:[%s1149_s17 + $0x38] sm:$0xff] %vm448_vm1, %v439_v39  ;;  %738 = vst.msk [vmem:[%s1149_s17 + $0xb8] sm:$0xff] %vm448_vm1, %v722_v40  ;;  %v438_v49 = vmax.f32 %v422_v43, 0.0  ;;  %v721_v50 = vmax.f32 %v705_v44, 0.0  ;;  %v404_v51 = vmul.f32 %v1131_v41, %v353_v47  ;;  %v691_v52 = vmul.f32 %v1131_v41, %v644_v48 }
  0xf3   : > { %v425_v53 = vadd.f32 %v1136_v42, %v405_v45  ;;  %v708_v54 = vadd.f32 %v1136_v42, %v692_v46  ;;  %v934_v55 = vpop.f32.mrf.mxu0  ;;  %v976_v56 = vpop.f32.mrf.mxu1 }
  0xf4   : > { %455 = vst.msk [vmem:[%s1149_s17 + $0x30] sm:$0xff] %vm448_vm1, %v438_v49  ;;  %737 = vst.msk [vmem:[%s1149_s17 + $0xb0] sm:$0xff] %vm448_vm1, %v721_v50  ;;  %v424_v57 = vadd.f32 %v1136_v42, %v404_v51  ;;  %v707_v58 = vadd.f32 %v1136_v42, %v691_v52  ;;  %v407_v59 = vmul.f32 %v934_v55, %v1131_v41 }
  0xf5   : > { %v694_v60 = vmul.f32 %v976_v56, %v1131_v41  ;;  %v441_v61 = vmax.f32 %v425_v53, 0.0  ;;  %v724_v62 = vmax.f32 %v708_v54, 0.0  ;;  %v363_v63 = vpop.f32.mrf.mxu0  ;;  %v654_v0 = vpop.f32.mrf.mxu1 }
  0xf6   : > { %v440_v1 = vmax.f32 %v424_v57, 0.0  ;;  %v723_v2 = vmax.f32 %v707_v58, 0.0  ;;  %v427_v3 = vadd.f32 %v1136_v42, %v407_v59  ;;  %v406_v5 = vmul.f32 %v1131_v41, %v363_v63 }
  0xf7   : > { %v710_v4 = vadd.f32 %v1136_v42, %v694_v60  ;;  %458 = vst.msk [vmem:[%s1149_s17 + $0x48] sm:$0xff] %vm448_vm1, %v441_v61  ;;  %740 = vst.msk [vmem:[%s1149_s17 + $0xc8] sm:$0xff] %vm448_vm1, %v724_v62  ;;  %v693_v6 = vmul.f32 %v1131_v41, %v654_v0  ;;  %v937_v7 = vpop.f32.mrf.mxu0  ;;  %v979_v8 = vpop.f32.mrf.mxu1 }
  0xf8   : > { %457 = vst.msk [vmem:[%s1149_s17 + $0x40] sm:$0xff] %vm448_vm1, %v440_v1  ;;  %739 = vst.msk [vmem:[%s1149_s17 + $0xc0] sm:$0xff] %vm448_vm1, %v723_v2  ;;  %v443_v9 = vmax.f32 %v427_v3, 0.0  ;;  %v409_v11 = vmul.f32 %v937_v7, %v1131_v41  ;;  %v696_v12 = vmul.f32 %v979_v8, %v1131_v41  ;;  %v426_v13 = vadd.f32 %v1136_v42, %v406_v5 }
  0xf9   : > { %v726_v10 = vmax.f32 %v710_v4, 0.0  ;;  %v709_v14 = vadd.f32 %v1136_v42, %v693_v6  ;;  %v373_v15 = vpop.f32.mrf.mxu0  ;;  %v664_v16 = vpop.f32.mrf.mxu1 }
  0xfa   : > { %460 = vst.msk [vmem:[%s1149_s17 + $0x58] sm:$0xff] %vm448_vm1, %v443_v9  ;;  %v429_v17 = vadd.f32 %v1136_v42, %v409_v11  ;;  %v712_v18 = vadd.f32 %v1136_v42, %v696_v12  ;;  %v408_v19 = vmul.f32 %v1131_v41, %v373_v15  ;;  %v695_v20 = vmul.f32 %v1131_v41, %v664_v16 }
  0xfb   : > { %742 = vst.msk [vmem:[%s1149_s17 + $0xd8] sm:$0xff] %vm448_vm1, %v726_v10  ;;  %v442_v21 = vmax.f32 %v426_v13, 0.0  ;;  %v725_v22 = vmax.f32 %v709_v14, 0.0  ;;  %v940_v23 = vpop.f32.mrf.mxu0  ;;  %v982_v24 = vpop.f32.mrf.mxu1 }
  0xfc   : > { %v445_v25 = vmax.f32 %v429_v17, 0.0  ;;  %v728_v26 = vmax.f32 %v712_v18, 0.0  ;;  %v428_v27 = vadd.f32 %v1136_v42, %v408_v19  ;;  %v711_v28 = vadd.f32 %v1136_v42, %v695_v20 }
  0xfd   : > { %459 = vst.msk [vmem:[%s1149_s17 + $0x50] sm:$0xff] %vm448_vm1, %v442_v21  ;;  %741 = vst.msk [vmem:[%s1149_s17 + $0xd0] sm:$0xff] %vm448_vm1, %v725_v22  ;;  %v411_v29 = vmul.f32 %v940_v23, %v1131_v41  ;;  %v698_v30 = vmul.f32 %v982_v24, %v1131_v41  ;;  %v383_v31 = vpop.f32.mrf.mxu0  ;;  %v674_v32 = vpop.f32.mrf.mxu1 }
  0xfe   : > { %462 = vst.msk [vmem:[%s1149_s17 + $0x68] sm:$0xff] %vm448_vm1, %v445_v25  ;;  %744 = vst.msk [vmem:[%s1149_s17 + $0xe8] sm:$0xff] %vm448_vm1, %v728_v26  ;;  %v444_v33 = vmax.f32 %v428_v27, 0.0  ;;  %v727_v34 = vmax.f32 %v711_v28, 0.0  ;;  %v410_v35 = vmul.f32 %v1131_v41, %v383_v31  ;;  %v697_v36 = vmul.f32 %v1131_v41, %v674_v32 }
  0xff   : > { %v431_v37 = vadd.f32 %v1136_v42, %v411_v29  ;;  %v714_v38 = vadd.f32 %v1136_v42, %v698_v30 }
 0x100   : > { %461 = vst.msk [vmem:[%s1149_s17 + $0x60] sm:$0xff] %vm448_vm1, %v444_v33  ;;  %743 = vst.msk [vmem:[%s1149_s17 + $0xe0] sm:$0xff] %vm448_vm1, %v727_v34  ;;  %v430_v39 = vadd.f32 %v1136_v42, %v410_v35  ;;  %v713_v40 = vadd.f32 %v1136_v42, %v697_v36 }
 0x101   : > { %v447_v43 = vmax.f32 %v431_v37, 0.0  ;;  %v730_v44 = vmax.f32 %v714_v38, 0.0 }
 0x102   : > { %v446_v45 = vmax.f32 %v430_v39, 0.0  ;;  %v729_v46 = vmax.f32 %v713_v40, 0.0 }
 0x103   : > { %464 = vst.msk [vmem:[%s1149_s17 + $0x78] sm:$0xff] %vm448_vm1, %v447_v43  ;;  %746 = vst.msk [vmem:[%s1149_s17 + $0xf8] sm:$0xff] %vm448_vm1, %v730_v44 }
 0x104   : > { %463 = vst.msk [vmem:[%s1149_s17 + $0x70] sm:$0xff] %vm448_vm1, %v446_v45  ;;  %745 = vst.msk [vmem:[%s1149_s17 + $0xf0] sm:$0xff] %vm448_vm1, %v729_v46 }
 0x105 PF: > { %s13_s12 = sadd.s32 1, %s997_s12  }
 0x106   : > { %p10_p4 = scmp.ge.s32.totalorder %s13_s12, 4  }
 0x108   :  { %12 = sbr.rel (!%p10_p4) target bundleno = 1 (0x1), region = 62 }

// kernel: encoder_forward.8
= control target key start
LH: loop header
LB: loop body
LE: loop exit
PB: predicated region body
PF: predicated region fallthrough
CT: control target
= control target key end

     0   :  { %s530_s12 = smov 0   ;;  %s695_s0 = inlined_call_operand.vmem [shape: f32[2,64,144], index: 0, kind: input, shape index: {}]   ;;  %s696_s1 = inlined_call_operand.vmem [shape: f32[144,32], index: 1, kind: input, shape index: {}]   ;;  %s697_s2 = inlined_call_operand.vmem [shape: f32[2,32], index: 2, kind: input, shape index: {}]   ;;  %s698_s3 = inlined_call_operand.vmem [shape: f32[2,64,32], index: 3, kind: output, shape index: {}]  }
   0x1 LB: > { %s433_s13 = sadd.s32 4294967295, %s507_s12   ;;  %p437_p0 = scmp.ge.s32.totalorder %s507_s12, 1  ;;  %s507_s12 = sphi %s530_s12, %s13_s12  }
   0x2   : > { %p137_p1 = scmp.lt.s32.totalorder %s507_s12, 3 }
   0x4   : > { %p138_p2 = pnand %p437_p0, %p137_p1 }
   0x5   : > { %p161_p3 = scmp.lt.s32.totalorder (!%p138_p2), %s433_s13, 1 }
   0x6   : > { %141 = sbr.rel (%p138_p2) target bundleno = 261 (0x105), region = 32 }
   0xb   : > { %v204_v0 = vld [vmem:[%s696_s1 + $0x78] sm:$0xff]  ;;  %v509_v1 = vmov 0.0   ;;  %v203_v2 = vld [vmem:[%s696_s1 + $0x70] sm:$0xff]  ;;  %v202_v3 = vld [vmem:[%s696_s1 + $0x68] sm:$0xff]  ;;  %s700_s13 = smov (!%p161_p3, %s433_s13), 1  ;;  %vm207_vm0 = vcmask 130048  }
   0xc   : > { %232 = vmatprep.subr.mxu0 %v509_v1  ;;  %456 = vmatprep.subr.mxu1 %v509_v1  ;;  %v201_v4 = vld [vmem:[%s696_s1 + $0x60] sm:$0xff]  ;;  %v200_v5 = vld [vmem:[%s696_s1 + $0x58] sm:$0xff]  ;;  %v199_v6 = vld [vmem:[%s696_s1 + $0x50] sm:$0xff]  ;;  %s454_s19 = sshll.u32 %s700_s13, 7  ;;  %s455_s6 = sshll.u32 %s700_s13, 6  ;;  %vm369_vm1 = vcmask 261120  }
   0xd   : > { %233 = vmatpush1.msra.mxu0 %v204_v0  ;;  %474 = vmatpush1.msra.mxu1 %v204_v0  ;;  %v198_v7 = vld [vmem:[%s696_s1 + $0x48] sm:$0xff]  ;;  %v197_v8 = vld [vmem:[%s696_s1 + $0x40] sm:$0xff]  ;;  %v196_v9 = vld [vmem:[%s696_s1 + $0x38] sm:$0xff]  ;;  %s631_s26 = scalar_lea.vmem %s695_s0, %s454_s19  ;;  %s674_s9 = scalar_lea.vmem %s698_s3, %s455_s6 }
   0xe   : > { %234 = vmatprep.subr.mxu0 %v509_v1  ;;  %457 = vmatprep.subr.mxu1 %v509_v1  ;;  %v195_v10 = vld [vmem:[%s696_s1 + $0x30] sm:$0xff]  ;;  %v194_v11 = vld [vmem:[%s696_s1 + $0x28] sm:$0xff]  ;;  %v193_v12 = vld [vmem:[%s696_s1 + $0x20] sm:$0xff] }
   0xf   : > { %235 = vmatpush1.msra.mxu0 %v203_v2  ;;  %475 = vmatpush1.msra.mxu1 %v203_v2  ;;  %v192_v13 = vld [vmem:[%s696_s1 + $0x18] sm:$0xff]  ;;  %v191_v14 = vld [vmem:[%s696_s1 + $0x10] sm:$0xff]  ;;  %v190_v15 = vld [vmem:[%s696_s1 + $0x8] sm:$0xff] }
  0x10   : > { %236 = vmatprep.subr.mxu0 %v509_v1  ;;  %458 = vmatprep.subr.mxu1 %v509_v1  ;;  %v189_v16 = vld [vmem:[%s696_s1] sm:$0xff]  ;;  %v206_v17 = vld [vmem:[%s696_s1 + $0x88] sm:$0xff]  ;;  %v176_v23 = vld [vmem:[%s631_s26 + $0x18] sm:$0xff] }
  0x11   : > { %237 = vmatpush1.msra.mxu0 %v202_v3  ;;  %476 = vmatpush1.msra.mxu1 %v202_v3  ;;  %v205_v18 = vld [vmem:[%s696_s1 + $0x80] sm:$0xff]  ;;  %v174_v19 = vld [vmem:[%s631_s26 + $0x8] sm:$0xff]  ;;  %v184_v24 = vld [vmem:[%s631_s26 + $0x58] sm:$0xff] }
  0x12   : > { %238 = vmatprep.subr.mxu0 %v509_v1  ;;  %459 = vmatprep.subr.mxu1 %v509_v1  ;;  %v182_v20 = vld [vmem:[%s631_s26 + $0x48] sm:$0xff]  ;;  %v173_v21 = vld [vmem:[%s631_s26] sm:$0xff]  ;;  %v175_v25 = vld [vmem:[%s631_s26 + $0x10] sm:$0xff] }
  0x13   : > { %239 = vmatpush1.msra.mxu0 %v201_v4  ;;  %477 = vmatpush1.msra.mxu1 %v201_v4  ;;  %v181_v22 = vld [vmem:[%s631_s26 + $0x40] sm:$0xff]  ;;  %v183_v26 = vld [vmem:[%s631_s26 + $0x50] sm:$0xff]  ;;  %v178_v27 = vld [vmem:[%s631_s26 + $0x28] sm:$0xff] }
  0x14   : > { %240 = vmatprep.subr.mxu0 %v509_v1  ;;  %460 = vmatprep.subr.mxu1 %v509_v1  ;;  %v186_v28 = vld [vmem:[%s631_s26 + $0x68] sm:$0xff]  ;;  %v177_v29 = vld [vmem:[%s631_s26 + $0x20] sm:$0xff]  ;;  %v180_v31 = vld [vmem:[%s631_s26 + $0x38] sm:$0xff] }
  0x15   : > { %241 = vmatpush1.msra.mxu0 %v200_v5  ;;  %478 = vmatpush1.msra.mxu1 %v200_v5  ;;  %v185_v30 = vld [vmem:[%s631_s26 + $0x60] sm:$0xff]  ;;  %v188_v32 = vld [vmem:[%s631_s26 + $0x78] sm:$0xff]  ;;  %v179_v33 = vld [vmem:[%s631_s26 + $0x30] sm:$0xff] }
  0x16   : > { %242 = vmatprep.subr.mxu0 %v509_v1  ;;  %461 = vmatprep.subr.mxu1 %v509_v1  ;;  %v187_v34 = vld [vmem:[%s631_s26 + $0x70] sm:$0xff]  ;;  %v450_v35 = vld [vmem:[%s697_s2] ss:$0 sm:$0xff]  ;;  %v451_v36 = vld [vmem:[%s697_s2 + $0x1] ss:$0 sm:$0xff] }
  0x17   : > { %243 = vmatpush1.msra.mxu0 %v199_v6  ;;  %479 = vmatpush1.msra.mxu1 %v199_v6 }
  0x18   : > { %244 = vmatprep.subr.mxu0 %v509_v1  ;;  %462 = vmatprep.subr.mxu1 %v509_v1 }
  0x19   : > { %245 = vmatpush1.msra.mxu0 %v198_v7  ;;  %480 = vmatpush1.msra.mxu1 %v198_v7 }
  0x1a   : > { %246 = vmatprep.subr.mxu0 %v509_v1  ;;  %463 = vmatprep.subr.mxu1 %v509_v1 }
  0x1b   : > { %247 = vmatpush1.msra.mxu0 %v197_v8  ;;  %481 = vmatpush1.msra.mxu1 %v197_v8 }
  0x1c   : > { %248 = vmatprep.subr.mxu0 %v509_v1  ;;  %464 = vmatprep.subr.mxu1 %v509_v1 }
  0x1d   : > { %249 = vmatpush1.msra.mxu0 %v196_v9  ;;  %482 = vmatpush1.msra.mxu1 %v196_v9 }
  0x1e   : > { %250 = vmatprep.subr.mxu0 %v509_v1  ;;  %465 = vmatprep.subr.mxu1 %v509_v1 }
  0x1f   : > { %251 = vmatpush1.msra.mxu0 %v195_v10  ;;  %483 = vmatpush1.msra.mxu1 %v195_v10 }
  0x20   : > { %252 = vmatprep.subr.mxu0 %v509_v1  ;;  %466 = vmatprep.subr.mxu1 %v509_v1 }
  0x21   : > { %253 = vmatpush1.msra.mxu0 %v194_v11  ;;  %484 = vmatpush1.msra.mxu1 %v194_v11 }
  0x22   : > { %254 = vmatprep.subr.mxu0 %v509_v1  ;;  %467 = vmatprep.subr.mxu1 %v509_v1 }
  0x23   : > { %255 = vmatpush1.msra.mxu0 %v193_v12  ;;  %485 = vmatpush1.msra.mxu1 %v193_v12 }
  0x24   : > { %256 = vmatprep.subr.mxu0 %v509_v1  ;;  %468 = vmatprep.subr.mxu1 %v509_v1 }
  0x25   : > { %257 = vmatpush1.msra.mxu0 %v192_v13  ;;  %486 = vmatpush1.msra.mxu1 %v192_v13 }
  0x26   : > { %258 = vmatprep.subr.mxu0 %v509_v1  ;;  %469 = vmatprep.subr.mxu1 %v509_v1 }
  0x27   : > { %259 = vmatpush1.msra.mxu0 %v191_v14  ;;  %487 = vmatpush1.msra.mxu1 %v191_v14 }
  0x28   : > { %260 = vmatprep.subr.mxu0 %v509_v1  ;;  %470 = vmatprep.subr.mxu1 %v509_v1 }
  0x29   : > { %261 = vmatpush1.msra.mxu0 %v190_v15  ;;  %488 = vmatpush1.msra.mxu1 %v190_v15 }
  0x2a   : > { %262 = vmatprep.subr.mxu0 %v509_v1  ;;  %471 = vmatprep.subr.mxu1 %v509_v1 }
  0x2b   : > { %263 = vmatpush1.msra.mxu0 %v189_v16  ;;  %489 = vmatpush1.msra.mxu1 %v189_v16 }
  0x2c   : > { %292 = vmatprep.subr.mxu0 %v509_v1  ;;  %472 = vmatprep.subr.mxu1 %v509_v1 }
  0x2d   : > { %293 = vmatpush2.msra.mxu0 %v206_v17  ;;  %490 = vmatpush2.msra.mxu1 %v206_v17 }
  0x2e   : > { %294 = vmatprep.subr.mxu0 %v509_v1  ;;  %473 = vmatprep.subr.mxu1 %v509_v1 }
  0x2f   : > { %295 = vmatpush2.msra.mxu0 %v205_v18  ;;  %491 = vmatpush2.msra.mxu1 %v205_v18 }
  0x30   : > { %442 = vmatprep.mubr.msk.f32.mxu0 %vm207_vm0, %v174_v19  ;;  %446 = vmatprep.mubr.msk.f32.mxu1 %vm207_vm0, %v182_v20 }
  0x31   : > { %297 = vmatmul.mubr.f32.vlgmr.msra.gmra.mxu0 %v173_v21  ;;  %317 = vmatmul.mubr.f32.vlgmr.msra.gmra.mxu1 %v181_v22 }
  0x32   : > { %443 = vmatprep.mubr.msk.f32.mxu0 %vm207_vm0, %v176_v23  ;;  %447 = vmatprep.mubr.msk.f32.mxu1 %vm207_vm0, %v184_v24 }
  0x35   : > { %302 = vmatmul.mubr.f32.gmra.mxu0 %v175_v25  ;;  %322 = vmatmul.mubr.f32.gmra.mxu1 %v183_v26 }
  0x36   : > { %444 = vmatprep.mubr.msk.f32.mxu0 %vm207_vm0, %v178_v27  ;;  %448 = vmatprep.mubr.msk.f32.mxu1 %vm207_vm0, %v186_v28 }
  0x39   : > { %307 = vmatmul.mubr.f32.gmra.mxu0 %v177_v29  ;;  %327 = vmatmul.mubr.f32.gmra.mxu1 %v185_v30 }
  0x3a   : > { %445 = vmatprep.mubr.msk.f32.mxu0 %vm207_vm0, %v180_v31  ;;  %449 = vmatprep.mubr.msk.f32.mxu1 %vm207_vm0, %v188_v32 }
  0x3d   : > { %312 = vmatmul.mubr.f32.gmra.mxu0 %v179_v33  ;;  %332 = vmatmul.mubr.f32.gmra.mxu1 %v187_v34 }
  0xf1   : > { %v298_v37 = vpop.f32.mrf.mxu0  ;;  %v318_v38 = vpop.f32.mrf.mxu1 }
  0xf2   : > { %v341_v39 = vmul.f32 %v450_v35, %v298_v37  ;;  %v345_v40 = vmul.f32 %v450_v35, %v318_v38 }
  0xf3   : > { %v300_v41 = vpop.f32.mrf.mxu0  ;;  %v320_v42 = vpop.f32.mrf.mxu1 }
  0xf4   : > { %v353_v43 = vadd.f32 %v451_v36, %v341_v39  ;;  %v357_v44 = vadd.f32 %v451_v36, %v345_v40 }
  0xf5   : > { %v303_v45 = vpop.f32.mrf.mxu0  ;;  %v323_v46 = vpop.f32.mrf.mxu1 }
  0xf6   : > { %v361_v47 = vmax.f32 %v353_v43, 0.0  ;;  %v365_v48 = vmax.f32 %v357_v44, 0.0  ;;  %v342_v49 = vmul.f32 %v450_v35, %v303_v45  ;;  %v346_v50 = vmul.f32 %v450_v35, %v323_v46 }
  0xf7   : > { %v305_v51 = vpop.f32.mrf.mxu0  ;;  %v325_v52 = vpop.f32.mrf.mxu1 }
  0xf8   : > { %370 = vst.msk [vmem:[%s674_s9] sm:$0xff] %vm369_vm1, %v361_v47  ;;  %374 = vst.msk [vmem:[%s674_s9 + $0x20] sm:$0xff] %vm369_vm1, %v365_v48  ;;  %v354_v53 = vadd.f32 %v451_v36, %v342_v49  ;;  %v358_v54 = vadd.f32 %v451_v36, %v346_v50 }
  0xf9   : > { %v308_v55 = vpop.f32.mrf.mxu0  ;;  %v328_v56 = vpop.f32.mrf.mxu1 }
  0xfa   : > { %v362_v57 = vmax.f32 %v354_v53, 0.0  ;;  %v366_v58 = vmax.f32 %v358_v54, 0.0  ;;  %v343_v59 = vmul.f32 %v450_v35, %v308_v55  ;;  %v347_v60 = vmul.f32 %v450_v35, %v328_v56 }
  0xfb   : > { %v310_v61 = vpop.f32.mrf.mxu0  ;;  %v330_v62 = vpop.f32.mrf.mxu1 }
  0xfc   : > { %371 = vst.msk [vmem:[%s674_s9 + $0x8] sm:$0xff] %vm369_vm1, %v362_v57  ;;  %375 = vst.msk [vmem:[%s674_s9 + $0x28] sm:$0xff] %vm369_vm1, %v366_v58  ;;  %v355_v63 = vadd.f32 %v451_v36, %v343_v59  ;;  %v359_v0 = vadd.f32 %v451_v36, %v347_v60 }
  0xfd   : > { %v313_v1 = vpop.f32.mrf.mxu0  ;;  %v333_v2 = vpop.f32.mrf.mxu1 }
  0xfe   : > { %v363_v3 = vmax.f32 %v355_v63, 0.0  ;;  %v367_v4 = vmax.f32 %v359_v0, 0.0  ;;  %v344_v5 = vmul.f32 %v450_v35, %v313_v1  ;;  %v348_v6 = vmul.f32 %v450_v35, %v333_v2 }
  0xff   : > { %v315_v7 = vpop.f32.mrf.mxu0  ;;  %v335_v8 = vpop.f32.mrf.mxu1 }
 0x100   : > { %372 = vst.msk [vmem:[%s674_s9 + $0x10] sm:$0xff] %vm369_vm1, %v363_v3  ;;  %376 = vst.msk [vmem:[%s674_s9 + $0x30] sm:$0xff] %vm369_vm1, %v367_v4  ;;  %v356_v9 = vadd.f32 %v451_v36, %v344_v5  ;;  %v360_v10 = vadd.f32 %v451_v36, %v348_v6 }
 0x102   : > { %v364_v11 = vmax.f32 %v356_v9, 0.0  ;;  %v368_v12 = vmax.f32 %v360_v10, 0.0 }
 0x104   : > { %373 = vst.msk [vmem:[%s674_s9 + $0x18] sm:$0xff] %vm369_vm1, %v364_v11  ;;  %377 = vst.msk [vmem:[%s674_s9 + $0x38] sm:$0xff] %vm369_vm1, %v368_v12 }
 0x105 PF: > { %s13_s12 = sadd.s32 1, %s507_s12  }
 0x106   : > { %p10_p4 = scmp.ge.s32.totalorder %s13_s12, 4  }
 0x108   :  { %12 = sbr.rel (!%p10_p4) target bundleno = 1 (0x1), region = 62 }

// kernel: encoder_forward.9
= control target key start
LH: loop header
LB: loop body
LE: loop exit
PB: predicated region body
PF: predicated region fallthrough
CT: control target
= control target key end

     0   :  { %s551_s12 = smov 0   ;;  %s694_s0 = inlined_call_operand.vmem [shape: f32[2,16,288], index: 0, kind: input, shape index: {}]   ;;  %s695_s1 = inlined_call_operand.vmem [shape: f32[288,64], index: 1, kind: input, shape index: {}]   ;;  %s696_s2 = inlined_call_operand.vmem [shape: f32[2,64], index: 2, kind: input, shape index: {}]   ;;  %s697_s3 = inlined_call_operand.vmem [shape: f32[2,16,64], index: 3, kind: output, shape index: {}]  }
   0x1 LB: > { %s444_s13 = sadd.s32 4294967295, %s529_s12   ;;  %p448_p0 = scmp.ge.s32.totalorder %s529_s12, 1  ;;  %s529_s12 = sphi %s551_s12, %s13_s12  }
   0x2   : > { %p137_p1 = scmp.lt.s32.totalorder %s529_s12, 3 }
   0x4   : > { %p138_p2 = pnand %p448_p0, %p137_p1 }
   0x5   : > { %p161_p3 = scmp.lt.s32.totalorder (!%p138_p2), %s444_s13, 1 }
   0x6   : > { %141 = sbr.rel (%p138_p2) target bundleno = 254 (0xfe), region = 32 }
   0xb   : > { %v210_v0 = vld [vmem:[%s695_s1 + $0xf8] sm:$0xff]  ;;  %v209_v2 = vld [vmem:[%s695_s1 + $0xf0] sm:$0xff]  ;;  %v208_v4 = vld [vmem:[%s695_s1 + $0xe8] sm:$0xff]  ;;  %s699_s13 = smov (!%p161_p3, %s444_s13), 1  ;;  %vm215_vm0 = vcmask 261120   ;;  %vm386_vm1 = vcmask 523264  }
   0xc   : > { %v194_v1 = vld [vmem:[%s695_s1 + $0x78] sm:$0xff]  ;;  %459 = vmatprep.subr.mxu0 %v210_v0  ;;  %v193_v3 = vld [vmem:[%s695_s1 + $0x70] sm:$0xff]  ;;  %v192_v5 = vld [vmem:[%s695_s1 + $0x68] sm:$0xff]  ;;  %s514_s30 = smul.u32 48, %s699_s13  ;;  %s458_s21 = sshll.u32 %s699_s13, 4 }
   0xd   : > { %460 = vmatpush3.msra.mxu0 %v194_v1  ;;  %v207_v6 = vld [vmem:[%s695_s1 + $0xe0] sm:$0xff]  ;;  %v206_v8 = vld [vmem:[%s695_s1 + $0xd8] sm:$0xff]  ;;  %v205_v10 = vld [vmem:[%s695_s1 + $0xd0] sm:$0xff]  ;;  %s170_s23 = scalar_lea.vmem %s697_s3, %s458_s21 }
   0xe   : > { %461 = vmatprep.subr.mxu0 %v209_v2  ;;  %v191_v7 = vld [vmem:[%s695_s1 + $0x60] sm:$0xff]  ;;  %v190_v9 = vld [vmem:[%s695_s1 + $0x58] sm:$0xff]  ;;  %v189_v11 = vld [vmem:[%s695_s1 + $0x50] sm:$0xff]  ;;  %s604_s18 = scalar_lea.vmem %s694_s0, %s514_s30 }
   0xf   : > { %462 = vmatpush3.msra.mxu0 %v193_v3  ;;  %v214_v12 = vld [vmem:[%s695_s1 + $0x118] sm:$0xff]  ;;  %v204_v13 = vld [vmem:[%s695_s1 + $0xc8] sm:$0xff]  ;;  %v213_v14 = vld [vmem:[%s695_s1 + $0x110] sm:$0xff] }
  0x10   : > { %463 = vmatprep.subr.mxu0 %v208_v4  ;;  %503 = vmatprep.subr.mxu1 %v214_v12  ;;  %v188_v15 = vld [vmem:[%s695_s1 + $0x48] sm:$0xff]  ;;  %v203_v17 = vld [vmem:[%s695_s1 + $0xc0] sm:$0xff]  ;;  %v202_v20 = vld [vmem:[%s695_s1 + $0xb8] sm:$0xff] }
  0x11   : > { %464 = vmatpush3.msra.mxu0 %v192_v5  ;;  %504 = vmatpush3.msra.mxu1 %v214_v12  ;;  %v212_v16 = vld [vmem:[%s695_s1 + $0x108] sm:$0xff]  ;;  %v187_v19 = vld [vmem:[%s695_s1 + $0x40] sm:$0xff]  ;;  %v186_v22 = vld [vmem:[%s695_s1 + $0x38] sm:$0xff] }
  0x12   : > { %465 = vmatprep.subr.mxu0 %v207_v6  ;;  %505 = vmatprep.subr.mxu1 %v213_v14  ;;  %v174_v18 = vld [vmem:[%s604_s18 + $0x8] sm:$0xff]  ;;  %v211_v21 = vld [vmem:[%s695_s1 + $0x100] sm:$0xff]  ;;  %v201_v23 = vld [vmem:[%s695_s1 + $0xb0] sm:$0xff] }
  0x13   : > { %466 = vmatpush3.msra.mxu0 %v191_v7  ;;  %506 = vmatpush3.msra.mxu1 %v213_v14  ;;  %v175_v24 = vld [vmem:[%s604_s18 + $0x10] sm:$0xff]  ;;  %v178_v26 = vld [vmem:[%s604_s18 + $0x28] sm:$0xff]  ;;  %v199_v29 = vld [vmem:[%s695_s1 + $0xa0] sm:$0xff] }
  0x14   : > { %467 = vmatprep.subr.mxu0 %v206_v8  ;;  %507 = vmatprep.subr.mxu1 %v212_v16  ;;  %v185_v25 = vld [vmem:[%s695_s1 + $0x30] sm:$0xff]  ;;  %v200_v27 = vld [vmem:[%s695_s1 + $0xa8] sm:$0xff]  ;;  %v183_v30 = vld [vmem:[%s695_s1 + $0x20] sm:$0xff] }
  0x15   : > { %468 = vmatpush3.msra.mxu0 %v190_v9  ;;  %286 = vmatprep.mubr.f32.mxu0 %v174_v18  ;;  %v184_v28 = vld [vmem:[%s695_s1 + $0x28] sm:$0xff]  ;;  %v198_v31 = vld [vmem:[%s695_s1 + $0x98] sm:$0xff]  ;;  %v197_v33 = vld [vmem:[%s695_s1 + $0x90] sm:$0xff] }
  0x16   : > { %469 = vmatprep.subr.mxu0 %v205_v10  ;;  %508 = vmatpush3.msra.mxu1 %v212_v16  ;;  %v182_v32 = vld [vmem:[%s695_s1 + $0x18] sm:$0xff]  ;;  %v181_v34 = vld [vmem:[%s695_s1 + $0x10] sm:$0xff]  ;;  %v196_v35 = vld [vmem:[%s695_s1 + $0x88] sm:$0xff] }
  0x17   : > { %470 = vmatpush3.msra.mxu0 %v189_v11  ;;  %509 = vmatprep.subr.mxu1 %v211_v21  ;;  %v180_v36 = vld [vmem:[%s695_s1 + $0x8] sm:$0xff]  ;;  %v195_v37 = vld [vmem:[%s695_s1 + $0x80] sm:$0xff]  ;;  %v176_v41 = vld [vmem:[%s604_s18 + $0x18] sm:$0xff] }
  0x18   : > { %471 = vmatprep.subr.mxu0 %v204_v13  ;;  %510 = vmatpush3.msra.mxu1 %v211_v21  ;;  %v179_v38 = vld [vmem:[%s695_s1] sm:$0xff] }
  0x19   : > { %472 = vmatpush3.msra.mxu0 %v188_v15  ;;  %511 = vmatprep.mubr.msk.f32.mxu1 %vm215_vm0, %v175_v24  ;;  %v173_v39 = vld [vmem:[%s604_s18] sm:$0xff] }
  0x1a   : > { %473 = vmatprep.subr.mxu0 %v203_v17  ;;  %512 = vmatmul.mubr.msk.f32.vlgmr.msra.gmra.mxu1 %vm215_vm0, %v178_v26  ;;  %v177_v40 = vld [vmem:[%s604_s18 + $0x20] sm:$0xff] }
  0x1b   : > { %474 = vmatpush3.msra.mxu0 %v187_v19  ;;  %v454_v48 = vld [vmem:[%s696_s2] ss:$0 sm:$0xff]  ;;  %v455_v50 = vld [vmem:[%s696_s2 + $0x1] ss:$0 sm:$0xff] }
  0x1c   : > { %475 = vmatprep.subr.mxu0 %v202_v20 }
  0x1d   : > { %476 = vmatpush3.msra.mxu0 %v186_v22 }
  0x1e   : > { %477 = vmatprep.subr.mxu0 %v201_v23 }
  0x1f   : > { %478 = vmatpush3.msra.mxu0 %v185_v25 }
  0x20   : > { %479 = vmatprep.subr.mxu0 %v200_v27 }
  0x21   : > { %480 = vmatpush3.msra.mxu0 %v184_v28 }
  0x22   : > { %481 = vmatprep.subr.mxu0 %v199_v29 }
  0x23   : > { %482 = vmatpush3.msra.mxu0 %v183_v30 }
  0x24   : > { %483 = vmatprep.subr.mxu0 %v198_v31 }
  0x25   : > { %484 = vmatpush3.msra.mxu0 %v182_v32 }
  0x26   : > { %485 = vmatprep.subr.mxu0 %v197_v33 }
  0x27   : > { %486 = vmatpush3.msra.mxu0 %v181_v34 }
  0x28   : > { %487 = vmatprep.subr.mxu0 %v196_v35 }
  0x29   : > { %488 = vmatpush3.msra.mxu0 %v180_v36 }
  0x2a   : > { %489 = vmatprep.subr.mxu0 %v195_v37 }
  0x2b   : > { %490 = vmatpush3.msra.mxu0 %v179_v38 }
  0x2c   : > { %287 = vmatmul.mubr.f32.vlgmr.msra.gmra.mxu0 %v173_v39 }
  0x2d   : > { %291 = vmatprep.mubr.f32.mxu0 %v177_v40 }
  0x30   : > { %292 = vmatmul.mubr.f32.gmra.mxu0 %v176_v41 }
  0xda   : > { %v513_v42 = vpop.f32.mrf.mxu1 }
  0xdc   : > { %v363_v45 = vpop.f32.mrf.mxu1 }
  0xec   : > { %v491_v43 = vpop.f32.mrf.mxu0 }
  0xee   : > { %v492_v44 = vpop.f32.mrf.mxu0 }
  0xef   : > { %v493_v46 = vadd.f32 %v492_v44, %v491_v43 }
  0xf0   : > { %v494_v47 = vpop.f32.mrf.mxu0 }
  0xf1   : > { %v364_v49 = vadd.f32 %v493_v46, %v363_v45 }
  0xf2   : > { %v495_v51 = vpop.f32.mrf.mxu0 }
  0xf3   : > { %v376_v52 = vmul.f32 %v454_v48, %v364_v49  ;;  %v496_v53 = vadd.f32 %v495_v51, %v494_v47 }
  0xf5   : > { %v382_v54 = vadd.f32 %v455_v50, %v376_v52  ;;  %v369_v55 = vadd.f32 %v513_v42, %v496_v53 }
  0xf7   : > { %v384_v56 = vmax.f32 %v382_v54, 0.0  ;;  %v377_v57 = vmul.f32 %v454_v48, %v369_v55 }
  0xf9   : > { %387 = vst.msk [vmem:[%s170_s23] sm:$0xff] %vm386_vm1, %v384_v56  ;;  %v383_v58 = vadd.f32 %v455_v50, %v377_v57 }
  0xfb   : > { %v385_v59 = vmax.f32 %v383_v58, 0.0 }
  0xfd   : > { %388 = vst.msk [vmem:[%s170_s23 + $0x8] sm:$0xff] %vm386_vm1, %v385_v59 }
  0xfe PF: > { %s13_s12 = sadd.s32 1, %s529_s12  }
  0xff   : > { %p10_p4 = scmp.ge.s32.totalorder %s13_s12, 4  }
 0x101   :  { %12 = sbr.rel (!%p10_p4) target bundleno = 1 (0x1), region = 62 }

// kernel: encoder_forward.11
= control target key start
LH: loop header
LB: loop body
LE: loop exit
PB: predicated region body
PF: predicated region fallthrough
CT: control target
= control target key end

     0   :  { %s1125_s12 = smov 0   ;;  %s2102_s0 = inlined_call_operand.vmem [shape: f32[2,16,576], index: 0, kind: input, shape index: {}]   ;;  %s2103_s1 = inlined_call_operand.vmem [shape: f32[576,512], index: 1, kind: input, shape index: {}]   ;;  %s2104_s2 = inlined_call_operand.vmem [shape: f32[2,512], index: 2, kind: input, shape index: {}]   ;;  %s2105_s3 = inlined_call_operand.vmem [shape: f32[2,16,512], index: 3, kind: output, shape index: {}]  }
   0x1 LB: > { %s1070_s13 = sadd.s32 4294967295, %s1102_s12   ;;  %p1074_p0 = scmp.ge.s32.totalorder %s1102_s12, 1  ;;  %s1102_s12 = sphi %s1125_s12, %s13_s12  }
   0x2   : > { %p137_p1 = scmp.lt.s32.totalorder %s1102_s12, 3 }
   0x4   : > { %p138_p2 = pnand %p1074_p0, %p137_p1 }
   0x5   : > { %p1429_p3 = scmp.lt.s32.totalorder (!%p138_p2), %s1070_s13, 1 }
   0x6   : > { %141 = sbr.rel (%p138_p2) target bundleno = 375 (0x177), region = 32 }
   0xb   : > { %v245_v0 = vld [vmem:[%s2103_s1 + $0x1e8] sm:$0xff]  ;;  %v244_v2 = vld [vmem:[%s2103_s1 + $0x1e0] sm:$0xff]  ;;  %s2108_s13 = smov (!%p1429_p3, %s1070_s13), 1  ;;  %vm472_vm0 = vcmask 523264  }
   0xc   : > { %v373_v1 = vld [vmem:[%s2103_s1 + $0x5e8] sm:$0xff]  ;;  %479 = vmatprep.subr.mxu0 %v245_v0  ;;  %v372_v3 = vld [vmem:[%s2103_s1 + $0x5e0] sm:$0xff]  ;;  %s1086_s18 = smul.u32 80, %s2108_s13  ;;  %s1085_s27 = sshll.u32 %s2108_s13, 6 }
   0xd   : > { %556 = vmatprep.subr.mxu1 %v373_v1  ;;  %v241_v4 = vld [vmem:[%s2103_s1 + $0x1c8] sm:$0xff]  ;;  %480 = vmatpush1.msra.mxu0 %v244_v2  ;;  %v240_v6 = vld [vmem:[%s2103_s1 + $0x1c0] sm:$0xff]  ;;  %s2087_s30 = scalar_lea.vmem %s2105_s3, %s1085_s27 }
   0xe   : > { %v369_v5 = vld [vmem:[%s2103_s1 + $0x5c8] sm:$0xff]  ;;  %557 = vmatpush1.msra.mxu1 %v372_v3  ;;  %v368_v7 = vld [vmem:[%s2103_s1 + $0x5c0] sm:$0xff]  ;;  %481 = vmatprep.subr.mxu0 %v241_v4  ;;  %s1515_s10 = scalar_lea.vmem %s2102_s0, %s1086_s18 }
   0xf   : > { %v237_v8 = vld [vmem:[%s2103_s1 + $0x1a8] sm:$0xff]  ;;  %558 = vmatprep.subr.mxu1 %v369_v5  ;;  %v236_v10 = vld [vmem:[%s2103_s1 + $0x1a0] sm:$0xff]  ;;  %482 = vmatpush1.msra.mxu0 %v240_v6 }
  0x10   : > { %v365_v9 = vld [vmem:[%s2103_s1 + $0x5a8] sm:$0xff]  ;;  %v364_v11 = vld [vmem:[%s2103_s1 + $0x5a0] sm:$0xff]  ;;  %559 = vmatpush1.msra.mxu1 %v368_v7  ;;  %483 = vmatprep.subr.mxu0 %v237_v8 }
  0x11   : > { %v233_v12 = vld [vmem:[%s2103_s1 + $0x188] sm:$0xff]  ;;  %560 = vmatprep.subr.mxu1 %v365_v9  ;;  %v232_v14 = vld [vmem:[%s2103_s1 + $0x180] sm:$0xff]  ;;  %484 = vmatpush1.msra.mxu0 %v236_v10 }
  0x12   : > { %v361_v13 = vld [vmem:[%s2103_s1 + $0x588] sm:$0xff]  ;;  %v360_v15 = vld [vmem:[%s2103_s1 + $0x580] sm:$0xff]  ;;  %561 = vmatpush1.msra.mxu1 %v364_v11  ;;  %485 = vmatprep.subr.mxu0 %v233_v12 }
  0x13   : > { %v229_v16 = vld [vmem:[%s2103_s1 + $0x168] sm:$0xff]  ;;  %562 = vmatprep.subr.mxu1 %v361_v13  ;;  %v228_v18 = vld [vmem:[%s2103_s1 + $0x160] sm:$0xff]  ;;  %486 = vmatpush1.msra.mxu0 %v232_v14 }
  0x14   : > { %v357_v17 = vld [vmem:[%s2103_s1 + $0x568] sm:$0xff]  ;;  %v356_v19 = vld [vmem:[%s2103_s1 + $0x560] sm:$0xff]  ;;  %563 = vmatpush1.msra.mxu1 %v360_v15  ;;  %487 = vmatprep.subr.mxu0 %v229_v16 }
  0x15   : > { %v225_v20 = vld [vmem:[%s2103_s1 + $0x148] sm:$0xff]  ;;  %564 = vmatprep.subr.mxu1 %v357_v17  ;;  %v224_v22 = vld [vmem:[%s2103_s1 + $0x140] sm:$0xff]  ;;  %488 = vmatpush1.msra.mxu0 %v228_v18 }
  0x16   : > { %v353_v21 = vld [vmem:[%s2103_s1 + $0x548] sm:$0xff]  ;;  %v352_v23 = vld [vmem:[%s2103_s1 + $0x540] sm:$0xff]  ;;  %565 = vmatpush1.msra.mxu1 %v356_v19  ;;  %489 = vmatprep.subr.mxu0 %v225_v20 }
  0x17   : > { %v221_v24 = vld [vmem:[%s2103_s1 + $0x128] sm:$0xff]  ;;  %566 = vmatprep.subr.mxu1 %v353_v21  ;;  %v220_v26 = vld [vmem:[%s2103_s1 + $0x120] sm:$0xff]  ;;  %490 = vmatpush1.msra.mxu0 %v224_v22 }
  0x18   : > { %v349_v25 = vld [vmem:[%s2103_s1 + $0x528] sm:$0xff]  ;;  %v348_v27 = vld [vmem:[%s2103_s1 + $0x520] sm:$0xff]  ;;  %567 = vmatpush1.msra.mxu1 %v352_v23  ;;  %491 = vmatprep.subr.mxu0 %v221_v24 }
  0x19   : > { %v217_v28 = vld [vmem:[%s2103_s1 + $0x108] sm:$0xff]  ;;  %568 = vmatprep.subr.mxu1 %v349_v25  ;;  %v216_v30 = vld [vmem:[%s2103_s1 + $0x100] sm:$0xff]  ;;  %492 = vmatpush1.msra.mxu0 %v220_v26 }
  0x1a   : > { %v345_v29 = vld [vmem:[%s2103_s1 + $0x508] sm:$0xff]  ;;  %v344_v31 = vld [vmem:[%s2103_s1 + $0x500] sm:$0xff]  ;;  %569 = vmatpush1.msra.mxu1 %v348_v27  ;;  %493 = vmatprep.subr.mxu0 %v217_v28 }
  0x1b   : > { %v213_v32 = vld [vmem:[%s2103_s1 + $0xe8] sm:$0xff]  ;;  %570 = vmatprep.subr.mxu1 %v345_v29  ;;  %v212_v34 = vld [vmem:[%s2103_s1 + $0xe0] sm:$0xff]  ;;  %494 = vmatpush1.msra.mxu0 %v216_v30 }
  0x1c   : > { %v341_v33 = vld [vmem:[%s2103_s1 + $0x4e8] sm:$0xff]  ;;  %v340_v35 = vld [vmem:[%s2103_s1 + $0x4e0] sm:$0xff]  ;;  %571 = vmatpush1.msra.mxu1 %v344_v31  ;;  %495 = vmatprep.subr.mxu0 %v213_v32 }
  0x1d   : > { %v209_v36 = vld [vmem:[%s2103_s1 + $0xc8] sm:$0xff]  ;;  %572 = vmatprep.subr.mxu1 %v341_v33  ;;  %v208_v38 = vld [vmem:[%s2103_s1 + $0xc0] sm:$0xff]  ;;  %496 = vmatpush1.msra.mxu0 %v212_v34 }
  0x1e   : > { %v337_v37 = vld [vmem:[%s2103_s1 + $0x4c8] sm:$0xff]  ;;  %v336_v39 = vld [vmem:[%s2103_s1 + $0x4c0] sm:$0xff]  ;;  %573 = vmatpush1.msra.mxu1 %v340_v35  ;;  %497 = vmatprep.subr.mxu0 %v209_v36 }
  0x1f   : > { %v205_v40 = vld [vmem:[%s2103_s1 + $0xa8] sm:$0xff]  ;;  %574 = vmatprep.subr.mxu1 %v337_v37  ;;  %v204_v42 = vld [vmem:[%s2103_s1 + $0xa0] sm:$0xff]  ;;  %498 = vmatpush1.msra.mxu0 %v208_v38 }
  0x20   : > { %v333_v41 = vld [vmem:[%s2103_s1 + $0x4a8] sm:$0xff]  ;;  %v332_v43 = vld [vmem:[%s2103_s1 + $0x4a0] sm:$0xff]  ;;  %575 = vmatpush1.msra.mxu1 %v336_v39  ;;  %499 = vmatprep.subr.mxu0 %v205_v40 }
  0x21   : > { %v201_v44 = vld [vmem:[%s2103_s1 + $0x88] sm:$0xff]  ;;  %576 = vmatprep.subr.mxu1 %v333_v41  ;;  %v200_v46 = vld [vmem:[%s2103_s1 + $0x80] sm:$0xff]  ;;  %500 = vmatpush1.msra.mxu0 %v204_v42 }
  0x22   : > { %v329_v45 = vld [vmem:[%s2103_s1 + $0x488] sm:$0xff]  ;;  %v328_v47 = vld [vmem:[%s2103_s1 + $0x480] sm:$0xff]  ;;  %577 = vmatpush1.msra.mxu1 %v332_v43  ;;  %501 = vmatprep.subr.mxu0 %v201_v44 }
  0x23   : > { %v197_v48 = vld [vmem:[%s2103_s1 + $0x68] sm:$0xff]  ;;  %578 = vmatprep.subr.mxu1 %v329_v45  ;;  %v196_v50 = vld [vmem:[%s2103_s1 + $0x60] sm:$0xff]  ;;  %502 = vmatpush1.msra.mxu0 %v200_v46 }
  0x24   : > { %v325_v49 = vld [vmem:[%s2103_s1 + $0x468] sm:$0xff]  ;;  %v324_v51 = vld [vmem:[%s2103_s1 + $0x460] sm:$0xff]  ;;  %579 = vmatpush1.msra.mxu1 %v328_v47  ;;  %503 = vmatprep.subr.mxu0 %v197_v48 }
  0x25   : > { %v193_v52 = vld [vmem:[%s2103_s1 + $0x48] sm:$0xff]  ;;  %580 = vmatprep.subr.mxu1 %v325_v49  ;;  %v192_v54 = vld [vmem:[%s2103_s1 + $0x40] sm:$0xff]  ;;  %504 = vmatpush1.msra.mxu0 %v196_v50 }
  0x26   : > { %v321_v53 = vld [vmem:[%s2103_s1 + $0x448] sm:$0xff]  ;;  %v320_v55 = vld [vmem:[%s2103_s1 + $0x440] sm:$0xff]  ;;  %581 = vmatpush1.msra.mxu1 %v324_v51  ;;  %505 = vmatprep.subr.mxu0 %v193_v52 }
  0x27   : > { %v189_v56 = vld [vmem:[%s2103_s1 + $0x28] sm:$0xff]  ;;  %582 = vmatprep.subr.mxu1 %v321_v53  ;;  %v188_v58 = vld [vmem:[%s2103_s1 + $0x20] sm:$0xff]  ;;  %506 = vmatpush1.msra.mxu0 %v192_v54 }
  0x28   : > { %v317_v57 = vld [vmem:[%s2103_s1 + $0x428] sm:$0xff]  ;;  %v316_v59 = vld [vmem:[%s2103_s1 + $0x420] sm:$0xff]  ;;  %583 = vmatpush1.msra.mxu1 %v320_v55  ;;  %507 = vmatprep.subr.mxu0 %v189_v56 }
  0x29   : > { %v185_v60 = vld [vmem:[%s2103_s1 + $0x8] sm:$0xff]  ;;  %584 = vmatprep.subr.mxu1 %v317_v57  ;;  %v184_v62 = vld [vmem:[%s2103_s1] sm:$0xff]  ;;  %508 = vmatpush1.msra.mxu0 %v188_v58 }
  0x2a   : > { %v313_v61 = vld [vmem:[%s2103_s1 + $0x408] sm:$0xff]  ;;  %v312_v63 = vld [vmem:[%s2103_s1 + $0x400] sm:$0xff]  ;;  %585 = vmatpush1.msra.mxu1 %v316_v59  ;;  %509 = vmatprep.subr.mxu0 %v185_v60 }
  0x2b   : > { %v309_v0 = vld [vmem:[%s2103_s1 + $0x3e8] sm:$0xff]  ;;  %586 = vmatprep.subr.mxu1 %v313_v61  ;;  %v308_v2 = vld [vmem:[%s2103_s1 + $0x3e0] sm:$0xff]  ;;  %510 = vmatpush1.msra.mxu0 %v184_v62 }
  0x2c   : > { %v437_v1 = vld [vmem:[%s2103_s1 + $0x7e8] sm:$0xff]  ;;  %v436_v3 = vld [vmem:[%s2103_s1 + $0x7e0] sm:$0xff]  ;;  %587 = vmatpush1.msra.mxu1 %v312_v63  ;;  %511 = vmatprep.subr.mxu0 %v309_v0 }
  0x2d   : > { %v305_v4 = vld [vmem:[%s2103_s1 + $0x3c8] sm:$0xff]  ;;  %588 = vmatprep.subr.mxu1 %v437_v1  ;;  %v304_v6 = vld [vmem:[%s2103_s1 + $0x3c0] sm:$0xff]  ;;  %512 = vmatpush2.msra.mxu0 %v308_v2  ;;  %v1539_v1 = vld [vmem:[%s1515_s10 + $0x18] sm:$0xff] }
  0x2e   : > { %v433_v5 = vld [vmem:[%s2103_s1 + $0x7c8] sm:$0xff]  ;;  %v432_v7 = vld [vmem:[%s2103_s1 + $0x7c0] sm:$0xff]  ;;  %589 = vmatpush2.msra.mxu1 %v436_v3  ;;  %513 = vmatprep.subr.mxu0 %v305_v4  ;;  %v1545_v3 = vld [vmem:[%s1515_s10 + $0x10] sm:$0xff] }
  0x2f   : > { %v301_v8 = vld [vmem:[%s2103_s1 + $0x3a8] sm:$0xff]  ;;  %590 = vmatprep.subr.mxu1 %v433_v5  ;;  %v300_v10 = vld [vmem:[%s2103_s1 + $0x3a0] sm:$0xff]  ;;  %514 = vmatpush2.msra.mxu0 %v304_v6  ;;  %v247_v5 = vld [vmem:[%s2103_s1 + $0x1f8] sm:$0xff] }
  0x30   : > { %v429_v9 = vld [vmem:[%s2103_s1 + $0x7a8] sm:$0xff]  ;;  %v428_v11 = vld [vmem:[%s2103_s1 + $0x7a0] sm:$0xff]  ;;  %591 = vmatpush2.msra.mxu1 %v432_v7  ;;  %515 = vmatprep.subr.mxu0 %v301_v8  ;;  %v246_v7 = vld [vmem:[%s2103_s1 + $0x1f0] sm:$0xff] }
  0x31   : > { %v297_v12 = vld [vmem:[%s2103_s1 + $0x388] sm:$0xff]  ;;  %592 = vmatprep.subr.mxu1 %v429_v9  ;;  %v296_v14 = vld [vmem:[%s2103_s1 + $0x380] sm:$0xff]  ;;  %516 = vmatpush2.msra.mxu0 %v300_v10  ;;  %v243_v9 = vld [vmem:[%s2103_s1 + $0x1d8] sm:$0xff] }
  0x32   : > { %v425_v13 = vld [vmem:[%s2103_s1 + $0x788] sm:$0xff]  ;;  %v424_v15 = vld [vmem:[%s2103_s1 + $0x780] sm:$0xff]  ;;  %593 = vmatpush2.msra.mxu1 %v428_v11  ;;  %517 = vmatprep.subr.mxu0 %v297_v12  ;;  %v242_v11 = vld [vmem:[%s2103_s1 + $0x1d0] sm:$0xff] }
  0x33   : > { %v293_v16 = vld [vmem:[%s2103_s1 + $0x368] sm:$0xff]  ;;  %594 = vmatprep.subr.mxu1 %v425_v13  ;;  %v292_v18 = vld [vmem:[%s2103_s1 + $0x360] sm:$0xff]  ;;  %518 = vmatpush2.msra.mxu0 %v296_v14  ;;  %v239_v13 = vld [vmem:[%s2103_s1 + $0x1b8] sm:$0xff] }
  0x34   : > { %v421_v17 = vld [vmem:[%s2103_s1 + $0x768] sm:$0xff]  ;;  %v420_v19 = vld [vmem:[%s2103_s1 + $0x760] sm:$0xff]  ;;  %595 = vmatpush2.msra.mxu1 %v424_v15  ;;  %519 = vmatprep.subr.mxu0 %v293_v16  ;;  %v238_v15 = vld [vmem:[%s2103_s1 + $0x1b0] sm:$0xff] }
  0x35   : > { %v289_v20 = vld [vmem:[%s2103_s1 + $0x348] sm:$0xff]  ;;  %596 = vmatprep.subr.mxu1 %v421_v17  ;;  %v288_v22 = vld [vmem:[%s2103_s1 + $0x340] sm:$0xff]  ;;  %520 = vmatpush2.msra.mxu0 %v292_v18  ;;  %v235_v17 = vld [vmem:[%s2103_s1 + $0x198] sm:$0xff] }
  0x36   : > { %v417_v21 = vld [vmem:[%s2103_s1 + $0x748] sm:$0xff]  ;;  %v416_v23 = vld [vmem:[%s2103_s1 + $0x740] sm:$0xff]  ;;  %597 = vmatpush2.msra.mxu1 %v420_v19  ;;  %521 = vmatprep.subr.mxu0 %v289_v20  ;;  %v234_v19 = vld [vmem:[%s2103_s1 + $0x190] sm:$0xff] }
  0x37   : > { %v285_v24 = vld [vmem:[%s2103_s1 + $0x328] sm:$0xff]  ;;  %598 = vmatprep.subr.mxu1 %v417_v21  ;;  %v284_v26 = vld [vmem:[%s2103_s1 + $0x320] sm:$0xff]  ;;  %522 = vmatpush2.msra.mxu0 %v288_v22  ;;  %v231_v21 = vld [vmem:[%s2103_s1 + $0x178] sm:$0xff] }
  0x38   : > { %v413_v25 = vld [vmem:[%s2103_s1 + $0x728] sm:$0xff]  ;;  %v412_v27 = vld [vmem:[%s2103_s1 + $0x720] sm:$0xff]  ;;  %599 = vmatpush2.msra.mxu1 %v416_v23  ;;  %523 = vmatprep.subr.mxu0 %v285_v24  ;;  %v230_v23 = vld [vmem:[%s2103_s1 + $0x170] sm:$0xff] }
  0x39   : > { %v281_v28 = vld [vmem:[%s2103_s1 + $0x308] sm:$0xff]  ;;  %600 = vmatprep.subr.mxu1 %v413_v25  ;;  %v280_v30 = vld [vmem:[%s2103_s1 + $0x300] sm:$0xff]  ;;  %524 = vmatpush2.msra.mxu0 %v284_v26  ;;  %v1612_v24 = vld [vmem:[%s1515_s10 + $0x30] sm:$0xff] }
  0x3a   : > { %v409_v29 = vld [vmem:[%s2103_s1 + $0x708] sm:$0xff]  ;;  %v408_v31 = vld [vmem:[%s2103_s1 + $0x700] sm:$0xff]  ;;  %601 = vmatpush2.msra.mxu1 %v412_v27  ;;  %525 = vmatprep.subr.mxu0 %v281_v28  ;;  %v227_v27 = vld [vmem:[%s2103_s1 + $0x158] sm:$0xff] }
  0x3b   : > { %v277_v32 = vld [vmem:[%s2103_s1 + $0x2e8] sm:$0xff]  ;;  %602 = vmatprep.subr.mxu1 %v409_v29  ;;  %v276_v34 = vld [vmem:[%s2103_s1 + $0x2e0] sm:$0xff]  ;;  %526 = vmatpush2.msra.mxu0 %v280_v30  ;;  %v1627_v29 = vld [vmem:[%s1515_s10 + $0x38] sm:$0xff] }
  0x3c   : > { %v405_v33 = vld [vmem:[%s2103_s1 + $0x6e8] sm:$0xff]  ;;  %v404_v35 = vld [vmem:[%s2103_s1 + $0x6e0] sm:$0xff]  ;;  %603 = vmatpush2.msra.mxu1 %v408_v31  ;;  %527 = vmatprep.subr.mxu0 %v277_v32  ;;  %v226_v31 = vld [vmem:[%s2103_s1 + $0x150] sm:$0xff] }
  0x3d   : > { %v273_v36 = vld [vmem:[%s2103_s1 + $0x2c8] sm:$0xff]  ;;  %604 = vmatprep.subr.mxu1 %v405_v33  ;;  %v272_v38 = vld [vmem:[%s2103_s1 + $0x2c0] sm:$0xff]  ;;  %528 = vmatpush2.msra.mxu0 %v276_v34  ;;  %v223_v33 = vld [vmem:[%s2103_s1 + $0x138] sm:$0xff] }
  0x3e   : > { %v401_v37 = vld [vmem:[%s2103_s1 + $0x6c8] sm:$0xff]  ;;  %v400_v39 = vld [vmem:[%s2103_s1 + $0x6c0] sm:$0xff]  ;;  %605 = vmatpush2.msra.mxu1 %v404_v35  ;;  %529 = vmatprep.subr.mxu0 %v273_v36  ;;  %v222_v35 = vld [vmem:[%s2103_s1 + $0x130] sm:$0xff] }
  0x3f   : > { %v269_v40 = vld [vmem:[%s2103_s1 + $0x2a8] sm:$0xff]  ;;  %606 = vmatprep.subr.mxu1 %v401_v37  ;;  %v268_v42 = vld [vmem:[%s2103_s1 + $0x2a0] sm:$0xff]  ;;  %530 = vmatpush2.msra.mxu0 %v272_v38  ;;  %v219_v37 = vld [vmem:[%s2103_s1 + $0x118] sm:$0xff] }
  0x40   : > { %v397_v41 = vld [vmem:[%s2103_s1 + $0x6a8] sm:$0xff]  ;;  %v396_v43 = vld [vmem:[%s2103_s1 + $0x6a0] sm:$0xff]  ;;  %607 = vmatpush2.msra.mxu1 %v400_v39  ;;  %531 = vmatprep.subr.mxu0 %v269_v40  ;;  %v218_v39 = vld [vmem:[%s2103_s1 + $0x110] sm:$0xff] }
  0x41   : > { %v265_v44 = vld [vmem:[%s2103_s1 + $0x288] sm:$0xff]  ;;  %608 = vmatprep.subr.mxu1 %v397_v41  ;;  %v264_v46 = vld [vmem:[%s2103_s1 + $0x280] sm:$0xff]  ;;  %532 = vmatpush2.msra.mxu0 %v268_v42  ;;  %v215_v41 = vld [vmem:[%s2103_s1 + $0xf8] sm:$0xff] }
  0x42   : > { %v393_v45 = vld [vmem:[%s2103_s1 + $0x688] sm:$0xff]  ;;  %v392_v47 = vld [vmem:[%s2103_s1 + $0x680] sm:$0xff]  ;;  %609 = vmatpush2.msra.mxu1 %v396_v43  ;;  %533 = vmatprep.subr.mxu0 %v265_v44  ;;  %v375_v42 = vld [vmem:[%s2103_s1 + $0x5f8] sm:$0xff]  ;;  %v1104_v43 = vmov 0.0  }
  0x43   : > { %v261_v48 = vld [vmem:[%s2103_s1 + $0x268] sm:$0xff]  ;;  %610 = vmatprep.subr.mxu1 %v393_v45  ;;  %v260_v50 = vld [vmem:[%s2103_s1 + $0x260] sm:$0xff]  ;;  %534 = vmatpush2.msra.mxu0 %v264_v46  ;;  %v214_v44 = vld [vmem:[%s2103_s1 + $0xf0] sm:$0xff] }
  0x44   : > { %v389_v49 = vld [vmem:[%s2103_s1 + $0x668] sm:$0xff]  ;;  %v388_v51 = vld [vmem:[%s2103_s1 + $0x660] sm:$0xff]  ;;  %611 = vmatpush2.msra.mxu1 %v392_v47  ;;  %535 = vmatprep.subr.mxu0 %v261_v48  ;;  %v374_v45 = vld [vmem:[%s2103_s1 + $0x5f0] sm:$0xff] }
  0x45   : > { %v257_v52 = vld [vmem:[%s2103_s1 + $0x248] sm:$0xff]  ;;  %612 = vmatprep.subr.mxu1 %v389_v49  ;;  %v256_v54 = vld [vmem:[%s2103_s1 + $0x240] sm:$0xff]  ;;  %536 = vmatpush2.msra.mxu0 %v260_v50  ;;  %v211_v46 = vld [vmem:[%s2103_s1 + $0xd8] sm:$0xff] }
  0x46   : > { %v385_v53 = vld [vmem:[%s2103_s1 + $0x648] sm:$0xff]  ;;  %v384_v55 = vld [vmem:[%s2103_s1 + $0x640] sm:$0xff]  ;;  %613 = vmatpush2.msra.mxu1 %v388_v51  ;;  %537 = vmatprep.subr.mxu0 %v257_v52  ;;  %v371_v47 = vld [vmem:[%s2103_s1 + $0x5d8] sm:$0xff] }
  0x47   : > { %v253_v56 = vld [vmem:[%s2103_s1 + $0x228] sm:$0xff]  ;;  %614 = vmatprep.subr.mxu1 %v385_v53  ;;  %v252_v58 = vld [vmem:[%s2103_s1 + $0x220] sm:$0xff]  ;;  %538 = vmatpush2.msra.mxu0 %v256_v54  ;;  %v210_v48 = vld [vmem:[%s2103_s1 + $0xd0] sm:$0xff] }
  0x48   : > { %v381_v57 = vld [vmem:[%s2103_s1 + $0x628] sm:$0xff]  ;;  %v380_v59 = vld [vmem:[%s2103_s1 + $0x620] sm:$0xff]  ;;  %615 = vmatpush2.msra.mxu1 %v384_v55  ;;  %539 = vmatprep.subr.mxu0 %v253_v56  ;;  %v370_v49 = vld [vmem:[%s2103_s1 + $0x5d0] sm:$0xff] }
  0x49   : > { %v249_v60 = vld [vmem:[%s2103_s1 + $0x208] sm:$0xff]  ;;  %616 = vmatprep.subr.mxu1 %v381_v57  ;;  %v248_v62 = vld [vmem:[%s2103_s1 + $0x200] sm:$0xff]  ;;  %540 = vmatpush2.msra.mxu0 %v252_v58  ;;  %v207_v50 = vld [vmem:[%s2103_s1 + $0xb8] sm:$0xff] }
  0x4a   : > { %v377_v61 = vld [vmem:[%s2103_s1 + $0x608] sm:$0xff]  ;;  %617 = vmatpush2.msra.mxu1 %v380_v59  ;;  %v376_v0 = vld [vmem:[%s2103_s1 + $0x600] sm:$0xff]  ;;  %541 = vmatprep.subr.mxu0 %v249_v60  ;;  %v367_v52 = vld [vmem:[%s2103_s1 + $0x5b8] sm:$0xff] }
  0x4b   : > { %v1533_v63 = vld [vmem:[%s1515_s10 + $0x8] sm:$0xff]  ;;  %618 = vmatprep.subr.mxu1 %v377_v61  ;;  %v1542_v2 = vld [vmem:[%s1515_s10] sm:$0xff]  ;;  %542 = vmatpush2.msra.mxu0 %v248_v62  ;;  %v206_v53 = vld [vmem:[%s2103_s1 + $0xb0] sm:$0xff] }
  0x4c   : > { %543 = vmatprep.mubr.f32.mxu0 %v1533_v63  ;;  %v469_v4 = vld [vmem:[%s2103_s1 + $0x8e8] sm:$0xff]  ;;  %619 = vmatpush2.msra.mxu1 %v376_v0  ;;  %v468_v6 = vld [vmem:[%s2103_s1 + $0x8e0] sm:$0xff]  ;;  %v366_v54 = vld [vmem:[%s2103_s1 + $0x5b0] sm:$0xff] }
  0x4d   : > { %620 = vmatprep.mubr.f32.mxu1 %v1539_v1  ;;  %544 = vmatmul.mubr.f32.vlgmr.msra.gmra.mxu0 %v1542_v2  ;;  %v465_v8 = vld [vmem:[%s2103_s1 + $0x8c8] sm:$0xff]  ;;  %v464_v10 = vld [vmem:[%s2103_s1 + $0x8c0] sm:$0xff]  ;;  %v203_v55 = vld [vmem:[%s2103_s1 + $0x98] sm:$0xff] }
  0x4e   : > { %621 = vmatmul.mubr.f32.vlgmr.msra.gmra.mxu1 %v1545_v3  ;;  %649 = vmatprep.subr.mxu0 %v469_v4  ;;  %v461_v12 = vld [vmem:[%s2103_s1 + $0x8a8] sm:$0xff]  ;;  %v460_v14 = vld [vmem:[%s2103_s1 + $0x8a0] sm:$0xff]  ;;  %v363_v56 = vld [vmem:[%s2103_s1 + $0x598] sm:$0xff] }
  0x4f   : > { %710 = vmatprep.subr.mxu1 %v247_v5  ;;  %650 = vmatpush1.msra.mxu0 %v468_v6  ;;  %v457_v16 = vld [vmem:[%s2103_s1 + $0x888] sm:$0xff]  ;;  %v456_v18 = vld [vmem:[%s2103_s1 + $0x880] sm:$0xff]  ;;  %v202_v57 = vld [vmem:[%s2103_s1 + $0x90] sm:$0xff] }
  0x50   : > { %711 = vmatpush1.msra.mxu1 %v246_v7  ;;  %651 = vmatprep.subr.mxu0 %v465_v8  ;;  %v453_v20 = vld [vmem:[%s2103_s1 + $0x868] sm:$0xff]  ;;  %v452_v22 = vld [vmem:[%s2103_s1 + $0x860] sm:$0xff]  ;;  %v362_v58 = vld [vmem:[%s2103_s1 + $0x590] sm:$0xff] }
  0x51   : > { %712 = vmatprep.subr.mxu1 %v243_v9  ;;  %652 = vmatpush1.msra.mxu0 %v464_v10  ;;  %v1615_v25 = vld [vmem:[%s1515_s10 + $0x40] sm:$0xff]  ;;  %v449_v26 = vld [vmem:[%s2103_s1 + $0x848] sm:$0xff]  ;;  %v199_v59 = vld [vmem:[%s2103_s1 + $0x78] sm:$0xff] }
  0x52   : > { %713 = vmatpush1.msra.mxu1 %v242_v11  ;;  %653 = vmatprep.subr.mxu0 %v461_v12  ;;  %v1624_v28 = vld [vmem:[%s1515_s10 + $0x28] sm:$0xff]  ;;  %v448_v30 = vld [vmem:[%s2103_s1 + $0x840] sm:$0xff]  ;;  %v359_v60 = vld [vmem:[%s2103_s1 + $0x578] sm:$0xff] }
  0x53   : > { %714 = vmatprep.subr.mxu1 %v239_v13  ;;  %654 = vmatpush1.msra.mxu0 %v460_v14  ;;  %v445_v32 = vld [vmem:[%s2103_s1 + $0x828] sm:$0xff]  ;;  %v444_v34 = vld [vmem:[%s2103_s1 + $0x820] sm:$0xff]  ;;  %v198_v61 = vld [vmem:[%s2103_s1 + $0x70] sm:$0xff] }
  0x54   : > { %715 = vmatpush1.msra.mxu1 %v238_v15  ;;  %655 = vmatprep.subr.mxu0 %v457_v16  ;;  %v441_v36 = vld [vmem:[%s2103_s1 + $0x808] sm:$0xff]  ;;  %v440_v38 = vld [vmem:[%s2103_s1 + $0x800] sm:$0xff]  ;;  %v358_v62 = vld [vmem:[%s2103_s1 + $0x570] sm:$0xff] }
  0x55   : > { %716 = vmatprep.subr.mxu1 %v235_v17  ;;  %656 = vmatpush1.msra.mxu0 %v456_v18  ;;  %v1664_v40 = vld [vmem:[%s1515_s10 + $0x20] sm:$0xff]  ;;  %v1697_v51 = vld [vmem:[%s1515_s10 + $0x48] sm:$0xff]  ;;  %v195_v0 = vld [vmem:[%s2103_s1 + $0x58] sm:$0xff] }
  0x56   : > { %717 = vmatpush1.msra.mxu1 %v234_v19  ;;  %657 = vmatprep.subr.mxu0 %v453_v20  ;;  %v355_v4 = vld [vmem:[%s2103_s1 + $0x558] sm:$0xff]  ;;  %v194_v5 = vld [vmem:[%s2103_s1 + $0x50] sm:$0xff] }
  0x57   : > { %718 = vmatprep.subr.mxu1 %v231_v21  ;;  %658 = vmatpush1.msra.mxu0 %v452_v22  ;;  %v354_v6 = vld [vmem:[%s2103_s1 + $0x550] sm:$0xff]  ;;  %v191_v7 = vld [vmem:[%s2103_s1 + $0x38] sm:$0xff] }
  0x58   : > { %719 = vmatpush1.msra.mxu1 %v230_v23  ;;  %549 = vmatprep.mubr.f32.mxu0 %v1612_v24  ;;  %v351_v8 = vld [vmem:[%s2103_s1 + $0x538] sm:$0xff]  ;;  %v190_v9 = vld [vmem:[%s2103_s1 + $0x30] sm:$0xff] }
  0x59   : > { %626 = vmatprep.mubr.f32.mxu1 %v1615_v25  ;;  %659 = vmatprep.subr.mxu0 %v449_v26  ;;  %v350_v10 = vld [vmem:[%s2103_s1 + $0x530] sm:$0xff]  ;;  %v187_v11 = vld [vmem:[%s2103_s1 + $0x18] sm:$0xff] }
  0x5a   : > { %720 = vmatprep.subr.mxu1 %v227_v27  ;;  %550 = vmatmul.mubr.f32.gmra.mxu0 %v1624_v28  ;;  %v347_v12 = vld [vmem:[%s2103_s1 + $0x518] sm:$0xff]  ;;  %v186_v13 = vld [vmem:[%s2103_s1 + $0x10] sm:$0xff] }
  0x5b   : > { %627 = vmatmul.mubr.f32.gmra.mxu1 %v1627_v29  ;;  %660 = vmatpush1.msra.mxu0 %v448_v30  ;;  %v346_v14 = vld [vmem:[%s2103_s1 + $0x510] sm:$0xff]  ;;  %v311_v15 = vld [vmem:[%s2103_s1 + $0x3f8] sm:$0xff] }
  0x5c   : > { %721 = vmatpush1.msra.mxu1 %v226_v31  ;;  %661 = vmatprep.subr.mxu0 %v445_v32  ;;  %v343_v16 = vld [vmem:[%s2103_s1 + $0x4f8] sm:$0xff]  ;;  %v310_v17 = vld [vmem:[%s2103_s1 + $0x3f0] sm:$0xff] }
  0x5d   : > { %722 = vmatprep.subr.mxu1 %v223_v33  ;;  %662 = vmatpush1.msra.mxu0 %v444_v34  ;;  %v342_v18 = vld [vmem:[%s2103_s1 + $0x4f0] sm:$0xff]  ;;  %v307_v19 = vld [vmem:[%s2103_s1 + $0x3d8] sm:$0xff] }
  0x5e   : > { %723 = vmatpush1.msra.mxu1 %v222_v35  ;;  %663 = vmatprep.subr.mxu0 %v441_v36  ;;  %v339_v20 = vld [vmem:[%s2103_s1 + $0x4d8] sm:$0xff]  ;;  %v306_v21 = vld [vmem:[%s2103_s1 + $0x3d0] sm:$0xff] }
  0x5f   : > { %724 = vmatprep.subr.mxu1 %v219_v37  ;;  %664 = vmatpush1.msra.mxu0 %v440_v38  ;;  %v338_v22 = vld [vmem:[%s2103_s1 + $0x4d0] sm:$0xff]  ;;  %v303_v23 = vld [vmem:[%s2103_s1 + $0x3b8] sm:$0xff] }
  0x60   : > { %697 = vmatprep.mubr.f32.mxu0 %v1104_v43  ;;  %725 = vmatpush1.msra.mxu1 %v218_v39  ;;  %v335_v26 = vld [vmem:[%s2103_s1 + $0x4b8] sm:$0xff]  ;;  %v302_v27 = vld [vmem:[%s2103_s1 + $0x3b0] sm:$0xff] }
  0x61   : > { %1079 = vmatmul.mubr.msk.f32.vlgmr.msra.gmra.mxu0 %vm472_vm0, %v1664_v40  ;;  %726 = vmatprep.subr.mxu1 %v215_v41  ;;  %v334_v30 = vld [vmem:[%s2103_s1 + $0x4b0] sm:$0xff]  ;;  %v299_v31 = vld [vmem:[%s2103_s1 + $0x398] sm:$0xff] }
  0x62   : > { %787 = vmatprep.subr.mxu0 %v375_v42  ;;  %727 = vmatpush1.msra.mxu1 %v214_v44  ;;  %v331_v32 = vld [vmem:[%s2103_s1 + $0x498] sm:$0xff]  ;;  %v298_v33 = vld [vmem:[%s2103_s1 + $0x390] sm:$0xff] }
  0x63   : > { %788 = vmatpush1.msra.mxu0 %v374_v45  ;;  %728 = vmatprep.subr.mxu1 %v211_v46  ;;  %v330_v34 = vld [vmem:[%s2103_s1 + $0x490] sm:$0xff]  ;;  %v295_v35 = vld [vmem:[%s2103_s1 + $0x378] sm:$0xff] }
  0x64   : > { %789 = vmatprep.subr.mxu0 %v371_v47  ;;  %703 = vmatprep.mubr.f32.mxu0 %v1104_v43  ;;  %v327_v36 = vld [vmem:[%s2103_s1 + $0x478] sm:$0xff]  ;;  %v294_v37 = vld [vmem:[%s2103_s1 + $0x370] sm:$0xff] }
  0x65   : > { %729 = vmatpush1.msra.mxu1 %v210_v48  ;;  %790 = vmatpush1.msra.mxu0 %v370_v49  ;;  %v326_v38 = vld [vmem:[%s2103_s1 + $0x470] sm:$0xff]  ;;  %v291_v39 = vld [vmem:[%s2103_s1 + $0x358] sm:$0xff] }
  0x66   : > { %730 = vmatprep.subr.mxu1 %v207_v50  ;;  %1080 = vmatmul.mubr.msk.f32.gmra.mxu0 %vm472_vm0, %v1697_v51  ;;  %v323_v41 = vld [vmem:[%s2103_s1 + $0x458] sm:$0xff]  ;;  %v290_v42 = vld [vmem:[%s2103_s1 + $0x350] sm:$0xff] }
  0x67   : > { %791 = vmatprep.subr.mxu0 %v367_v52  ;;  %731 = vmatpush1.msra.mxu1 %v206_v53  ;;  %v322_v44 = vld [vmem:[%s2103_s1 + $0x450] sm:$0xff]  ;;  %v287_v45 = vld [vmem:[%s2103_s1 + $0x338] sm:$0xff] }
  0x68   : > { %792 = vmatpush1.msra.mxu0 %v366_v54  ;;  %732 = vmatprep.subr.mxu1 %v203_v55  ;;  %v319_v46 = vld [vmem:[%s2103_s1 + $0x438] sm:$0xff]  ;;  %v286_v47 = vld [vmem:[%s2103_s1 + $0x330] sm:$0xff] }
  0x69   : > { %793 = vmatprep.subr.mxu0 %v363_v56  ;;  %733 = vmatpush1.msra.mxu1 %v202_v57  ;;  %v318_v48 = vld [vmem:[%s2103_s1 + $0x430] sm:$0xff]  ;;  %v283_v49 = vld [vmem:[%s2103_s1 + $0x318] sm:$0xff] }
  0x6a   : > { %794 = vmatpush1.msra.mxu0 %v362_v58  ;;  %734 = vmatprep.subr.mxu1 %v199_v59  ;;  %v315_v50 = vld [vmem:[%s2103_s1 + $0x418] sm:$0xff]  ;;  %v282_v52 = vld [vmem:[%s2103_s1 + $0x310] sm:$0xff] }
  0x6b   : > { %795 = vmatprep.subr.mxu0 %v359_v60  ;;  %735 = vmatpush1.msra.mxu1 %v198_v61  ;;  %v314_v53 = vld [vmem:[%s2103_s1 + $0x410] sm:$0xff]  ;;  %v279_v54 = vld [vmem:[%s2103_s1 + $0x2f8] sm:$0xff] }
  0x6c   : > { %796 = vmatpush1.msra.mxu0 %v358_v62  ;;  %736 = vmatprep.subr.mxu1 %v195_v0  ;;  %v439_v55 = vld [vmem:[%s2103_s1 + $0x7f8] sm:$0xff]  ;;  %v278_v56 = vld [vmem:[%s2103_s1 + $0x2f0] sm:$0xff] }
  0x6d   : > { %797 = vmatprep.subr.mxu0 %v355_v4  ;;  %737 = vmatpush1.msra.mxu1 %v194_v5  ;;  %v438_v57 = vld [vmem:[%s2103_s1 + $0x7f0] sm:$0xff]  ;;  %v275_v58 = vld [vmem:[%s2103_s1 + $0x2d8] sm:$0xff] }
  0x6e   : > { %798 = vmatpush1.msra.mxu0 %v354_v6  ;;  %738 = vmatprep.subr.mxu1 %v191_v7  ;;  %v435_v59 = vld [vmem:[%s2103_s1 + $0x7d8] sm:$0xff]  ;;  %v274_v60 = vld [vmem:[%s2103_s1 + $0x2d0] sm:$0xff] }
  0x6f   : > { %799 = vmatprep.subr.mxu0 %v351_v8  ;;  %739 = vmatpush1.msra.mxu1 %v190_v9  ;;  %v434_v61 = vld [vmem:[%s2103_s1 + $0x7d0] sm:$0xff]  ;;  %v271_v62 = vld [vmem:[%s2103_s1 + $0x2b8] sm:$0xff] }
  0x70   : > { %800 = vmatpush1.msra.mxu0 %v350_v10  ;;  %740 = vmatprep.subr.mxu1 %v187_v11  ;;  %v431_v0 = vld [vmem:[%s2103_s1 + $0x7b8] sm:$0xff]  ;;  %v270_v4 = vld [vmem:[%s2103_s1 + $0x2b0] sm:$0xff] }
  0x71   : > { %801 = vmatprep.subr.mxu0 %v347_v12  ;;  %741 = vmatpush1.msra.mxu1 %v186_v13  ;;  %v430_v5 = vld [vmem:[%s2103_s1 + $0x7b0] sm:$0xff]  ;;  %v267_v6 = vld [vmem:[%s2103_s1 + $0x298] sm:$0xff] }
  0x72   : > { %802 = vmatpush1.msra.mxu0 %v346_v14  ;;  %742 = vmatprep.subr.mxu1 %v311_v15  ;;  %v427_v7 = vld [vmem:[%s2103_s1 + $0x798] sm:$0xff]  ;;  %v266_v8 = vld [vmem:[%s2103_s1 + $0x290] sm:$0xff] }
  0x73   : > { %803 = vmatprep.subr.mxu0 %v343_v16  ;;  %743 = vmatpush2.msra.mxu1 %v310_v17  ;;  %v426_v9 = vld [vmem:[%s2103_s1 + $0x790] sm:$0xff]  ;;  %v263_v10 = vld [vmem:[%s2103_s1 + $0x278] sm:$0xff] }
  0x74   : > { %804 = vmatpush1.msra.mxu0 %v342_v18  ;;  %744 = vmatprep.subr.mxu1 %v307_v19  ;;  %v423_v11 = vld [vmem:[%s2103_s1 + $0x778] sm:$0xff]  ;;  %v262_v12 = vld [vmem:[%s2103_s1 + $0x270] sm:$0xff] }
  0x75   : > { %805 = vmatprep.subr.mxu0 %v339_v20  ;;  %745 = vmatpush2.msra.mxu1 %v306_v21  ;;  %v422_v13 = vld [vmem:[%s2103_s1 + $0x770] sm:$0xff]  ;;  %v259_v14 = vld [vmem:[%s2103_s1 + $0x258] sm:$0xff] }
  0x76   : > { %806 = vmatpush1.msra.mxu0 %v338_v22  ;;  %746 = vmatprep.subr.mxu1 %v303_v23  ;;  %v419_v15 = vld [vmem:[%s2103_s1 + $0x758] sm:$0xff]  ;;  %v258_v16 = vld [vmem:[%s2103_s1 + $0x250] sm:$0xff] }
  0x77   : > { %807 = vmatprep.subr.mxu0 %v335_v26  ;;  %747 = vmatpush2.msra.mxu1 %v302_v27  ;;  %v418_v17 = vld [vmem:[%s2103_s1 + $0x750] sm:$0xff]  ;;  %v255_v18 = vld [vmem:[%s2103_s1 + $0x238] sm:$0xff] }
  0x78   : > { %808 = vmatpush1.msra.mxu0 %v334_v30  ;;  %748 = vmatprep.subr.mxu1 %v299_v31  ;;  %v415_v19 = vld [vmem:[%s2103_s1 + $0x738] sm:$0xff]  ;;  %v254_v20 = vld [vmem:[%s2103_s1 + $0x230] sm:$0xff] }
  0x79   : > { %809 = vmatprep.subr.mxu0 %v331_v32  ;;  %749 = vmatpush2.msra.mxu1 %v298_v33  ;;  %v414_v21 = vld [vmem:[%s2103_s1 + $0x730] sm:$0xff]  ;;  %v251_v22 = vld [vmem:[%s2103_s1 + $0x218] sm:$0xff] }
  0x7a   : > { %810 = vmatpush1.msra.mxu0 %v330_v34  ;;  %750 = vmatprep.subr.mxu1 %v295_v35  ;;  %v411_v23 = vld [vmem:[%s2103_s1 + $0x718] sm:$0xff]  ;;  %v250_v26 = vld [vmem:[%s2103_s1 + $0x210] sm:$0xff] }
  0x7b   : > { %811 = vmatprep.subr.mxu0 %v327_v36  ;;  %751 = vmatpush2.msra.mxu1 %v294_v37  ;;  %v410_v27 = vld [vmem:[%s2103_s1 + $0x710] sm:$0xff]  ;;  %v407_v30 = vld [vmem:[%s2103_s1 + $0x6f8] sm:$0xff] }
  0x7c   : > { %812 = vmatpush1.msra.mxu0 %v326_v38  ;;  %752 = vmatprep.subr.mxu1 %v291_v39  ;;  %v471_v31 = vld [vmem:[%s2103_s1 + $0x8f8] sm:$0xff]  ;;  %v406_v32 = vld [vmem:[%s2103_s1 + $0x6f0] sm:$0xff] }
  0x7d   : > { %813 = vmatprep.subr.mxu0 %v323_v41  ;;  %753 = vmatpush2.msra.mxu1 %v290_v42  ;;  %v470_v33 = vld [vmem:[%s2103_s1 + $0x8f0] sm:$0xff]  ;;  %v403_v34 = vld [vmem:[%s2103_s1 + $0x6d8] sm:$0xff] }
  0x7e   : > { %814 = vmatpush1.msra.mxu0 %v322_v44  ;;  %754 = vmatprep.subr.mxu1 %v287_v45  ;;  %v467_v35 = vld [vmem:[%s2103_s1 + $0x8d8] sm:$0xff]  ;;  %v402_v36 = vld [vmem:[%s2103_s1 + $0x6d0] sm:$0xff] }
  0x7f   : > { %815 = vmatprep.subr.mxu0 %v319_v46  ;;  %755 = vmatpush2.msra.mxu1 %v286_v47  ;;  %v399_v37 = vld [vmem:[%s2103_s1 + $0x6b8] sm:$0xff]  ;;  %v462_v39 = vld [vmem:[%s2103_s1 + $0x8b0] sm:$0xff] }
  0x80   : > { %816 = vmatpush1.msra.mxu0 %v318_v48  ;;  %756 = vmatprep.subr.mxu1 %v283_v49  ;;  %v463_v38 = vld [vmem:[%s2103_s1 + $0x8b8] sm:$0xff]  ;;  %v394_v44 = vld [vmem:[%s2103_s1 + $0x690] sm:$0xff] }
  0x81   : > { %817 = vmatprep.subr.mxu0 %v315_v50  ;;  %757 = vmatpush2.msra.mxu1 %v282_v52  ;;  %v395_v41 = vld [vmem:[%s2103_s1 + $0x698] sm:$0xff]  ;;  %v458_v45 = vld [vmem:[%s2103_s1 + $0x890] sm:$0xff] }
  0x82   : > { %818 = vmatpush1.msra.mxu0 %v314_v53  ;;  %758 = vmatprep.subr.mxu1 %v279_v54  ;;  %v459_v42 = vld [vmem:[%s2103_s1 + $0x898] sm:$0xff]  ;;  %v390_v48 = vld [vmem:[%s2103_s1 + $0x670] sm:$0xff] }
  0x83   : > { %819 = vmatprep.subr.mxu0 %v439_v55  ;;  %759 = vmatpush2.msra.mxu1 %v278_v56  ;;  %v391_v46 = vld [vmem:[%s2103_s1 + $0x678] sm:$0xff]  ;;  %v454_v49 = vld [vmem:[%s2103_s1 + $0x870] sm:$0xff] }
  0x84   : > { %820 = vmatpush2.msra.mxu0 %v438_v57  ;;  %760 = vmatprep.subr.mxu1 %v275_v58  ;;  %v455_v47 = vld [vmem:[%s2103_s1 + $0x878] sm:$0xff]  ;;  %v386_v53 = vld [vmem:[%s2103_s1 + $0x650] sm:$0xff] }
  0x85   : > { %821 = vmatprep.subr.mxu0 %v435_v59  ;;  %761 = vmatpush2.msra.mxu1 %v274_v60  ;;  %v387_v50 = vld [vmem:[%s2103_s1 + $0x658] sm:$0xff]  ;;  %v450_v54 = vld [vmem:[%s2103_s1 + $0x850] sm:$0xff] }
  0x86   : > { %822 = vmatpush2.msra.mxu0 %v434_v61  ;;  %762 = vmatprep.subr.mxu1 %v271_v62  ;;  %v451_v52 = vld [vmem:[%s2103_s1 + $0x858] sm:$0xff]  ;;  %v382_v57 = vld [vmem:[%s2103_s1 + $0x630] sm:$0xff] }
  0x87   : > { %823 = vmatprep.subr.mxu0 %v431_v0  ;;  %763 = vmatpush2.msra.mxu1 %v270_v4  ;;  %v383_v55 = vld [vmem:[%s2103_s1 + $0x638] sm:$0xff]  ;;  %v446_v58 = vld [vmem:[%s2103_s1 + $0x830] sm:$0xff] }
  0x88   : > { %824 = vmatpush2.msra.mxu0 %v430_v5  ;;  %764 = vmatprep.subr.mxu1 %v267_v6  ;;  %v447_v56 = vld [vmem:[%s2103_s1 + $0x838] sm:$0xff]  ;;  %v442_v61 = vld [vmem:[%s2103_s1 + $0x810] sm:$0xff] }
  0x89   : > { %825 = vmatprep.subr.mxu0 %v427_v7  ;;  %765 = vmatpush2.msra.mxu1 %v266_v8  ;;  %v379_v59 = vld [vmem:[%s2103_s1 + $0x618] sm:$0xff] }
  0x8a   : > { %826 = vmatpush2.msra.mxu0 %v426_v9  ;;  %766 = vmatprep.subr.mxu1 %v263_v10  ;;  %v443_v60 = vld [vmem:[%s2103_s1 + $0x818] sm:$0xff] }
  0x8b   : > { %827 = vmatprep.subr.mxu0 %v423_v11  ;;  %767 = vmatpush2.msra.mxu1 %v262_v12 }
  0x8c   : > { %828 = vmatpush2.msra.mxu0 %v422_v13  ;;  %768 = vmatprep.subr.mxu1 %v259_v14 }
  0x8d   : > { %829 = vmatprep.subr.mxu0 %v419_v15  ;;  %769 = vmatpush2.msra.mxu1 %v258_v16 }
  0x8e   : > { %830 = vmatpush2.msra.mxu0 %v418_v17  ;;  %770 = vmatprep.subr.mxu1 %v255_v18 }
  0x8f   : > { %831 = vmatprep.subr.mxu0 %v415_v19  ;;  %771 = vmatpush2.msra.mxu1 %v254_v20 }
  0x90   : > { %832 = vmatpush2.msra.mxu0 %v414_v21  ;;  %772 = vmatprep.subr.mxu1 %v251_v22 }
  0x91   : > { %833 = vmatprep.subr.mxu0 %v411_v23  ;;  %773 = vmatpush2.msra.mxu1 %v250_v26 }
  0x92   : > { %834 = vmatpush2.msra.mxu0 %v410_v27  ;;  %774 = vmatprep.mubr.f32.mxu1 %v1533_v63  ;;  %v466_v63 = vld [vmem:[%s2103_s1 + $0x8d0] sm:$0xff] }
  0x93   : > { %835 = vmatprep.subr.mxu0 %v407_v30  ;;  %880 = vmatprep.subr.mxu1 %v471_v31 }
  0x94   : > { %775 = vmatmul.mubr.f32.vlgmr.msra.gmra.mxu1 %v1542_v2  ;;  %836 = vmatpush2.msra.mxu0 %v406_v32  ;;  %v398_v2 = vld [vmem:[%s2103_s1 + $0x6b0] sm:$0xff] }
  0x95   : > { %881 = vmatpush1.msra.mxu1 %v470_v33  ;;  %837 = vmatprep.subr.mxu0 %v403_v34 }
  0x96   : > { %882 = vmatprep.subr.mxu1 %v467_v35  ;;  %838 = vmatpush2.msra.mxu0 %v402_v36 }
  0x97   : > { %883 = vmatpush1.msra.mxu1 %v466_v63  ;;  %839 = vmatprep.subr.mxu0 %v399_v37 }
  0x98   : > { %884 = vmatprep.subr.mxu1 %v463_v38  ;;  %840 = vmatpush2.msra.mxu0 %v398_v2 }
  0x99   : > { %885 = vmatpush1.msra.mxu1 %v462_v39  ;;  %841 = vmatprep.subr.mxu0 %v395_v41 }
  0x9a   : > { %886 = vmatprep.subr.mxu1 %v459_v42  ;;  %842 = vmatpush2.msra.mxu0 %v394_v44 }
  0x9b   : > { %887 = vmatpush1.msra.mxu1 %v458_v45  ;;  %843 = vmatprep.subr.mxu0 %v391_v46 }
  0x9c   : > { %888 = vmatprep.subr.mxu1 %v455_v47  ;;  %844 = vmatpush2.msra.mxu0 %v390_v48 }
  0x9d   : > { %889 = vmatpush1.msra.mxu1 %v454_v49  ;;  %845 = vmatprep.subr.mxu0 %v387_v50 }
  0x9e   : > { %890 = vmatprep.subr.mxu1 %v451_v52  ;;  %780 = vmatprep.mubr.f32.mxu1 %v1612_v24  ;;  %v378_v24 = vld [vmem:[%s2103_s1 + $0x610] sm:$0xff] }
  0x9f   : > { %846 = vmatpush2.msra.mxu0 %v386_v53  ;;  %891 = vmatpush1.msra.mxu1 %v450_v54 }
  0xa0   : > { %847 = vmatprep.subr.mxu0 %v383_v55  ;;  %781 = vmatmul.mubr.f32.gmra.mxu1 %v1624_v28  ;;  %v942_v28 = vlaneseq }
  0xa1   : > { %892 = vmatprep.subr.mxu1 %v447_v56  ;;  %848 = vmatpush2.msra.mxu0 %v382_v57 }
  0xa2   : > { %893 = vmatpush1.msra.mxu1 %v446_v58  ;;  %849 = vmatprep.subr.mxu0 %v379_v59 }
  0xa3   : > { %894 = vmatprep.subr.mxu1 %v443_v60  ;;  %850 = vmatpush2.msra.mxu0 %v378_v24 }
  0xa4   : > { %851 = vmatprep.mubr.f32.mxu0 %v1539_v1  ;;  %895 = vmatpush1.msra.mxu1 %v442_v61  ;;  %v2073_v1 = vshrl.u32 %v942_v28, 7 }
  0xa5   : > { %928 = vmatprep.mubr.f32.mxu1 %v1104_v43  ;;  %852 = vmatmul.mubr.f32.vlgmr.msra.gmra.mxu0 %v1545_v3 }
  0xa6   : > { %1081 = vmatmul.mubr.msk.f32.vlgmr.msra.gmra.mxu1 %vm472_vm0, %v1664_v40  ;;  %857 = vmatprep.mubr.f32.mxu0 %v1615_v25  ;;  %v944_v3 = vsub.s32 0, %v2073_v1  ;;  %v171_v25 = vld [vmem:[%s2104_s2] ss:$2 sm:$0xf]  ;;  %v952_v44 = vsub.s32 2, %v2073_v1  ;;  %v956_v45 = vsub.s32 3, %v2073_v1 }
  0xa7   : > { %934 = vmatprep.mubr.f32.mxu1 %v1104_v43 }
  0xa8   : > { %v945_v7 = vrot.slane %v171_v25, %v944_v3  ;;  %v953_v49 = vrot.slane %v171_v25, %v952_v44  ;;  %v957_v56 = vrot.slane %v171_v25, %v956_v45 }
  0xa9   : > { %858 = vmatmul.mubr.f32.gmra.mxu0 %v1627_v29  ;;  %v948_v29 = vsub.s32 1, %v2073_v1 }
  0xaa   : > { %1082 = vmatmul.mubr.msk.f32.gmra.mxu1 %vm472_vm0, %v1697_v51  ;;  %v1078_v51 = vld [vmem:[%s2104_s2 + $0x1] ss:$2 sm:$0xf] }
  0xab   : > { %v974_v12 = vrot.slane %v1078_v51, %v944_v3  ;;  %v949_v13 = vrot.slane %v171_v25, %v948_v29  ;;  %v978_v17 = vrot.slane %v1078_v51, %v948_v29  ;;  %v982_v54 = vrot.slane %v1078_v51, %v952_v44 }
  0xac   : > { %v986_v24 = vrot.slane %v1078_v51, %v956_v45 }
 0x10d   : > { %v545_v62 = vpop.f32.mrf.mxu0 }
 0x10e   : > { %v622_v4 = vpop.f32.mrf.mxu1 }
 0x10f   : > { %v547_v0 = vpop.f32.mrf.mxu0  ;;  %v623_v6 = vadd.f32 %v622_v4, %v545_v62 }
 0x110   : > { %v624_v43 = vpop.f32.mrf.mxu1 }
 0x111   : > { %v625_v10 = vadd.f32 %v624_v43, %v547_v0 }
 0x11a   : > { %v551_v5 = vpop.f32.mrf.mxu0 }
 0x11b   : > { %v628_v8 = vpop.f32.mrf.mxu1 }
 0x11c   : > { %v553_v40 = vpop.f32.mrf.mxu0  ;;  %v629_v19 = vadd.f32 %v628_v8, %v551_v5 }
 0x11d   : > { %v630_v18 = vpop.f32.mrf.mxu1 }
 0x11e   : > { %v631_v23 = vadd.f32 %v630_v18, %v553_v40 }
 0x121   : > { %v699_v9 = vpop.f32.mrf.mxu0 }
 0x122   : > { %v700_v11 = vadd.f32 %v699_v9, %v623_v6 }
 0x123   : > { %v701_v14 = vpop.f32.mrf.mxu0 }
 0x124   : > { %v962_v15 = vmul.f32 %v945_v7, %v700_v11  ;;  %v702_v16 = vadd.f32 %v701_v14, %v625_v10 }
 0x126   : > { %v991_v20 = vadd.f32 %v974_v12, %v962_v15  ;;  %v963_v21 = vmul.f32 %v949_v13, %v702_v16  ;;  %v705_v22 = vpop.f32.mrf.mxu0 }
 0x127   : > { %v706_v30 = vadd.f32 %v705_v22, %v629_v19 }
 0x128   : > { %v999_v26 = vmax.f32 %v991_v20, 0.0  ;;  %v992_v27 = vadd.f32 %v978_v17, %v963_v21  ;;  %v707_v31 = vpop.f32.mrf.mxu0 }
 0x129   : > { %v966_v33 = vmul.f32 %v945_v7, %v706_v30  ;;  %v708_v34 = vadd.f32 %v707_v31, %v631_v23 }
 0x12a   : > { %1007 = vst [vmem:[%s2087_s30] sm:$0xff] %v999_v26  ;;  %v1000_v32 = vmax.f32 %v992_v27, 0.0 }
 0x12b   : > { %v995_v35 = vadd.f32 %v974_v12, %v966_v33  ;;  %v967_v36 = vmul.f32 %v949_v13, %v708_v34 }
 0x12c   : > { %1008 = vst [vmem:[%s2087_s30 + $0x8] sm:$0xff] %v1000_v32 }
 0x12d   : > { %v1003_v63 = vmax.f32 %v995_v35, 0.0  ;;  %v996_v37 = vadd.f32 %v978_v17, %v967_v36 }
 0x12f   : > { %1011 = vst [vmem:[%s2087_s30 + $0x20] sm:$0xff] %v1003_v63  ;;  %v1004_v38 = vmax.f32 %v996_v37, 0.0 }
 0x131   : > { %1012 = vst [vmem:[%s2087_s30 + $0x28] sm:$0xff] %v1004_v38 }
 0x154   : > { %v776_v2 = vpop.f32.mrf.mxu1 }
 0x156   : > { %v778_v39 = vpop.f32.mrf.mxu1 }
 0x160   : > { %v782_v41 = vpop.f32.mrf.mxu1 }
 0x162   : > { %v784_v42 = vpop.f32.mrf.mxu1 }
 0x165   : > { %v853_v46 = vpop.f32.mrf.mxu0 }
 0x166   : > { %v930_v47 = vpop.f32.mrf.mxu1  ;;  %v854_v48 = vadd.f32 %v853_v46, %v776_v2 }
 0x167   : > { %v855_v50 = vpop.f32.mrf.mxu0 }
 0x168   : > { %v932_v52 = vpop.f32.mrf.mxu1  ;;  %v931_v53 = vadd.f32 %v930_v47, %v854_v48  ;;  %v856_v55 = vadd.f32 %v855_v50, %v778_v39 }
 0x169   : > { %v859_v57 = vpop.f32.mrf.mxu0 }
 0x16a   : > { %v936_v58 = vpop.f32.mrf.mxu1  ;;  %v964_v59 = vmul.f32 %v953_v49, %v931_v53  ;;  %v933_v60 = vadd.f32 %v932_v52, %v856_v55  ;;  %v860_v61 = vadd.f32 %v859_v57, %v782_v41 }
 0x16b   : > { %v861_v28 = vpop.f32.mrf.mxu0 }
 0x16c   : > { %v993_v62 = vadd.f32 %v982_v54, %v964_v59  ;;  %v965_v1 = vmul.f32 %v957_v56, %v933_v60  ;;  %v937_v0 = vadd.f32 %v936_v58, %v860_v61  ;;  %v862_v4 = vadd.f32 %v861_v28, %v784_v42  ;;  %v938_v5 = vpop.f32.mrf.mxu1 }
 0x16e   : > { %v1001_v3 = vmax.f32 %v993_v62, 0.0  ;;  %v994_v40 = vadd.f32 %v986_v24, %v965_v1  ;;  %v968_v29 = vmul.f32 %v953_v49, %v937_v0  ;;  %v939_v25 = vadd.f32 %v938_v5, %v862_v4 }
 0x170   : > { %1009 = vst [vmem:[%s2087_s30 + $0x10] sm:$0xff] %v1001_v3  ;;  %v1002_v43 = vmax.f32 %v994_v40, 0.0  ;;  %v997_v6 = vadd.f32 %v982_v54, %v968_v29  ;;  %v969_v7 = vmul.f32 %v957_v56, %v939_v25 }
 0x172   : > { %1010 = vst [vmem:[%s2087_s30 + $0x18] sm:$0xff] %v1002_v43  ;;  %v1005_v51 = vmax.f32 %v997_v6, 0.0  ;;  %v998_v8 = vadd.f32 %v986_v24, %v969_v7 }
 0x174   : > { %1013 = vst [vmem:[%s2087_s30 + $0x30] sm:$0xff] %v1005_v51  ;;  %v1006_v9 = vmax.f32 %v998_v8, 0.0 }
 0x176   : > { %1014 = vst [vmem:[%s2087_s30 + $0x38] sm:$0xff] %v1006_v9 }
 0x177 PF: > { %s13_s12 = sadd.s32 1, %s1102_s12  }
 0x178   : > { %p10_p4 = scmp.ge.s32.totalorder %s13_s12, 4  }
 0x17a   :  { %12 = sbr.rel (!%p10_p4) target bundleno = 1 (0x1), region = 63 }

// kernel: encoder_forward.10
= control target key start
LH: loop header
LB: loop body
LE: loop exit
PB: predicated region body
PF: predicated region fallthrough
CT: control target
= control target key end

     0   :  { %s8408_s24 = smov 0   ;;  %s10295_s0 = inlined_call_operand.vmem [shape: f32[2,16,64], index: 0, kind: input, shape index: {}]   ;;  %s10296_s1 = inlined_call_operand.vmem [shape: f32[64,64], index: 1, kind: input, shape index: {}]   ;;  %s10297_s2 = inlined_call_operand.vmem [shape: f32[1,64], index: 2, kind: input, shape index: {}]   ;;  %s10298_s3 = inlined_call_operand.vmem [shape: f32[17,64], index: 3, kind: input, shape index: {}]   ;;  %s10299_s4 = inlined_call_operand.vmem [shape: f32[17,16], index: 4, kind: input, shape index: {}]   ;;  %s10300_s5 = inlined_call_operand.vmem [shape: f32[2,4,64,16], index: 5, kind: input, shape index: {}]   ;;  %s10301_s6 = inlined_call_operand.vmem [shape: f32[2,4,64,16], index: 6, kind: input, shape index: {}]   ;;  %s10302_s7 = inlined_call_operand.vmem [shape: f32[2,4,64,16], index: 7, kind: input, shape index: {}]   ;;  %s10303_s8 = inlined_call_operand.vmem [shape: f32[2,4,16,64], index: 8, kind: input, shape index: {}]   ;;  %s10304_s9 = inlined_call_operand.vmem [shape: f32[2,1,64], index: 9, kind: input, shape index: {}]   ;;  %s10305_s10 = inlined_call_operand.vmem [shape: f32[2,1,64], index: 10, kind: input, shape index: {}]   ;;  %s10306_s11 = inlined_call_operand.vmem [shape: f32[2,64,32], index: 11, kind: input, shape index: {}]   ;;  %s10307_s12 = inlined_call_operand.vmem [shape: f32[2,1,32], index: 12, kind: input, shape index: {}]   ;;  %s10308_s13 = inlined_call_operand.vmem [shape: f32[2,32,64], index: 13, kind: input, shape index: {}]   ;;  %s10309_s14 = inlined_call_operand.vmem [shape: f32[2,1,64], index: 14, kind: input, shape index: {}]   ;;  %s10310_s15 = inlined_call_operand.vmem [shape: f32[2,1,64], index: 15, kind: input, shape index: {}]   ;;  %s10311_s16 = inlined_call_operand.vmem [shape: f32[2,1,64], index: 16, kind: input, shape index: {}]   ;;  %s10312_s17 = inlined_call_operand.vmem [shape: f32[2,16,64], index: 17, kind: output, shape index: {}]  }
   0x1   :  { %10314 = sst [smem:[#allocation2_spill]] %s10295_s0 }
   0x2   :  { %10315 = sst [smem:[#allocation3_spill]] %s10296_s1 }
   0x3 LB: > { %s6236_s25 = sadd.s32 4294967295, %s8314_s24   ;;  %p6240_p0 = scmp.ge.s32.totalorder %s8314_s24, 1  ;;  %s8314_s24 = sphi %s8408_s24, %s27_s24  }
   0x4   : > { %p487_p1 = scmp.lt.s32.totalorder %s8314_s24, 3 }
   0x6   : > { %p488_p2 = pnand %p6240_p0, %p487_p1 }
   0x7   : > { %s10316_s28 = sld [smem:[#allocation3_spill]] (!%p488_p2)  ;;  %p539_p3 = scmp.lt.s32.totalorder (!%p488_p2), %s6236_s25, 1 }
   0x8   : > { %491 = sbr.rel (%p488_p2) target bundleno = 9869 (0x268d), region = 88  ;;  %s10317_s23 = sld [smem:[#allocation2_spill]] (!%p488_p2) }
   0xd   : > { %v558_v0 = vld [vmem:[%s10316_s28 + $0x38] sm:$0xff]  ;;  %v557_v1 = vld [vmem:[%s10316_s28 + $0x30] sm:$0xff]  ;;  %v556_v2 = vld [vmem:[%s10316_s28 + $0x28] sm:$0xff]  ;;  %s10319_s25 = smov (!%p539_p3, %s6236_s25), 1  ;;  %vm566_vm0 = vcmask 523264   ;;  %v8316_v10 = vmov 0.0  }
   0xe   : > { %7106 = vmatprep.subr.mxu0 %v558_v0  ;;  %v555_v3 = vld [vmem:[%s10316_s28 + $0x20] sm:$0xff]  ;;  %s6653_s20 = sshll.u32 %s10319_s25, 4  ;;  %v554_v4 = vld [vmem:[%s10316_s28 + $0x18] sm:$0xff]  ;;  %v553_v6 = vld [vmem:[%s10316_s28 + $0x10] sm:$0xff]  ;;  %7125 = vmatprep.subr.mxu1 %v8316_v10  ;;  %vm8317_vm1 = vmmov 0   ;;  %vm654_vm2 = vcmask 130048  }
   0xf   : > { %7107 = vmatpush3.msra.mxu0 %v558_v0  ;;  %s543_s26 = scalar_lea.vmem %s10317_s23, %s6653_s20  ;;  %v552_v7 = vld [vmem:[%s10316_s28 + $0x8] sm:$0xff]  ;;  %v551_v8 = vld [vmem:[%s10316_s28] sm:$0xff]  ;;  %7129 = vmatprep.mubr.msk.f32.mxu1 %vm8317_vm1, %v8316_v10  ;;  %v851_v11 = vld [vmem:[%s10301_s6 + $0x38] sm:$0xff]  ;;  %vm1165_vm3 = vcmask 1040384   ;;  %vm1121_vm4 = vcmask 138240   ;;  %vm1128_vm5 = vcmask 131072   ;;  %s548_s1 = scalar_lea.vmem %s10312_s17, %s6653_s20 }
  0x10   : > { %7108 = vmatprep.subr.mxu0 %v557_v1  ;;  %v549_v5 = vld [vmem:[%s543_s26] sm:$0xff]  ;;  %v550_v9 = vld [vmem:[%s543_s26 + $0x8] sm:$0xff]  ;;  %v850_v12 = vld [vmem:[%s10301_s6 + $0x30] sm:$0xff]  ;;  %vm3112_vm6 = vcmask 516096   ;;  %vm3307_vm7 = vcmask 261120   ;;  %vm6177_vm8 = vcmask 523265  }
  0x11   : > { %7109 = vmatpush3.msra.mxu0 %v557_v1  ;;  %7122 = vmatprep.mubr.msk.f32.mxu0 %vm566_vm0, %v549_v5  ;;  %v849_v13 = vld [vmem:[%s10301_s6 + $0x28] sm:$0xff]  ;;  %v848_v14 = vld [vmem:[%s10301_s6 + $0x20] sm:$0xff]  ;;  %v847_v15 = vld [vmem:[%s10301_s6 + $0x18] sm:$0xff] }
  0x12   : > { %7110 = vmatprep.subr.mxu0 %v556_v2  ;;  %v846_v16 = vld [vmem:[%s10301_s6 + $0x10] sm:$0xff]  ;;  %v6245_v17 = vld [vmem:[%s10297_s2] ss:$0 sm:$0xff]  ;;  %v754_v23 = vld [vmem:[%s10300_s5 + $0x38] sm:$0xff] }
  0x13   : > { %7111 = vmatpush3.msra.mxu0 %v556_v2  ;;  %v651_v22 = vld [vmem:[%s10299_s4] sm:$0xff]  ;;  %v753_v24 = vld [vmem:[%s10300_s5 + $0x30] sm:$0xff]  ;;  %v652_v25 = vld [vmem:[%s10299_s4 + $0x8] sm:$0xff] }
  0x14   : > { %7112 = vmatprep.subr.mxu0 %v555_v3  ;;  %v752_v26 = vld [vmem:[%s10300_s5 + $0x28] sm:$0xff]  ;;  %v751_v27 = vld [vmem:[%s10300_s5 + $0x20] sm:$0xff]  ;;  %v653_v28 = vld [vmem:[%s10299_s4 + $0x10] sm:$0x1] }
  0x15   : > { %7113 = vmatpush3.msra.mxu0 %v555_v3  ;;  %v750_v29 = vld [vmem:[%s10300_s5 + $0x18] sm:$0xff]  ;;  %v749_v30 = vld [vmem:[%s10300_s5 + $0x10] sm:$0xff]  ;;  %v748_v31 = vld [vmem:[%s10300_s5 + $0x8] sm:$0xff] }
  0x16   : > { %7114 = vmatprep.subr.mxu0 %v554_v4  ;;  %v845_v32 = vld [vmem:[%s10301_s6 + $0x8] sm:$0xff]  ;;  %v747_v33 = vld [vmem:[%s10300_s5] sm:$0xff]  ;;  %v939_v38 = vld [vmem:[%s10302_s7 + $0x38] sm:$0xff] }
  0x17   : > { %7115 = vmatpush3.msra.mxu0 %v554_v4  ;;  %v844_v34 = vld [vmem:[%s10301_s6] sm:$0xff]  ;;  %v649_v40 = vld [vmem:[%s10298_s3 + $0x8] sm:$0xff]  ;;  %v938_v41 = vld [vmem:[%s10302_s7 + $0x30] sm:$0xff] }
  0x18   : > { %7116 = vmatprep.subr.mxu0 %v553_v6  ;;  %v648_v35 = vld [vmem:[%s10298_s3] sm:$0xff]  ;;  %v937_v44 = vld [vmem:[%s10302_s7 + $0x28] sm:$0xff]  ;;  %v650_v46 = vld [vmem:[%s10298_s3 + $0x10] sm:$0x1] }
  0x19   : > { %7117 = vmatpush3.msra.mxu0 %v553_v6  ;;  %v936_v47 = vld [vmem:[%s10302_s7 + $0x20] sm:$0xff]  ;;  %v935_v50 = vld [vmem:[%s10302_s7 + $0x18] sm:$0xff]  ;;  %v934_v52 = vld [vmem:[%s10302_s7 + $0x10] sm:$0xff] }
  0x1a   : > { %7118 = vmatprep.subr.mxu0 %v552_v7  ;;  %v933_v53 = vld [vmem:[%s10302_s7 + $0x8] sm:$0xff]  ;;  %v932_v54 = vld [vmem:[%s10302_s7] sm:$0xff]  ;;  %v6277_v5 = vld [vmem:[%s10300_s5 + $0x78] sm:$0xff] }
  0x1b   : > { %7119 = vmatpush3.msra.mxu0 %v552_v7  ;;  %v6276_v7 = vld [vmem:[%s10300_s5 + $0x70] sm:$0xff] }
  0x1c   : > { %7120 = vmatprep.subr.mxu0 %v551_v8 }
  0x1d   : > { %7121 = vmatpush3.msra.mxu0 %v551_v8 }
  0x1e   : > { %7123 = vmatmul.mubr.msk.f32.vlgmr.msra.gmra.mxu0 %vm566_vm0, %v550_v9  ;;  %7163 = vmatprep.subr.mxu0 %v8316_v10 }
  0x1f   : > { %7179 = vmatprep.mubr.msk.f32.mxu0 %vm8317_vm1, %v8316_v10  ;;  %7164 = vmatpush3.msra.mxu0 %v851_v11  ;;  %v6275_v11 = vld [vmem:[%s10300_s5 + $0x68] sm:$0xff] }
  0x20   : > { %7165 = vmatprep.subr.mxu0 %v8316_v10 }
  0x21   : > { %7166 = vmatpush3.msra.mxu0 %v850_v12 }
  0x22   : > { %7167 = vmatprep.subr.mxu0 %v8316_v10 }
  0x23   : > { %7168 = vmatpush3.msra.mxu0 %v849_v13  ;;  %v6274_v13 = vld [vmem:[%s10300_s5 + $0x60] sm:$0xff] }
  0x24   : > { %7169 = vmatprep.subr.mxu0 %v8316_v10 }
  0x25   : > { %7170 = vmatpush3.msra.mxu0 %v848_v14  ;;  %v6273_v14 = vld [vmem:[%s10300_s5 + $0x58] sm:$0xff] }
  0x26   : > { %7171 = vmatprep.subr.mxu0 %v8316_v10 }
  0x27   : > { %7172 = vmatpush3.msra.mxu0 %v847_v15  ;;  %v6272_v15 = vld [vmem:[%s10300_s5 + $0x50] sm:$0xff] }
  0x28   : > { %7173 = vmatprep.subr.mxu0 %v8316_v10 }
  0x29   : > { %7174 = vmatpush3.msra.mxu0 %v846_v16  ;;  %v6271_v16 = vld [vmem:[%s10300_s5 + $0x48] sm:$0xff] }
  0x2a   : > { %7175 = vmatprep.subr.mxu0 %v8316_v10 }
  0x2b   : > { %7176 = vmatpush3.msra.mxu0 %v845_v32 }
  0x2c   : > { %7177 = vmatprep.subr.mxu0 %v8316_v10 }
  0x2d   : > { %7178 = vmatpush3.msra.mxu0 %v844_v34 }
  0x2e   : > { %7213 = vmatprep.subr.mxu0 %v8316_v10 }
  0xde   : > { %v7124_v18 = vpop.f32.mrf.mxu0 }
  0xdf   : > { %v645_v19 = vadd.f32 %v7124_v18, %v6245_v17  ;;  %v6299_v18 = vld [vmem:[%s10302_s7 + $0x78] sm:$0xff] }
  0xe0   : > { %v639_v20 = vpop.f32.mrf.mxu0 }
  0xe1   : > { %v640_v21 = vadd.f32 %v6245_v17, %v639_v20  ;;  %7126 = vmatpush3.msra.mxu1 %v645_v19  ;;  %v6270_v17 = vld [vmem:[%s10300_s5 + $0x40] sm:$0xff]  ;;  %v6298_v19 = vld [vmem:[%s10302_s7 + $0x70] sm:$0xff]  ;;  %v6297_v20 = vld [vmem:[%s10302_s7 + $0x68] sm:$0xff] }
  0xe2   : > { %7127 = vmatprep.subr.mxu1 %v8316_v10 }
  0xe3   : > { %7128 = vmatpush3.msra.mxu1 %v640_v21  ;;  %v6296_v21 = vld [vmem:[%s10302_s7 + $0x60] sm:$0xff] }
  0xe4   : > { %7130 = vmatmul.mubr.msk.f32.vlgmr.msra.gmra.mxu1 %vm654_vm2, %v651_v22  ;;  %7138 = vmatprep.subr.mxu1 %v8316_v10  ;;  %v6295_v22 = vld [vmem:[%s10302_s7 + $0x58] sm:$0xff] }
  0xe5   : > { %7132 = vmatprep.mubr.msk.f32.mxu1 %vm8317_vm1, %v8316_v10  ;;  %7139 = vmatpush3.msra.mxu1 %v754_v23  ;;  %v6294_v23 = vld [vmem:[%s10302_s7 + $0x50] sm:$0xff] }
  0xe6   : > { %7140 = vmatprep.subr.mxu1 %v8316_v10 }
  0xe7   : > { %7141 = vmatpush3.msra.mxu1 %v753_v24  ;;  %v6293_v24 = vld [vmem:[%s10302_s7 + $0x48] sm:$0xff] }
  0xe8   : > { %7133 = vmatmul.mubr.msk.f32.gmra.mxu1 %vm654_vm2, %v652_v25  ;;  %7142 = vmatprep.subr.mxu1 %v8316_v10  ;;  %v6292_v25 = vld [vmem:[%s10302_s7 + $0x40] sm:$0xff] }
  0xe9   : > { %7135 = vmatprep.mubr.msk.f32.mxu1 %vm8317_vm1, %v8316_v10  ;;  %7143 = vmatpush3.msra.mxu1 %v752_v26 }
  0xea   : > { %7144 = vmatprep.subr.mxu1 %v8316_v10 }
  0xeb   : > { %7145 = vmatpush3.msra.mxu1 %v751_v27 }
  0xec   : > { %7136 = vmatmul.mubr.msk.f32.gmra.mxu1 %vm654_vm2, %v653_v28  ;;  %7146 = vmatprep.subr.mxu1 %v8316_v10 }
  0xed   : > { %7147 = vmatpush3.msra.mxu1 %v750_v29  ;;  %7154 = vmatprep.mubr.msk.f32.mxu1 %vm8317_vm1, %v8316_v10 }
  0xee   : > { %7148 = vmatprep.subr.mxu1 %v8316_v10 }
  0xef   : > { %7149 = vmatpush3.msra.mxu1 %v749_v30 }
  0xf0   : > { %7150 = vmatprep.subr.mxu1 %v8316_v10 }
  0xf1   : > { %7151 = vmatpush3.msra.mxu1 %v748_v31 }
  0xf2   : > { %7152 = vmatprep.subr.mxu1 %v8316_v10 }
  0xf3   : > { %7153 = vmatpush3.msra.mxu1 %v747_v33 }
  0xf4   : > { %7188 = vmatprep.subr.mxu1 %v8316_v10 }
 0x1a4   : > { %v730_v36 = vpop.f32.mrf.mxu1 }
 0x1a5   : > { %v8546_v37 = vadd.f32 %v730_v36, %v648_v35 }
 0x1a6   : > { %v7131_v39 = vpop.f32.mrf.mxu1 }
 0x1a7   : > { %7155 = vmatmul.mubr.msk.f32.vlgmr.msra.gmra.mxu1 %vm566_vm0, %v8546_v37  ;;  %7180 = vmatmul.mubr.msk.f32.vlgmr.msra.gmra.mxu0 %vm566_vm0, %v8546_v37 }
 0x1a8   : > { %7189 = vmatpush3.msra.mxu1 %v939_v38  ;;  %v735_v42 = vpop.f32.mrf.mxu1  ;;  %7157 = vmatprep.mubr.msk.f32.mxu1 %vm8317_vm1, %v8316_v10 }
 0x1a9   : > { %v8563_v43 = vadd.f32 %v735_v42, %v649_v40  ;;  %7190 = vmatprep.subr.mxu1 %v8316_v10  ;;  %7182 = vmatprep.mubr.msk.f32.mxu0 %vm8317_vm1, %v8316_v10 }
 0x1aa   : > { %7191 = vmatpush3.msra.mxu1 %v938_v41  ;;  %v7134_v45 = vpop.f32.mrf.mxu1 }
 0x1ab   : > { %7192 = vmatprep.subr.mxu1 %v8316_v10  ;;  %7158 = vmatmul.mubr.msk.f32.gmra.mxu1 %vm566_vm0, %v8563_v43 }
 0x1ac   : > { %7183 = vmatmul.mubr.msk.f32.gmra.mxu0 %vm566_vm0, %v8563_v43  ;;  %7193 = vmatpush3.msra.mxu1 %v937_v44  ;;  %v740_v48 = vpop.f32.mrf.mxu1 }
 0x1ad   : > { %v8582_v49 = vadd.f32 %v740_v48, %v650_v46  ;;  %7194 = vmatprep.subr.mxu1 %v8316_v10  ;;  %7160 = vmatprep.mubr.msk.f32.mxu1 %vm8317_vm1, %v8316_v10 }
 0x1ae   : > { %7195 = vmatpush3.msra.mxu1 %v936_v47  ;;  %v7137_v51 = vpop.f32.mrf.mxu1  ;;  %7185 = vmatprep.mubr.msk.f32.mxu0 %vm8317_vm1, %v8316_v10 }
 0x1af   : > { %7196 = vmatprep.subr.mxu1 %v8316_v10  ;;  %7161 = vmatmul.mubr.msk.f32.gmra.mxu1 %vm566_vm0, %v8582_v49 }
 0x1b0   : > { %7186 = vmatmul.mubr.msk.f32.gmra.mxu0 %vm566_vm0, %v8582_v49  ;;  %7197 = vmatpush3.msra.mxu1 %v935_v50 }
 0x1b1   : > { %7198 = vmatprep.subr.mxu1 %v8316_v10  ;;  %7204 = vmatprep.mubr.msk.f32.mxu1 %vm8317_vm1, %v8316_v10 }
 0x1b2   : > { %7199 = vmatpush3.msra.mxu1 %v934_v52  ;;  %7219 = vmatprep.mubr.msk.f32.mxu0 %vm8317_vm1, %v8316_v10 }
 0x1b3   : > { %7200 = vmatprep.subr.mxu1 %v8316_v10 }
 0x1b4   : > { %7201 = vmatpush3.msra.mxu1 %v933_v53 }
 0x1b5   : > { %7202 = vmatprep.subr.mxu1 %v8316_v10 }
 0x1b6   : > { %7203 = vmatpush3.msra.mxu1 %v932_v54 }
 0x1b7   : > { %7205 = vmatmul.mubr.msk.f32.vlgmr.msra.gmra.mxu1 %vm566_vm0, %v8546_v37  ;;  %7228 = vmatprep.subr.mxu1 %v8316_v10 }
 0x1b8   : > { %7207 = vmatprep.mubr.msk.f32.mxu1 %vm8317_vm1, %v8316_v10 }
 0x1bb   : > { %7208 = vmatmul.mubr.msk.f32.gmra.mxu1 %vm566_vm0, %v8563_v43 }
 0x1bc   : > { %7210 = vmatprep.mubr.msk.f32.mxu1 %vm8317_vm1, %v8316_v10 }
 0x1bf   : > { %7211 = vmatmul.mubr.msk.f32.gmra.mxu1 %vm566_vm0, %v8582_v49 }
 0x1c0   : > { %7234 = vmatprep.mubr.msk.f32.mxu1 %vm8317_vm1, %v8316_v10 }
 0x267   : > { %v830_v55 = vpop.f32.mrf.mxu1  ;;  %v918_v56 = vpop.f32.mrf.mxu0 }
 0x269   : > { %v7156_v57 = vpop.f32.mrf.mxu1  ;;  %v7181_v58 = vpop.f32.mrf.mxu0 }
 0x26b   : > { %v835_v59 = vpop.f32.mrf.mxu1 }
 0x26c   : > { %v923_v60 = vpop.f32.mrf.mxu0 }
 0x26d   : > { %v7159_v61 = vpop.f32.mrf.mxu1 }
 0x26e   : > { %v7184_v62 = vpop.f32.mrf.mxu0 }
 0x26f   : > { %v840_v63 = vpop.f32.mrf.mxu1 }
 0x270   : > { %v928_v0 = vpop.f32.mrf.mxu0 }
 0x271   : > { %7214 = vmatpush3.xpose.msk.msra.mxu0 %vm654_vm2, %v928_v0  ;;  %v7162_v1 = vpop.f32.mrf.mxu1 }
 0x272   : > { %v7187_v2 = vpop.f32.mrf.mxu0  ;;  %7215 = vmatprep.subr.mxu0 %v8316_v10 }
 0x275   : > { %7216 = vmatpush3.xpose.msk.msra.mxu0 %vm654_vm2, %v923_v60 }
 0x276   : > { %7217 = vmatprep.subr.mxu0 %v8316_v10 }
 0x277   : > { %v1006_v3 = vpop.f32.mrf.mxu1 }
 0x279   : > { %v7206_v4 = vpop.f32.mrf.mxu1  ;;  %7218 = vmatpush3.xpose.msk.msra.mxu0 %vm654_vm2, %v918_v56 }
 0x27a   : > { %7243 = vmatprep.subr.mxu0 %v8316_v10 }
 0x27b   : > { %v1011_v6 = vpop.f32.mrf.mxu1 }
 0x27c   : > { %7220 = vmatmul.mubr.msk.f32.vlgmr.msra.gmra.mxu0 %vm654_vm2, %v830_v55 }
 0x27d   : > { %v7209_v8 = vpop.f32.mrf.mxu1  ;;  %7244 = vmatpush3.msra.mxu0 %v6277_v5  ;;  %7222 = vmatprep.mubr.msk.f32.mxu0 %vm8317_vm1, %v8316_v10 }
 0x27e   : > { %7245 = vmatprep.subr.mxu0 %v8316_v10 }
 0x27f   : > { %v1016_v9 = vpop.f32.mrf.mxu1  ;;  %7246 = vmatpush3.msra.mxu0 %v6276_v7 }
 0x280   : > { %7223 = vmatmul.mubr.msk.f32.gmra.mxu0 %vm654_vm2, %v835_v59  ;;  %7229 = vmatpush3.msk.msra.mxu1 %vm1165_vm3, %v1016_v9  ;;  %v6288_v9 = vld [vmem:[%s10301_s6 + $0x78] sm:$0xff] }
 0x281   : > { %7247 = vmatprep.subr.mxu0 %v8316_v10  ;;  %v7212_v12 = vpop.f32.mrf.mxu1  ;;  %7230 = vmatprep.subr.mxu1 %v8316_v10 }
 0x282   : > { %7248 = vmatpush3.msra.mxu0 %v6275_v11  ;;  %7231 = vmatpush3.msra.mxu1 %v1011_v6  ;;  %v6287_v11 = vld [vmem:[%s10301_s6 + $0x70] sm:$0xff] }
 0x283   : > { %7249 = vmatprep.subr.mxu0 %v8316_v10  ;;  %7225 = vmatprep.mubr.msk.f32.mxu0 %vm8317_vm1, %v8316_v10 }
 0x284   : > { %7232 = vmatprep.subr.mxu1 %v8316_v10  ;;  %7250 = vmatpush3.msra.mxu0 %v6274_v13 }
 0x285   : > { %7226 = vmatmul.mubr.msk.f32.gmra.mxu0 %vm654_vm2, %v840_v63  ;;  %7233 = vmatpush3.msra.mxu1 %v1006_v3 }
 0x286   : > { %7251 = vmatprep.subr.mxu0 %v8316_v10  ;;  %7259 = vmatprep.mubr.msk.f32.mxu0 %vm8317_vm1, %v8316_v10 }
 0x287   : > { %7252 = vmatpush3.msra.mxu0 %v6273_v14  ;;  %7268 = vmatprep.subr.mxu1 %v8316_v10  ;;  %v6286_v14 = vld [vmem:[%s10301_s6 + $0x68] sm:$0xff] }
 0x288   : > { %7253 = vmatprep.subr.mxu0 %v8316_v10 }
 0x289   : > { %7254 = vmatpush3.msra.mxu0 %v6272_v15  ;;  %v6285_v15 = vld [vmem:[%s10301_s6 + $0x60] sm:$0xff] }
 0x28a   : > { %7255 = vmatprep.subr.mxu0 %v8316_v10 }
 0x28b   : > { %7256 = vmatpush3.msra.mxu0 %v6271_v16 }
 0x28c   : > { %7257 = vmatprep.subr.mxu0 %v8316_v10 }
 0x28d   : > { %7258 = vmatpush3.msra.mxu0 %v6270_v17 }
 0x28e   : > { %7260 = vmatmul.mubr.msk.f32.vlgmr.msra.gmra.mxu0 %vm566_vm0, %v8546_v37  ;;  %7293 = vmatprep.subr.mxu0 %v8316_v10 }
 0x28f   : > { %7294 = vmatpush3.msra.mxu0 %v6299_v18  ;;  %7262 = vmatprep.mubr.msk.f32.mxu0 %vm8317_vm1, %v8316_v10  ;;  %v6284_v18 = vld [vmem:[%s10301_s6 + $0x58] sm:$0xff] }
 0x290   : > { %7295 = vmatprep.subr.mxu0 %v8316_v10 }
 0x291   : > { %7296 = vmatpush3.msra.mxu0 %v6298_v19  ;;  %v6283_v19 = vld [vmem:[%s10301_s6 + $0x50] sm:$0xff] }
 0x292   : > { %7263 = vmatmul.mubr.msk.f32.gmra.mxu0 %vm566_vm0, %v8563_v43  ;;  %7297 = vmatprep.subr.mxu0 %v8316_v10 }
 0x293   : > { %7298 = vmatpush3.msra.mxu0 %v6297_v20  ;;  %7265 = vmatprep.mubr.msk.f32.mxu0 %vm8317_vm1, %v8316_v10  ;;  %v6282_v20 = vld [vmem:[%s10301_s6 + $0x48] sm:$0xff] }
 0x294   : > { %7299 = vmatprep.subr.mxu0 %v8316_v10 }
 0x295   : > { %7300 = vmatpush3.msra.mxu0 %v6296_v21  ;;  %v6281_v21 = vld [vmem:[%s10301_s6 + $0x40] sm:$0xff] }
 0x296   : > { %7266 = vmatmul.mubr.msk.f32.gmra.mxu0 %vm566_vm0, %v8582_v49  ;;  %7301 = vmatprep.subr.mxu0 %v8316_v10 }
 0x297   : > { %7302 = vmatpush3.msra.mxu0 %v6295_v22  ;;  %7309 = vmatprep.mubr.msk.f32.mxu0 %vm8317_vm1, %v8316_v10 }
 0x298   : > { %7303 = vmatprep.subr.mxu0 %v8316_v10 }
 0x299   : > { %7304 = vmatpush3.msra.mxu0 %v6294_v23 }
 0x29a   : > { %7305 = vmatprep.subr.mxu0 %v8316_v10 }
 0x29b   : > { %7306 = vmatpush3.msra.mxu0 %v6293_v24 }
 0x29c   : > { %7307 = vmatprep.subr.mxu0 %v8316_v10 }
 0x29d   : > { %7308 = vmatpush3.msra.mxu0 %v6292_v25 }
 0x29e   : > { %7310 = vmatmul.mubr.msk.f32.vlgmr.msra.gmra.mxu0 %vm566_vm0, %v8546_v37  ;;  %7333 = vmatprep.subr.mxu0 %v8316_v10 }
 0x29f   : > { %7312 = vmatprep.mubr.msk.f32.mxu0 %vm8317_vm1, %v8316_v10 }
 0x2a2   : > { %7313 = vmatmul.mubr.msk.f32.gmra.mxu0 %vm566_vm0, %v8563_v43 }
 0x2a3   : > { %7315 = vmatprep.mubr.msk.f32.mxu0 %vm8317_vm1, %v8316_v10 }
 0x2a6   : > { %7316 = vmatmul.mubr.msk.f32.gmra.mxu0 %vm566_vm0, %v8582_v49 }
 0x2a7   : > { %7339 = vmatprep.mubr.msk.f32.mxu0 %vm8317_vm1, %v8316_v10 }
 0x33c   : > { %v1104_v26 = vpop.f32.mrf.mxu0 }
 0x33d   : > { %v1118_v27 = vmul.f32 0.25, %v1104_v26 }
 0x33e   : > { %v7221_v28 = vpop.f32.mrf.mxu0 }
 0x33f   : > { %v1122_v29 = vsel %vm1121_vm4, %v1118_v27, -inf }
 0x340   : > { %1123 = vmax.xlane.f32.xlu0 %v1122_v29  ;;  %v1109_v30 = vpop.f32.mrf.mxu0 }
 0x341   : > { %v1119_v31 = vmul.f32 0.25, %v1109_v30 }
 0x342   : > { %v7224_v32 = vpop.f32.mrf.mxu0 }
 0x343   : > { %v1125_v33 = vsel %vm1121_vm4, %v1119_v31, -inf }
 0x344   : > { %1126 = vmax.xlane.f32.xlu0 %v1125_v33 }
 0x345   : > { %v1114_v34 = vpop.f32.mrf.mxu0 }
 0x346   : > { %v1120_v35 = vmul.f32 0.25, %v1114_v34 }
 0x347   : > { %v7227_v36 = vpop.f32.mrf.mxu0 }
 0x348   : > { %v1129_v38 = vsel %vm1128_vm5, %v1120_v35, -inf }
 0x349   : > { %1130 = vmax.xlane.f32.xlu1 %v1129_v38 }
 0x34e   : > { %v8736_v39 = vpop.f32.mrf.mxu0 }
 0x350   : > { %v7261_v40 = vpop.f32.mrf.mxu0 }
 0x352   : > { %v8738_v41 = vpop.f32.mrf.mxu0 }
 0x354   : > { %v7264_v42 = vpop.f32.mrf.mxu0 }
 0x356   : > { %v8740_v44 = vpop.f32.mrf.mxu0 }
 0x358   : > { %v7267_v45 = vpop.f32.mrf.mxu0 }
 0x35e   : > { %v1504_v46 = vpop.f32.mrf.mxu0 }
 0x360   : > { %v7311_v47 = vpop.f32.mrf.mxu0 }
 0x362   : > { %v1509_v48 = vpop.f32.mrf.mxu0 }
 0x364   : > { %v7314_v50 = vpop.f32.mrf.mxu0 }
 0x366   : > { %v1514_v51 = vpop.f32.mrf.mxu0 }
 0x367   : > { %7334 = vmatpush3.msk.msra.mxu0 %vm1165_vm3, %v1514_v51 }
 0x368   : > { %v7317_v52 = vpop.f32.mrf.mxu0  ;;  %7335 = vmatprep.subr.mxu0 %v8316_v10 }
 0x369   : > { %7336 = vmatpush3.msra.mxu0 %v1509_v48 }
 0x36a   : > { %7337 = vmatprep.subr.mxu0 %v8316_v10 }
 0x36b   : > { %7338 = vmatpush3.msra.mxu0 %v1504_v46 }
 0x36c   : > { %7361 = vmatprep.subr.mxu0 %v8316_v10 }
 0x3c9   : > { %v1124_v53 = vpop.xlane.xlu0 %1123 }
 0x3ca   : > { %v1132_v54 = vsub.f32 %v1118_v27, %v1124_v53 }
 0x3cc   : > { %v1135_v55 = vmul.f32 1.442695, %v1132_v54 }
 0x3cd   : > { %v1127_v56 = vpop.xlane.xlu0 %1126 }
 0x3ce   : > { %8176 = vpow2.f32 %v1135_v55  ;;  %v1133_v57 = vsub.f32 %v1119_v31, %v1127_v56 }
 0x3d0   : > { %v1137_v58 = vmul.f32 1.442695, %v1133_v57 }
 0x3d2   : > { %8178 = vpow2.f32 %v1137_v58  ;;  %v1131_v59 = vpop.xlane.xlu1 %1130 }
 0x3d3   : > { %v1134_v60 = vsub.f32 %v1120_v35, %v1131_v59 }
 0x3d5   : > { %v1139_v61 = vmul.f32 1.442695, %v1134_v60 }
 0x3d7   : > { %8180 = vpow2.f32 %v1139_v61 }
 0x3db   : > { %v8177_v62 = vpop.eup %8176 }
 0x3dc   : > { %v1141_v63 = vsel %vm1121_vm4, %v8177_v62, 0.0 }
 0x3dd   : > { %1142 = vadd.xlane.f32.xlu1 %v1141_v63 }
 0x3df   : > { %v8179_v0 = vpop.eup %8178 }
 0x3e0   : > { %v1144_v1 = vsel %vm1121_vm4, %v8179_v0, 0.0 }
 0x3e1   : > { %1145 = vadd.xlane.f32.xlu0 %v1144_v1  ;;  %v6313_v1 = vld [vmem:[%s10303_s8 + $0x10] sm:$0xff] }
 0x3e4   : > { %v8181_v2 = vpop.eup %8180 }
 0x3e5   : > { %v1147_v3 = vsel %vm1128_vm5, %v8181_v2, 0.0 }
 0x3e6   : > { %1148 = vadd.xlane.f32.xlu1 %v1147_v3 }
 0x466   : > { %v1143_v4 = vpop.xlane.xlu1 %1142 }
 0x467   : > { %8182 = vrcp.f32 %v1143_v4 }
 0x46a   : > { %v1146_v5 = vpop.xlane.xlu0 %1145 }
 0x46b   : > { %8184 = vrcp.f32 %v1146_v5 }
 0x46f   : > { %v1149_v6 = vpop.xlane.xlu1 %1148 }
 0x470   : > { %8186 = vrcp.f32 %v1149_v6 }
 0x474   : > { %v8183_v7 = vpop.eup %8182 }
 0x475   : > { %v1151_v8 = vmul.f32 %v8183_v7, %v8177_v62  ;;  %v1250_v7 = vld [vmem:[%s10303_s8 + $0x8] sm:$0xff] }
 0x477   : > { %7235 = vmatmul.mubr.msk.f32.vlgmr.msra.gmra.mxu1 %vm1121_vm4, %v1151_v8  ;;  %v1249_v8 = vld [vmem:[%s10303_s8] sm:$0xff] }
 0x478   : > { %v8185_v12 = vpop.eup %8184  ;;  %7269 = vmatpush3.msra.mxu1 %v6288_v9  ;;  %7237 = vmatprep.mubr.msk.f32.mxu1 %vm8317_vm1, %v8316_v10 }
 0x479   : > { %7270 = vmatprep.subr.mxu1 %v8316_v10  ;;  %v1153_v13 = vmul.f32 %v8185_v12, %v8179_v0  ;;  %v6314_v0 = vld [vmem:[%s10303_s8 + $0x18] sm:$0xff] }
 0x47a   : > { %7271 = vmatpush3.msra.mxu1 %v6287_v11 }
 0x47b   : > { %7272 = vmatprep.subr.mxu1 %v8316_v10  ;;  %7238 = vmatmul.mubr.msk.f32.gmra.mxu1 %vm1121_vm4, %v1153_v13 }
 0x47c   : > { %7273 = vmatpush3.msra.mxu1 %v6286_v14  ;;  %7240 = vmatprep.mubr.msk.f32.mxu1 %vm8317_vm1, %v8316_v10  ;;  %v6339_v14 = vld [vmem:[%s10301_s6 + $0xb8] sm:$0xff] }
 0x47d   : > { %v8187_v16 = vpop.eup %8186  ;;  %7274 = vmatprep.subr.mxu1 %v8316_v10 }
 0x47e   : > { %7275 = vmatpush3.msra.mxu1 %v6285_v15  ;;  %v1155_v17 = vmul.f32 %v8187_v16, %v8181_v2  ;;  %v6338_v15 = vld [vmem:[%s10301_s6 + $0xb0] sm:$0xff]  ;;  %v6337_v16 = vld [vmem:[%s10301_s6 + $0xa8] sm:$0xff] }
 0x47f   : > { %7276 = vmatprep.subr.mxu1 %v8316_v10 }
 0x480   : > { %7241 = vmatmul.mubr.msk.f32.gmra.mxu1 %vm1121_vm4, %v1155_v17  ;;  %v6336_v17 = vld [vmem:[%s10301_s6 + $0xa0] sm:$0xff] }
 0x481   : > { %7277 = vmatpush3.msra.mxu1 %v6284_v18  ;;  %7284 = vmatprep.mubr.msk.f32.mxu1 %vm8317_vm1, %v8316_v10  ;;  %v6335_v18 = vld [vmem:[%s10301_s6 + $0x98] sm:$0xff] }
 0x482   : > { %7278 = vmatprep.subr.mxu1 %v8316_v10 }
 0x483   : > { %7279 = vmatpush3.msra.mxu1 %v6283_v19  ;;  %v6334_v19 = vld [vmem:[%s10301_s6 + $0x90] sm:$0xff] }
 0x484   : > { %7280 = vmatprep.subr.mxu1 %v8316_v10 }
 0x485   : > { %7281 = vmatpush3.msra.mxu1 %v6282_v20  ;;  %v6333_v20 = vld [vmem:[%s10301_s6 + $0x88] sm:$0xff] }
 0x486   : > { %7282 = vmatprep.subr.mxu1 %v8316_v10 }
 0x487   : > { %7283 = vmatpush3.msra.mxu1 %v6281_v21  ;;  %v6332_v21 = vld [vmem:[%s10301_s6 + $0x80] sm:$0xff] }
 0x488   : > { %7285 = vmatmul.mubr.msk.f32.vlgmr.msra.gmra.mxu1 %vm566_vm0, %v8546_v37  ;;  %7318 = vmatprep.subr.mxu1 %v8316_v10 }
 0x489   : > { %7287 = vmatprep.mubr.msk.f32.mxu1 %vm8317_vm1, %v8316_v10 }
 0x48c   : > { %7288 = vmatmul.mubr.msk.f32.gmra.mxu1 %vm566_vm0, %v8563_v43 }
 0x48d   : > { %7290 = vmatprep.mubr.msk.f32.mxu1 %vm8317_vm1, %v8316_v10 }
 0x490   : > { %7291 = vmatmul.mubr.msk.f32.gmra.mxu1 %vm566_vm0, %v8582_v49 }
 0x491   : > { %7324 = vmatprep.mubr.msk.f32.mxu1 %vm8317_vm1, %v8316_v10 }
 0x537   : > { %v8802_v22 = vpop.f32.mrf.mxu1 }
 0x539   : > { %v7236_v23 = vpop.f32.mrf.mxu1 }
 0x53b   : > { %v8804_v24 = vpop.f32.mrf.mxu1 }
 0x53d   : > { %v7239_v25 = vpop.f32.mrf.mxu1 }
 0x540   : > { %v8806_v26 = vpop.f32.mrf.mxu1 }
 0x542   : > { %v7242_v27 = vpop.f32.mrf.mxu1 }
 0x548   : > { %v1415_v28 = vpop.f32.mrf.mxu1 }
 0x54a   : > { %v7286_v29 = vpop.f32.mrf.mxu1 }
 0x54c   : > { %v1420_v30 = vpop.f32.mrf.mxu1 }
 0x54e   : > { %v7289_v31 = vpop.f32.mrf.mxu1 }
 0x550   : > { %v1425_v32 = vpop.f32.mrf.mxu1 }
 0x551   : > { %7319 = vmatpush3.xpose.msk.msra.mxu1 %vm654_vm2, %v1425_v32  ;;  %v6323_v32 = vld [vmem:[%s10300_s5 + $0x90] sm:$0xff] }
 0x552   : > { %v7292_v33 = vpop.f32.mrf.mxu1  ;;  %7320 = vmatprep.subr.mxu1 %v8316_v10 }
 0x555   : > { %7321 = vmatpush3.xpose.msk.msra.mxu1 %vm654_vm2, %v1420_v30  ;;  %v6324_v30 = vld [vmem:[%s10300_s5 + $0x98] sm:$0xff] }
 0x556   : > { %7322 = vmatprep.subr.mxu1 %v8316_v10 }
 0x559   : > { %7323 = vmatpush3.xpose.msk.msra.mxu1 %vm654_vm2, %v1415_v28  ;;  %v6325_v28 = vld [vmem:[%s10300_s5 + $0xa0] sm:$0xff] }
 0x55a   : > { %7348 = vmatprep.subr.mxu1 %v8316_v10 }
 0x55c   : > { %7325 = vmatmul.mubr.msk.f32.vlgmr.msra.gmra.mxu1 %vm654_vm2, %v8736_v39 }
 0x55d   : > { %7327 = vmatprep.mubr.msk.f32.mxu1 %vm8317_vm1, %v8316_v10  ;;  %7349 = vmatpush3.msra.mxu1 %v6314_v0 }
 0x55e   : > { %7350 = vmatprep.subr.mxu1 %v8316_v10 }
 0x55f   : > { %7351 = vmatpush3.msra.mxu1 %v6313_v1 }
 0x560   : > { %7328 = vmatmul.mubr.msk.f32.gmra.mxu1 %vm654_vm2, %v8738_v41  ;;  %7374 = vmatprep.subr.mxu1 %v8316_v10 }
 0x561   : > { %7330 = vmatprep.mubr.msk.f32.mxu1 %vm8317_vm1, %v8316_v10 }
 0x564   : > { %7331 = vmatmul.mubr.msk.f32.gmra.mxu1 %vm654_vm2, %v8740_v44 }
 0x565   : > { %7352 = vmatprep.mubr.msk.f32.mxu1 %vm8317_vm1, %v8316_v10 }
 0x61c   : > { %v1602_v34 = vpop.f32.mrf.mxu1 }
 0x61d   : > { %v1616_v35 = vmul.f32 0.25, %v1602_v34  ;;  %v6322_v34 = vld [vmem:[%s10300_s5 + $0x88] sm:$0xff] }
 0x61e   : > { %v7326_v36 = vpop.f32.mrf.mxu1 }
 0x61f   : > { %v1619_v38 = vsel %vm1121_vm4, %v1616_v35, -inf  ;;  %v6321_v36 = vld [vmem:[%s10300_s5 + $0x80] sm:$0xff] }
 0x620   : > { %1620 = vmax.xlane.f32.xlu0 %v1619_v38  ;;  %v1607_v39 = vpop.f32.mrf.mxu1 }
 0x621   : > { %v1617_v40 = vmul.f32 0.25, %v1607_v39  ;;  %v6350_v39 = vld [vmem:[%s10302_s7 + $0xb8] sm:$0xff] }
 0x622   : > { %v7329_v42 = vpop.f32.mrf.mxu1 }
 0x623   : > { %v1622_v41 = vsel %vm1121_vm4, %v1617_v40, -inf  ;;  %v6349_v42 = vld [vmem:[%s10302_s7 + $0xb0] sm:$0xff] }
 0x624   : > { %1623 = vmax.xlane.f32.xlu1 %v1622_v41  ;;  %v1612_v45 = vpop.f32.mrf.mxu1 }
 0x625   : > { %v1618_v46 = vmul.f32 0.25, %v1612_v45  ;;  %v6348_v45 = vld [vmem:[%s10302_s7 + $0xa8] sm:$0xff] }
 0x626   : > { %v7332_v47 = vpop.f32.mrf.mxu1 }
 0x627   : > { %v1625_v44 = vsel %vm1128_vm5, %v1618_v46, -inf  ;;  %v6347_v47 = vld [vmem:[%s10302_s7 + $0xa0] sm:$0xff] }
 0x628   : > { %1626 = vmax.xlane.f32.xlu0 %v1625_v44 }
 0x6a9   : > { %v1621_v48 = vpop.xlane.xlu0 %1620 }
 0x6aa   : > { %v1628_v50 = vsub.f32 %v1616_v35, %v1621_v48  ;;  %v6346_v48 = vld [vmem:[%s10302_s7 + $0x98] sm:$0xff] }
 0x6ac   : > { %v1631_v51 = vmul.f32 1.442695, %v1628_v50  ;;  %v6345_v50 = vld [vmem:[%s10302_s7 + $0x90] sm:$0xff] }
 0x6ad   : > { %v1624_v52 = vpop.xlane.xlu1 %1623 }
 0x6ae   : > { %8188 = vpow2.f32 %v1631_v51  ;;  %v1629_v53 = vsub.f32 %v1617_v40, %v1624_v52  ;;  %v6344_v51 = vld [vmem:[%s10302_s7 + $0x88] sm:$0xff] }
 0x6b0   : > { %v1633_v54 = vmul.f32 1.442695, %v1629_v53  ;;  %v6343_v53 = vld [vmem:[%s10302_s7 + $0x80] sm:$0xff] }
 0x6b1   : > { %v1627_v55 = vpop.xlane.xlu0 %1626 }
 0x6b2   : > { %8190 = vpow2.f32 %v1633_v54  ;;  %v1630_v56 = vsub.f32 %v1618_v46, %v1627_v55 }
 0x6b4   : > { %v1635_v57 = vmul.f32 1.442695, %v1630_v56 }
 0x6b6   : > { %8192 = vpow2.f32 %v1635_v57 }
 0x6bb   : > { %v8189_v58 = vpop.eup %8188 }
 0x6bc   : > { %v1637_v59 = vsel %vm1121_vm4, %v8189_v58, 0.0 }
 0x6bd   : > { %1638 = vadd.xlane.f32.xlu1 %v1637_v59 }
 0x6bf   : > { %v8191_v60 = vpop.eup %8190 }
 0x6c0   : > { %v1640_v61 = vsel %vm1121_vm4, %v8191_v60, 0.0 }
 0x6c1   : > { %1641 = vadd.xlane.f32.xlu0 %v1640_v61 }
 0x6c3   : > { %v8193_v62 = vpop.eup %8192 }
 0x6c4   : > { %v1643_v63 = vsel %vm1128_vm5, %v8193_v62, 0.0 }
 0x6c5   : > { %1644 = vadd.xlane.f32.xlu1 %v1643_v63 }
 0x746   : > { %v1639_v2 = vpop.xlane.xlu1 %1638 }
 0x747   : > { %8194 = vrcp.f32 %v1639_v2 }
 0x74a   : > { %v1642_v3 = vpop.xlane.xlu0 %1641 }
 0x74b   : > { %8196 = vrcp.f32 %v1642_v3 }
 0x74e   : > { %v1645_v4 = vpop.xlane.xlu1 %1644 }
 0x74f   : > { %8198 = vrcp.f32 %v1645_v4 }
 0x754   : > { %v8195_v5 = vpop.eup %8194 }
 0x755   : > { %v1647_v6 = vmul.f32 %v8195_v5, %v8189_v58 }
 0x757   : > { %7340 = vmatmul.mubr.msk.f32.vlgmr.msra.gmra.mxu0 %vm1121_vm4, %v1647_v6 }
 0x758   : > { %v8197_v9 = vpop.eup %8196  ;;  %7342 = vmatprep.mubr.msk.f32.mxu0 %vm8317_vm1, %v8316_v10  ;;  %7362 = vmatpush3.msra.mxu0 %v1250_v7 }
 0x759   : > { %v1649_v11 = vmul.f32 %v8197_v9, %v8191_v60  ;;  %7363 = vmatprep.subr.mxu0 %v8316_v10 }
 0x75a   : > { %7364 = vmatpush3.msra.mxu0 %v1249_v8 }
 0x75b   : > { %7343 = vmatmul.mubr.msk.f32.gmra.mxu0 %vm1121_vm4, %v1649_v11  ;;  %7399 = vmatprep.subr.mxu0 %v8316_v10 }
 0x75c   : > { %v8199_v12 = vpop.eup %8198  ;;  %7345 = vmatprep.mubr.msk.f32.mxu0 %vm8317_vm1, %v8316_v10 }
 0x75d   : > { %v1651_v13 = vmul.f32 %v8199_v12, %v8193_v62 }
 0x75f   : > { %7346 = vmatmul.mubr.msk.f32.gmra.mxu0 %vm1121_vm4, %v1651_v13 }
 0x760   : > { %7365 = vmatprep.mubr.msk.f32.mxu0 %vm8317_vm1, %v8316_v10 }
 0x763   : > { %7366 = vmatmul.mubr.msk.f32.vlgmr.msra.gmra.mxu0 %vm654_vm2, %v8802_v22  ;;  %v6328_v22 = vld [vmem:[%s10300_s5 + $0xb8] sm:$0xff] }
 0x764   : > { %7400 = vmatpush3.msra.mxu0 %v6339_v14  ;;  %7368 = vmatprep.mubr.msk.f32.mxu0 %vm8317_vm1, %v8316_v10 }
 0x765   : > { %7401 = vmatprep.subr.mxu0 %v8316_v10 }
 0x766   : > { %7402 = vmatpush3.msra.mxu0 %v6338_v15 }
 0x767   : > { %7403 = vmatprep.subr.mxu0 %v8316_v10  ;;  %7369 = vmatmul.mubr.msk.f32.gmra.mxu0 %vm654_vm2, %v8804_v24  ;;  %v6327_v24 = vld [vmem:[%s10300_s5 + $0xb0] sm:$0xff] }
 0x768   : > { %7404 = vmatpush3.msra.mxu0 %v6337_v16  ;;  %7371 = vmatprep.mubr.msk.f32.mxu0 %vm8317_vm1, %v8316_v10 }
 0x769   : > { %7405 = vmatprep.subr.mxu0 %v8316_v10 }
 0x76a   : > { %7406 = vmatpush3.msra.mxu0 %v6336_v17 }
 0x76b   : > { %7407 = vmatprep.subr.mxu0 %v8316_v10  ;;  %7372 = vmatmul.mubr.msk.f32.gmra.mxu0 %vm654_vm2, %v8806_v26  ;;  %v6326_v26 = vld [vmem:[%s10300_s5 + $0xa8] sm:$0xff] }
 0x76c   : > { %7408 = vmatpush3.msra.mxu0 %v6335_v18  ;;  %7415 = vmatprep.mubr.msk.f32.mxu0 %vm8317_vm1, %v8316_v10 }
 0x76d   : > { %7409 = vmatprep.subr.mxu0 %v8316_v10 }
 0x76e   : > { %7410 = vmatpush3.msra.mxu0 %v6334_v19 }
 0x76f   : > { %7411 = vmatprep.subr.mxu0 %v8316_v10 }
 0x770   : > { %7412 = vmatpush3.msra.mxu0 %v6333_v20 }
 0x771   : > { %7413 = vmatprep.subr.mxu0 %v8316_v10 }
 0x772   : > { %7414 = vmatpush3.msra.mxu0 %v6332_v21 }
 0x773   : > { %7416 = vmatmul.mubr.msk.f32.vlgmr.msra.gmra.mxu0 %vm566_vm0, %v8546_v37  ;;  %7449 = vmatprep.subr.mxu0 %v8316_v10 }
 0x774   : > { %7418 = vmatprep.mubr.msk.f32.mxu0 %vm8317_vm1, %v8316_v10 }
 0x777   : > { %7419 = vmatmul.mubr.msk.f32.gmra.mxu0 %vm566_vm0, %v8563_v43 }
 0x778   : > { %7421 = vmatprep.mubr.msk.f32.mxu0 %vm8317_vm1, %v8316_v10 }
 0x77b   : > { %7422 = vmatmul.mubr.msk.f32.gmra.mxu0 %vm566_vm0, %v8582_v49 }
 0x77c   : > { %7455 = vmatprep.mubr.msk.f32.mxu0 %vm8317_vm1, %v8316_v10 }
 0x817   : > { %v1730_v23 = vpop.f32.mrf.mxu0 }
 0x818   : > { %7353 = vmatmul.mubr.msk.f32.vlgmr.msra.gmra.mxu1 %vm654_vm2, %v1730_v23 }
 0x819   : > { %7375 = vmatpush3.msra.mxu1 %v6328_v22  ;;  %v7341_v25 = vpop.f32.mrf.mxu0  ;;  %7355 = vmatprep.mubr.msk.f32.mxu1 %vm8317_vm1, %v8316_v10 }
 0x81a   : > { %7376 = vmatprep.subr.mxu1 %v8316_v10 }
 0x81b   : > { %7377 = vmatpush3.msra.mxu1 %v6327_v24  ;;  %v1735_v27 = vpop.f32.mrf.mxu0 }
 0x81c   : > { %7378 = vmatprep.subr.mxu1 %v8316_v10  ;;  %7356 = vmatmul.mubr.msk.f32.gmra.mxu1 %vm654_vm2, %v1735_v27 }
 0x81d   : > { %7379 = vmatpush3.msra.mxu1 %v6326_v26  ;;  %v7344_v29 = vpop.f32.mrf.mxu0  ;;  %7358 = vmatprep.mubr.msk.f32.mxu1 %vm8317_vm1, %v8316_v10 }
 0x81e   : > { %7380 = vmatprep.subr.mxu1 %v8316_v10 }
 0x81f   : > { %7381 = vmatpush3.msra.mxu1 %v6325_v28  ;;  %v1740_v31 = vpop.f32.mrf.mxu0 }
 0x820   : > { %7382 = vmatprep.subr.mxu1 %v8316_v10  ;;  %7359 = vmatmul.mubr.msk.f32.gmra.mxu1 %vm654_vm2, %v1740_v31 }
 0x821   : > { %7383 = vmatpush3.msra.mxu1 %v6324_v30  ;;  %v7347_v33 = vpop.f32.mrf.mxu0  ;;  %7390 = vmatprep.mubr.msk.f32.mxu1 %vm8317_vm1, %v8316_v10 }
 0x822   : > { %7384 = vmatprep.subr.mxu1 %v8316_v10 }
 0x823   : > { %7385 = vmatpush3.msra.mxu1 %v6323_v32  ;;  %v8948_v35 = vpop.f32.mrf.mxu0 }
 0x824   : > { %7386 = vmatprep.subr.mxu1 %v8316_v10 }
 0x825   : > { %7387 = vmatpush3.msra.mxu1 %v6322_v34  ;;  %v7367_v38 = vpop.f32.mrf.mxu0 }
 0x826   : > { %7388 = vmatprep.subr.mxu1 %v8316_v10 }
 0x827   : > { %7389 = vmatpush3.msra.mxu1 %v6321_v36  ;;  %v8958_v40 = vpop.f32.mrf.mxu0 }
 0x828   : > { %7391 = vmatmul.mubr.msk.f32.vlgmr.msra.gmra.mxu1 %vm566_vm0, %v8546_v37  ;;  %7424 = vmatprep.subr.mxu1 %v8316_v10 }
 0x829   : > { %7425 = vmatpush3.msra.mxu1 %v6350_v39  ;;  %v7370_v41 = vpop.f32.mrf.mxu0  ;;  %7393 = vmatprep.mubr.msk.f32.mxu1 %vm8317_vm1, %v8316_v10 }
 0x82a   : > { %7426 = vmatprep.subr.mxu1 %v8316_v10 }
 0x82b   : > { %7427 = vmatpush3.msra.mxu1 %v6349_v42  ;;  %v8972_v46 = vpop.f32.mrf.mxu0 }
 0x82c   : > { %7394 = vmatmul.mubr.msk.f32.gmra.mxu1 %vm566_vm0, %v8563_v43  ;;  %7428 = vmatprep.subr.mxu1 %v8316_v10 }
 0x82d   : > { %7429 = vmatpush3.msra.mxu1 %v6348_v45  ;;  %v7373_v44 = vpop.f32.mrf.mxu0  ;;  %7396 = vmatprep.mubr.msk.f32.mxu1 %vm8317_vm1, %v8316_v10 }
 0x82e   : > { %7430 = vmatprep.subr.mxu1 %v8316_v10  ;;  %v6364_v44 = vld [vmem:[%s10303_s8 + $0x20] sm:$0xff] }
 0x82f   : > { %7431 = vmatpush3.msra.mxu1 %v6347_v47  ;;  %v6365_v47 = vld [vmem:[%s10303_s8 + $0x28] sm:$0xff] }
 0x830   : > { %7397 = vmatmul.mubr.msk.f32.gmra.mxu1 %vm566_vm0, %v8582_v49  ;;  %7432 = vmatprep.subr.mxu1 %v8316_v10 }
 0x831   : > { %7433 = vmatpush3.msra.mxu1 %v6346_v48  ;;  %7440 = vmatprep.mubr.msk.f32.mxu1 %vm8317_vm1, %v8316_v10 }
 0x832   : > { %7434 = vmatprep.subr.mxu1 %v8316_v10 }
 0x833   : > { %v2089_v52 = vpop.f32.mrf.mxu0  ;;  %7435 = vmatpush3.msra.mxu1 %v6345_v50 }
 0x834   : > { %7436 = vmatprep.subr.mxu1 %v8316_v10 }
 0x835   : > { %v7417_v54 = vpop.f32.mrf.mxu0  ;;  %7437 = vmatpush3.msra.mxu1 %v6344_v51 }
 0x836   : > { %7438 = vmatprep.subr.mxu1 %v8316_v10  ;;  %v6376_v54 = vld [vmem:[%s10300_s5 + $0xf8] sm:$0xff] }
 0x837   : > { %v2094_v55 = vpop.f32.mrf.mxu0  ;;  %7439 = vmatpush3.msra.mxu1 %v6343_v53 }
 0x838   : > { %7441 = vmatmul.mubr.msk.f32.vlgmr.msra.gmra.mxu1 %vm566_vm0, %v8546_v37  ;;  %7464 = vmatprep.subr.mxu1 %v8316_v10 }
 0x839   : > { %v7420_v56 = vpop.f32.mrf.mxu0  ;;  %7443 = vmatprep.mubr.msk.f32.mxu1 %vm8317_vm1, %v8316_v10 }
 0x83b   : > { %v2099_v57 = vpop.f32.mrf.mxu0 }
 0x83c   : > { %7444 = vmatmul.mubr.msk.f32.gmra.mxu1 %vm566_vm0, %v8563_v43  ;;  %7450 = vmatpush3.xpose.msk.msra.mxu0 %vm654_vm2, %v2099_v57 }
 0x83d   : > { %v7423_v58 = vpop.f32.mrf.mxu0  ;;  %7446 = vmatprep.mubr.msk.f32.mxu1 %vm8317_vm1, %v8316_v10  ;;  %7451 = vmatprep.subr.mxu0 %v8316_v10 }
 0x83e   : > { %v6374_v58 = vld [vmem:[%s10300_s5 + $0xe8] sm:$0xff] }
 0x840   : > { %7447 = vmatmul.mubr.msk.f32.gmra.mxu1 %vm566_vm0, %v8582_v49  ;;  %7452 = vmatpush3.xpose.msk.msra.mxu0 %vm654_vm2, %v2094_v55  ;;  %v6375_v55 = vld [vmem:[%s10300_s5 + $0xf0] sm:$0xff] }
 0x841   : > { %7453 = vmatprep.subr.mxu0 %v8316_v10  ;;  %7470 = vmatprep.mubr.msk.f32.mxu1 %vm8317_vm1, %v8316_v10 }
 0x844   : > { %7454 = vmatpush3.xpose.msk.msra.mxu0 %vm654_vm2, %v2089_v52 }
 0x845   : > { %7479 = vmatprep.subr.mxu0 %v8316_v10 }
 0x8d8   : > { %v9022_v59 = vpop.f32.mrf.mxu1 }
 0x8da   : > { %v7354_v60 = vpop.f32.mrf.mxu1 }
 0x8db   : > { %v6373_v60 = vld [vmem:[%s10300_s5 + $0xe0] sm:$0xff] }
 0x8dc   : > { %v9024_v61 = vpop.f32.mrf.mxu1 }
 0x8de   : > { %v7357_v62 = vpop.f32.mrf.mxu1 }
 0x8e0   : > { %v9026_v63 = vpop.f32.mrf.mxu1 }
 0x8e2   : > { %v7360_v0 = vpop.f32.mrf.mxu1 }
 0x8e8   : > { %v2000_v1 = vpop.f32.mrf.mxu1 }
 0x8e9   : > { %7456 = vmatmul.mubr.msk.f32.vlgmr.msra.gmra.mxu0 %vm654_vm2, %v2000_v1  ;;  %v6372_v1 = vld [vmem:[%s10300_s5 + $0xd8] sm:$0xff] }
 0x8ea   : > { %v7392_v2 = vpop.f32.mrf.mxu1  ;;  %7458 = vmatprep.mubr.msk.f32.mxu0 %vm8317_vm1, %v8316_v10  ;;  %7480 = vmatpush3.msra.mxu0 %v6365_v47 }
 0x8eb   : > { %7481 = vmatprep.subr.mxu0 %v8316_v10  ;;  %v6371_v2 = vld [vmem:[%s10300_s5 + $0xd0] sm:$0xff] }
 0x8ec   : > { %v2005_v3 = vpop.f32.mrf.mxu1  ;;  %7482 = vmatpush3.msra.mxu0 %v6364_v44 }
 0x8ed   : > { %7459 = vmatmul.mubr.msk.f32.gmra.mxu0 %vm654_vm2, %v2005_v3  ;;  %7517 = vmatprep.subr.mxu0 %v8316_v10  ;;  %v6370_v3 = vld [vmem:[%s10300_s5 + $0xc8] sm:$0xff] }
 0x8ee   : > { %v7395_v4 = vpop.f32.mrf.mxu1  ;;  %7461 = vmatprep.mubr.msk.f32.mxu0 %vm8317_vm1, %v8316_v10 }
 0x8ef   : > { %v6369_v4 = vld [vmem:[%s10300_s5 + $0xc0] sm:$0xff] }
 0x8f0   : > { %v2010_v5 = vpop.f32.mrf.mxu1 }
 0x8f1   : > { %7462 = vmatmul.mubr.msk.f32.gmra.mxu0 %vm654_vm2, %v2010_v5  ;;  %v6398_v5 = vld [vmem:[%s10302_s7 + $0xf8] sm:$0xff] }
 0x8f2   : > { %v7398_v6 = vpop.f32.mrf.mxu1  ;;  %7483 = vmatprep.mubr.msk.f32.mxu0 %vm8317_vm1, %v8316_v10 }
 0x8f3   : > { %v6397_v6 = vld [vmem:[%s10302_s7 + $0xf0] sm:$0xff] }
 0x8f8   : > { %v2178_v7 = vpop.f32.mrf.mxu1 }
 0x8fa   : > { %v7442_v8 = vpop.f32.mrf.mxu1 }
 0x8fb   : > { %v6395_v8 = vld [vmem:[%s10302_s7 + $0xe0] sm:$0xff] }
 0x8fc   : > { %v2183_v9 = vpop.f32.mrf.mxu1 }
 0x8fe   : > { %v7445_v11 = vpop.f32.mrf.mxu1 }
 0x8ff   : > { %v6393_v11 = vld [vmem:[%s10302_s7 + $0xd0] sm:$0xff] }
 0x900   : > { %v2188_v12 = vpop.f32.mrf.mxu1 }
 0x901   : > { %7465 = vmatpush3.msk.msra.mxu1 %vm1165_vm3, %v2188_v12  ;;  %v6392_v12 = vld [vmem:[%s10302_s7 + $0xc8] sm:$0xff] }
 0x902   : > { %v7448_v13 = vpop.f32.mrf.mxu1  ;;  %7466 = vmatprep.subr.mxu1 %v8316_v10 }
 0x903   : > { %7467 = vmatpush3.msra.mxu1 %v2183_v9  ;;  %v6394_v9 = vld [vmem:[%s10302_s7 + $0xd8] sm:$0xff]  ;;  %v6391_v13 = vld [vmem:[%s10302_s7 + $0xc0] sm:$0xff] }
 0x904   : > { %7468 = vmatprep.subr.mxu1 %v8316_v10 }
 0x905   : > { %7469 = vmatpush3.msra.mxu1 %v2178_v7  ;;  %v6396_v7 = vld [vmem:[%s10302_s7 + $0xe8] sm:$0xff] }
 0x906   : > { %7492 = vmatprep.subr.mxu1 %v8316_v10 }
 0x9a9   : > { %v2276_v14 = vpop.f32.mrf.mxu0 }
 0x9aa   : > { %v2290_v15 = vmul.f32 0.25, %v2276_v14  ;;  %v6387_v14 = vld [vmem:[%s10301_s6 + $0xf8] sm:$0xff] }
 0x9ab   : > { %v7457_v16 = vpop.f32.mrf.mxu0 }
 0x9ac   : > { %v2293_v17 = vsel %vm1121_vm4, %v2290_v15, -inf  ;;  %v6386_v16 = vld [vmem:[%s10301_s6 + $0xf0] sm:$0xff] }
 0x9ad   : > { %2294 = vmax.xlane.f32.xlu0 %v2293_v17  ;;  %v2281_v18 = vpop.f32.mrf.mxu0 }
 0x9ae   : > { %v2291_v19 = vmul.f32 0.25, %v2281_v18  ;;  %v6385_v18 = vld [vmem:[%s10301_s6 + $0xe8] sm:$0xff] }
 0x9af   : > { %v7460_v20 = vpop.f32.mrf.mxu0 }
 0x9b0   : > { %v2296_v21 = vsel %vm1121_vm4, %v2291_v19, -inf  ;;  %v6384_v20 = vld [vmem:[%s10301_s6 + $0xe0] sm:$0xff] }
 0x9b1   : > { %2297 = vmax.xlane.f32.xlu1 %v2296_v21  ;;  %v2286_v22 = vpop.f32.mrf.mxu0 }
 0x9b2   : > { %v2292_v23 = vmul.f32 0.25, %v2286_v22  ;;  %v6383_v22 = vld [vmem:[%s10301_s6 + $0xd8] sm:$0xff] }
 0x9b3   : > { %v7463_v24 = vpop.f32.mrf.mxu0 }
 0x9b4   : > { %v2299_v25 = vsel %vm1128_vm5, %v2292_v23, -inf  ;;  %v6382_v24 = vld [vmem:[%s10301_s6 + $0xd0] sm:$0xff] }
 0x9b5   : > { %2300 = vmax.xlane.f32.xlu0 %v2299_v25 }
 0xa36   : > { %v2295_v26 = vpop.xlane.xlu0 %2294 }
 0xa37   : > { %v2302_v27 = vsub.f32 %v2290_v15, %v2295_v26  ;;  %v6381_v26 = vld [vmem:[%s10301_s6 + $0xc8] sm:$0xff] }
 0xa39   : > { %v2305_v28 = vmul.f32 1.442695, %v2302_v27  ;;  %v6380_v27 = vld [vmem:[%s10301_s6 + $0xc0] sm:$0xff] }
 0xa3a   : > { %v2298_v29 = vpop.xlane.xlu1 %2297 }
 0xa3b   : > { %8200 = vpow2.f32 %v2305_v28  ;;  %v2303_v30 = vsub.f32 %v2291_v19, %v2298_v29 }
 0xa3d   : > { %v2307_v31 = vmul.f32 1.442695, %v2303_v30 }
 0xa3e   : > { %v2301_v32 = vpop.xlane.xlu0 %2300 }
 0xa3f   : > { %8202 = vpow2.f32 %v2307_v31  ;;  %v2304_v33 = vsub.f32 %v2292_v23, %v2301_v32 }
 0xa41   : > { %v2309_v34 = vmul.f32 1.442695, %v2304_v33 }
 0xa43   : > { %8204 = vpow2.f32 %v2309_v34 }
 0xa48   : > { %v8201_v36 = vpop.eup %8200 }
 0xa49   : > { %v2311_v38 = vsel %vm1121_vm4, %v8201_v36, 0.0 }
 0xa4a   : > { %2312 = vadd.xlane.f32.xlu1 %v2311_v38 }
 0xa4c   : > { %v8203_v39 = vpop.eup %8202 }
 0xa4d   : > { %v2314_v42 = vsel %vm1121_vm4, %v8203_v39, 0.0 }
 0xa4e   : > { %2315 = vadd.xlane.f32.xlu0 %v2314_v42 }
 0xa50   : > { %v8205_v41 = vpop.eup %8204 }
 0xa51   : > { %v2317_v45 = vsel %vm1128_vm5, %v8205_v41, 0.0 }
 0xa52   : > { %2318 = vadd.xlane.f32.xlu1 %v2317_v45  ;;  %v1912_v45 = vadd.f32 %v8948_v35, %v9022_v59 }
 0xad3   : > { %v2313_v48 = vpop.xlane.xlu1 %2312 }
 0xad4   : > { %8206 = vrcp.f32 %v2313_v48 }
 0xad7   : > { %v2316_v50 = vpop.xlane.xlu0 %2315 }
 0xad8   : > { %8208 = vrcp.f32 %v2316_v50  ;;  %v1917_v50 = vadd.f32 %v8958_v40, %v9024_v61 }
 0xadb   : > { %v2319_v51 = vpop.xlane.xlu1 %2318 }
 0xadc   : > { %8210 = vrcp.f32 %v2319_v51 }
 0xae1   : > { %v8207_v52 = vpop.eup %8206 }
 0xae2   : > { %v2321_v53 = vmul.f32 %v8207_v52, %v8201_v36 }
 0xae4   : > { %7471 = vmatmul.mubr.msk.f32.vlgmr.msra.gmra.mxu1 %vm1121_vm4, %v2321_v53 }
 0xae5   : > { %v8209_v56 = vpop.eup %8208  ;;  %7493 = vmatpush3.msra.mxu1 %v6376_v54  ;;  %7473 = vmatprep.mubr.msk.f32.mxu1 %vm8317_vm1, %v8316_v10  ;;  %v1922_v54 = vadd.f32 %v8972_v46, %v9026_v63 }
 0xae6   : > { %7494 = vmatprep.subr.mxu1 %v8316_v10  ;;  %v2323_v57 = vmul.f32 %v8209_v56, %v8203_v39 }
 0xae7   : > { %7495 = vmatpush3.msra.mxu1 %v6375_v55 }
 0xae8   : > { %7496 = vmatprep.subr.mxu1 %v8316_v10  ;;  %7474 = vmatmul.mubr.msk.f32.gmra.mxu1 %vm1121_vm4, %v2323_v57 }
 0xae9   : > { %v8211_v62 = vpop.eup %8210  ;;  %7497 = vmatpush3.msra.mxu1 %v6374_v58  ;;  %7476 = vmatprep.mubr.msk.f32.mxu1 %vm8317_vm1, %v8316_v10 }
 0xaea   : > { %7498 = vmatprep.subr.mxu1 %v8316_v10  ;;  %v2325_v0 = vmul.f32 %v8211_v62, %v8205_v41 }
 0xaeb   : > { %7499 = vmatpush3.msra.mxu1 %v6373_v60 }
 0xaec   : > { %7500 = vmatprep.subr.mxu1 %v8316_v10  ;;  %7477 = vmatmul.mubr.msk.f32.gmra.mxu1 %vm1121_vm4, %v2325_v0 }
 0xaed   : > { %7501 = vmatpush3.msra.mxu1 %v6372_v1  ;;  %7508 = vmatprep.mubr.msk.f32.mxu1 %vm8317_vm1, %v8316_v10 }
 0xaee   : > { %7502 = vmatprep.subr.mxu1 %v8316_v10 }
 0xaef   : > { %7503 = vmatpush3.msra.mxu1 %v6371_v2 }
 0xaf0   : > { %7504 = vmatprep.subr.mxu1 %v8316_v10 }
 0xaf1   : > { %7505 = vmatpush3.msra.mxu1 %v6370_v3 }
 0xaf2   : > { %7506 = vmatprep.subr.mxu1 %v8316_v10 }
 0xaf3   : > { %7507 = vmatpush3.msra.mxu1 %v6369_v4 }
 0xaf4   : > { %7509 = vmatmul.mubr.msk.f32.vlgmr.msra.gmra.mxu1 %vm566_vm0, %v8546_v37  ;;  %7542 = vmatprep.subr.mxu1 %v8316_v10 }
 0xaf5   : > { %7543 = vmatpush3.msra.mxu1 %v6398_v5  ;;  %7511 = vmatprep.mubr.msk.f32.mxu1 %vm8317_vm1, %v8316_v10 }
 0xaf6   : > { %7544 = vmatprep.subr.mxu1 %v8316_v10 }
 0xaf7   : > { %7545 = vmatpush3.msra.mxu1 %v6397_v6 }
 0xaf8   : > { %7512 = vmatmul.mubr.msk.f32.gmra.mxu1 %vm566_vm0, %v8563_v43  ;;  %7546 = vmatprep.subr.mxu1 %v8316_v10 }
 0xaf9   : > { %7547 = vmatpush3.msra.mxu1 %v6396_v7  ;;  %7514 = vmatprep.mubr.msk.f32.mxu1 %vm8317_vm1, %v8316_v10 }
 0xafa   : > { %7548 = vmatprep.subr.mxu1 %v8316_v10 }
 0xafb   : > { %7549 = vmatpush3.msra.mxu1 %v6395_v8 }
 0xafc   : > { %7515 = vmatmul.mubr.msk.f32.gmra.mxu1 %vm566_vm0, %v8582_v49  ;;  %7550 = vmatprep.subr.mxu1 %v8316_v10 }
 0xafd   : > { %7551 = vmatpush3.msra.mxu1 %v6394_v9  ;;  %7558 = vmatprep.mubr.msk.f32.mxu1 %vm8317_vm1, %v8316_v10 }
 0xafe   : > { %7552 = vmatprep.subr.mxu1 %v8316_v10 }
 0xaff   : > { %7553 = vmatpush3.msra.mxu1 %v6393_v11 }
 0xb00   : > { %7554 = vmatprep.subr.mxu1 %v8316_v10 }
 0xb01   : > { %7555 = vmatpush3.msra.mxu1 %v6392_v12 }
 0xb02   : > { %7556 = vmatprep.subr.mxu1 %v8316_v10 }
 0xb03   : > { %7557 = vmatpush3.msra.mxu1 %v6391_v13 }
 0xb04   : > { %7559 = vmatmul.mubr.msk.f32.vlgmr.msra.gmra.mxu1 %vm566_vm0, %v8546_v37  ;;  %7582 = vmatprep.subr.mxu1 %v8316_v10 }
 0xb05   : > { %7561 = vmatprep.mubr.msk.f32.mxu1 %vm8317_vm1, %v8316_v10 }
 0xb08   : > { %7562 = vmatmul.mubr.msk.f32.gmra.mxu1 %vm566_vm0, %v8563_v43 }
 0xb09   : > { %7564 = vmatprep.mubr.msk.f32.mxu1 %vm8317_vm1, %v8316_v10 }
 0xb0c   : > { %7565 = vmatmul.mubr.msk.f32.gmra.mxu1 %vm566_vm0, %v8582_v49 }
 0xb0d   : > { %7588 = vmatprep.mubr.msk.f32.mxu1 %vm8317_vm1, %v8316_v10 }
 0xba4   : > { %v2404_v15 = vpop.f32.mrf.mxu1 }
 0xba5   : > { %7484 = vmatmul.mubr.msk.f32.vlgmr.msra.gmra.mxu0 %vm654_vm2, %v2404_v15 }
 0xba6   : > { %7518 = vmatpush3.msra.mxu0 %v6387_v14  ;;  %v7472_v17 = vpop.f32.mrf.mxu1  ;;  %7486 = vmatprep.mubr.msk.f32.mxu0 %vm8317_vm1, %v8316_v10 }
 0xba7   : > { %7519 = vmatprep.subr.mxu0 %v8316_v10 }
 0xba8   : > { %7520 = vmatpush3.msra.mxu0 %v6386_v16  ;;  %v2409_v19 = vpop.f32.mrf.mxu1 }
 0xba9   : > { %7521 = vmatprep.subr.mxu0 %v8316_v10  ;;  %7487 = vmatmul.mubr.msk.f32.gmra.mxu0 %vm654_vm2, %v2409_v19 }
 0xbaa   : > { %7522 = vmatpush3.msra.mxu0 %v6385_v18  ;;  %v7475_v21 = vpop.f32.mrf.mxu1  ;;  %7489 = vmatprep.mubr.msk.f32.mxu0 %vm8317_vm1, %v8316_v10 }
 0xbab   : > { %7523 = vmatprep.subr.mxu0 %v8316_v10 }
 0xbac   : > { %7524 = vmatpush3.msra.mxu0 %v6384_v20  ;;  %v2414_v23 = vpop.f32.mrf.mxu1 }
 0xbad   : > { %7525 = vmatprep.subr.mxu0 %v8316_v10  ;;  %7490 = vmatmul.mubr.msk.f32.gmra.mxu0 %vm654_vm2, %v2414_v23 }
 0xbae   : > { %7526 = vmatpush3.msra.mxu0 %v6383_v22  ;;  %v7478_v25 = vpop.f32.mrf.mxu1  ;;  %7533 = vmatprep.mubr.msk.f32.mxu0 %vm8317_vm1, %v8316_v10 }
 0xbaf   : > { %7527 = vmatprep.subr.mxu0 %v8316_v10  ;;  %v6413_v25 = vld [vmem:[%s10303_s8 + $0x38] sm:$0xff] }
 0xbb0   : > { %7528 = vmatpush3.msra.mxu0 %v6382_v24 }
 0xbb1   : > { %7529 = vmatprep.subr.mxu0 %v8316_v10 }
 0xbb2   : > { %7530 = vmatpush3.msra.mxu0 %v6381_v26  ;;  %v6412_v26 = vld [vmem:[%s10303_s8 + $0x30] sm:$0xff] }
 0xbb3   : > { %7531 = vmatprep.subr.mxu0 %v8316_v10 }
 0xbb4   : > { %v2588_v28 = vpop.f32.mrf.mxu1  ;;  %7532 = vmatpush3.msra.mxu0 %v6380_v27 }
 0xbb5   : > { %7534 = vmatmul.mubr.msk.f32.vlgmr.msra.gmra.mxu0 %vm566_vm0, %v8546_v37  ;;  %7567 = vmatprep.subr.mxu0 %v8316_v10 }
 0xbb6   : > { %v7510_v29 = vpop.f32.mrf.mxu1  ;;  %7536 = vmatprep.mubr.msk.f32.mxu0 %vm8317_vm1, %v8316_v10 }
 0xbb8   : > { %v2593_v30 = vpop.f32.mrf.mxu1 }
 0xbb9   : > { %7537 = vmatmul.mubr.msk.f32.gmra.mxu0 %vm566_vm0, %v8563_v43 }
 0xbba   : > { %v7513_v31 = vpop.f32.mrf.mxu1  ;;  %7539 = vmatprep.mubr.msk.f32.mxu0 %vm8317_vm1, %v8316_v10 }
 0xbbc   : > { %v2598_v32 = vpop.f32.mrf.mxu1 }
 0xbbd   : > { %7540 = vmatmul.mubr.msk.f32.gmra.mxu0 %vm566_vm0, %v8582_v49 }
 0xbbe   : > { %v7516_v33 = vpop.f32.mrf.mxu1  ;;  %7573 = vmatprep.mubr.msk.f32.mxu0 %vm8317_vm1, %v8316_v10 }
 0xbc4   : > { %v2766_v34 = vpop.f32.mrf.mxu1 }
 0xbc6   : > { %v7560_v36 = vpop.f32.mrf.mxu1 }
 0xbc8   : > { %v2771_v38 = vpop.f32.mrf.mxu1 }
 0xbca   : > { %v7563_v39 = vpop.f32.mrf.mxu1 }
 0xbcc   : > { %v2776_v42 = vpop.f32.mrf.mxu1 }
 0xbcd   : > { %7583 = vmatpush3.msk.msra.mxu1 %vm1165_vm3, %v2776_v42 }
 0xbce   : > { %v7566_v41 = vpop.f32.mrf.mxu1  ;;  %7584 = vmatprep.subr.mxu1 %v8316_v10 }
 0xbcf   : > { %7585 = vmatpush3.msra.mxu1 %v2771_v38 }
 0xbd0   : > { %7586 = vmatprep.subr.mxu1 %v8316_v10 }
 0xbd1   : > { %7587 = vmatpush3.msra.mxu1 %v2766_v34 }
 0xbd2   : > { %7610 = vmatprep.subr.mxu1 %v8316_v10 }
 0xc65   : > { %v2496_v47 = vpop.f32.mrf.mxu0 }
 0xc66   : > { %v9211_v44 = vadd.f32 %v2496_v47, %v1912_v45 }
 0xc67   : > { %v7485_v48 = vpop.f32.mrf.mxu0 }
 0xc69   : > { %v2501_v51 = vpop.f32.mrf.mxu0 }
 0xc6a   : > { %v9215_v52 = vadd.f32 %v2501_v51, %v1917_v50 }
 0xc6b   : > { %v7488_v53 = vpop.f32.mrf.mxu0 }
 0xc6d   : > { %v2506_v55 = vpop.f32.mrf.mxu0 }
 0xc6e   : > { %v9219_v56 = vadd.f32 %v2506_v55, %v1922_v54 }
 0xc6f   : > { %v7491_v57 = vpop.f32.mrf.mxu0 }
 0xc75   : > { %v2677_v58 = vpop.f32.mrf.mxu0 }
 0xc77   : > { %v7535_v35 = vpop.f32.mrf.mxu0 }
 0xc79   : > { %v2682_v59 = vpop.f32.mrf.mxu0 }
 0xc7b   : > { %v7538_v60 = vpop.f32.mrf.mxu0 }
 0xc7d   : > { %v2687_v62 = vpop.f32.mrf.mxu0 }
 0xc7e   : > { %7568 = vmatpush3.xpose.msk.msra.mxu0 %vm654_vm2, %v2687_v62 }
 0xc7f   : > { %v7541_v0 = vpop.f32.mrf.mxu0  ;;  %7569 = vmatprep.subr.mxu0 %v8316_v10 }
 0xc82   : > { %7570 = vmatpush3.xpose.msk.msra.mxu0 %vm654_vm2, %v2682_v59 }
 0xc83   : > { %7571 = vmatprep.subr.mxu0 %v8316_v10 }
 0xc86   : > { %7572 = vmatpush3.xpose.msk.msra.mxu0 %vm654_vm2, %v2677_v58 }
 0xc87   : > { %7597 = vmatprep.subr.mxu0 %v8316_v10 }
 0xc89   : > { %7574 = vmatmul.mubr.msk.f32.vlgmr.msra.gmra.mxu0 %vm654_vm2, %v2588_v28 }
 0xc8a   : > { %7576 = vmatprep.mubr.msk.f32.mxu0 %vm8317_vm1, %v8316_v10  ;;  %7598 = vmatpush3.msra.mxu0 %v6413_v25 }
 0xc8b   : > { %7599 = vmatprep.subr.mxu0 %v8316_v10 }
 0xc8c   : > { %7600 = vmatpush3.msra.mxu0 %v6412_v26 }
 0xc8d   : > { %7577 = vmatmul.mubr.msk.f32.gmra.mxu0 %vm654_vm2, %v2593_v30  ;;  %7635 = vmatprep.subr.mxu0 %v8316_v10 }
 0xc8e   : > { %7579 = vmatprep.mubr.msk.f32.mxu0 %vm8317_vm1, %v8316_v10 }
 0xc91   : > { %7580 = vmatmul.mubr.msk.f32.gmra.mxu0 %vm654_vm2, %v2598_v32 }
 0xc92   : > { %7601 = vmatprep.mubr.msk.f32.mxu0 %vm8317_vm1, %v8316_v10 }
 0xd49   : > { %v2864_v40 = vpop.f32.mrf.mxu0 }
 0xd4a   : > { %v2878_v46 = vmul.f32 0.25, %v2864_v40 }
 0xd4b   : > { %v7575_v61 = vpop.f32.mrf.mxu0 }
 0xd4c   : > { %v2881_v63 = vsel %vm1121_vm4, %v2878_v46, -inf }
 0xd4d   : > { %2882 = vmax.xlane.f32.xlu0 %v2881_v63  ;;  %v2869_v1 = vpop.f32.mrf.mxu0 }
 0xd4e   : > { %v2879_v2 = vmul.f32 0.25, %v2869_v1 }
 0xd4f   : > { %v7578_v3 = vpop.f32.mrf.mxu0 }
 0xd50   : > { %v2884_v4 = vsel %vm1121_vm4, %v2879_v2, -inf }
 0xd51   : > { %2885 = vmax.xlane.f32.xlu1 %v2884_v4  ;;  %v2874_v5 = vpop.f32.mrf.mxu0 }
 0xd52   : > { %v2880_v6 = vmul.f32 0.25, %v2874_v5 }
 0xd53   : > { %v7581_v7 = vpop.f32.mrf.mxu0 }
 0xd54   : > { %v2887_v8 = vsel %vm1128_vm5, %v2880_v6, -inf }
 0xd55   : > { %2888 = vmax.xlane.f32.xlu0 %v2887_v8  ;;  %v3172_v8 = vld [vmem:[%s10306_s11 + $0x38] sm:$0xff] }
 0xdd6   : > { %v2883_v9 = vpop.xlane.xlu0 %2882 }
 0xdd7   : > { %v2890_v11 = vsub.f32 %v2878_v46, %v2883_v9  ;;  %v3171_v9 = vld [vmem:[%s10306_s11 + $0x30] sm:$0xff] }
 0xdd9   : > { %v2893_v12 = vmul.f32 1.442695, %v2890_v11  ;;  %v3170_v11 = vld [vmem:[%s10306_s11 + $0x28] sm:$0xff] }
 0xdda   : > { %v2886_v13 = vpop.xlane.xlu1 %2885 }
 0xddb   : > { %8212 = vpow2.f32 %v2893_v12  ;;  %v2891_v14 = vsub.f32 %v2879_v2, %v2886_v13  ;;  %v3169_v12 = vld [vmem:[%s10306_s11 + $0x20] sm:$0xff]  ;;  %v3168_v13 = vld [vmem:[%s10306_s11 + $0x18] sm:$0xff] }
 0xddd   : > { %v2895_v15 = vmul.f32 1.442695, %v2891_v14  ;;  %v3167_v14 = vld [vmem:[%s10306_s11 + $0x10] sm:$0xff] }
 0xdde   : > { %v2889_v16 = vpop.xlane.xlu0 %2888 }
 0xddf   : > { %8214 = vpow2.f32 %v2895_v15  ;;  %v2892_v17 = vsub.f32 %v2880_v6, %v2889_v16  ;;  %v3166_v15 = vld [vmem:[%s10306_s11 + $0x8] sm:$0xff]  ;;  %v3165_v16 = vld [vmem:[%s10306_s11] sm:$0xff] }
 0xde1   : > { %v2897_v18 = vmul.f32 1.442695, %v2892_v17 }
 0xde3   : > { %8216 = vpow2.f32 %v2897_v18 }
 0xde8   : > { %v8213_v19 = vpop.eup %8212 }
 0xde9   : > { %v2899_v20 = vsel %vm1121_vm4, %v8213_v19, 0.0 }
 0xdea   : > { %2900 = vadd.xlane.f32.xlu1 %v2899_v20 }
 0xdec   : > { %v8215_v21 = vpop.eup %8214 }
 0xded   : > { %v2902_v22 = vsel %vm1121_vm4, %v8215_v21, 0.0 }
 0xdee   : > { %2903 = vadd.xlane.f32.xlu0 %v2902_v22 }
 0xdf0   : > { %v8217_v23 = vpop.eup %8216 }
 0xdf1   : > { %v2905_v24 = vsel %vm1128_vm5, %v8217_v23, 0.0 }
 0xdf2   : > { %2906 = vadd.xlane.f32.xlu1 %v2905_v24 }
 0xe73   : > { %v2901_v27 = vpop.xlane.xlu1 %2900 }
 0xe74   : > { %8218 = vrcp.f32 %v2901_v27  ;;  %v6417_v27 = vld [vmem:[%s10304_s9] ss:$0 sm:$0xff] }
 0xe77   : > { %v2904_v28 = vpop.xlane.xlu0 %2903 }
 0xe78   : > { %8220 = vrcp.f32 %v2904_v28 }
 0xe7b   : > { %v2907_v29 = vpop.xlane.xlu1 %2906 }
 0xe7c   : > { %8222 = vrcp.f32 %v2907_v29  ;;  %v6418_v29 = vld [vmem:[%s10305_s10] ss:$0 sm:$0xff] }
 0xe81   : > { %v8219_v30 = vpop.eup %8218 }
 0xe82   : > { %v2909_v31 = vmul.f32 %v8219_v30, %v8213_v19 }
 0xe84   : > { %7589 = vmatmul.mubr.msk.f32.vlgmr.msra.gmra.mxu1 %vm1121_vm4, %v2909_v31 }
 0xe85   : > { %v8221_v32 = vpop.eup %8220  ;;  %7591 = vmatprep.mubr.msk.f32.mxu1 %vm8317_vm1, %v8316_v10  ;;  %7611 = vmatpush3.msra.mxu1 %v3172_v8 }
 0xe86   : > { %v2911_v33 = vmul.f32 %v8221_v32, %v8215_v21  ;;  %7612 = vmatprep.subr.mxu1 %v8316_v10 }
 0xe87   : > { %7613 = vmatpush3.msra.mxu1 %v3171_v9 }
 0xe88   : > { %7592 = vmatmul.mubr.msk.f32.gmra.mxu1 %vm1121_vm4, %v2911_v33  ;;  %7614 = vmatprep.subr.mxu1 %v8316_v10 }
 0xe89   : > { %v8223_v34 = vpop.eup %8222  ;;  %7594 = vmatprep.mubr.msk.f32.mxu1 %vm8317_vm1, %v8316_v10  ;;  %7615 = vmatpush3.msra.mxu1 %v3170_v11 }
 0xe8a   : > { %v2913_v36 = vmul.f32 %v8223_v34, %v8217_v23  ;;  %7616 = vmatprep.subr.mxu1 %v8316_v10 }
 0xe8b   : > { %7617 = vmatpush3.msra.mxu1 %v3169_v12 }
 0xe8c   : > { %7595 = vmatmul.mubr.msk.f32.gmra.mxu1 %vm1121_vm4, %v2913_v36  ;;  %7618 = vmatprep.subr.mxu1 %v8316_v10 }
 0xe8d   : > { %7626 = vmatprep.mubr.msk.f32.mxu1 %vm8317_vm1, %v8316_v10  ;;  %7619 = vmatpush3.msra.mxu1 %v3168_v13 }
 0xe8e   : > { %7620 = vmatprep.subr.mxu1 %v8316_v10 }
 0xe8f   : > { %7621 = vmatpush3.msra.mxu1 %v3167_v14 }
 0xe90   : > { %7622 = vmatprep.subr.mxu1 %v8316_v10 }
 0xe91   : > { %7623 = vmatpush3.msra.mxu1 %v3166_v15 }
 0xe92   : > { %7624 = vmatprep.subr.mxu1 %v8316_v10 }
 0xe93   : > { %7625 = vmatpush3.msra.mxu1 %v3165_v16 }
 0xe94   : > { %7677 = vmatprep.subr.mxu1 %v8316_v10 }
 0xf44   : > { %v2992_v38 = vpop.f32.mrf.mxu1 }
 0xf45   : > { %7602 = vmatmul.mubr.msk.f32.vlgmr.msra.gmra.mxu0 %vm654_vm2, %v2992_v38 }
 0xf46   : > { %v7590_v39 = vpop.f32.mrf.mxu1  ;;  %7604 = vmatprep.mubr.msk.f32.mxu0 %vm8317_vm1, %v8316_v10 }
 0xf48   : > { %v2997_v42 = vpop.f32.mrf.mxu1 }
 0xf49   : > { %7605 = vmatmul.mubr.msk.f32.gmra.mxu0 %vm654_vm2, %v2997_v42 }
 0xf4a   : > { %v7593_v41 = vpop.f32.mrf.mxu1  ;;  %7607 = vmatprep.mubr.msk.f32.mxu0 %vm8317_vm1, %v8316_v10 }
 0xf4c   : > { %v3002_v45 = vpop.f32.mrf.mxu1 }
 0xf4d   : > { %7608 = vmatmul.mubr.msk.f32.gmra.mxu0 %vm654_vm2, %v3002_v45  ;;  %v3299_v45 = vld [vmem:[%s10308_s13 + $0x18] sm:$0xff] }
 0xf4e   : > { %v7596_v47 = vpop.f32.mrf.mxu1  ;;  %7643 = vmatprep.mubr.msk.f32.mxu0 %vm8317_vm1, %v8316_v10  ;;  %7636 = vmatpush3.msra.mxu0 %v3299_v45 }
 0xf4f   : > { %7637 = vmatprep.subr.mxu0 %v8316_v10  ;;  %v3298_v47 = vld [vmem:[%s10308_s13 + $0x10] sm:$0xff] }
 0xf50   : > { %7638 = vmatpush3.msra.mxu0 %v3298_v47 }
 0xf51   : > { %7639 = vmatprep.subr.mxu0 %v8316_v10 }
0x1005   : > { %v3084_v48 = vpop.f32.mrf.mxu0 }
0x1006   : > { %v3098_v50 = vadd.f32 %v3084_v48, %v9211_v44  ;;  %v3297_v48 = vld [vmem:[%s10308_s13 + $0x8] sm:$0xff] }
0x1007   : > { %v7603_v51 = vpop.f32.mrf.mxu0  ;;  %7640 = vmatpush3.msra.mxu0 %v3297_v48 }
0x1008   : > { %v3101_v53 = vadd.f32 %v3098_v50, %v8546_v37  ;;  %7641 = vmatprep.subr.mxu0 %v8316_v10  ;;  %v3296_v50 = vld [vmem:[%s10308_s13] sm:$0xff] }
0x1009   : > { %v3089_v54 = vpop.f32.mrf.mxu0  ;;  %7642 = vmatpush3.msra.mxu0 %v3296_v50  ;;  %v6419_v51 = vld [vmem:[%s10307_s12] ss:$0 sm:$0xff] }
0x100a   : > { %v3099_v55 = vadd.f32 %v3089_v54, %v9215_v52  ;;  %v3106_v57 = vsel %vm566_vm0, %v3101_v53, 0.0  ;;  %7652 = vmatprep.subr.mxu0 %v8316_v10 }
0x100b   : > { %3107 = vadd.xlane.f32.xlu0 %v3106_v57  ;;  %v7606_v58 = vpop.f32.mrf.mxu0 }
0x100c   : > { %v3102_v35 = vadd.f32 %v3099_v55, %v8563_v43 }
0x100d   : > { %v3094_v59 = vpop.f32.mrf.mxu0 }
0x100e   : > { %v3100_v60 = vadd.f32 %v3094_v59, %v9219_v56  ;;  %v3109_v62 = vsel %vm566_vm0, %v3102_v35, 0.0 }
0x100f   : > { %3110 = vadd.xlane.f32.xlu1 %v3109_v62  ;;  %v7609_v0 = vpop.f32.mrf.mxu0 }
0x1010   : > { %v3103_v44 = vadd.f32 %v3100_v60, %v8582_v49 }
0x1012   : > { %v3113_v37 = vsel %vm3112_vm6, %v3103_v44, 0.0 }
0x1013   : > { %3114 = vadd.xlane.f32.xlu0 %v3113_v37 }
0x1094   : > { %v3108_v52 = vpop.xlane.xlu0 %3107 }
0x1095   : > { %v3117_v40 = vmul.f32 0.015625, %v3108_v52 }
0x1097   : > { %v3120_v46 = vsub.f32 %v3101_v53, %v3117_v40 }
0x1098   : > { %v3111_v61 = vpop.xlane.xlu1 %3110 }
0x1099   : > { %v3118_v63 = vmul.f32 0.015625, %v3111_v61  ;;  %v3123_v1 = vmul.f32 %v3120_v46, %v3120_v46 }
0x109b   : > { %v3121_v43 = vsub.f32 %v3102_v35, %v3118_v63  ;;  %v3126_v2 = vsel %vm566_vm0, %v3123_v1, 0.0 }
0x109c   : > { %3127 = vadd.xlane.f32.xlu1 %v3126_v2  ;;  %v3115_v56 = vpop.xlane.xlu0 %3114 }
0x109d   : > { %v3119_v3 = vmul.f32 0.015625, %v3115_v56  ;;  %v3124_v4 = vmul.f32 %v3121_v43, %v3121_v43 }
0x109f   : > { %v3122_v5 = vsub.f32 %v3103_v44, %v3119_v3  ;;  %v3129_v6 = vsel %vm566_vm0, %v3124_v4, 0.0 }
0x10a0   : > { %3130 = vadd.xlane.f32.xlu0 %v3129_v6 }
0x10a1   : > { %v3125_v49 = vmul.f32 %v3122_v5, %v3122_v5 }
0x10a3   : > { %v3132_v7 = vsel %vm3112_vm6, %v3125_v49, 0.0 }
0x10a4   : > { %3133 = vadd.xlane.f32.xlu1 %v3132_v7 }
0x1125   : > { %v3128_v17 = vpop.xlane.xlu1 %3127 }
0x1126   : > { %v3135_v18 = vmul.f32 0.015625, %v3128_v17 }
0x1128   : > { %v3138_v19 = vadd.f32 1e-05, %v3135_v18  ;;  %v6423_v18 = vld [vmem:[%s10309_s14] ss:$0 sm:$0xff] }
0x1129   : > { %v3131_v20 = vpop.xlane.xlu0 %3130 }
0x112a   : > { %8224 = vrsqrt.f32 %v3138_v19  ;;  %v3136_v21 = vmul.f32 0.015625, %v3131_v20 }
0x112c   : > { %v3139_v22 = vadd.f32 1e-05, %v3136_v21 }
0x112d   : > { %v3134_v23 = vpop.xlane.xlu1 %3133 }
0x112e   : > { %8226 = vrsqrt.f32 %v3139_v22  ;;  %v3137_v24 = vmul.f32 0.015625, %v3134_v23 }
0x1130   : > { %v3140_v25 = vadd.f32 1e-05, %v3137_v24 }
0x1132   : > { %8228 = vrsqrt.f32 %v3140_v25 }
0x1137   : > { %v8225_v26 = vpop.eup %8224 }
0x1138   : > { %v3144_v28 = vmul.f32 %v8225_v26, %v3120_v46 }
0x113a   : > { %v3153_v30 = vmul.f32 %v6417_v27, %v3144_v28 }
0x113b   : > { %v8227_v31 = vpop.eup %8226 }
0x113c   : > { %v9318_v32 = vadd.f32 %v6418_v29, %v3153_v30  ;;  %v3145_v33 = vmul.f32 %v8227_v31, %v3121_v43 }
0x113e   : > { %7627 = vmatmul.mubr.msk.f32.vlgmr.msra.gmra.mxu1 %vm566_vm0, %v9318_v32  ;;  %v3154_v34 = vmul.f32 %v6417_v27, %v3145_v33 }
0x113f   : > { %v8229_v36 = vpop.eup %8228  ;;  %7629 = vmatprep.mubr.msk.f32.mxu1 %vm8317_vm1, %v8316_v10 }
0x1140   : > { %v9324_v38 = vadd.f32 %v6418_v29, %v3154_v34  ;;  %v3146_v39 = vmul.f32 %v8229_v36, %v3122_v5 }
0x1142   : > { %7630 = vmatmul.mubr.msk.f32.gmra.mxu1 %vm566_vm0, %v9324_v38  ;;  %v3155_v42 = vmul.f32 %v6417_v27, %v3146_v39 }
0x1143   : > { %7632 = vmatprep.mubr.msk.f32.mxu1 %vm8317_vm1, %v8316_v10 }
0x1144   : > { %v9330_v41 = vadd.f32 %v6418_v29, %v3155_v42 }
0x1146   : > { %7633 = vmatmul.mubr.msk.f32.gmra.mxu1 %vm566_vm0, %v9330_v41 }
0x1147   : > { %7693 = vmatprep.mubr.msk.f32.mxu1 %vm8317_vm1, %v8316_v10 }
0x11fe   : > { %v3255_v53 = vpop.f32.mrf.mxu1 }
0x11ff   : > { %v3256_v54 = vadd.f32 %v6419_v51, %v3255_v53 }
0x1200   : > { %v7628_v55 = vpop.f32.mrf.mxu1 }
0x1201   : > { %v3272_v57 = vmul.f32 0.044715, %v3256_v54  ;;  %v3269_v49 = vmul.f32 0.5, %v3256_v54 }
0x1202   : > { %v3260_v58 = vpop.f32.mrf.mxu1 }
0x1203   : > { %v3275_v35 = vmul.f32 %v3272_v57, %v3256_v54  ;;  %v3261_v59 = vadd.f32 %v6419_v51, %v3260_v58  ;;  %v6436_v58 = vld [vmem:[%s10300_s5 + $0x138] sm:$0xff] }
0x1204   : > { %v7631_v60 = vpop.f32.mrf.mxu1 }
0x1205   : > { %v3278_v62 = vmul.f32 %v3275_v35, %v3256_v54  ;;  %v3273_v0 = vmul.f32 0.044715, %v3261_v59  ;;  %v3270_v11 = vmul.f32 0.5, %v3261_v59  ;;  %v6447_v35 = vld [vmem:[%s10301_s6 + $0x138] sm:$0xff]  ;;  %v6446_v60 = vld [vmem:[%s10301_s6 + $0x130] sm:$0xff] }
0x1206   : > { %v3265_v44 = vpop.f32.mrf.mxu1  ;;  %7678 = vmatpush3.msra.mxu1 %v6447_v35 }
0x1207   : > { %v3281_v37 = vadd.f32 %v3278_v62, %v3256_v54  ;;  %v3276_v52 = vmul.f32 %v3273_v0, %v3261_v59  ;;  %v3266_v40 = vadd.f32 %v6419_v51, %v3265_v44  ;;  %7679 = vmatprep.subr.mxu1 %v8316_v10  ;;  %v6434_v62 = vld [vmem:[%s10300_s5 + $0x128] sm:$0xff]  ;;  %v6433_v44 = vld [vmem:[%s10300_s5 + $0x120] sm:$0xff] }
0x1208   : > { %v7634_v46 = vpop.f32.mrf.mxu1  ;;  %7680 = vmatpush3.msra.mxu1 %v6446_v60  ;;  %v6445_v0 = vld [vmem:[%s10301_s6 + $0x128] sm:$0xff] }
0x1209   : > { %v3284_v61 = vmul.f32 0.7978846, %v3281_v37  ;;  %v3279_v63 = vmul.f32 %v3276_v52, %v3261_v59  ;;  %v3274_v1 = vmul.f32 0.044715, %v3266_v40  ;;  %v3271_v15 = vmul.f32 0.5, %v3266_v40  ;;  %7681 = vmatprep.subr.mxu1 %v8316_v10  ;;  %v6444_v37 = vld [vmem:[%s10301_s6 + $0x120] sm:$0xff] }
0x120a   : > { %7682 = vmatpush3.msra.mxu1 %v6445_v0  ;;  %v6432_v52 = vld [vmem:[%s10300_s5 + $0x118] sm:$0xff]  ;;  %v6431_v46 = vld [vmem:[%s10300_s5 + $0x110] sm:$0xff] }
0x120b   : > { %8230 = vtanh.f32 %v3284_v61  ;;  %v3282_v43 = vadd.f32 %v3279_v63, %v3261_v59  ;;  %v3277_v2 = vmul.f32 %v3274_v1, %v3266_v40  ;;  %v6435_v59 = vld [vmem:[%s10300_s5 + $0x130] sm:$0xff]  ;;  %7683 = vmatprep.subr.mxu1 %v8316_v10  ;;  %v6430_v63 = vld [vmem:[%s10300_s5 + $0x108] sm:$0xff] }
0x120c   : > { %7684 = vmatpush3.msra.mxu1 %v6444_v37  ;;  %v6442_v61 = vld [vmem:[%s10301_s6 + $0x110] sm:$0xff]  ;;  %v6441_v1 = vld [vmem:[%s10301_s6 + $0x108] sm:$0xff] }
0x120d   : > { %v3280_v56 = vmul.f32 %v3277_v2, %v3266_v40  ;;  %v3285_v3 = vmul.f32 0.7978846, %v3282_v43  ;;  %7685 = vmatprep.subr.mxu1 %v8316_v10  ;;  %v6429_v43 = vld [vmem:[%s10300_s5 + $0x100] sm:$0xff] }
0x120e   : > { %v6440_v2 = vld [vmem:[%s10301_s6 + $0x100] sm:$0xff] }
0x120f   : > { %v3283_v4 = vadd.f32 %v3280_v56, %v3266_v40  ;;  %8232 = vtanh.f32 %v3285_v3  ;;  %v6443_v40 = vld [vmem:[%s10301_s6 + $0x118] sm:$0xff] }
0x1210   : > { %7686 = vmatpush3.msra.mxu1 %v6443_v40 }
0x1211   : > { %v3286_v5 = vmul.f32 0.7978846, %v3283_v4  ;;  %7687 = vmatprep.subr.mxu1 %v8316_v10 }
0x1212   : > { %7688 = vmatpush3.msra.mxu1 %v6442_v61 }
0x1213   : > { %8234 = vtanh.f32 %v3286_v5  ;;  %7689 = vmatprep.subr.mxu1 %v8316_v10 }
0x1214   : > { %7690 = vmatpush3.msra.mxu1 %v6441_v1 }
0x1215   : > { %7691 = vmatprep.subr.mxu1 %v8316_v10 }
0x1216   : > { %7692 = vmatpush3.msra.mxu1 %v6440_v2 }
0x1217   : > { %7727 = vmatprep.subr.mxu1 %v8316_v10 }
0x1218   : > { %v8231_v6 = vpop.eup %8230 }
0x1219   : > { %v3290_v7 = vadd.f32 1.0, %v8231_v6 }
0x121b   : > { %v3293_v8 = vmul.f32 %v3290_v7, %v3269_v49 }
0x121c   : > { %v8233_v9 = vpop.eup %8232 }
0x121d   : > { %7644 = vmatmul.mubr.msk.f32.vlgmr.msra.gmra.mxu0 %vm3307_vm7, %v3293_v8  ;;  %v3291_v12 = vadd.f32 1.0, %v8233_v9 }
0x121e   : > { %7646 = vmatprep.mubr.msk.f32.mxu0 %vm8317_vm1, %v8316_v10  ;;  %7653 = vmatpush3.msra.mxu0 %v6436_v58 }
0x121f   : > { %v3294_v13 = vmul.f32 %v3291_v12, %v3270_v11  ;;  %7654 = vmatprep.subr.mxu0 %v8316_v10  ;;  %v6427_v12 = vld [vmem:[%s10310_s15] ss:$0 sm:$0xff] }
0x1220   : > { %v8235_v14 = vpop.eup %8234  ;;  %7655 = vmatpush3.msra.mxu0 %v6435_v59 }
0x1221   : > { %7647 = vmatmul.mubr.msk.f32.gmra.mxu0 %vm3307_vm7, %v3294_v13  ;;  %v3292_v16 = vadd.f32 1.0, %v8235_v14  ;;  %7656 = vmatprep.subr.mxu0 %v8316_v10  ;;  %v6428_v14 = vld [vmem:[%s10311_s16] ss:$0 sm:$0xff] }
0x1222   : > { %7649 = vmatprep.mubr.msk.f32.mxu0 %vm8317_vm1, %v8316_v10  ;;  %7657 = vmatpush3.msra.mxu0 %v6434_v62 }
0x1223   : > { %v3295_v17 = vmul.f32 %v3292_v16, %v3271_v15  ;;  %7658 = vmatprep.subr.mxu0 %v8316_v10 }
0x1224   : > { %7659 = vmatpush3.msra.mxu0 %v6433_v44 }
0x1225   : > { %7650 = vmatmul.mubr.msk.f32.gmra.mxu0 %vm3307_vm7, %v3295_v17  ;;  %7660 = vmatprep.subr.mxu0 %v8316_v10 }
0x1226   : > { %7668 = vmatprep.mubr.msk.f32.mxu0 %vm8317_vm1, %v8316_v10  ;;  %7661 = vmatpush3.msra.mxu0 %v6432_v52 }
0x1227   : > { %7662 = vmatprep.subr.mxu0 %v8316_v10 }
0x1228   : > { %7663 = vmatpush3.msra.mxu0 %v6431_v46 }
0x1229   : > { %7664 = vmatprep.subr.mxu0 %v8316_v10 }
0x122a   : > { %7665 = vmatpush3.msra.mxu0 %v6430_v63 }
0x122b   : > { %7666 = vmatprep.subr.mxu0 %v8316_v10 }
0x122c   : > { %7667 = vmatpush3.msra.mxu0 %v6429_v43 }
0x122d   : > { %7702 = vmatprep.subr.mxu0 %v8316_v10 }
0x12dd   : > { %v3383_v19 = vpop.f32.mrf.mxu0 }
0x12de   : > { %v3384_v20 = vadd.f32 %v6423_v18, %v3383_v19  ;;  %v6458_v19 = vld [vmem:[%s10302_s7 + $0x138] sm:$0xff] }
0x12df   : > { %v7645_v21 = vpop.f32.mrf.mxu0 }
0x12e0   : > { %v3397_v22 = vadd.f32 %v3384_v20, %v9318_v32  ;;  %v6457_v21 = vld [vmem:[%s10302_s7 + $0x130] sm:$0xff] }
0x12e1   : > { %v3388_v23 = vpop.f32.mrf.mxu0 }
0x12e2   : > { %v3389_v24 = vadd.f32 %v6423_v18, %v3388_v23  ;;  %v3402_v25 = vsel %vm566_vm0, %v3397_v22, 0.0 }
0x12e3   : > { %3403 = vadd.xlane.f32.xlu0 %v3402_v25  ;;  %v7648_v26 = vpop.f32.mrf.mxu0  ;;  %v6456_v25 = vld [vmem:[%s10302_s7 + $0x128] sm:$0xff] }
0x12e4   : > { %v3398_v27 = vadd.f32 %v3389_v24, %v9324_v38 }
0x12e5   : > { %v3393_v28 = vpop.f32.mrf.mxu0 }
0x12e6   : > { %v3394_v29 = vadd.f32 %v6423_v18, %v3393_v28  ;;  %v3405_v30 = vsel %vm566_vm0, %v3398_v27, 0.0 }
0x12e7   : > { %3406 = vadd.xlane.f32.xlu1 %v3405_v30  ;;  %v7651_v31 = vpop.f32.mrf.mxu0  ;;  %v6453_v30 = vld [vmem:[%s10302_s7 + $0x110] sm:$0xff] }
0x12e8   : > { %v3399_v33 = vadd.f32 %v3394_v29, %v9330_v41  ;;  %v6454_v29 = vld [vmem:[%s10302_s7 + $0x118] sm:$0xff]  ;;  %v6452_v31 = vld [vmem:[%s10302_s7 + $0x108] sm:$0xff] }
0x12ea   : > { %v3408_v34 = vsel %vm3112_vm6, %v3399_v33, 0.0 }
0x12eb   : > { %3409 = vadd.xlane.f32.xlu0 %v3408_v34  ;;  %v6481_v34 = vld [vmem:[%s10300_s5 + $0x178] sm:$0xff] }
0x136c   : > { %v3404_v32 = vpop.xlane.xlu0 %3403 }
0x136d   : > { %v3411_v36 = vmul.f32 0.015625, %v3404_v32  ;;  %v6480_v32 = vld [vmem:[%s10300_s5 + $0x170] sm:$0xff] }
0x136f   : > { %v9373_v39 = vsub.f32 %v3397_v22, %v3411_v36  ;;  %v6479_v36 = vld [vmem:[%s10300_s5 + $0x168] sm:$0xff] }
0x1370   : > { %v3407_v42 = vpop.xlane.xlu1 %3406 }
0x1371   : > { %v3412_v45 = vmul.f32 0.015625, %v3407_v42  ;;  %v3417_v38 = vmul.f32 %v9373_v39, %v9373_v39  ;;  %v6477_v42 = vld [vmem:[%s10300_s5 + $0x158] sm:$0xff] }
0x1373   : > { %v9377_v47 = vsub.f32 %v3398_v27, %v3412_v45  ;;  %v3420_v48 = vsel %vm566_vm0, %v3417_v38, 0.0  ;;  %v6455_v27 = vld [vmem:[%s10302_s7 + $0x120] sm:$0xff]  ;;  %v6476_v45 = vld [vmem:[%s10300_s5 + $0x150] sm:$0xff]  ;;  %v6475_v38 = vld [vmem:[%s10300_s5 + $0x148] sm:$0xff] }
0x1374   : > { %3421 = vadd.xlane.f32.xlu1 %v3420_v48  ;;  %v3410_v50 = vpop.xlane.xlu0 %3409  ;;  %v6503_v48 = vld [vmem:[%s10302_s7 + $0x178] sm:$0xff] }
0x1375   : > { %v3413_v51 = vmul.f32 0.015625, %v3410_v50  ;;  %v3418_v41 = vmul.f32 %v9377_v47, %v9377_v47  ;;  %v6502_v50 = vld [vmem:[%s10302_s7 + $0x170] sm:$0xff] }
0x1377   : > { %v9382_v53 = vsub.f32 %v3399_v33, %v3413_v51  ;;  %v3423_v54 = vsel %vm566_vm0, %v3418_v41, 0.0  ;;  %v6451_v33 = vld [vmem:[%s10302_s7 + $0x100] sm:$0xff]  ;;  %v6501_v51 = vld [vmem:[%s10302_s7 + $0x168] sm:$0xff] }
0x1378   : > { %3424 = vadd.xlane.f32.xlu0 %v3423_v54  ;;  %v6500_v41 = vld [vmem:[%s10302_s7 + $0x160] sm:$0xff]  ;;  %v6498_v54 = vld [vmem:[%s10302_s7 + $0x150] sm:$0xff] }
0x1379   : > { %v3419_v55 = vmul.f32 %v9382_v53, %v9382_v53 }
0x137b   : > { %v3426_v57 = vsel %vm3112_vm6, %v3419_v55, 0.0  ;;  %v6497_v55 = vld [vmem:[%s10302_s7 + $0x148] sm:$0xff] }
0x137c   : > { %3427 = vadd.xlane.f32.xlu1 %v3426_v57  ;;  %v6496_v57 = vld [vmem:[%s10302_s7 + $0x140] sm:$0xff] }
0x13fd   : > { %v3422_v56 = vpop.xlane.xlu1 %3421 }
0x13fe   : > { %v3429_v3 = vmul.f32 0.015625, %v3422_v56 }
0x1400   : > { %v3432_v4 = vadd.f32 1e-05, %v3429_v3 }
0x1401   : > { %v3425_v5 = vpop.xlane.xlu0 %3424 }
0x1402   : > { %8236 = vrsqrt.f32 %v3432_v4  ;;  %v3430_v6 = vmul.f32 0.015625, %v3425_v5 }
0x1404   : > { %v3433_v49 = vadd.f32 1e-05, %v3430_v6 }
0x1405   : > { %v3428_v7 = vpop.xlane.xlu1 %3427 }
0x1406   : > { %8238 = vrsqrt.f32 %v3433_v49  ;;  %v3431_v8 = vmul.f32 0.015625, %v3428_v7 }
0x1408   : > { %v3434_v9 = vadd.f32 1e-05, %v3431_v8 }
0x140a   : > { %8240 = vrsqrt.f32 %v3434_v9 }
0x140f   : > { %v8237_v11 = vpop.eup %8236 }
0x1410   : > { %v3438_v13 = vmul.f32 %v8237_v11, %v9373_v39  ;;  %v6478_v39 = vld [vmem:[%s10300_s5 + $0x160] sm:$0xff] }
0x1412   : > { %v3447_v15 = vmul.f32 %v6427_v12, %v3438_v13 }
0x1413   : > { %v8239_v16 = vpop.eup %8238 }
0x1414   : > { %v9459_v17 = vadd.f32 %v6428_v14, %v3447_v15  ;;  %v3439_v18 = vmul.f32 %v8239_v16, %v9377_v47  ;;  %v6474_v47 = vld [vmem:[%s10300_s5 + $0x140] sm:$0xff] }
0x1416   : > { %v3448_v20 = vmul.f32 %v6427_v12, %v3439_v18  ;;  %7669 = vmatmul.mubr.msk.f32.vlgmr.msra.gmra.mxu0 %vm566_vm0, %v9459_v17  ;;  %7694 = vmatmul.mubr.msk.f32.vlgmr.msra.gmra.mxu1 %vm566_vm0, %v9459_v17 }
0x1417   : > { %v8241_v22 = vpop.eup %8240  ;;  %7703 = vmatpush3.msra.mxu0 %v6458_v19  ;;  %7671 = vmatprep.mubr.msk.f32.mxu0 %vm8317_vm1, %v8316_v10 }
0x1418   : > { %v9474_v23 = vadd.f32 %v6428_v14, %v3448_v20  ;;  %v3440_v24 = vmul.f32 %v8241_v22, %v9382_v53  ;;  %7704 = vmatprep.subr.mxu0 %v8316_v10  ;;  %7696 = vmatprep.mubr.msk.f32.mxu1 %vm8317_vm1, %v8316_v10  ;;  %v6499_v53 = vld [vmem:[%s10302_s7 + $0x158] sm:$0xff] }
0x1419   : > { %7705 = vmatpush3.msra.mxu0 %v6457_v21 }
0x141a   : > { %v3449_v26 = vmul.f32 %v6427_v12, %v3440_v24  ;;  %7706 = vmatprep.subr.mxu0 %v8316_v10  ;;  %7672 = vmatmul.mubr.msk.f32.gmra.mxu0 %vm566_vm0, %v9474_v23 }
0x141b   : > { %7697 = vmatmul.mubr.msk.f32.gmra.mxu1 %vm566_vm0, %v9474_v23  ;;  %7707 = vmatpush3.msra.mxu0 %v6456_v25 }
0x141c   : > { %v9491_v28 = vadd.f32 %v6428_v14, %v3449_v26  ;;  %7708 = vmatprep.subr.mxu0 %v8316_v10  ;;  %7674 = vmatprep.mubr.msk.f32.mxu0 %vm8317_vm1, %v8316_v10 }
0x141d   : > { %7709 = vmatpush3.msra.mxu0 %v6455_v27  ;;  %7699 = vmatprep.mubr.msk.f32.mxu1 %vm8317_vm1, %v8316_v10 }
0x141e   : > { %7710 = vmatprep.subr.mxu0 %v8316_v10  ;;  %7675 = vmatmul.mubr.msk.f32.gmra.mxu0 %vm566_vm0, %v9491_v28 }
0x141f   : > { %7700 = vmatmul.mubr.msk.f32.gmra.mxu1 %vm566_vm0, %v9491_v28  ;;  %7711 = vmatpush3.msra.mxu0 %v6454_v29 }
0x1420   : > { %7712 = vmatprep.subr.mxu0 %v8316_v10  ;;  %7718 = vmatprep.mubr.msk.f32.mxu0 %vm8317_vm1, %v8316_v10 }
0x1421   : > { %7713 = vmatpush3.msra.mxu0 %v6453_v30  ;;  %7733 = vmatprep.mubr.msk.f32.mxu1 %vm8317_vm1, %v8316_v10 }
0x1422   : > { %7714 = vmatprep.subr.mxu0 %v8316_v10 }
0x1423   : > { %7715 = vmatpush3.msra.mxu0 %v6452_v31 }
0x1424   : > { %7716 = vmatprep.subr.mxu0 %v8316_v10 }
0x1425   : > { %7717 = vmatpush3.msra.mxu0 %v6451_v33 }
0x1426   : > { %7719 = vmatmul.mubr.msk.f32.vlgmr.msra.gmra.mxu0 %vm566_vm0, %v9459_v17  ;;  %7757 = vmatprep.subr.mxu0 %v8316_v10 }
0x1427   : > { %7758 = vmatpush3.msra.mxu0 %v6481_v34  ;;  %7721 = vmatprep.mubr.msk.f32.mxu0 %vm8317_vm1, %v8316_v10 }
0x1428   : > { %7759 = vmatprep.subr.mxu0 %v8316_v10 }
0x1429   : > { %7760 = vmatpush3.msra.mxu0 %v6480_v32 }
0x142a   : > { %7722 = vmatmul.mubr.msk.f32.gmra.mxu0 %vm566_vm0, %v9474_v23  ;;  %7761 = vmatprep.subr.mxu0 %v8316_v10 }
0x142b   : > { %7762 = vmatpush3.msra.mxu0 %v6479_v36  ;;  %7724 = vmatprep.mubr.msk.f32.mxu0 %vm8317_vm1, %v8316_v10 }
0x142c   : > { %7763 = vmatprep.subr.mxu0 %v8316_v10 }
0x142d   : > { %7764 = vmatpush3.msra.mxu0 %v6478_v39 }
0x142e   : > { %7725 = vmatmul.mubr.msk.f32.gmra.mxu0 %vm566_vm0, %v9491_v28  ;;  %7765 = vmatprep.subr.mxu0 %v8316_v10 }
0x142f   : > { %7766 = vmatpush3.msra.mxu0 %v6477_v42  ;;  %7773 = vmatprep.mubr.msk.f32.mxu0 %vm8317_vm1, %v8316_v10 }
0x1430   : > { %7767 = vmatprep.subr.mxu0 %v8316_v10 }
0x1431   : > { %7768 = vmatpush3.msra.mxu0 %v6476_v45 }
0x1432   : > { %7769 = vmatprep.subr.mxu0 %v8316_v10 }
0x1433   : > { %7770 = vmatpush3.msra.mxu0 %v6475_v38 }
0x1434   : > { %7771 = vmatprep.subr.mxu0 %v8316_v10 }
0x1435   : > { %7772 = vmatpush3.msra.mxu0 %v6474_v47 }
0x1436   : > { %7774 = vmatmul.mubr.msk.f32.vlgmr.msra.gmra.mxu0 %vm566_vm0, %v9459_v17  ;;  %7807 = vmatprep.subr.mxu0 %v8316_v10 }
0x1437   : > { %7808 = vmatpush3.msra.mxu0 %v6503_v48  ;;  %7776 = vmatprep.mubr.msk.f32.mxu0 %vm8317_vm1, %v8316_v10 }
0x1438   : > { %7809 = vmatprep.subr.mxu0 %v8316_v10 }
0x1439   : > { %7810 = vmatpush3.msra.mxu0 %v6502_v50 }
0x143a   : > { %7777 = vmatmul.mubr.msk.f32.gmra.mxu0 %vm566_vm0, %v9474_v23  ;;  %7811 = vmatprep.subr.mxu0 %v8316_v10 }
0x143b   : > { %7812 = vmatpush3.msra.mxu0 %v6501_v51  ;;  %7779 = vmatprep.mubr.msk.f32.mxu0 %vm8317_vm1, %v8316_v10 }
0x143c   : > { %7813 = vmatprep.subr.mxu0 %v8316_v10 }
0x143d   : > { %7814 = vmatpush3.msra.mxu0 %v6500_v41 }
0x143e   : > { %7780 = vmatmul.mubr.msk.f32.gmra.mxu0 %vm566_vm0, %v9491_v28  ;;  %7815 = vmatprep.subr.mxu0 %v8316_v10 }
0x143f   : > { %7816 = vmatpush3.msra.mxu0 %v6499_v53  ;;  %7823 = vmatprep.mubr.msk.f32.mxu0 %vm8317_vm1, %v8316_v10 }
0x1440   : > { %7817 = vmatprep.subr.mxu0 %v8316_v10 }
0x1441   : > { %7818 = vmatpush3.msra.mxu0 %v6498_v54 }
0x1442   : > { %7819 = vmatprep.subr.mxu0 %v8316_v10 }
0x1443   : > { %7820 = vmatpush3.msra.mxu0 %v6497_v55 }
0x1444   : > { %7821 = vmatprep.subr.mxu0 %v8316_v10 }
0x1445   : > { %7822 = vmatpush3.msra.mxu0 %v6496_v57 }
0x1446   : > { %7824 = vmatmul.mubr.msk.f32.vlgmr.msra.gmra.mxu0 %vm566_vm0, %v9459_v17  ;;  %7847 = vmatprep.subr.mxu0 %v8316_v10 }
0x1447   : > { %7826 = vmatprep.mubr.msk.f32.mxu0 %vm8317_vm1, %v8316_v10 }
0x144a   : > { %7827 = vmatmul.mubr.msk.f32.gmra.mxu0 %vm566_vm0, %v9474_v23 }
0x144b   : > { %7829 = vmatprep.mubr.msk.f32.mxu0 %vm8317_vm1, %v8316_v10 }
0x144e   : > { %7830 = vmatmul.mubr.msk.f32.gmra.mxu0 %vm566_vm0, %v9491_v28 }
0x144f   : > { %7853 = vmatprep.mubr.msk.f32.mxu0 %vm8317_vm1, %v8316_v10 }
0x14d6   : > { %v3543_v58 = vpop.f32.mrf.mxu0  ;;  %v3632_v35 = vpop.f32.mrf.mxu1 }
0x14d8   : > { %v7670_v59 = vpop.f32.mrf.mxu0  ;;  %v7695_v60 = vpop.f32.mrf.mxu1 }
0x14d9   : > { %v6492_v59 = vld [vmem:[%s10301_s6 + $0x178] sm:$0xff]  ;;  %v6491_v60 = vld [vmem:[%s10301_s6 + $0x170] sm:$0xff] }
0x14da   : > { %v3548_v62 = vpop.f32.mrf.mxu0 }
0x14db   : > { %v3637_v0 = vpop.f32.mrf.mxu1 }
0x14dc   : > { %v7673_v44 = vpop.f32.mrf.mxu0 }
0x14dd   : > { %v7698_v37 = vpop.f32.mrf.mxu1  ;;  %v6490_v44 = vld [vmem:[%s10301_s6 + $0x168] sm:$0xff] }
0x14de   : > { %v3553_v52 = vpop.f32.mrf.mxu0  ;;  %v6489_v37 = vld [vmem:[%s10301_s6 + $0x160] sm:$0xff] }
0x14df   : > { %v3642_v40 = vpop.f32.mrf.mxu1 }
0x14e0   : > { %7728 = vmatpush3.xpose.msk.msra.mxu1 %vm654_vm2, %v3642_v40  ;;  %v7676_v46 = vpop.f32.mrf.mxu0 }
0x14e1   : > { %v7701_v61 = vpop.f32.mrf.mxu1  ;;  %7729 = vmatprep.subr.mxu1 %v8316_v10  ;;  %v6488_v46 = vld [vmem:[%s10301_s6 + $0x158] sm:$0xff] }
0x14e2   : > { %v6487_v61 = vld [vmem:[%s10301_s6 + $0x150] sm:$0xff] }
0x14e4   : > { %7730 = vmatpush3.xpose.msk.msra.mxu1 %vm654_vm2, %v3637_v0 }
0x14e5   : > { %7731 = vmatprep.subr.mxu1 %v8316_v10 }
0x14e6   : > { %v3721_v63 = vpop.f32.mrf.mxu0 }
0x14e8   : > { %v7720_v1 = vpop.f32.mrf.mxu0  ;;  %7732 = vmatpush3.xpose.msk.msra.mxu1 %vm654_vm2, %v3632_v35 }
0x14e9   : > { %7742 = vmatprep.subr.mxu1 %v8316_v10  ;;  %v6485_v1 = vld [vmem:[%s10301_s6 + $0x140] sm:$0xff] }
0x14ea   : > { %v3726_v43 = vpop.f32.mrf.mxu0 }
0x14eb   : > { %7734 = vmatmul.mubr.msk.f32.vlgmr.msra.gmra.mxu1 %vm654_vm2, %v3543_v58 }
0x14ec   : > { %v7723_v2 = vpop.f32.mrf.mxu0  ;;  %7736 = vmatprep.mubr.msk.f32.mxu1 %vm8317_vm1, %v8316_v10 }
0x14ee   : > { %v3731_v56 = vpop.f32.mrf.mxu0 }
0x14ef   : > { %7737 = vmatmul.mubr.msk.f32.gmra.mxu1 %vm654_vm2, %v3548_v62 }
0x14f0   : > { %7743 = vmatpush3.msk.msra.mxu1 %vm1165_vm3, %v3731_v56  ;;  %v7726_v3 = vpop.f32.mrf.mxu0  ;;  %7739 = vmatprep.mubr.msk.f32.mxu1 %vm8317_vm1, %v8316_v10 }
0x14f1   : > { %7744 = vmatprep.subr.mxu1 %v8316_v10 }
0x14f2   : > { %7745 = vmatpush3.msra.mxu1 %v3726_v43 }
0x14f3   : > { %7746 = vmatprep.subr.mxu1 %v8316_v10  ;;  %7740 = vmatmul.mubr.msk.f32.gmra.mxu1 %vm654_vm2, %v3553_v52 }
0x14f4   : > { %7747 = vmatpush3.msra.mxu1 %v3721_v63  ;;  %7748 = vmatprep.mubr.msk.f32.mxu1 %vm8317_vm1, %v8316_v10  ;;  %v6486_v63 = vld [vmem:[%s10301_s6 + $0x148] sm:$0xff] }
0x14f5   : > { %7782 = vmatprep.subr.mxu1 %v8316_v10 }
0x14f6   : > { %v9642_v4 = vpop.f32.mrf.mxu0 }
0x14f8   : > { %v7775_v5 = vpop.f32.mrf.mxu0 }
0x14fa   : > { %v9644_v6 = vpop.f32.mrf.mxu0 }
0x14fc   : > { %v7778_v49 = vpop.f32.mrf.mxu0 }
0x14fe   : > { %v9646_v7 = vpop.f32.mrf.mxu0 }
0x1500   : > { %v7781_v8 = vpop.f32.mrf.mxu0 }
0x1506   : > { %v4217_v9 = vpop.f32.mrf.mxu0 }
0x1508   : > { %v7825_v11 = vpop.f32.mrf.mxu0 }
0x150a   : > { %v4222_v12 = vpop.f32.mrf.mxu0 }
0x150c   : > { %v7828_v13 = vpop.f32.mrf.mxu0 }
0x150e   : > { %v4227_v14 = vpop.f32.mrf.mxu0 }
0x150f   : > { %7848 = vmatpush3.msk.msra.mxu0 %vm1165_vm3, %v4227_v14 }
0x1510   : > { %v7831_v15 = vpop.f32.mrf.mxu0  ;;  %7849 = vmatprep.subr.mxu0 %v8316_v10 }
0x1511   : > { %7850 = vmatpush3.msra.mxu0 %v4222_v12 }
0x1512   : > { %7851 = vmatprep.subr.mxu0 %v8316_v10 }
0x1513   : > { %7852 = vmatpush3.msra.mxu0 %v4217_v9 }
0x1514   : > { %7875 = vmatprep.subr.mxu0 %v8316_v10 }
0x15ab   : > { %v3819_v16 = vpop.f32.mrf.mxu1 }
0x15ac   : > { %v3833_v18 = vmul.f32 0.25, %v3819_v16 }
0x15ad   : > { %v7735_v19 = vpop.f32.mrf.mxu1 }
0x15ae   : > { %v3836_v20 = vsel %vm1121_vm4, %v3833_v18, -inf }
0x15af   : > { %3837 = vmax.xlane.f32.xlu0 %v3836_v20  ;;  %v3824_v21 = vpop.f32.mrf.mxu1 }
0x15b0   : > { %v3834_v22 = vmul.f32 0.25, %v3824_v21 }
0x15b1   : > { %v7738_v24 = vpop.f32.mrf.mxu1 }
0x15b2   : > { %v3839_v25 = vsel %vm1121_vm4, %v3834_v22, -inf }
0x15b3   : > { %3840 = vmax.xlane.f32.xlu1 %v3839_v25  ;;  %v3829_v26 = vpop.f32.mrf.mxu1 }
0x15b4   : > { %v3835_v27 = vmul.f32 0.25, %v3829_v26 }
0x15b5   : > { %v7741_v29 = vpop.f32.mrf.mxu1 }
0x15b6   : > { %v3842_v30 = vsel %vm1128_vm5, %v3835_v27, -inf }
0x15b7   : > { %3843 = vmax.xlane.f32.xlu0 %v3842_v30 }
0x1638   : > { %v3838_v31 = vpop.xlane.xlu0 %3837 }
0x1639   : > { %v3845_v33 = vsub.f32 %v3833_v18, %v3838_v31 }
0x163b   : > { %v3848_v34 = vmul.f32 1.442695, %v3845_v33 }
0x163c   : > { %v3841_v32 = vpop.xlane.xlu1 %3840 }
0x163d   : > { %8242 = vpow2.f32 %v3848_v34  ;;  %v3846_v36 = vsub.f32 %v3834_v22, %v3841_v32 }
0x163f   : > { %v3850_v39 = vmul.f32 1.442695, %v3846_v36 }
0x1640   : > { %v3844_v42 = vpop.xlane.xlu0 %3843 }
0x1641   : > { %8244 = vpow2.f32 %v3850_v39  ;;  %v3847_v45 = vsub.f32 %v3835_v27, %v3844_v42 }
0x1643   : > { %v3852_v38 = vmul.f32 1.442695, %v3847_v45 }
0x1645   : > { %8246 = vpow2.f32 %v3852_v38 }
0x164a   : > { %v8243_v47 = vpop.eup %8242 }
0x164b   : > { %v3854_v48 = vsel %vm1121_vm4, %v8243_v47, 0.0 }
0x164c   : > { %3855 = vadd.xlane.f32.xlu1 %v3854_v48 }
0x164e   : > { %v8245_v50 = vpop.eup %8244 }
0x164f   : > { %v3857_v51 = vsel %vm1121_vm4, %v8245_v50, 0.0 }
0x1650   : > { %3858 = vadd.xlane.f32.xlu0 %v3857_v51  ;;  %v6517_v51 = vld [vmem:[%s10303_s8 + $0x50] sm:$0xff] }
0x1652   : > { %v8247_v41 = vpop.eup %8246 }
0x1653   : > { %v3860_v53 = vsel %vm1128_vm5, %v8247_v41, 0.0 }
0x1654   : > { %3861 = vadd.xlane.f32.xlu1 %v3860_v53 }
0x16d5   : > { %v3856_v54 = vpop.xlane.xlu1 %3855 }
0x16d6   : > { %8248 = vrcp.f32 %v3856_v54 }
0x16d9   : > { %v3859_v55 = vpop.xlane.xlu0 %3858 }
0x16da   : > { %8250 = vrcp.f32 %v3859_v55 }
0x16dd   : > { %v3862_v57 = vpop.xlane.xlu1 %3861 }
0x16de   : > { %8252 = vrcp.f32 %v3862_v57 }
0x16e3   : > { %v8249_v58 = vpop.eup %8248 }
0x16e4   : > { %v3864_v35 = vmul.f32 %v8249_v58, %v8243_v47  ;;  %v6473_v58 = vld [vmem:[%s10303_s8 + $0x48] sm:$0xff] }
0x16e6   : > { %7749 = vmatmul.mubr.msk.f32.vlgmr.msra.gmra.mxu1 %vm1121_vm4, %v3864_v35  ;;  %v6472_v35 = vld [vmem:[%s10303_s8 + $0x40] sm:$0xff] }
0x16e7   : > { %v8251_v62 = vpop.eup %8250  ;;  %7783 = vmatpush3.msra.mxu1 %v6492_v59  ;;  %7751 = vmatprep.mubr.msk.f32.mxu1 %vm8317_vm1, %v8316_v10 }
0x16e8   : > { %7784 = vmatprep.subr.mxu1 %v8316_v10  ;;  %v3866_v0 = vmul.f32 %v8251_v62, %v8245_v50  ;;  %v6518_v50 = vld [vmem:[%s10303_s8 + $0x58] sm:$0xff] }
0x16e9   : > { %7785 = vmatpush3.msra.mxu1 %v6491_v60 }
0x16ea   : > { %7786 = vmatprep.subr.mxu1 %v8316_v10  ;;  %7752 = vmatmul.mubr.msk.f32.gmra.mxu1 %vm1121_vm4, %v3866_v0 }
0x16eb   : > { %v8253_v52 = vpop.eup %8252  ;;  %7787 = vmatpush3.msra.mxu1 %v6490_v44  ;;  %7754 = vmatprep.mubr.msk.f32.mxu1 %vm8317_vm1, %v8316_v10  ;;  %v6543_v44 = vld [vmem:[%s10301_s6 + $0x1b8] sm:$0xff] }
0x16ec   : > { %7788 = vmatprep.subr.mxu1 %v8316_v10  ;;  %v3868_v40 = vmul.f32 %v8253_v52, %v8247_v41  ;;  %v6541_v52 = vld [vmem:[%s10301_s6 + $0x1a8] sm:$0xff] }
0x16ed   : > { %7789 = vmatpush3.msra.mxu1 %v6489_v37  ;;  %v6542_v37 = vld [vmem:[%s10301_s6 + $0x1b0] sm:$0xff] }
0x16ee   : > { %7790 = vmatprep.subr.mxu1 %v8316_v10  ;;  %7755 = vmatmul.mubr.msk.f32.gmra.mxu1 %vm1121_vm4, %v3868_v40  ;;  %v6540_v40 = vld [vmem:[%s10301_s6 + $0x1a0] sm:$0xff] }
0x16ef   : > { %7791 = vmatpush3.msra.mxu1 %v6488_v46  ;;  %7798 = vmatprep.mubr.msk.f32.mxu1 %vm8317_vm1, %v8316_v10  ;;  %v6539_v46 = vld [vmem:[%s10301_s6 + $0x198] sm:$0xff] }
0x16f0   : > { %7792 = vmatprep.subr.mxu1 %v8316_v10 }
0x16f1   : > { %7793 = vmatpush3.msra.mxu1 %v6487_v61  ;;  %v6538_v61 = vld [vmem:[%s10301_s6 + $0x190] sm:$0xff] }
0x16f2   : > { %7794 = vmatprep.subr.mxu1 %v8316_v10 }
0x16f3   : > { %7795 = vmatpush3.msra.mxu1 %v6486_v63  ;;  %v6537_v63 = vld [vmem:[%s10301_s6 + $0x188] sm:$0xff] }
0x16f4   : > { %7796 = vmatprep.subr.mxu1 %v8316_v10 }
0x16f5   : > { %7797 = vmatpush3.msra.mxu1 %v6485_v1  ;;  %v6536_v1 = vld [vmem:[%s10301_s6 + $0x180] sm:$0xff] }
0x16f6   : > { %7799 = vmatmul.mubr.msk.f32.vlgmr.msra.gmra.mxu1 %vm566_vm0, %v9459_v17  ;;  %7832 = vmatprep.subr.mxu1 %v8316_v10 }
0x16f7   : > { %7801 = vmatprep.mubr.msk.f32.mxu1 %vm8317_vm1, %v8316_v10 }
0x16fa   : > { %7802 = vmatmul.mubr.msk.f32.gmra.mxu1 %vm566_vm0, %v9474_v23 }
0x16fb   : > { %7804 = vmatprep.mubr.msk.f32.mxu1 %vm8317_vm1, %v8316_v10 }
0x16fe   : > { %7805 = vmatmul.mubr.msk.f32.gmra.mxu1 %vm566_vm0, %v9491_v28 }
0x16ff   : > { %7838 = vmatprep.mubr.msk.f32.mxu1 %vm8317_vm1, %v8316_v10 }
0x17a6   : > { %v9711_v43 = vpop.f32.mrf.mxu1 }
0x17a8   : > { %v7750_v2 = vpop.f32.mrf.mxu1 }
0x17aa   : > { %v9713_v56 = vpop.f32.mrf.mxu1 }
0x17ac   : > { %v7753_v3 = vpop.f32.mrf.mxu1 }
0x17ae   : > { %v9715_v5 = vpop.f32.mrf.mxu1 }
0x17b0   : > { %v7756_v49 = vpop.f32.mrf.mxu1 }
0x17b6   : > { %v4128_v8 = vpop.f32.mrf.mxu1 }
0x17b8   : > { %v7800_v9 = vpop.f32.mrf.mxu1 }
0x17ba   : > { %v4133_v11 = vpop.f32.mrf.mxu1 }
0x17bc   : > { %v7803_v12 = vpop.f32.mrf.mxu1 }
0x17be   : > { %v4138_v13 = vpop.f32.mrf.mxu1 }
0x17bf   : > { %7833 = vmatpush3.xpose.msk.msra.mxu1 %vm654_vm2, %v4138_v13  ;;  %v6527_v13 = vld [vmem:[%s10300_s5 + $0x190] sm:$0xff] }
0x17c0   : > { %v7806_v14 = vpop.f32.mrf.mxu1  ;;  %7834 = vmatprep.subr.mxu1 %v8316_v10 }
0x17c3   : > { %7835 = vmatpush3.xpose.msk.msra.mxu1 %vm654_vm2, %v4133_v11  ;;  %v6528_v11 = vld [vmem:[%s10300_s5 + $0x198] sm:$0xff] }
0x17c4   : > { %7836 = vmatprep.subr.mxu1 %v8316_v10 }
0x17c7   : > { %7837 = vmatpush3.xpose.msk.msra.mxu1 %vm654_vm2, %v4128_v8  ;;  %v6529_v8 = vld [vmem:[%s10300_s5 + $0x1a0] sm:$0xff] }
0x17c8   : > { %7862 = vmatprep.subr.mxu1 %v8316_v10 }
0x17ca   : > { %7839 = vmatmul.mubr.msk.f32.vlgmr.msra.gmra.mxu1 %vm654_vm2, %v9642_v4 }
0x17cb   : > { %7841 = vmatprep.mubr.msk.f32.mxu1 %vm8317_vm1, %v8316_v10  ;;  %7863 = vmatpush3.msra.mxu1 %v6518_v50 }
0x17cc   : > { %7864 = vmatprep.subr.mxu1 %v8316_v10 }
0x17cd   : > { %7865 = vmatpush3.msra.mxu1 %v6517_v51 }
0x17ce   : > { %7842 = vmatmul.mubr.msk.f32.gmra.mxu1 %vm654_vm2, %v9644_v6  ;;  %7888 = vmatprep.subr.mxu1 %v8316_v10 }
0x17cf   : > { %7844 = vmatprep.mubr.msk.f32.mxu1 %vm8317_vm1, %v8316_v10 }
0x17d2   : > { %7845 = vmatmul.mubr.msk.f32.gmra.mxu1 %vm654_vm2, %v9646_v7 }
0x17d3   : > { %7866 = vmatprep.mubr.msk.f32.mxu1 %vm8317_vm1, %v8316_v10 }
0x188a   : > { %v4315_v15 = vpop.f32.mrf.mxu1 }
0x188b   : > { %v4329_v16 = vmul.f32 0.25, %v4315_v15  ;;  %v6526_v15 = vld [vmem:[%s10300_s5 + $0x188] sm:$0xff] }
0x188c   : > { %v7840_v18 = vpop.f32.mrf.mxu1 }
0x188d   : > { %v4332_v4 = vsel %vm1121_vm4, %v4329_v16, -inf  ;;  %v6525_v18 = vld [vmem:[%s10300_s5 + $0x180] sm:$0xff] }
0x188e   : > { %4333 = vmax.xlane.f32.xlu0 %v4332_v4  ;;  %v4320_v19 = vpop.f32.mrf.mxu1 }
0x188f   : > { %v4330_v20 = vmul.f32 0.25, %v4320_v19  ;;  %v6554_v19 = vld [vmem:[%s10302_s7 + $0x1b8] sm:$0xff] }
0x1890   : > { %v7843_v21 = vpop.f32.mrf.mxu1 }
0x1891   : > { %v4335_v6 = vsel %vm1121_vm4, %v4330_v20, -inf  ;;  %v6553_v21 = vld [vmem:[%s10302_s7 + $0x1b0] sm:$0xff] }
0x1892   : > { %4336 = vmax.xlane.f32.xlu1 %v4335_v6  ;;  %v4325_v22 = vpop.f32.mrf.mxu1 }
0x1893   : > { %v4331_v24 = vmul.f32 0.25, %v4325_v22  ;;  %v6552_v22 = vld [vmem:[%s10302_s7 + $0x1a8] sm:$0xff] }
0x1894   : > { %v7846_v25 = vpop.f32.mrf.mxu1 }
0x1895   : > { %v4338_v7 = vsel %vm1128_vm5, %v4331_v24, -inf  ;;  %v6551_v25 = vld [vmem:[%s10302_s7 + $0x1a0] sm:$0xff] }
0x1896   : > { %4339 = vmax.xlane.f32.xlu0 %v4338_v7 }
0x1917   : > { %v4334_v26 = vpop.xlane.xlu0 %4333 }
0x1918   : > { %v4341_v27 = vsub.f32 %v4329_v16, %v4334_v26  ;;  %v6550_v26 = vld [vmem:[%s10302_s7 + $0x198] sm:$0xff] }
0x191a   : > { %v4344_v29 = vmul.f32 1.442695, %v4341_v27  ;;  %v6549_v27 = vld [vmem:[%s10302_s7 + $0x190] sm:$0xff] }
0x191b   : > { %v4337_v30 = vpop.xlane.xlu1 %4336 }
0x191c   : > { %8254 = vpow2.f32 %v4344_v29  ;;  %v4342_v31 = vsub.f32 %v4330_v20, %v4337_v30  ;;  %v6548_v29 = vld [vmem:[%s10302_s7 + $0x188] sm:$0xff] }
0x191e   : > { %v4346_v33 = vmul.f32 1.442695, %v4342_v31  ;;  %v6547_v31 = vld [vmem:[%s10302_s7 + $0x180] sm:$0xff] }
0x191f   : > { %v4340_v34 = vpop.xlane.xlu0 %4339 }
0x1920   : > { %8256 = vpow2.f32 %v4346_v33  ;;  %v4343_v32 = vsub.f32 %v4331_v24, %v4340_v34 }
0x1922   : > { %v4348_v36 = vmul.f32 1.442695, %v4343_v32 }
0x1924   : > { %8258 = vpow2.f32 %v4348_v36 }
0x1929   : > { %v8255_v39 = vpop.eup %8254 }
0x192a   : > { %v4350_v42 = vsel %vm1121_vm4, %v8255_v39, 0.0 }
0x192b   : > { %4351 = vadd.xlane.f32.xlu1 %v4350_v42 }
0x192d   : > { %v8257_v45 = vpop.eup %8256 }
0x192e   : > { %v4353_v38 = vsel %vm1121_vm4, %v8257_v45, 0.0 }
0x192f   : > { %4354 = vadd.xlane.f32.xlu0 %v4353_v38 }
0x1931   : > { %v8259_v47 = vpop.eup %8258 }
0x1932   : > { %v4356_v48 = vsel %vm1128_vm5, %v8259_v47, 0.0 }
0x1933   : > { %4357 = vadd.xlane.f32.xlu1 %v4356_v48 }
0x19b4   : > { %v4352_v41 = vpop.xlane.xlu1 %4351 }
0x19b5   : > { %8260 = vrcp.f32 %v4352_v41 }
0x19b8   : > { %v4355_v53 = vpop.xlane.xlu0 %4354 }
0x19b9   : > { %8262 = vrcp.f32 %v4355_v53 }
0x19bc   : > { %v4358_v54 = vpop.xlane.xlu1 %4357 }
0x19bd   : > { %8264 = vrcp.f32 %v4358_v54 }
0x19c2   : > { %v8261_v55 = vpop.eup %8260 }
0x19c3   : > { %v4360_v57 = vmul.f32 %v8261_v55, %v8255_v39 }
0x19c5   : > { %7854 = vmatmul.mubr.msk.f32.vlgmr.msra.gmra.mxu0 %vm1121_vm4, %v4360_v57 }
0x19c6   : > { %v8263_v59 = vpop.eup %8262  ;;  %7856 = vmatprep.mubr.msk.f32.mxu0 %vm8317_vm1, %v8316_v10  ;;  %7876 = vmatpush3.msra.mxu0 %v6473_v58 }
0x19c7   : > { %v4362_v60 = vmul.f32 %v8263_v59, %v8257_v45  ;;  %7877 = vmatprep.subr.mxu0 %v8316_v10 }
0x19c8   : > { %7878 = vmatpush3.msra.mxu0 %v6472_v35 }
0x19c9   : > { %7857 = vmatmul.mubr.msk.f32.gmra.mxu0 %vm1121_vm4, %v4362_v60  ;;  %7913 = vmatprep.subr.mxu0 %v8316_v10 }
0x19ca   : > { %v8265_v62 = vpop.eup %8264  ;;  %7859 = vmatprep.mubr.msk.f32.mxu0 %vm8317_vm1, %v8316_v10 }
0x19cb   : > { %v4364_v0 = vmul.f32 %v8265_v62, %v8259_v47 }
0x19cd   : > { %7860 = vmatmul.mubr.msk.f32.gmra.mxu0 %vm1121_vm4, %v4364_v0 }
0x19ce   : > { %7879 = vmatprep.mubr.msk.f32.mxu0 %vm8317_vm1, %v8316_v10 }
0x19d1   : > { %7880 = vmatmul.mubr.msk.f32.vlgmr.msra.gmra.mxu0 %vm654_vm2, %v9711_v43  ;;  %v6532_v43 = vld [vmem:[%s10300_s5 + $0x1b8] sm:$0xff] }
0x19d2   : > { %7914 = vmatpush3.msra.mxu0 %v6543_v44  ;;  %7882 = vmatprep.mubr.msk.f32.mxu0 %vm8317_vm1, %v8316_v10 }
0x19d3   : > { %7915 = vmatprep.subr.mxu0 %v8316_v10 }
0x19d4   : > { %7916 = vmatpush3.msra.mxu0 %v6542_v37 }
0x19d5   : > { %7917 = vmatprep.subr.mxu0 %v8316_v10  ;;  %7883 = vmatmul.mubr.msk.f32.gmra.mxu0 %vm654_vm2, %v9713_v56  ;;  %v6531_v56 = vld [vmem:[%s10300_s5 + $0x1b0] sm:$0xff] }
0x19d6   : > { %7918 = vmatpush3.msra.mxu0 %v6541_v52  ;;  %7885 = vmatprep.mubr.msk.f32.mxu0 %vm8317_vm1, %v8316_v10 }
0x19d7   : > { %7919 = vmatprep.subr.mxu0 %v8316_v10 }
0x19d8   : > { %7920 = vmatpush3.msra.mxu0 %v6540_v40 }
0x19d9   : > { %7921 = vmatprep.subr.mxu0 %v8316_v10  ;;  %7886 = vmatmul.mubr.msk.f32.gmra.mxu0 %vm654_vm2, %v9715_v5  ;;  %v6530_v5 = vld [vmem:[%s10300_s5 + $0x1a8] sm:$0xff] }
0x19da   : > { %7922 = vmatpush3.msra.mxu0 %v6539_v46  ;;  %7929 = vmatprep.mubr.msk.f32.mxu0 %vm8317_vm1, %v8316_v10 }
0x19db   : > { %7923 = vmatprep.subr.mxu0 %v8316_v10 }
0x19dc   : > { %7924 = vmatpush3.msra.mxu0 %v6538_v61 }
0x19dd   : > { %7925 = vmatprep.subr.mxu0 %v8316_v10 }
0x19de   : > { %7926 = vmatpush3.msra.mxu0 %v6537_v63 }
0x19df   : > { %7927 = vmatprep.subr.mxu0 %v8316_v10 }
0x19e0   : > { %7928 = vmatpush3.msra.mxu0 %v6536_v1 }
0x19e1   : > { %7930 = vmatmul.mubr.msk.f32.vlgmr.msra.gmra.mxu0 %vm566_vm0, %v9459_v17  ;;  %7963 = vmatprep.subr.mxu0 %v8316_v10 }
0x19e2   : > { %7932 = vmatprep.mubr.msk.f32.mxu0 %vm8317_vm1, %v8316_v10 }
0x19e5   : > { %7933 = vmatmul.mubr.msk.f32.gmra.mxu0 %vm566_vm0, %v9474_v23 }
0x19e6   : > { %7935 = vmatprep.mubr.msk.f32.mxu0 %vm8317_vm1, %v8316_v10 }
0x19e9   : > { %7936 = vmatmul.mubr.msk.f32.gmra.mxu0 %vm566_vm0, %v9491_v28 }
0x19ea   : > { %7969 = vmatprep.mubr.msk.f32.mxu0 %vm8317_vm1, %v8316_v10 }
0x1a85   : > { %v4443_v2 = vpop.f32.mrf.mxu0 }
0x1a86   : > { %7867 = vmatmul.mubr.msk.f32.vlgmr.msra.gmra.mxu1 %vm654_vm2, %v4443_v2 }
0x1a87   : > { %7889 = vmatpush3.msra.mxu1 %v6532_v43  ;;  %v7855_v3 = vpop.f32.mrf.mxu0  ;;  %7869 = vmatprep.mubr.msk.f32.mxu1 %vm8317_vm1, %v8316_v10 }
0x1a88   : > { %7890 = vmatprep.subr.mxu1 %v8316_v10 }
0x1a89   : > { %7891 = vmatpush3.msra.mxu1 %v6531_v56  ;;  %v4448_v49 = vpop.f32.mrf.mxu0 }
0x1a8a   : > { %7892 = vmatprep.subr.mxu1 %v8316_v10  ;;  %7870 = vmatmul.mubr.msk.f32.gmra.mxu1 %vm654_vm2, %v4448_v49 }
0x1a8b   : > { %7893 = vmatpush3.msra.mxu1 %v6530_v5  ;;  %v7858_v9 = vpop.f32.mrf.mxu0  ;;  %7872 = vmatprep.mubr.msk.f32.mxu1 %vm8317_vm1, %v8316_v10 }
0x1a8c   : > { %7894 = vmatprep.subr.mxu1 %v8316_v10 }
0x1a8d   : > { %7895 = vmatpush3.msra.mxu1 %v6529_v8  ;;  %v4453_v12 = vpop.f32.mrf.mxu0 }
0x1a8e   : > { %7896 = vmatprep.subr.mxu1 %v8316_v10  ;;  %7873 = vmatmul.mubr.msk.f32.gmra.mxu1 %vm654_vm2, %v4453_v12 }
0x1a8f   : > { %7897 = vmatpush3.msra.mxu1 %v6528_v11  ;;  %v7861_v14 = vpop.f32.mrf.mxu0  ;;  %7904 = vmatprep.mubr.msk.f32.mxu1 %vm8317_vm1, %v8316_v10 }
0x1a90   : > { %7898 = vmatprep.subr.mxu1 %v8316_v10 }
0x1a91   : > { %7899 = vmatpush3.msra.mxu1 %v6527_v13  ;;  %v9857_v16 = vpop.f32.mrf.mxu0 }
0x1a92   : > { %7900 = vmatprep.subr.mxu1 %v8316_v10 }
0x1a93   : > { %7901 = vmatpush3.msra.mxu1 %v6526_v15  ;;  %v7881_v4 = vpop.f32.mrf.mxu0 }
0x1a94   : > { %7902 = vmatprep.subr.mxu1 %v8316_v10 }
0x1a95   : > { %7903 = vmatpush3.msra.mxu1 %v6525_v18  ;;  %v9867_v20 = vpop.f32.mrf.mxu0 }
0x1a96   : > { %7905 = vmatmul.mubr.msk.f32.vlgmr.msra.gmra.mxu1 %vm566_vm0, %v9459_v17  ;;  %7938 = vmatprep.subr.mxu1 %v8316_v10 }
0x1a97   : > { %7939 = vmatpush3.msra.mxu1 %v6554_v19  ;;  %v7884_v6 = vpop.f32.mrf.mxu0  ;;  %7907 = vmatprep.mubr.msk.f32.mxu1 %vm8317_vm1, %v8316_v10 }
0x1a98   : > { %7940 = vmatprep.subr.mxu1 %v8316_v10 }
0x1a99   : > { %7941 = vmatpush3.msra.mxu1 %v6553_v21  ;;  %v9881_v24 = vpop.f32.mrf.mxu0 }
0x1a9a   : > { %7908 = vmatmul.mubr.msk.f32.gmra.mxu1 %vm566_vm0, %v9474_v23  ;;  %7942 = vmatprep.subr.mxu1 %v8316_v10 }
0x1a9b   : > { %7943 = vmatpush3.msra.mxu1 %v6552_v22  ;;  %v7887_v7 = vpop.f32.mrf.mxu0  ;;  %7910 = vmatprep.mubr.msk.f32.mxu1 %vm8317_vm1, %v8316_v10 }
0x1a9c   : > { %7944 = vmatprep.subr.mxu1 %v8316_v10  ;;  %v6568_v7 = vld [vmem:[%s10303_s8 + $0x60] sm:$0xff] }
0x1a9d   : > { %7945 = vmatpush3.msra.mxu1 %v6551_v25  ;;  %v6569_v25 = vld [vmem:[%s10303_s8 + $0x68] sm:$0xff] }
0x1a9e   : > { %7911 = vmatmul.mubr.msk.f32.gmra.mxu1 %vm566_vm0, %v9491_v28  ;;  %7946 = vmatprep.subr.mxu1 %v8316_v10 }
0x1a9f   : > { %7947 = vmatpush3.msra.mxu1 %v6550_v26  ;;  %7954 = vmatprep.mubr.msk.f32.mxu1 %vm8317_vm1, %v8316_v10 }
0x1aa0   : > { %7948 = vmatprep.subr.mxu1 %v8316_v10 }
0x1aa1   : > { %v4802_v30 = vpop.f32.mrf.mxu0  ;;  %7949 = vmatpush3.msra.mxu1 %v6549_v27 }
0x1aa2   : > { %7950 = vmatprep.subr.mxu1 %v8316_v10 }
0x1aa3   : > { %v7931_v33 = vpop.f32.mrf.mxu0  ;;  %7951 = vmatpush3.msra.mxu1 %v6548_v29 }
0x1aa4   : > { %7952 = vmatprep.subr.mxu1 %v8316_v10  ;;  %v6580_v33 = vld [vmem:[%s10300_s5 + $0x1f8] sm:$0xff] }
0x1aa5   : > { %v4807_v34 = vpop.f32.mrf.mxu0  ;;  %7953 = vmatpush3.msra.mxu1 %v6547_v31 }
0x1aa6   : > { %7955 = vmatmul.mubr.msk.f32.vlgmr.msra.gmra.mxu1 %vm566_vm0, %v9459_v17  ;;  %7978 = vmatprep.subr.mxu1 %v8316_v10 }
0x1aa7   : > { %v7934_v32 = vpop.f32.mrf.mxu0  ;;  %7957 = vmatprep.mubr.msk.f32.mxu1 %vm8317_vm1, %v8316_v10 }
0x1aa9   : > { %v4812_v36 = vpop.f32.mrf.mxu0 }
0x1aaa   : > { %7958 = vmatmul.mubr.msk.f32.gmra.mxu1 %vm566_vm0, %v9474_v23  ;;  %7964 = vmatpush3.xpose.msk.msra.mxu0 %vm654_vm2, %v4812_v36 }
0x1aab   : > { %v7937_v39 = vpop.f32.mrf.mxu0  ;;  %7960 = vmatprep.mubr.msk.f32.mxu1 %vm8317_vm1, %v8316_v10  ;;  %7965 = vmatprep.subr.mxu0 %v8316_v10 }
0x1aac   : > { %v6578_v39 = vld [vmem:[%s10300_s5 + $0x1e8] sm:$0xff] }
0x1aae   : > { %7961 = vmatmul.mubr.msk.f32.gmra.mxu1 %vm566_vm0, %v9491_v28  ;;  %7966 = vmatpush3.xpose.msk.msra.mxu0 %vm654_vm2, %v4807_v34  ;;  %v6579_v34 = vld [vmem:[%s10300_s5 + $0x1f0] sm:$0xff] }
0x1aaf   : > { %7967 = vmatprep.subr.mxu0 %v8316_v10  ;;  %7984 = vmatprep.mubr.msk.f32.mxu1 %vm8317_vm1, %v8316_v10 }
0x1ab2   : > { %7968 = vmatpush3.xpose.msk.msra.mxu0 %vm654_vm2, %v4802_v30 }
0x1ab3   : > { %7993 = vmatprep.subr.mxu0 %v8316_v10 }
0x1b46   : > { %v9931_v42 = vpop.f32.mrf.mxu1 }
0x1b48   : > { %v7868_v45 = vpop.f32.mrf.mxu1 }
0x1b49   : > { %v6577_v45 = vld [vmem:[%s10300_s5 + $0x1e0] sm:$0xff] }
0x1b4a   : > { %v9933_v38 = vpop.f32.mrf.mxu1 }
0x1b4c   : > { %v7871_v47 = vpop.f32.mrf.mxu1 }
0x1b4e   : > { %v9935_v48 = vpop.f32.mrf.mxu1 }
0x1b50   : > { %v7874_v50 = vpop.f32.mrf.mxu1 }
0x1b56   : > { %v4713_v51 = vpop.f32.mrf.mxu1 }
0x1b57   : > { %7970 = vmatmul.mubr.msk.f32.vlgmr.msra.gmra.mxu0 %vm654_vm2, %v4713_v51  ;;  %v6576_v51 = vld [vmem:[%s10300_s5 + $0x1d8] sm:$0xff] }
0x1b58   : > { %v7906_v41 = vpop.f32.mrf.mxu1  ;;  %7972 = vmatprep.mubr.msk.f32.mxu0 %vm8317_vm1, %v8316_v10  ;;  %7994 = vmatpush3.msra.mxu0 %v6569_v25 }
0x1b59   : > { %7995 = vmatprep.subr.mxu0 %v8316_v10  ;;  %v6575_v41 = vld [vmem:[%s10300_s5 + $0x1d0] sm:$0xff] }
0x1b5a   : > { %v4718_v53 = vpop.f32.mrf.mxu1  ;;  %7996 = vmatpush3.msra.mxu0 %v6568_v7 }
0x1b5b   : > { %7973 = vmatmul.mubr.msk.f32.gmra.mxu0 %vm654_vm2, %v4718_v53  ;;  %8031 = vmatprep.subr.mxu0 %v8316_v10  ;;  %v6574_v53 = vld [vmem:[%s10300_s5 + $0x1c8] sm:$0xff] }
0x1b5c   : > { %v7909_v54 = vpop.f32.mrf.mxu1  ;;  %7975 = vmatprep.mubr.msk.f32.mxu0 %vm8317_vm1, %v8316_v10 }
0x1b5d   : > { %v6573_v54 = vld [vmem:[%s10300_s5 + $0x1c0] sm:$0xff] }
0x1b5e   : > { %v4723_v55 = vpop.f32.mrf.mxu1 }
0x1b5f   : > { %7976 = vmatmul.mubr.msk.f32.gmra.mxu0 %vm654_vm2, %v4723_v55  ;;  %v6602_v55 = vld [vmem:[%s10302_s7 + $0x1f8] sm:$0xff] }
0x1b60   : > { %v7912_v57 = vpop.f32.mrf.mxu1  ;;  %7997 = vmatprep.mubr.msk.f32.mxu0 %vm8317_vm1, %v8316_v10 }
0x1b61   : > { %v6601_v57 = vld [vmem:[%s10302_s7 + $0x1f0] sm:$0xff] }
0x1b66   : > { %v4891_v58 = vpop.f32.mrf.mxu1 }
0x1b68   : > { %v7956_v35 = vpop.f32.mrf.mxu1 }
0x1b69   : > { %v6599_v35 = vld [vmem:[%s10302_s7 + $0x1e0] sm:$0xff] }
0x1b6a   : > { %v4896_v59 = vpop.f32.mrf.mxu1 }
0x1b6c   : > { %v7959_v60 = vpop.f32.mrf.mxu1 }
0x1b6d   : > { %v6597_v60 = vld [vmem:[%s10302_s7 + $0x1d0] sm:$0xff] }
0x1b6e   : > { %v4901_v62 = vpop.f32.mrf.mxu1 }
0x1b6f   : > { %7979 = vmatpush3.msk.msra.mxu1 %vm1165_vm3, %v4901_v62  ;;  %v6596_v62 = vld [vmem:[%s10302_s7 + $0x1c8] sm:$0xff] }
0x1b70   : > { %v7962_v0 = vpop.f32.mrf.mxu1  ;;  %7980 = vmatprep.subr.mxu1 %v8316_v10 }
0x1b71   : > { %7981 = vmatpush3.msra.mxu1 %v4896_v59  ;;  %v6598_v59 = vld [vmem:[%s10302_s7 + $0x1d8] sm:$0xff]  ;;  %v6595_v0 = vld [vmem:[%s10302_s7 + $0x1c0] sm:$0xff] }
0x1b72   : > { %7982 = vmatprep.subr.mxu1 %v8316_v10 }
0x1b73   : > { %7983 = vmatpush3.msra.mxu1 %v4891_v58  ;;  %v6600_v58 = vld [vmem:[%s10302_s7 + $0x1e8] sm:$0xff] }
0x1b74   : > { %8006 = vmatprep.subr.mxu1 %v8316_v10 }
0x1c17   : > { %v4989_v44 = vpop.f32.mrf.mxu0 }
0x1c18   : > { %v5003_v37 = vmul.f32 0.25, %v4989_v44  ;;  %v6591_v44 = vld [vmem:[%s10301_s6 + $0x1f8] sm:$0xff] }
0x1c19   : > { %v7971_v52 = vpop.f32.mrf.mxu0 }
0x1c1a   : > { %v5006_v40 = vsel %vm1121_vm4, %v5003_v37, -inf  ;;  %v6590_v52 = vld [vmem:[%s10301_s6 + $0x1f0] sm:$0xff] }
0x1c1b   : > { %5007 = vmax.xlane.f32.xlu0 %v5006_v40  ;;  %v4994_v46 = vpop.f32.mrf.mxu0 }
0x1c1c   : > { %v5004_v61 = vmul.f32 0.25, %v4994_v46  ;;  %v6589_v46 = vld [vmem:[%s10301_s6 + $0x1e8] sm:$0xff] }
0x1c1d   : > { %v7974_v63 = vpop.f32.mrf.mxu0 }
0x1c1e   : > { %v5009_v1 = vsel %vm1121_vm4, %v5004_v61, -inf  ;;  %v6588_v63 = vld [vmem:[%s10301_s6 + $0x1e0] sm:$0xff] }
0x1c1f   : > { %5010 = vmax.xlane.f32.xlu1 %v5009_v1  ;;  %v4999_v43 = vpop.f32.mrf.mxu0 }
0x1c20   : > { %v5005_v2 = vmul.f32 0.25, %v4999_v43  ;;  %v6587_v43 = vld [vmem:[%s10301_s6 + $0x1d8] sm:$0xff] }
0x1c21   : > { %v7977_v56 = vpop.f32.mrf.mxu0 }
0x1c22   : > { %v5012_v3 = vsel %vm1128_vm5, %v5005_v2, -inf  ;;  %v6586_v56 = vld [vmem:[%s10301_s6 + $0x1d0] sm:$0xff] }
0x1c23   : > { %5013 = vmax.xlane.f32.xlu0 %v5012_v3 }
0x1ca4   : > { %v5008_v5 = vpop.xlane.xlu0 %5007 }
0x1ca5   : > { %v5015_v49 = vsub.f32 %v5003_v37, %v5008_v5  ;;  %v6585_v5 = vld [vmem:[%s10301_s6 + $0x1c8] sm:$0xff] }
0x1ca7   : > { %v5018_v8 = vmul.f32 1.442695, %v5015_v49  ;;  %v6584_v49 = vld [vmem:[%s10301_s6 + $0x1c0] sm:$0xff] }
0x1ca8   : > { %v5011_v9 = vpop.xlane.xlu1 %5010 }
0x1ca9   : > { %8266 = vpow2.f32 %v5018_v8  ;;  %v5016_v11 = vsub.f32 %v5004_v61, %v5011_v9 }
0x1cab   : > { %v5020_v12 = vmul.f32 1.442695, %v5016_v11 }
0x1cac   : > { %v5014_v13 = vpop.xlane.xlu0 %5013 }
0x1cad   : > { %8268 = vpow2.f32 %v5020_v12  ;;  %v5017_v14 = vsub.f32 %v5005_v2, %v5014_v13 }
0x1caf   : > { %v5022_v15 = vmul.f32 1.442695, %v5017_v14 }
0x1cb1   : > { %8270 = vpow2.f32 %v5022_v15 }
0x1cb6   : > { %v8267_v18 = vpop.eup %8266 }
0x1cb7   : > { %v5024_v4 = vsel %vm1121_vm4, %v8267_v18, 0.0 }
0x1cb8   : > { %5025 = vadd.xlane.f32.xlu1 %v5024_v4 }
0x1cba   : > { %v8269_v19 = vpop.eup %8268 }
0x1cbb   : > { %v5027_v21 = vsel %vm1121_vm4, %v8269_v19, 0.0 }
0x1cbc   : > { %5028 = vadd.xlane.f32.xlu0 %v5027_v21 }
0x1cbe   : > { %v8271_v6 = vpop.eup %8270 }
0x1cbf   : > { %v5030_v22 = vsel %vm1128_vm5, %v8271_v6, 0.0 }
0x1cc0   : > { %5031 = vadd.xlane.f32.xlu1 %v5030_v22  ;;  %v4625_v22 = vadd.f32 %v9857_v16, %v9931_v42 }
0x1d41   : > { %v5026_v26 = vpop.xlane.xlu1 %5025 }
0x1d42   : > { %8272 = vrcp.f32 %v5026_v26 }
0x1d45   : > { %v5029_v27 = vpop.xlane.xlu0 %5028 }
0x1d46   : > { %8274 = vrcp.f32 %v5029_v27  ;;  %v4630_v27 = vadd.f32 %v9867_v20, %v9933_v38 }
0x1d49   : > { %v5032_v29 = vpop.xlane.xlu1 %5031 }
0x1d4a   : > { %8276 = vrcp.f32 %v5032_v29 }
0x1d4f   : > { %v8273_v30 = vpop.eup %8272 }
0x1d50   : > { %v5034_v31 = vmul.f32 %v8273_v30, %v8267_v18 }
0x1d52   : > { %7985 = vmatmul.mubr.msk.f32.vlgmr.msra.gmra.mxu1 %vm1121_vm4, %v5034_v31 }
0x1d53   : > { %v8275_v32 = vpop.eup %8274  ;;  %8007 = vmatpush3.msra.mxu1 %v6580_v33  ;;  %7987 = vmatprep.mubr.msk.f32.mxu1 %vm8317_vm1, %v8316_v10  ;;  %v4635_v33 = vadd.f32 %v9881_v24, %v9935_v48 }
0x1d54   : > { %8008 = vmatprep.subr.mxu1 %v8316_v10  ;;  %v5036_v36 = vmul.f32 %v8275_v32, %v8269_v19 }
0x1d55   : > { %8009 = vmatpush3.msra.mxu1 %v6579_v34 }
0x1d56   : > { %8010 = vmatprep.subr.mxu1 %v8316_v10  ;;  %7988 = vmatmul.mubr.msk.f32.gmra.mxu1 %vm1121_vm4, %v5036_v36 }
0x1d57   : > { %v8277_v47 = vpop.eup %8276  ;;  %8011 = vmatpush3.msra.mxu1 %v6578_v39  ;;  %7990 = vmatprep.mubr.msk.f32.mxu1 %vm8317_vm1, %v8316_v10 }
0x1d58   : > { %8012 = vmatprep.subr.mxu1 %v8316_v10  ;;  %v5038_v50 = vmul.f32 %v8277_v47, %v8271_v6 }
0x1d59   : > { %8013 = vmatpush3.msra.mxu1 %v6577_v45 }
0x1d5a   : > { %8014 = vmatprep.subr.mxu1 %v8316_v10  ;;  %7991 = vmatmul.mubr.msk.f32.gmra.mxu1 %vm1121_vm4, %v5038_v50 }
0x1d5b   : > { %8015 = vmatpush3.msra.mxu1 %v6576_v51  ;;  %8022 = vmatprep.mubr.msk.f32.mxu1 %vm8317_vm1, %v8316_v10 }
0x1d5c   : > { %8016 = vmatprep.subr.mxu1 %v8316_v10 }
0x1d5d   : > { %8017 = vmatpush3.msra.mxu1 %v6575_v41 }
0x1d5e   : > { %8018 = vmatprep.subr.mxu1 %v8316_v10 }
0x1d5f   : > { %8019 = vmatpush3.msra.mxu1 %v6574_v53 }
0x1d60   : > { %8020 = vmatprep.subr.mxu1 %v8316_v10 }
0x1d61   : > { %8021 = vmatpush3.msra.mxu1 %v6573_v54 }
0x1d62   : > { %8023 = vmatmul.mubr.msk.f32.vlgmr.msra.gmra.mxu1 %vm566_vm0, %v9459_v17  ;;  %8056 = vmatprep.subr.mxu1 %v8316_v10 }
0x1d63   : > { %8057 = vmatpush3.msra.mxu1 %v6602_v55  ;;  %8025 = vmatprep.mubr.msk.f32.mxu1 %vm8317_vm1, %v8316_v10 }
0x1d64   : > { %8058 = vmatprep.subr.mxu1 %v8316_v10 }
0x1d65   : > { %8059 = vmatpush3.msra.mxu1 %v6601_v57 }
0x1d66   : > { %8026 = vmatmul.mubr.msk.f32.gmra.mxu1 %vm566_vm0, %v9474_v23  ;;  %8060 = vmatprep.subr.mxu1 %v8316_v10 }
0x1d67   : > { %8061 = vmatpush3.msra.mxu1 %v6600_v58  ;;  %8028 = vmatprep.mubr.msk.f32.mxu1 %vm8317_vm1, %v8316_v10 }
0x1d68   : > { %8062 = vmatprep.subr.mxu1 %v8316_v10 }
0x1d69   : > { %8063 = vmatpush3.msra.mxu1 %v6599_v35 }
0x1d6a   : > { %8029 = vmatmul.mubr.msk.f32.gmra.mxu1 %vm566_vm0, %v9491_v28  ;;  %8064 = vmatprep.subr.mxu1 %v8316_v10 }
0x1d6b   : > { %8065 = vmatpush3.msra.mxu1 %v6598_v59  ;;  %8072 = vmatprep.mubr.msk.f32.mxu1 %vm8317_vm1, %v8316_v10 }
0x1d6c   : > { %8066 = vmatprep.subr.mxu1 %v8316_v10 }
0x1d6d   : > { %8067 = vmatpush3.msra.mxu1 %v6597_v60 }
0x1d6e   : > { %8068 = vmatprep.subr.mxu1 %v8316_v10 }
0x1d6f   : > { %8069 = vmatpush3.msra.mxu1 %v6596_v62 }
0x1d70   : > { %8070 = vmatprep.subr.mxu1 %v8316_v10 }
0x1d71   : > { %8071 = vmatpush3.msra.mxu1 %v6595_v0 }
0x1d72   : > { %8073 = vmatmul.mubr.msk.f32.vlgmr.msra.gmra.mxu1 %vm566_vm0, %v9459_v17  ;;  %8111 = vmatprep.subr.mxu1 %v8316_v10 }
0x1d73   : > { %8075 = vmatprep.mubr.msk.f32.mxu1 %vm8317_vm1, %v8316_v10 }
0x1d76   : > { %8076 = vmatmul.mubr.msk.f32.gmra.mxu1 %vm566_vm0, %v9474_v23 }
0x1d77   : > { %8078 = vmatprep.mubr.msk.f32.mxu1 %vm8317_vm1, %v8316_v10 }
0x1d7a   : > { %8079 = vmatmul.mubr.msk.f32.gmra.mxu1 %vm566_vm0, %v9491_v28 }
0x1d7b   : > { %8115 = vmatprep.mubr.msk.f32.mxu1 %vm8317_vm1, %v8316_v10 }
0x1e12   : > { %v5117_v37 = vpop.f32.mrf.mxu1 }
0x1e13   : > { %7998 = vmatmul.mubr.msk.f32.vlgmr.msra.gmra.mxu0 %vm654_vm2, %v5117_v37 }
0x1e14   : > { %8032 = vmatpush3.msra.mxu0 %v6591_v44  ;;  %v7986_v40 = vpop.f32.mrf.mxu1  ;;  %8000 = vmatprep.mubr.msk.f32.mxu0 %vm8317_vm1, %v8316_v10 }
0x1e15   : > { %8033 = vmatprep.subr.mxu0 %v8316_v10 }
0x1e16   : > { %8034 = vmatpush3.msra.mxu0 %v6590_v52  ;;  %v5122_v61 = vpop.f32.mrf.mxu1 }
0x1e17   : > { %8035 = vmatprep.subr.mxu0 %v8316_v10  ;;  %8001 = vmatmul.mubr.msk.f32.gmra.mxu0 %vm654_vm2, %v5122_v61 }
0x1e18   : > { %8036 = vmatpush3.msra.mxu0 %v6589_v46  ;;  %v7989_v1 = vpop.f32.mrf.mxu1  ;;  %8003 = vmatprep.mubr.msk.f32.mxu0 %vm8317_vm1, %v8316_v10 }
0x1e19   : > { %8037 = vmatprep.subr.mxu0 %v8316_v10 }
0x1e1a   : > { %8038 = vmatpush3.msra.mxu0 %v6588_v63  ;;  %v5127_v2 = vpop.f32.mrf.mxu1 }
0x1e1b   : > { %8039 = vmatprep.subr.mxu0 %v8316_v10  ;;  %8004 = vmatmul.mubr.msk.f32.gmra.mxu0 %vm654_vm2, %v5127_v2 }
0x1e1c   : > { %8040 = vmatpush3.msra.mxu0 %v6587_v43  ;;  %v7992_v3 = vpop.f32.mrf.mxu1  ;;  %8047 = vmatprep.mubr.msk.f32.mxu0 %vm8317_vm1, %v8316_v10 }
0x1e1d   : > { %8041 = vmatprep.subr.mxu0 %v8316_v10  ;;  %v6617_v3 = vld [vmem:[%s10303_s8 + $0x78] sm:$0xff] }
0x1e1e   : > { %8042 = vmatpush3.msra.mxu0 %v6586_v56  ;;  %8112 = vmatpush3.msra.mxu1 %v6617_v3 }
0x1e1f   : > { %8043 = vmatprep.subr.mxu0 %v8316_v10  ;;  %8113 = vmatprep.subr.mxu1 %v8316_v10 }
0x1e20   : > { %8044 = vmatpush3.msra.mxu0 %v6585_v5  ;;  %v6616_v5 = vld [vmem:[%s10303_s8 + $0x70] sm:$0xff] }
0x1e21   : > { %8045 = vmatprep.subr.mxu0 %v8316_v10  ;;  %8114 = vmatpush3.msra.mxu1 %v6616_v5 }
0x1e22   : > { %v5301_v8 = vpop.f32.mrf.mxu1  ;;  %8046 = vmatpush3.msra.mxu0 %v6584_v49  ;;  %8149 = vmatprep.subr.mxu1 %v8316_v10 }
0x1e23   : > { %8048 = vmatmul.mubr.msk.f32.vlgmr.msra.gmra.mxu0 %vm566_vm0, %v9459_v17  ;;  %8081 = vmatprep.subr.mxu0 %v8316_v10 }
0x1e24   : > { %v8024_v9 = vpop.f32.mrf.mxu1  ;;  %8050 = vmatprep.mubr.msk.f32.mxu0 %vm8317_vm1, %v8316_v10 }
0x1e26   : > { %v5306_v11 = vpop.f32.mrf.mxu1 }
0x1e27   : > { %8051 = vmatmul.mubr.msk.f32.gmra.mxu0 %vm566_vm0, %v9474_v23 }
0x1e28   : > { %v8027_v12 = vpop.f32.mrf.mxu1  ;;  %8053 = vmatprep.mubr.msk.f32.mxu0 %vm8317_vm1, %v8316_v10 }
0x1e2a   : > { %v5311_v13 = vpop.f32.mrf.mxu1 }
0x1e2b   : > { %8054 = vmatmul.mubr.msk.f32.gmra.mxu0 %vm566_vm0, %v9491_v28 }
0x1e2c   : > { %v8030_v14 = vpop.f32.mrf.mxu1  ;;  %8087 = vmatprep.mubr.msk.f32.mxu0 %vm8317_vm1, %v8316_v10 }
0x1e32   : > { %v5479_v15 = vpop.f32.mrf.mxu1 }
0x1e34   : > { %v8074_v18 = vpop.f32.mrf.mxu1 }
0x1e36   : > { %v5484_v4 = vpop.f32.mrf.mxu1 }
0x1e38   : > { %v8077_v19 = vpop.f32.mrf.mxu1 }
0x1e3a   : > { %v5489_v21 = vpop.f32.mrf.mxu1 }
0x1e3c   : > { %v8080_v6 = vpop.f32.mrf.mxu1 }
0x1ed3   : > { %v5209_v25 = vpop.f32.mrf.mxu0 }
0x1ed4   : > { %v10116_v7 = vadd.f32 %v5209_v25, %v4625_v22 }
0x1ed5   : > { %v7999_v26 = vpop.f32.mrf.mxu0 }
0x1ed7   : > { %v5214_v29 = vpop.f32.mrf.mxu0 }
0x1ed8   : > { %v10120_v30 = vadd.f32 %v5214_v29, %v4630_v27 }
0x1ed9   : > { %v8002_v31 = vpop.f32.mrf.mxu0 }
0x1edb   : > { %v5219_v34 = vpop.f32.mrf.mxu0 }
0x1edc   : > { %v10124_v32 = vadd.f32 %v5219_v34, %v4635_v33 }
0x1edd   : > { %v8005_v36 = vpop.f32.mrf.mxu0 }
0x1ee3   : > { %v5390_v39 = vpop.f32.mrf.mxu0 }
0x1ee5   : > { %v8049_v16 = vpop.f32.mrf.mxu0 }
0x1ee7   : > { %v5395_v42 = vpop.f32.mrf.mxu0 }
0x1ee9   : > { %v8052_v45 = vpop.f32.mrf.mxu0 }
0x1eeb   : > { %v5400_v47 = vpop.f32.mrf.mxu0 }
0x1eec   : > { %8082 = vmatpush3.xpose.msk.msra.mxu0 %vm654_vm2, %v5400_v47 }
0x1eed   : > { %v8055_v50 = vpop.f32.mrf.mxu0  ;;  %8083 = vmatprep.subr.mxu0 %v8316_v10 }
0x1ef0   : > { %8084 = vmatpush3.xpose.msk.msra.mxu0 %vm654_vm2, %v5395_v42 }
0x1ef1   : > { %8085 = vmatprep.subr.mxu0 %v8316_v10 }
0x1ef4   : > { %8086 = vmatpush3.xpose.msk.msra.mxu0 %vm654_vm2, %v5390_v39 }
0x1ef5   : > { %8096 = vmatprep.subr.mxu0 %v8316_v10 }
0x1ef7   : > { %8088 = vmatmul.mubr.msk.f32.vlgmr.msra.gmra.mxu0 %vm654_vm2, %v5301_v8 }
0x1ef8   : > { %8097 = vmatpush3.msk.msra.mxu0 %vm1165_vm3, %v5489_v21  ;;  %8090 = vmatprep.mubr.msk.f32.mxu0 %vm8317_vm1, %v8316_v10 }
0x1ef9   : > { %8098 = vmatprep.subr.mxu0 %v8316_v10 }
0x1efa   : > { %8099 = vmatpush3.msra.mxu0 %v5484_v4 }
0x1efb   : > { %8091 = vmatmul.mubr.msk.f32.gmra.mxu0 %vm654_vm2, %v5306_v11  ;;  %8100 = vmatprep.subr.mxu0 %v8316_v10 }
0x1efc   : > { %8101 = vmatpush3.msra.mxu0 %v5479_v15  ;;  %8093 = vmatprep.mubr.msk.f32.mxu0 %vm8317_vm1, %v8316_v10 }
0x1efd   : > { %8124 = vmatprep.subr.mxu0 %v8316_v10 }
0x1eff   : > { %8094 = vmatmul.mubr.msk.f32.gmra.mxu0 %vm654_vm2, %v5311_v13 }
0x1f00   : > { %8102 = vmatprep.mubr.msk.f32.mxu0 %vm8317_vm1, %v8316_v10 }
0x1fb7   : > { %v5577_v20 = vpop.f32.mrf.mxu0 }
0x1fb8   : > { %v5591_v24 = vmul.f32 0.25, %v5577_v20 }
0x1fb9   : > { %v8089_v38 = vpop.f32.mrf.mxu0 }
0x1fba   : > { %v5594_v48 = vsel %vm1121_vm4, %v5591_v24, -inf }
0x1fbb   : > { %5595 = vmax.xlane.f32.xlu0 %v5594_v48  ;;  %v5582_v51 = vpop.f32.mrf.mxu0 }
0x1fbc   : > { %v5592_v41 = vmul.f32 0.25, %v5582_v51 }
0x1fbd   : > { %v8092_v53 = vpop.f32.mrf.mxu0 }
0x1fbe   : > { %v5597_v54 = vsel %vm1121_vm4, %v5592_v41, -inf }
0x1fbf   : > { %5598 = vmax.xlane.f32.xlu1 %v5597_v54  ;;  %v5587_v55 = vpop.f32.mrf.mxu0 }
0x1fc0   : > { %v5593_v57 = vmul.f32 0.25, %v5587_v55 }
0x1fc1   : > { %v8095_v58 = vpop.f32.mrf.mxu0 }
0x1fc2   : > { %v5600_v35 = vsel %vm1128_vm5, %v5593_v57, -inf }
0x1fc3   : > { %5601 = vmax.xlane.f32.xlu0 %v5600_v35  ;;  %v6632_v35 = vld [vmem:[%s10306_s11 + $0x78] sm:$0xff] }
0x2044   : > { %v5596_v59 = vpop.xlane.xlu0 %5595 }
0x2045   : > { %v5603_v60 = vsub.f32 %v5591_v24, %v5596_v59  ;;  %v6631_v59 = vld [vmem:[%s10306_s11 + $0x70] sm:$0xff] }
0x2047   : > { %v5606_v62 = vmul.f32 1.442695, %v5603_v60  ;;  %v6630_v60 = vld [vmem:[%s10306_s11 + $0x68] sm:$0xff] }
0x2048   : > { %v5599_v0 = vpop.xlane.xlu1 %5598 }
0x2049   : > { %8278 = vpow2.f32 %v5606_v62  ;;  %v5604_v44 = vsub.f32 %v5592_v41, %v5599_v0  ;;  %v6629_v62 = vld [vmem:[%s10306_s11 + $0x60] sm:$0xff]  ;;  %v6628_v0 = vld [vmem:[%s10306_s11 + $0x58] sm:$0xff] }
0x204b   : > { %v5608_v37 = vmul.f32 1.442695, %v5604_v44  ;;  %v6627_v44 = vld [vmem:[%s10306_s11 + $0x50] sm:$0xff] }
0x204c   : > { %v5602_v52 = vpop.xlane.xlu0 %5601 }
0x204d   : > { %8280 = vpow2.f32 %v5608_v37  ;;  %v5605_v40 = vsub.f32 %v5593_v57, %v5602_v52  ;;  %v6626_v37 = vld [vmem:[%s10306_s11 + $0x48] sm:$0xff]  ;;  %v6625_v52 = vld [vmem:[%s10306_s11 + $0x40] sm:$0xff] }
0x204f   : > { %v5610_v46 = vmul.f32 1.442695, %v5605_v40 }
0x2051   : > { %8282 = vpow2.f32 %v5610_v46 }
0x2056   : > { %v8279_v61 = vpop.eup %8278 }
0x2057   : > { %v5612_v63 = vsel %vm1121_vm4, %v8279_v61, 0.0 }
0x2058   : > { %5613 = vadd.xlane.f32.xlu1 %v5612_v63 }
0x205a   : > { %v8281_v1 = vpop.eup %8280 }
0x205b   : > { %v5615_v43 = vsel %vm1121_vm4, %v8281_v1, 0.0 }
0x205c   : > { %5616 = vadd.xlane.f32.xlu0 %v5615_v43 }
0x205e   : > { %v8283_v2 = vpop.eup %8282 }
0x205f   : > { %v5618_v56 = vsel %vm1128_vm5, %v8283_v2, 0.0 }
0x2060   : > { %5619 = vadd.xlane.f32.xlu1 %v5618_v56 }
0x20e1   : > { %v5614_v49 = vpop.xlane.xlu1 %5613 }
0x20e2   : > { %8284 = vrcp.f32 %v5614_v49  ;;  %v6623_v49 = vld [vmem:[%s10304_s9 + $0x1] ss:$0 sm:$0xff] }
0x20e5   : > { %v5617_v8 = vpop.xlane.xlu0 %5616 }
0x20e6   : > { %8286 = vrcp.f32 %v5617_v8 }
0x20e9   : > { %v5620_v9 = vpop.xlane.xlu1 %5619 }
0x20ea   : > { %8288 = vrcp.f32 %v5620_v9  ;;  %v6624_v9 = vld [vmem:[%s10305_s10 + $0x1] ss:$0 sm:$0xff] }
0x20ef   : > { %v8285_v11 = vpop.eup %8284 }
0x20f0   : > { %v5622_v12 = vmul.f32 %v8285_v11, %v8279_v61 }
0x20f2   : > { %8103 = vmatmul.mubr.msk.f32.vlgmr.msra.gmra.mxu0 %vm1121_vm4, %v5622_v12 }
0x20f3   : > { %v8287_v13 = vpop.eup %8286  ;;  %8105 = vmatprep.mubr.msk.f32.mxu0 %vm8317_vm1, %v8316_v10  ;;  %8125 = vmatpush3.msra.mxu0 %v6632_v35 }
0x20f4   : > { %v5624_v14 = vmul.f32 %v8287_v13, %v8281_v1  ;;  %8126 = vmatprep.subr.mxu0 %v8316_v10 }
0x20f5   : > { %8127 = vmatpush3.msra.mxu0 %v6631_v59 }
0x20f6   : > { %8106 = vmatmul.mubr.msk.f32.gmra.mxu0 %vm1121_vm4, %v5624_v14  ;;  %8128 = vmatprep.subr.mxu0 %v8316_v10 }
0x20f7   : > { %v8289_v15 = vpop.eup %8288  ;;  %8108 = vmatprep.mubr.msk.f32.mxu0 %vm8317_vm1, %v8316_v10  ;;  %8129 = vmatpush3.msra.mxu0 %v6630_v60 }
0x20f8   : > { %v5626_v18 = vmul.f32 %v8289_v15, %v8283_v2  ;;  %8130 = vmatprep.subr.mxu0 %v8316_v10 }
0x20f9   : > { %8131 = vmatpush3.msra.mxu0 %v6629_v62 }
0x20fa   : > { %8109 = vmatmul.mubr.msk.f32.gmra.mxu0 %vm1121_vm4, %v5626_v18  ;;  %8132 = vmatprep.subr.mxu0 %v8316_v10 }
0x20fb   : > { %8140 = vmatprep.mubr.msk.f32.mxu0 %vm8317_vm1, %v8316_v10  ;;  %8133 = vmatpush3.msra.mxu0 %v6628_v0 }
0x20fc   : > { %8134 = vmatprep.subr.mxu0 %v8316_v10 }
0x20fd   : > { %8135 = vmatpush3.msra.mxu0 %v6627_v44 }
0x20fe   : > { %8136 = vmatprep.subr.mxu0 %v8316_v10 }
0x20ff   : > { %8137 = vmatpush3.msra.mxu0 %v6626_v37 }
0x2100   : > { %8138 = vmatprep.subr.mxu0 %v8316_v10 }
0x2101   : > { %8139 = vmatpush3.msra.mxu0 %v6625_v52 }
0x21b2   : > { %v5705_v4 = vpop.f32.mrf.mxu0 }
0x21b3   : > { %8116 = vmatmul.mubr.msk.f32.vlgmr.msra.gmra.mxu1 %vm654_vm2, %v5705_v4 }
0x21b4   : > { %v8104_v19 = vpop.f32.mrf.mxu0  ;;  %8118 = vmatprep.mubr.msk.f32.mxu1 %vm8317_vm1, %v8316_v10 }
0x21b6   : > { %v5710_v21 = vpop.f32.mrf.mxu0 }
0x21b7   : > { %8119 = vmatmul.mubr.msk.f32.gmra.mxu1 %vm654_vm2, %v5710_v21 }
0x21b8   : > { %v8107_v6 = vpop.f32.mrf.mxu0  ;;  %8121 = vmatprep.mubr.msk.f32.mxu1 %vm8317_vm1, %v8316_v10 }
0x21ba   : > { %v5715_v22 = vpop.f32.mrf.mxu0 }
0x21bb   : > { %8122 = vmatmul.mubr.msk.f32.gmra.mxu1 %vm654_vm2, %v5715_v22  ;;  %v6641_v22 = vld [vmem:[%s10308_s13 + $0x38] sm:$0xff] }
0x21bc   : > { %v8110_v25 = vpop.f32.mrf.mxu0  ;;  %8157 = vmatprep.mubr.msk.f32.mxu1 %vm8317_vm1, %v8316_v10  ;;  %8150 = vmatpush3.msra.mxu1 %v6641_v22 }
0x21bd   : > { %8151 = vmatprep.subr.mxu1 %v8316_v10  ;;  %v6640_v25 = vld [vmem:[%s10308_s13 + $0x30] sm:$0xff] }
0x21be   : > { %8152 = vmatpush3.msra.mxu1 %v6640_v25 }
0x21bf   : > { %8153 = vmatprep.subr.mxu1 %v8316_v10 }
0x2273   : > { %v5797_v26 = vpop.f32.mrf.mxu1 }
0x2274   : > { %v5811_v27 = vadd.f32 %v5797_v26, %v10116_v7  ;;  %v6639_v26 = vld [vmem:[%s10308_s13 + $0x28] sm:$0xff] }
0x2275   : > { %v8117_v29 = vpop.f32.mrf.mxu1  ;;  %8154 = vmatpush3.msra.mxu1 %v6639_v26 }
0x2276   : > { %v5814_v31 = vadd.f32 %v5811_v27, %v9459_v17  ;;  %8155 = vmatprep.subr.mxu1 %v8316_v10  ;;  %v6638_v27 = vld [vmem:[%s10308_s13 + $0x20] sm:$0xff] }
0x2277   : > { %v5802_v33 = vpop.f32.mrf.mxu1  ;;  %8156 = vmatpush3.msra.mxu1 %v6638_v27  ;;  %v6634_v29 = vld [vmem:[%s10307_s12 + $0x1] ss:$0 sm:$0xff] }
0x2278   : > { %v5812_v34 = vadd.f32 %v5802_v33, %v10120_v30  ;;  %v5821_v36 = vsel %vm566_vm0, %v5814_v31, 0.0 }
0x2279   : > { %5822 = vadd.xlane.f32.xlu0 %v5821_v36  ;;  %v8120_v39 = vpop.f32.mrf.mxu1 }
0x227a   : > { %v5815_v16 = vadd.f32 %v5812_v34, %v9474_v23 }
0x227b   : > { %v5807_v42 = vpop.f32.mrf.mxu1 }
0x227c   : > { %v5813_v45 = vadd.f32 %v5807_v42, %v10124_v32  ;;  %v5824_v47 = vsel %vm566_vm0, %v5815_v16, 0.0 }
0x227d   : > { %5825 = vadd.xlane.f32.xlu1 %v5824_v47  ;;  %v8123_v50 = vpop.f32.mrf.mxu1 }
0x227e   : > { %v5816_v7 = vadd.f32 %v5813_v45, %v9491_v28 }
0x2280   : > { %v5827_v17 = vsel %vm3112_vm6, %v5816_v7, 0.0 }
0x2281   : > { %5828 = vadd.xlane.f32.xlu0 %v5827_v17 }
0x2302   : > { %v5823_v20 = vpop.xlane.xlu0 %5822 }
0x2303   : > { %v5830_v30 = vmul.f32 0.015625, %v5823_v20 }
0x2305   : > { %v5833_v24 = vsub.f32 %v5814_v31, %v5830_v30 }
0x2306   : > { %v5826_v38 = vpop.xlane.xlu1 %5825 }
0x2307   : > { %v5831_v48 = vmul.f32 0.015625, %v5826_v38  ;;  %v5836_v51 = vmul.f32 %v5833_v24, %v5833_v24 }
0x2309   : > { %v5834_v41 = vsub.f32 %v5815_v16, %v5831_v48  ;;  %v5839_v23 = vsel %vm566_vm0, %v5836_v51, 0.0 }
0x230a   : > { %5840 = vadd.xlane.f32.xlu1 %v5839_v23  ;;  %v5829_v32 = vpop.xlane.xlu0 %5828 }
0x230b   : > { %v5832_v53 = vmul.f32 0.015625, %v5829_v32  ;;  %v5837_v54 = vmul.f32 %v5834_v41, %v5834_v41 }
0x230d   : > { %v5835_v55 = vsub.f32 %v5816_v7, %v5832_v53  ;;  %v5842_v57 = vsel %vm566_vm0, %v5837_v54, 0.0 }
0x230e   : > { %5843 = vadd.xlane.f32.xlu0 %v5842_v57 }
0x230f   : > { %v5838_v28 = vmul.f32 %v5835_v55, %v5835_v55 }
0x2311   : > { %v5845_v58 = vsel %vm3112_vm6, %v5838_v28, 0.0 }
0x2312   : > { %5846 = vadd.xlane.f32.xlu1 %v5845_v58 }
0x2393   : > { %v5841_v40 = vpop.xlane.xlu1 %5840 }
0x2394   : > { %v5848_v46 = vmul.f32 0.015625, %v5841_v40 }
0x2396   : > { %v5851_v61 = vadd.f32 1e-05, %v5848_v46  ;;  %v6643_v46 = vld [vmem:[%s10309_s14 + $0x1] ss:$0 sm:$0xff] }
0x2397   : > { %v5844_v63 = vpop.xlane.xlu0 %5843 }
0x2398   : > { %8290 = vrsqrt.f32 %v5851_v61  ;;  %v5849_v1 = vmul.f32 0.015625, %v5844_v63 }
0x239a   : > { %v5852_v43 = vadd.f32 1e-05, %v5849_v1 }
0x239b   : > { %v5847_v2 = vpop.xlane.xlu1 %5846 }
0x239c   : > { %8292 = vrsqrt.f32 %v5852_v43  ;;  %v5850_v56 = vmul.f32 0.015625, %v5847_v2 }
0x239e   : > { %v5853_v3 = vadd.f32 1e-05, %v5850_v56 }
0x23a0   : > { %8294 = vrsqrt.f32 %v5853_v3 }
0x23a5   : > { %v8291_v5 = vpop.eup %8290 }
0x23a6   : > { %v5857_v8 = vmul.f32 %v8291_v5, %v5833_v24 }
0x23a8   : > { %v5866_v11 = vmul.f32 %v6623_v49, %v5857_v8 }
0x23a9   : > { %v8293_v12 = vpop.eup %8292 }
0x23aa   : > { %v10226_v13 = vadd.f32 %v6624_v9, %v5866_v11  ;;  %v5858_v14 = vmul.f32 %v8293_v12, %v5834_v41 }
0x23ac   : > { %8141 = vmatmul.mubr.msk.f32.vlgmr.msra.gmra.mxu0 %vm566_vm0, %v10226_v13  ;;  %v5867_v15 = vmul.f32 %v6623_v49, %v5858_v14 }
0x23ad   : > { %v8295_v18 = vpop.eup %8294  ;;  %8143 = vmatprep.mubr.msk.f32.mxu0 %vm8317_vm1, %v8316_v10 }
0x23ae   : > { %v5859_v4 = vmul.f32 %v8295_v18, %v5835_v55  ;;  %v10232_v19 = vadd.f32 %v6624_v9, %v5867_v15 }
0x23b0   : > { %8144 = vmatmul.mubr.msk.f32.gmra.mxu0 %vm566_vm0, %v10232_v19  ;;  %v5868_v21 = vmul.f32 %v6623_v49, %v5859_v4 }
0x23b1   : > { %8146 = vmatprep.mubr.msk.f32.mxu0 %vm8317_vm1, %v8316_v10 }
0x23b2   : > { %v10238_v6 = vadd.f32 %v6624_v9, %v5868_v21 }
0x23b4   : > { %8147 = vmatmul.mubr.msk.f32.gmra.mxu0 %vm566_vm0, %v10238_v6 }
0x246c   : > { %v5970_v31 = vpop.f32.mrf.mxu0 }
0x246d   : > { %v5971_v33 = vadd.f32 %v6634_v29, %v5970_v31 }
0x246e   : > { %v8142_v34 = vpop.f32.mrf.mxu0 }
0x246f   : > { %v5987_v36 = vmul.f32 0.044715, %v5971_v33  ;;  %v5984_v28 = vmul.f32 0.5, %v5971_v33 }
0x2470   : > { %v5975_v39 = vpop.f32.mrf.mxu0 }
0x2471   : > { %v5990_v16 = vmul.f32 %v5987_v36, %v5971_v33  ;;  %v5976_v42 = vadd.f32 %v6634_v29, %v5975_v39 }
0x2472   : > { %v8145_v45 = vpop.f32.mrf.mxu0 }
0x2473   : > { %v5993_v47 = vmul.f32 %v5990_v16, %v5971_v33  ;;  %v5988_v50 = vmul.f32 0.044715, %v5976_v42  ;;  %v5985_v60 = vmul.f32 0.5, %v5976_v42 }
0x2474   : > { %v5980_v7 = vpop.f32.mrf.mxu0 }
0x2475   : > { %v5996_v17 = vadd.f32 %v5993_v47, %v5971_v33  ;;  %v5991_v20 = vmul.f32 %v5988_v50, %v5976_v42  ;;  %v5981_v30 = vadd.f32 %v6634_v29, %v5980_v7 }
0x2476   : > { %v8148_v24 = vpop.f32.mrf.mxu0 }
0x2477   : > { %v5999_v38 = vmul.f32 0.7978846, %v5996_v17  ;;  %v5994_v48 = vmul.f32 %v5991_v20, %v5976_v42  ;;  %v5989_v51 = vmul.f32 0.044715, %v5981_v30  ;;  %v5986_v37 = vmul.f32 0.5, %v5981_v30 }
0x2479   : > { %8296 = vtanh.f32 %v5999_v38  ;;  %v5997_v41 = vadd.f32 %v5994_v48, %v5976_v42  ;;  %v5992_v23 = vmul.f32 %v5989_v51, %v5981_v30  ;;  %v6650_v38 = vld [vmem:[%s10311_s16 + $0x1] ss:$0 sm:$0xff] }
0x247b   : > { %v6000_v32 = vmul.f32 0.7978846, %v5997_v41  ;;  %v5995_v53 = vmul.f32 %v5992_v23, %v5981_v30 }
0x247d   : > { %8298 = vtanh.f32 %v6000_v32  ;;  %v5998_v54 = vadd.f32 %v5995_v53, %v5981_v30  ;;  %v6649_v30 = vld [vmem:[%s10310_s15 + $0x1] ss:$0 sm:$0xff] }
0x247f   : > { %v6001_v55 = vmul.f32 0.7978846, %v5998_v54 }
0x2481   : > { %8300 = vtanh.f32 %v6001_v55 }
0x2486   : > { %v8297_v57 = vpop.eup %8296 }
0x2487   : > { %v6005_v58 = vadd.f32 1.0, %v8297_v57 }
0x2489   : > { %v6008_v35 = vmul.f32 %v6005_v58, %v5984_v28 }
0x248a   : > { %v8299_v59 = vpop.eup %8298 }
0x248b   : > { %8158 = vmatmul.mubr.msk.f32.vlgmr.msra.gmra.mxu1 %vm3307_vm7, %v6008_v35  ;;  %v6006_v62 = vadd.f32 1.0, %v8299_v59 }
0x248c   : > { %8160 = vmatprep.mubr.msk.f32.mxu1 %vm8317_vm1, %v8316_v10 }
0x248d   : > { %v6009_v0 = vmul.f32 %v6006_v62, %v5985_v60 }
0x248e   : > { %v8301_v44 = vpop.eup %8300 }
0x248f   : > { %8161 = vmatmul.mubr.msk.f32.gmra.mxu1 %vm3307_vm7, %v6009_v0  ;;  %v6007_v52 = vadd.f32 1.0, %v8301_v44 }
0x2490   : > { %8163 = vmatprep.mubr.msk.f32.mxu1 %vm8317_vm1, %v8316_v10 }
0x2491   : > { %v6010_v40 = vmul.f32 %v6007_v52, %v5986_v37 }
0x2493   : > { %8164 = vmatmul.mubr.msk.f32.gmra.mxu1 %vm3307_vm7, %v6010_v40 }
0x254b   : > { %v6099_v61 = vpop.f32.mrf.mxu1 }
0x254c   : > { %v6100_v63 = vadd.f32 %v6643_v46, %v6099_v61 }
0x254d   : > { %v8159_v1 = vpop.f32.mrf.mxu1 }
0x254e   : > { %v6113_v43 = vadd.f32 %v6100_v63, %v10226_v13 }
0x254f   : > { %v6104_v2 = vpop.f32.mrf.mxu1 }
0x2550   : > { %v6105_v56 = vadd.f32 %v6643_v46, %v6104_v2  ;;  %v6120_v3 = vsel %vm566_vm0, %v6113_v43, 0.0 }
0x2551   : > { %6121 = vadd.xlane.f32.xlu0 %v6120_v3  ;;  %v8162_v5 = vpop.f32.mrf.mxu1 }
0x2552   : > { %v6114_v10 = vadd.f32 %v6105_v56, %v10232_v19 }
0x2553   : > { %v6109_v49 = vpop.f32.mrf.mxu1 }
0x2554   : > { %v6110_v8 = vadd.f32 %v6643_v46, %v6109_v49  ;;  %v6123_v9 = vsel %vm566_vm0, %v6114_v10, 0.0 }
0x2555   : > { %6124 = vadd.xlane.f32.xlu1 %v6123_v9  ;;  %v8165_v11 = vpop.f32.mrf.mxu1 }
0x2556   : > { %v6115_v12 = vadd.f32 %v6110_v8, %v10238_v6 }
0x2558   : > { %v6126_v14 = vsel %vm3112_vm6, %v6115_v12, 0.0 }
0x2559   : > { %6127 = vadd.xlane.f32.xlu0 %v6126_v14 }
0x25da   : > { %v6122_v13 = vpop.xlane.xlu0 %6121 }
0x25db   : > { %v6129_v15 = vmul.f32 0.015625, %v6122_v13 }
0x25dd   : > { %v6132_v18 = vsub.f32 %v6113_v43, %v6129_v15 }
0x25de   : > { %v6125_v4 = vpop.xlane.xlu1 %6124 }
0x25df   : > { %v6130_v21 = vmul.f32 0.015625, %v6125_v4  ;;  %v6135_v22 = vmul.f32 %v6132_v18, %v6132_v18 }
0x25e1   : > { %v6133_v25 = vsub.f32 %v6114_v10, %v6130_v21  ;;  %v6138_v19 = vsel %vm566_vm0, %v6135_v22, 0.0 }
0x25e2   : > { %6139 = vadd.xlane.f32.xlu1 %v6138_v19  ;;  %v6128_v26 = vpop.xlane.xlu0 %6127 }
0x25e3   : > { %v6131_v27 = vmul.f32 0.015625, %v6128_v26  ;;  %v6136_v29 = vmul.f32 %v6133_v25, %v6133_v25 }
0x25e5   : > { %v6134_v31 = vsub.f32 %v6115_v12, %v6131_v27  ;;  %v6141_v33 = vsel %vm566_vm0, %v6136_v29, 0.0 }
0x25e6   : > { %6142 = vadd.xlane.f32.xlu0 %v6141_v33 }
0x25e7   : > { %v6137_v6 = vmul.f32 %v6134_v31, %v6134_v31 }
0x25e9   : > { %v6144_v34 = vsel %vm3112_vm6, %v6137_v6, 0.0 }
0x25ea   : > { %6145 = vadd.xlane.f32.xlu1 %v6144_v34 }
0x266b   : > { %v6140_v36 = vpop.xlane.xlu1 %6139 }
0x266c   : > { %v6147_v39 = vmul.f32 0.015625, %v6140_v36 }
0x266e   : > { %v6150_v16 = vadd.f32 1e-05, %v6147_v39 }
0x266f   : > { %v6143_v42 = vpop.xlane.xlu0 %6142 }
0x2670   : > { %8302 = vrsqrt.f32 %v6150_v16  ;;  %v6148_v45 = vmul.f32 0.015625, %v6143_v42 }
0x2672   : > { %v6151_v47 = vadd.f32 1e-05, %v6148_v45 }
0x2673   : > { %v6146_v50 = vpop.xlane.xlu1 %6145 }
0x2674   : > { %8304 = vrsqrt.f32 %v6151_v47  ;;  %v6149_v7 = vmul.f32 0.015625, %v6146_v50 }
0x2676   : > { %v6152_v17 = vadd.f32 1e-05, %v6149_v7 }
0x2678   : > { %8306 = vrsqrt.f32 %v6152_v17 }
0x267d   : > { %v8303_v20 = vpop.eup %8302 }
0x267e   : > { %v6156_v24 = vmul.f32 %v8303_v20, %v6132_v18 }
0x2680   : > { %v6165_v48 = vmul.f32 %v6649_v30, %v6156_v24 }
0x2681   : > { %v8305_v51 = vpop.eup %8304 }
0x2682   : > { %v6174_v41 = vadd.f32 %v6650_v38, %v6165_v48  ;;  %v6157_v23 = vmul.f32 %v8305_v51, %v6133_v25 }
0x2684   : > { %6178 = vst.msk [vmem:[%s548_s1 - $0x1] sm:$0xfe] %vm6177_vm8, %v6174_v41  ;;  %v6166_v32 = vmul.f32 %v6649_v30, %v6157_v23 }
0x2685   : > { %v8307_v53 = vpop.eup %8306 }
0x2686   : > { %v6175_v54 = vadd.f32 %v6650_v38, %v6166_v32  ;;  %v6158_v55 = vmul.f32 %v8307_v53, %v6134_v31 }
0x2688   : > { %6179 = vst.msk [vmem:[%s548_s1 + $0x7] sm:$0xff] %vm566_vm0, %v6175_v54  ;;  %v6167_v57 = vmul.f32 %v6649_v30, %v6158_v55 }
0x268a   : > { %v6176_v28 = vadd.f32 %v6650_v38, %v6167_v57 }
0x268c   : > { %6180 = vst.msk [vmem:[%s548_s1 + $0xf] sm:$0x1] %vm3112_vm6, %v6176_v28 }
0x268d PF: > { %s27_s24 = sadd.s32 1, %s8314_s24  }
0x268e   : > { %p24_p4 = scmp.ge.s32.totalorder %s27_s24, 4  }
0x2690   :  { %26 = sbr.rel (!%p24_p4) target bundleno = 3 (0x3), region = 154 }

</bundles_post_ra>
